<compile_context>
chip_gen: v7x
topology: tpu7x:2x2x1
jax: 0.10.0
libtpu: 0.0.40
codegen_flags: <defaults>
</compile_context>

<pallas_src>
import functools

import jax
import jax.numpy as jnp
from jax.experimental import pallas as pl
from jax.experimental.pallas import tpu as pltpu

BN_EPS = 1e-5
LANE = 128


def _round_up(x, m):
    return (x + m - 1) // m * m


# ---------------------------------------------------------------------------
# Pass A: 3x3 'same' conv (+ optional fused pre-BN/ReLU of the input window)
#         + per-tile BatchNorm partial statistics.
# ---------------------------------------------------------------------------
def _window_dma(x_hbm, win_ref, sem_ref, n, t, slot, *, tile_h, width, do_start):
    """Start (or wait on) the DMAs that build one halo'd row window in VMEM.

    win_ref[slot] has shape (tile_h + 2, width + 2, C):
      rows 1..tile_h   <- input rows [t*tile_h, t*tile_h + tile_h)
      row 0            <- input row  t*tile_h - 1        (only if t > 0)
      row tile_h + 1   <- input row  t*tile_h + tile_h   (only if t < num_t - 1)
      cols 1..width    <- input cols; cols 0 / width+1 are the zero 'same' pad
    Missing halo rows / pad columns are zeroed later in the compute path.
    """
    h_total = x_hbm.shape[1]
    num_t = h_total // tile_h
    row0 = t * tile_h

    def mk_body():
        return pltpu.make_async_copy(
            x_hbm.at[n, pl.ds(row0, tile_h)],
            win_ref.at[slot, pl.ds(1, tile_h), pl.ds(1, width)],
            sem_ref.at[slot, 0])

    def mk_above():
        row = jnp.maximum(row0 - 1, 0)                    # clamped; issued only if t > 0
        return pltpu.make_async_copy(
            x_hbm.at[n, pl.ds(row, 1)],
            win_ref.at[slot, pl.ds(0, 1), pl.ds(1, width)],
            sem_ref.at[slot, 1])

    def mk_below():
        row = jnp.minimum(row0 + tile_h, h_total - 1)     # clamped; issued only if t < num_t-1
        return pltpu.make_async_copy(
            x_hbm.at[n, pl.ds(row, 1)],
            win_ref.at[slot, pl.ds(tile_h + 1, 1), pl.ds(1, width)],
            sem_ref.at[slot, 2])

    def run(mk):
        def _go():
            copy = mk()
            if do_start:
                copy.start()
            else:
                copy.wait()
        return _go

    run(mk_body)()
    pl.when(t > 0)(run(mk_above))
    pl.when(t < num_t - 1)(run(mk_below))


def _conv_stats_kernel(x_hbm, w_ref, pn_ref, raw_ref, stats_ref,
                       win_ref, nwin_ref, sem_ref,
                       *, tile_h, width, apply_prenorm):
    n = pl.program_id(0)
    t = pl.program_id(1)
    num_t = pl.num_programs(1)
    slot = t % 2
    dma = functools.partial(_window_dma, x_hbm, win_ref, sem_ref,
                            tile_h=tile_h, width=width)

    # Prime the double buffer at the first row tile of each batch element.
    @pl.when(t == 0)
    def _():
        dma(n, t, slot, do_start=True)

    # Wait for this tile's window, then prefetch the next tile (same batch element)
    # into the other slot so its DMA overlaps this tile's compute.
    dma(n, t, slot, do_start=False)

    @pl.when(t + 1 < num_t)
    def _():
        dma(n, t + 1, 1 - slot, do_start=True)

    cin_p = win_ref.shape[-1]
    cout_p = raw_ref.shape[-1]

    # Optionally apply the *previous* stage's BatchNorm + ReLU (fused per-channel
    # scale/shift), cast to bf16 for the MXU, and rebuild the zero 'same' ring.
    win = win_ref[slot]                                        # (tile_h+2, width+2, cin_p) f32
    if apply_prenorm:
        scale = pn_ref[pl.ds(0, 1), :].reshape(1, 1, cin_p)
        shift = pn_ref[pl.ds(1, 1), :].reshape(1, 1, cin_p)
        act = jnp.maximum(win * scale + shift, 0.0)
    else:
        act = win
    nwin_ref[...] = act.astype(jnp.bfloat16)

    zcol = jnp.zeros((tile_h + 2, 1, cin_p), jnp.bfloat16)
    nwin_ref[:, pl.ds(0, 1), :] = zcol
    nwin_ref[:, pl.ds(width + 1, 1), :] = zcol
    zrow = jnp.zeros((1, width + 2, cin_p), jnp.bfloat16)

    @pl.when(t == 0)
    def _():
        nwin_ref[pl.ds(0, 1), :, :] = zrow

    @pl.when(t == num_t - 1)
    def _():
        nwin_ref[pl.ds(tile_h + 1, 1), :, :] = zrow

    # im2col: one (tile_h*width, 9*cin_p) @ (9*cin_p, cout_p) MXU matmul, f32 accumulate.
    taps = []
    for ky in range(3):
        for kx in range(3):
            taps.append(
                nwin_ref[pl.ds(ky, tile_h), pl.ds(kx, width), :]
                .reshape(tile_h * width, cin_p))
    patch = jnp.concatenate(taps, axis=-1)
    acc = jnp.dot(patch, w_ref[...], preferred_element_type=jnp.float32)

    raw_ref[...] = acc.reshape(1, tile_h, width, cout_p)
    psum = jnp.sum(acc, axis=0, keepdims=True)
    psumsq = jnp.sum(acc * acc, axis=0, keepdims=True)
    stats_ref[...] = jnp.concatenate([psum, psumsq], axis=0).reshape(1, 1, 2, cout_p)


def _conv3x3_bn_stats(x, w_im2col, prenorm, *, tile_h, apply_prenorm):
    n, h, w, cin_p = x.shape
    kdim, cout_p = w_im2col.shape
    num_t = h // tile_h
    kernel = functools.partial(_conv_stats_kernel, tile_h=tile_h, width=w,
                               apply_prenorm=apply_prenorm)
    raw, stats = pl.pallas_call(
        kernel,
        out_shape=(jax.ShapeDtypeStruct((n, h, w, cout_p), jnp.float32),
                   jax.ShapeDtypeStruct((n, num_t, 2, cout_p), jnp.float32)),
        grid=(n, num_t),
        in_specs=[
            pl.BlockSpec(memory_space=pl.ANY),                      # full input stays in HBM
            pl.BlockSpec((kdim, cout_p), lambda i, j: (0, 0)),      # weights resident in VMEM
            pl.BlockSpec((2, cin_p), lambda i, j: (0, 0)),          # fused scale/shift
        ],
        out_specs=(
            pl.BlockSpec((1, tile_h, w, cout_p), lambda i, j: (i, j, 0, 0)),
            pl.BlockSpec((1, 1, 2, cout_p), lambda i, j: (i, j, 0, 0)),
        ),
        scratch_shapes=[
            pltpu.VMEM((2, tile_h + 2, w + 2, cin_p), jnp.float32),  # double-buffered window
            pltpu.VMEM((tile_h + 2, w + 2, cin_p), jnp.bfloat16),    # normalized bf16 window
            pltpu.SemaphoreType.DMA((2, 3)),
        ],
        compiler_params=pltpu.CompilerParams(
            dimension_semantics=("parallel", "arbitrary")),
    )(x, w_im2col, prenorm)
    return raw, stats


# ---------------------------------------------------------------------------
# Pass B: final BatchNorm (as per-channel scale/shift) + ReLU, tiled elementwise.
# ---------------------------------------------------------------------------
def _bn_relu_kernel(raw_ref, pn_ref, out_ref):
    c = out_ref.shape[-1]
    scale = pn_ref[pl.ds(0, 1), :].reshape(1, 1, 1, c)
    shift = pn_ref[pl.ds(1, 1), :].reshape(1, 1, 1, c)
    out_ref[...] = jnp.maximum(raw_ref[...] * scale + shift, 0.0)


def _bn_relu(raw, prenorm, *, tile_h):
    n, h, w, c = raw.shape
    blk = pl.BlockSpec((1, tile_h, w, c), lambda i, j: (i, j, 0, 0))
    return pl.pallas_call(
        _bn_relu_kernel,
        out_shape=jax.ShapeDtypeStruct((n, h, w, c), jnp.float32),
        grid=(n, h // tile_h),
        in_specs=[blk, pl.BlockSpec((2, c), lambda i, j: (0, 0))],
        out_specs=blk,
        compiler_params=pltpu.CompilerParams(
            dimension_semantics=("parallel", "parallel")),
    )(raw, prenorm)


# ---------------------------------------------------------------------------
# Parameter handling and forward pass.
# ---------------------------------------------------------------------------
def _bn_affine(stats, gamma_p, beta_p, count):
    """Reduce per-tile (sum, sum_sq) partials to per-channel (scale, shift)."""
    s = jnp.sum(stats, axis=(0, 1))                      # (2, Cp)
    mean = s[0] / count
    var = jnp.maximum(s[1] / count - mean * mean, 0.0)   # biased variance (PyTorch BN)
    scale = gamma_p * jax.lax.rsqrt(var + BN_EPS)
    shift = beta_p - mean * scale
    return jnp.stack([scale, shift], axis=0)


def _prep_conv_weight(w_pt, cin_p, cout_p):
    """(Cout, Cin, 3, 3) PyTorch layout -> (9*Cin_p, Cout_p) bf16 im2col matrix."""
    cout, cin = w_pt.shape[:2]
    w = jnp.transpose(w_pt, (2, 3, 1, 0))                # (ky, kx, Cin, Cout)
    w = jnp.pad(w, ((0, 0), (0, 0), (0, cin_p - cin), (0, cout_p - cout)))
    return w.reshape(9 * cin_p, cout_p).astype(jnp.bfloat16)


def init_up_block_params(key, in_channel, out_channel):
    """Deterministic synthetic parameters in PyTorch layouts (UP_Block / VGG_Block)."""
    k1, k2, k3, k4 = jax.random.split(key, 4)

    def conv_init(kw, kb, cin, cout):
        bound = 1.0 / ((cin * 9) ** 0.5)
        w = jax.random.uniform(kw, (cout, cin, 3, 3), jnp.float32, -bound, bound)
        b = jax.random.uniform(kb, (cout,), jnp.float32, -bound, bound)
        return w, b

    w1, b1 = conv_init(k1, k2, in_channel, out_channel)
    w2, b2 = conv_init(k3, k4, out_channel, out_channel)
    return dict(
        w1=w1, b1=b1,
        g1=jnp.ones((out_channel,), jnp.float32),
        be1=jnp.zeros((out_channel,), jnp.float32),
        w2=w2, b2=b2,
        g2=jnp.ones((out_channel,), jnp.float32),
        be2=jnp.zeros((out_channel,), jnp.float32))


@jax.jit
def up_block_forward(x1_nchw, x2_nchw, params):
    """UP_Block.forward (up_mode='nearest', conv_mode='vgg').  Inputs are NCHW."""
    # ---- UP_Block plumbing: nearest 2x upsample, pad to x2's size, concat([x2, x1]). ----
    # TODO(synk): fuse the upsample + skip-concat into the first conv stage's window DMA
    # instead of materializing the concatenated NHWC tensor in HBM.
    x1 = jnp.transpose(x1_nchw, (0, 2, 3, 1)).astype(jnp.float32)
    x2 = jnp.transpose(x2_nchw, (0, 2, 3, 1)).astype(jnp.float32)
    x1 = jnp.repeat(jnp.repeat(x1, 2, axis=1), 2, axis=2)          # nearest, scale_factor=2
    d_h = x2.shape[1] - x1.shape[1]                                # diffX in the PyTorch code
    d_w = x2.shape[2] - x1.shape[2]                                # diffY
    x1 = jnp.pad(x1, ((0, 0), (d_h // 2, d_h - d_h // 2),
                      (d_w // 2, d_w - d_w // 2), (0, 0)))

    n, h, w, _ = x2.shape
    cin = x1.shape[-1] + x2.shape[-1]
    cout = params["g1"].shape[0]
    cin_p = _round_up(cin, LANE)
    cout_p = _round_up(cout, LANE)

    parts = [x2, x1]                                               # torch.cat([x2, x1], dim=1)
    if cin_p > cin:
        parts.append(jnp.zeros((n, h, w, cin_p - cin), jnp.float32))
    xcat = jnp.concatenate(parts, axis=-1)

    tile_h = 8 if h % 8 == 0 else h   # TODO(synk): sweep tile size per chip (smaller on v7x)
    count = n * h * w

    # Lane-padded bf16 im2col weights; conv biases are dropped because training-mode
    # BatchNorm cancels any per-channel pre-BN constant exactly.
    w1 = _prep_conv_weight(params["w1"], cin_p, cout_p)
    w2 = _prep_conv_weight(params["w2"], cout_p, cout_p)
    g1 = jnp.pad(params["g1"], (0, cout_p - cout))
    be1 = jnp.pad(params["be1"], (0, cout_p - cout))
    g2 = jnp.pad(params["g2"], (0, cout_p - cout))
    be2 = jnp.pad(params["be2"], (0, cout_p - cout))

    # Stage 1: conv1 + BN partial stats.
    pn0 = jnp.zeros((2, cin_p), jnp.float32)                       # unused (apply_prenorm=False)
    raw1, st1 = _conv3x3_bn_stats(xcat, w1, pn0, tile_h=tile_h, apply_prenorm=False)
    pn1 = _bn_affine(st1, g1, be1, count)

    # Stage 2: BN1 + ReLU fused into the window prep, then conv2 + BN partial stats.
    raw2, st2 = _conv3x3_bn_stats(raw1, w2, pn1, tile_h=tile_h, apply_prenorm=True)
    pn2 = _bn_affine(st2, g2, be2, count)

    # Final BN2 + ReLU, drop the channel padding, back to NCHW.
    y = _bn_relu(raw2, pn2, tile_h=tile_h)
    return jnp.transpose(y[..., :cout], (0, 3, 1, 2))


# ---------------------------------------------------------------------------
# Pure-JAX reference (NCHW), mirroring the kernel's bf16 matmul operands.
# ---------------------------------------------------------------------------
def _reference_forward(x1_nchw, x2_nchw, params):
    x1 = jnp.repeat(jnp.repeat(x1_nchw, 2, axis=2), 2, axis=3)
    d_h = x2_nchw.shape[2] - x1.shape[2]
    d_w = x2_nchw.shape[3] - x1.shape[3]
    x1 = jnp.pad(x1, ((0, 0), (0, 0), (d_h // 2, d_h - d_h // 2),
                      (d_w // 2, d_w - d_w // 2)))
    x = jnp.concatenate([x2_nchw, x1], axis=1)

    def stage(x, w, b, g, be):
        y = jax.lax.conv_general_dilated(
            x.astype(jnp.bfloat16), w.astype(jnp.bfloat16), (1, 1), "SAME",
            dimension_numbers=("NCHW", "OIHW", "NCHW"),
            preferred_element_type=jnp.float32)
        y = y + b[None, :, None, None]       # kernel drops this; training BN cancels it
        mean = jnp.mean(y, axis=(0, 2, 3), keepdims=True)
        var = jnp.mean((y - mean) ** 2, axis=(0, 2, 3), keepdims=True)
        y = (y - mean) * jax.lax.rsqrt(var + BN_EPS)
        y = y * g[None, :, None, None] + be[None, :, None, None]
        return jnp.maximum(y, 0.0)

    y = stage(x, params["w1"], params["b1"], params["g1"], params["be1"])
    y = stage(y, params["w2"], params["b2"], params["g2"], params["be2"])
    return y


if __name__ == "__main__":
    key = jax.random.PRNGKey(0)
    kx1, kx2, kp = jax.random.split(key, 3)

    # UP_Block(in_channel=8, out_channel=8): x1 is the low-resolution decoder feature
    # (in_channel // 2 channels, half spatial size), x2 is the skip connection.
    N, IN_CH, OUT_CH, H, W = 2, 8, 8, 16, 16
    x1 = jax.random.normal(kx1, (N, IN_CH // 2, H // 2, W // 2), jnp.float32)
    x2 = jax.random.normal(kx2, (N, IN_CH // 2, H, W), jnp.float32)
    params = init_up_block_params(kp, IN_CH, OUT_CH)

    out = jax.block_until_ready(up_block_forward(x1, x2, params))
    assert out.shape == (N, OUT_CH, H, W), out.shape

    ref = jax.block_until_ready(_reference_forward(x1, x2, params))
    max_err = float(jnp.max(jnp.abs(out - ref)))
    assert max_err < 2e-2, f"mismatch vs reference: {max_err}"

    print("KERNEL_OK")
</pallas_src>

<mosaic_0001>
module attributes {stable_mosaic.version = 11 : i64} {
  func.func @_conv_stats_kernel(%arg0: i32, %arg1: i32, %arg2: memref<2x16x16x128xf32, #tpu.memory_space<any>>, %arg3: memref<1152x128xbf16, #tpu.memory_space<vmem>>, %arg4: memref<2x128xf32, #tpu.memory_space<vmem>>, %arg5: memref<1x8x16x128xf32, #tpu.memory_space<vmem>>, %arg6: memref<1x1x2x128xf32, #tpu.memory_space<vmem>>, %arg7: memref<2x10x18x128xf32, #tpu.memory_space<vmem>>, %arg8: memref<10x18x128xbf16, #tpu.memory_space<vmem>>, %arg9: memref<2x3x!tpu.dma_semaphore, #tpu.memory_space<semaphore_mem>>) attributes {dimension_semantics = [#tpu.dimension_semantics<parallel>, #tpu.dimension_semantics<arbitrary>], iteration_bounds = array<i64: 2, 2>, scalar_prefetch = 0 : i64, scratch_operands = 3 : i64, tpu.core_type = #tpu.core_type<tc>, window_params = [{}, {pipeline_mode = #tpu.pipeline_mode<synchronous>, transform_indices = @transform_1, window_bounds = array<i64: 1152, 128>}, {pipeline_mode = #tpu.pipeline_mode<synchronous>, transform_indices = @transform_2, window_bounds = array<i64: 2, 128>}, {transform_indices = @transform_3, window_bounds = array<i64: 1, 8, 16, 128>}, {transform_indices = @transform_4, window_bounds = array<i64: 1, 1, 2, 128>}]} {
    %c2_i32 = arith.constant 2 : i32
    %c0_i32 = arith.constant 0 : i32
    %0 = arith.cmpi eq, %c2_i32, %c0_i32 : i32
    %c1_i32 = arith.constant 1 : i32
    %1 = arith.select %0, %c1_i32, %c2_i32 : i32
    %2 = arith.remsi %arg1, %1 : i32
    %c0_i32_0 = arith.constant 0 : i32
    %3 = arith.cmpi ne, %2, %c0_i32_0 : i32
    %c0_i32_1 = arith.constant 0 : i32
    %4 = arith.cmpi slt, %2, %c0_i32_1 : i32
    %c0_i32_2 = arith.constant 0 : i32
    %5 = arith.cmpi slt, %1, %c0_i32_2 : i32
    %6 = arith.xori %4, %5 : i1
    %7 = arith.andi %6, %3 : i1
    %8 = arith.addi %2, %1 : i32
    %9 = arith.select %7, %8, %2 : i32
    %c0_i32_3 = arith.constant 0 : i32
    %10 = arith.cmpi eq, %arg1, %c0_i32_3 : i32
    %11 = arith.extui %10 : i1 to i32
    %c0_i32_4 = arith.constant 0 : i32
    %12 = arith.cmpi ne, %11, %c0_i32_4 : i32
    scf.if %12 {
      %c8_i32_71 = arith.constant 8 : i32
      %76 = arith.muli %arg1, %c8_i32_71 : i32
      %c0_i32_72 = arith.constant 0 : i32
      %c0_i32_73 = arith.constant 0 : i32
      %c0_i32_74 = arith.constant 0 : i32
      %77 = tpu.memref_slice %arg2[%arg0, %76, %c0_i32_73, %c0_i32_74] : memref<2x16x16x128xf32, #tpu.memory_space<any>> -> memref<1x8x16x128xf32, #tpu.memory_space<any>>
      %78 = tpu.memref_squeeze %77 : memref<1x8x16x128xf32, #tpu.memory_space<any>> -> memref<8x16x128xf32, #tpu.memory_space<any>>
      %c1_i32_75 = arith.constant 1 : i32
      %c1_i32_76 = arith.constant 1 : i32
      %c0_i32_77 = arith.constant 0 : i32
      %79 = tpu.memref_slice %arg7[%9, %c1_i32_75, %c1_i32_76, %c0_i32_77] : memref<2x10x18x128xf32, #tpu.memory_space<vmem>> -> memref<1x8x16x128xf32, #tpu.memory_space<vmem>>
      %80 = tpu.memref_squeeze %79 : memref<1x8x16x128xf32, #tpu.memory_space<vmem>> -> memref<8x16x128xf32, #tpu.memory_space<vmem>>
      %81 = tpu.memref_slice %arg9[%9, %c0_i32_72] : memref<2x3x!tpu.dma_semaphore, #tpu.memory_space<semaphore_mem>> -> memref<1x1x!tpu.dma_semaphore, #tpu.memory_space<semaphore_mem>>
      %82 = tpu.memref_squeeze %81 : memref<1x1x!tpu.dma_semaphore, #tpu.memory_space<semaphore_mem>> -> memref<!tpu.dma_semaphore, #tpu.memory_space<semaphore_mem>>
      tpu.enqueue_dma source(%78 : memref<8x16x128xf32, #tpu.memory_space<any>>) target(%80 : memref<8x16x128xf32, #tpu.memory_space<vmem>>) target_semaphore(%82 : memref<!tpu.dma_semaphore, #tpu.memory_space<semaphore_mem>>)
      %c0_i32_78 = arith.constant 0 : i32
      %83 = arith.cmpi sgt, %arg1, %c0_i32_78 : i32
      %84 = arith.extui %83 : i1 to i32
      %c0_i32_79 = arith.constant 0 : i32
      %85 = arith.cmpi ne, %84, %c0_i32_79 : i32
      scf.if %85 {
        %c1_i32_82 = arith.constant 1 : i32
        %89 = arith.subi %76, %c1_i32_82 : i32
        %c0_i32_83 = arith.constant 0 : i32
        %90 = arith.maxsi %89, %c0_i32_83 : i32
        %c1_i32_84 = arith.constant 1 : i32
        %c0_i32_85 = arith.constant 0 : i32
        %c0_i32_86 = arith.constant 0 : i32
        %91 = tpu.memref_slice %arg2[%arg0, %90, %c0_i32_85, %c0_i32_86] : memref<2x16x16x128xf32, #tpu.memory_space<any>> -> memref<1x1x16x128xf32, #tpu.memory_space<any>>
        %92 = tpu.memref_squeeze %91 : memref<1x1x16x128xf32, #tpu.memory_space<any>> -> memref<1x16x128xf32, #tpu.memory_space<any>>
        %c0_i32_87 = arith.constant 0 : i32
        %c1_i32_88 = arith.constant 1 : i32
        %c0_i32_89 = arith.constant 0 : i32
        %93 = tpu.memref_slice %arg7[%9, %c0_i32_87, %c1_i32_88, %c0_i32_89] : memref<2x10x18x128xf32, #tpu.memory_space<vmem>> -> memref<1x1x16x128xf32, #tpu.memory_space<vmem>>
        %94 = tpu.memref_squeeze %93 : memref<1x1x16x128xf32, #tpu.memory_space<vmem>> -> memref<1x16x128xf32, #tpu.memory_space<vmem>>
        %95 = tpu.memref_slice %arg9[%9, %c1_i32_84] : memref<2x3x!tpu.dma_semaphore, #tpu.memory_space<semaphore_mem>> -> memref<1x1x!tpu.dma_semaphore, #tpu.memory_space<semaphore_mem>>
        %96 = tpu.memref_squeeze %95 : memref<1x1x!tpu.dma_semaphore, #tpu.memory_space<semaphore_mem>> -> memref<!tpu.dma_semaphore, #tpu.memory_space<semaphore_mem>>
        tpu.enqueue_dma source(%92 : memref<1x16x128xf32, #tpu.memory_space<any>>) target(%94 : memref<1x16x128xf32, #tpu.memory_space<vmem>>) target_semaphore(%96 : memref<!tpu.dma_semaphore, #tpu.memory_space<semaphore_mem>>)
      } else {
      }
      %c1_i32_80 = arith.constant 1 : i32
      %86 = arith.cmpi slt, %arg1, %c1_i32_80 : i32
      %87 = arith.extui %86 : i1 to i32
      %c0_i32_81 = arith.constant 0 : i32
      %88 = arith.cmpi ne, %87, %c0_i32_81 : i32
      scf.if %88 {
        %c8_i32_82 = arith.constant 8 : i32
        %89 = arith.addi %76, %c8_i32_82 : i32
        %c15_i32 = arith.constant 15 : i32
        %90 = arith.minsi %89, %c15_i32 : i32
        %c2_i32_83 = arith.constant 2 : i32
        %c0_i32_84 = arith.constant 0 : i32
        %c0_i32_85 = arith.constant 0 : i32
        %91 = tpu.memref_slice %arg2[%arg0, %90, %c0_i32_84, %c0_i32_85] : memref<2x16x16x128xf32, #tpu.memory_space<any>> -> memref<1x1x16x128xf32, #tpu.memory_space<any>>
        %92 = tpu.memref_squeeze %91 : memref<1x1x16x128xf32, #tpu.memory_space<any>> -> memref<1x16x128xf32, #tpu.memory_space<any>>
        %c9_i32 = arith.constant 9 : i32
        %c1_i32_86 = arith.constant 1 : i32
        %c0_i32_87 = arith.constant 0 : i32
        %93 = tpu.memref_slice %arg7[%9, %c9_i32, %c1_i32_86, %c0_i32_87] : memref<2x10x18x128xf32, #tpu.memory_space<vmem>> -> memref<1x1x16x128xf32, #tpu.memory_space<vmem>>
        %94 = tpu.memref_squeeze %93 : memref<1x1x16x128xf32, #tpu.memory_space<vmem>> -> memref<1x16x128xf32, #tpu.memory_space<vmem>>
        %95 = tpu.memref_slice %arg9[%9, %c2_i32_83] : memref<2x3x!tpu.dma_semaphore, #tpu.memory_space<semaphore_mem>> -> memref<1x1x!tpu.dma_semaphore, #tpu.memory_space<semaphore_mem>>
        %96 = tpu.memref_squeeze %95 : memref<1x1x!tpu.dma_semaphore, #tpu.memory_space<semaphore_mem>> -> memref<!tpu.dma_semaphore, #tpu.memory_space<semaphore_mem>>
        tpu.enqueue_dma source(%92 : memref<1x16x128xf32, #tpu.memory_space<any>>) target(%94 : memref<1x16x128xf32, #tpu.memory_space<vmem>>) target_semaphore(%96 : memref<!tpu.dma_semaphore, #tpu.memory_space<semaphore_mem>>)
      } else {
      }
    } else {
    }
    %c8_i32 = arith.constant 8 : i32
    %13 = arith.muli %arg1, %c8_i32 : i32
    %c0_i32_5 = arith.constant 0 : i32
    %c0_i32_6 = arith.constant 0 : i32
    %c0_i32_7 = arith.constant 0 : i32
    %14 = tpu.memref_slice %arg2[%arg0, %13, %c0_i32_6, %c0_i32_7] : memref<2x16x16x128xf32, #tpu.memory_space<any>> -> memref<1x8x16x128xf32, #tpu.memory_space<any>>
    %15 = tpu.memref_squeeze %14 : memref<1x8x16x128xf32, #tpu.memory_space<any>> -> memref<8x16x128xf32, #tpu.memory_space<any>>
    %c1_i32_8 = arith.constant 1 : i32
    %c1_i32_9 = arith.constant 1 : i32
    %c0_i32_10 = arith.constant 0 : i32
    %16 = tpu.memref_slice %arg7[%9, %c1_i32_8, %c1_i32_9, %c0_i32_10] : memref<2x10x18x128xf32, #tpu.memory_space<vmem>> -> memref<1x8x16x128xf32, #tpu.memory_space<vmem>>
    %17 = tpu.memref_squeeze %16 : memref<1x8x16x128xf32, #tpu.memory_space<vmem>> -> memref<8x16x128xf32, #tpu.memory_space<vmem>>
    %18 = tpu.memref_slice %arg9[%9, %c0_i32_5] : memref<2x3x!tpu.dma_semaphore, #tpu.memory_space<semaphore_mem>> -> memref<1x1x!tpu.dma_semaphore, #tpu.memory_space<semaphore_mem>>
    %19 = tpu.memref_squeeze %18 : memref<1x1x!tpu.dma_semaphore, #tpu.memory_space<semaphore_mem>> -> memref<!tpu.dma_semaphore, #tpu.memory_space<semaphore_mem>>
    tpu.wait_dma2 semaphore(%19 : memref<!tpu.dma_semaphore, #tpu.memory_space<semaphore_mem>>) src(%15 : memref<8x16x128xf32, #tpu.memory_space<any>>) dst(%17 : memref<8x16x128xf32, #tpu.memory_space<vmem>>)
    %c0_i32_11 = arith.constant 0 : i32
    %20 = arith.cmpi sgt, %arg1, %c0_i32_11 : i32
    %21 = arith.extui %20 : i1 to i32
    %c0_i32_12 = arith.constant 0 : i32
    %22 = arith.cmpi ne, %21, %c0_i32_12 : i32
    scf.if %22 {
      %c1_i32_71 = arith.constant 1 : i32
      %76 = arith.subi %13, %c1_i32_71 : i32
      %c0_i32_72 = arith.constant 0 : i32
      %77 = arith.maxsi %76, %c0_i32_72 : i32
      %c1_i32_73 = arith.constant 1 : i32
      %c0_i32_74 = arith.constant 0 : i32
      %c0_i32_75 = arith.constant 0 : i32
      %78 = tpu.memref_slice %arg2[%arg0, %77, %c0_i32_74, %c0_i32_75] : memref<2x16x16x128xf32, #tpu.memory_space<any>> -> memref<1x1x16x128xf32, #tpu.memory_space<any>>
      %79 = tpu.memref_squeeze %78 : memref<1x1x16x128xf32, #tpu.memory_space<any>> -> memref<1x16x128xf32, #tpu.memory_space<any>>
      %c0_i32_76 = arith.constant 0 : i32
      %c1_i32_77 = arith.constant 1 : i32
      %c0_i32_78 = arith.constant 0 : i32
      %80 = tpu.memref_slice %arg7[%9, %c0_i32_76, %c1_i32_77, %c0_i32_78] : memref<2x10x18x128xf32, #tpu.memory_space<vmem>> -> memref<1x1x16x128xf32, #tpu.memory_space<vmem>>
      %81 = tpu.memref_squeeze %80 : memref<1x1x16x128xf32, #tpu.memory_space<vmem>> -> memref<1x16x128xf32, #tpu.memory_space<vmem>>
      %82 = tpu.memref_slice %arg9[%9, %c1_i32_73] : memref<2x3x!tpu.dma_semaphore, #tpu.memory_space<semaphore_mem>> -> memref<1x1x!tpu.dma_semaphore, #tpu.memory_space<semaphore_mem>>
      %83 = tpu.memref_squeeze %82 : memref<1x1x!tpu.dma_semaphore, #tpu.memory_space<semaphore_mem>> -> memref<!tpu.dma_semaphore, #tpu.memory_space<semaphore_mem>>
      tpu.wait_dma2 semaphore(%83 : memref<!tpu.dma_semaphore, #tpu.memory_space<semaphore_mem>>) src(%79 : memref<1x16x128xf32, #tpu.memory_space<any>>) dst(%81 : memref<1x16x128xf32, #tpu.memory_space<vmem>>)
    } else {
    }
    %c1_i32_13 = arith.constant 1 : i32
    %23 = arith.cmpi slt, %arg1, %c1_i32_13 : i32
    %24 = arith.extui %23 : i1 to i32
    %c0_i32_14 = arith.constant 0 : i32
    %25 = arith.cmpi ne, %24, %c0_i32_14 : i32
    scf.if %25 {
      %c8_i32_71 = arith.constant 8 : i32
      %76 = arith.addi %13, %c8_i32_71 : i32
      %c15_i32 = arith.constant 15 : i32
      %77 = arith.minsi %76, %c15_i32 : i32
      %c2_i32_72 = arith.constant 2 : i32
      %c0_i32_73 = arith.constant 0 : i32
      %c0_i32_74 = arith.constant 0 : i32
      %78 = tpu.memref_slice %arg2[%arg0, %77, %c0_i32_73, %c0_i32_74] : memref<2x16x16x128xf32, #tpu.memory_space<any>> -> memref<1x1x16x128xf32, #tpu.memory_space<any>>
      %79 = tpu.memref_squeeze %78 : memref<1x1x16x128xf32, #tpu.memory_space<any>> -> memref<1x16x128xf32, #tpu.memory_space<any>>
      %c9_i32 = arith.constant 9 : i32
      %c1_i32_75 = arith.constant 1 : i32
      %c0_i32_76 = arith.constant 0 : i32
      %80 = tpu.memref_slice %arg7[%9, %c9_i32, %c1_i32_75, %c0_i32_76] : memref<2x10x18x128xf32, #tpu.memory_space<vmem>> -> memref<1x1x16x128xf32, #tpu.memory_space<vmem>>
      %81 = tpu.memref_squeeze %80 : memref<1x1x16x128xf32, #tpu.memory_space<vmem>> -> memref<1x16x128xf32, #tpu.memory_space<vmem>>
      %82 = tpu.memref_slice %arg9[%9, %c2_i32_72] : memref<2x3x!tpu.dma_semaphore, #tpu.memory_space<semaphore_mem>> -> memref<1x1x!tpu.dma_semaphore, #tpu.memory_space<semaphore_mem>>
      %83 = tpu.memref_squeeze %82 : memref<1x1x!tpu.dma_semaphore, #tpu.memory_space<semaphore_mem>> -> memref<!tpu.dma_semaphore, #tpu.memory_space<semaphore_mem>>
      tpu.wait_dma2 semaphore(%83 : memref<!tpu.dma_semaphore, #tpu.memory_space<semaphore_mem>>) src(%79 : memref<1x16x128xf32, #tpu.memory_space<any>>) dst(%81 : memref<1x16x128xf32, #tpu.memory_space<vmem>>)
    } else {
    }
    %c1_i32_15 = arith.constant 1 : i32
    %26 = arith.addi %arg1, %c1_i32_15 : i32
    %c2_i32_16 = arith.constant 2 : i32
    %27 = arith.cmpi slt, %26, %c2_i32_16 : i32
    %28 = arith.extui %27 : i1 to i32
    %c0_i32_17 = arith.constant 0 : i32
    %29 = arith.cmpi ne, %28, %c0_i32_17 : i32
    scf.if %29 {
      %c1_i32_71 = arith.constant 1 : i32
      %76 = arith.addi %arg1, %c1_i32_71 : i32
      %c1_i32_72 = arith.constant 1 : i32
      %77 = arith.subi %c1_i32_72, %9 : i32
      %c8_i32_73 = arith.constant 8 : i32
      %78 = arith.muli %76, %c8_i32_73 : i32
      %c0_i32_74 = arith.constant 0 : i32
      %c0_i32_75 = arith.constant 0 : i32
      %c0_i32_76 = arith.constant 0 : i32
      %79 = tpu.memref_slice %arg2[%arg0, %78, %c0_i32_75, %c0_i32_76] : memref<2x16x16x128xf32, #tpu.memory_space<any>> -> memref<1x8x16x128xf32, #tpu.memory_space<any>>
      %80 = tpu.memref_squeeze %79 : memref<1x8x16x128xf32, #tpu.memory_space<any>> -> memref<8x16x128xf32, #tpu.memory_space<any>>
      %c1_i32_77 = arith.constant 1 : i32
      %c1_i32_78 = arith.constant 1 : i32
      %c0_i32_79 = arith.constant 0 : i32
      %81 = tpu.memref_slice %arg7[%77, %c1_i32_77, %c1_i32_78, %c0_i32_79] : memref<2x10x18x128xf32, #tpu.memory_space<vmem>> -> memref<1x8x16x128xf32, #tpu.memory_space<vmem>>
      %82 = tpu.memref_squeeze %81 : memref<1x8x16x128xf32, #tpu.memory_space<vmem>> -> memref<8x16x128xf32, #tpu.memory_space<vmem>>
      %83 = tpu.memref_slice %arg9[%77, %c0_i32_74] : memref<2x3x!tpu.dma_semaphore, #tpu.memory_space<semaphore_mem>> -> memref<1x1x!tpu.dma_semaphore, #tpu.memory_space<semaphore_mem>>
      %84 = tpu.memref_squeeze %83 : memref<1x1x!tpu.dma_semaphore, #tpu.memory_space<semaphore_mem>> -> memref<!tpu.dma_semaphore, #tpu.memory_space<semaphore_mem>>
      tpu.enqueue_dma source(%80 : memref<8x16x128xf32, #tpu.memory_space<any>>) target(%82 : memref<8x16x128xf32, #tpu.memory_space<vmem>>) target_semaphore(%84 : memref<!tpu.dma_semaphore, #tpu.memory_space<semaphore_mem>>)
      %c0_i32_80 = arith.constant 0 : i32
      %85 = arith.cmpi sgt, %76, %c0_i32_80 : i32
      %86 = arith.extui %85 : i1 to i32
      %c0_i32_81 = arith.constant 0 : i32
      %87 = arith.cmpi ne, %86, %c0_i32_81 : i32
      scf.if %87 {
        %c1_i32_84 = arith.constant 1 : i32
        %91 = arith.subi %78, %c1_i32_84 : i32
        %c0_i32_85 = arith.constant 0 : i32
        %92 = arith.maxsi %91, %c0_i32_85 : i32
        %c1_i32_86 = arith.constant 1 : i32
        %c0_i32_87 = arith.constant 0 : i32
        %c0_i32_88 = arith.constant 0 : i32
        %93 = tpu.memref_slice %arg2[%arg0, %92, %c0_i32_87, %c0_i32_88] : memref<2x16x16x128xf32, #tpu.memory_space<any>> -> memref<1x1x16x128xf32, #tpu.memory_space<any>>
        %94 = tpu.memref_squeeze %93 : memref<1x1x16x128xf32, #tpu.memory_space<any>> -> memref<1x16x128xf32, #tpu.memory_space<any>>
        %c0_i32_89 = arith.constant 0 : i32
        %c1_i32_90 = arith.constant 1 : i32
        %c0_i32_91 = arith.constant 0 : i32
        %95 = tpu.memref_slice %arg7[%77, %c0_i32_89, %c1_i32_90, %c0_i32_91] : memref<2x10x18x128xf32, #tpu.memory_space<vmem>> -> memref<1x1x16x128xf32, #tpu.memory_space<vmem>>
        %96 = tpu.memref_squeeze %95 : memref<1x1x16x128xf32, #tpu.memory_space<vmem>> -> memref<1x16x128xf32, #tpu.memory_space<vmem>>
        %97 = tpu.memref_slice %arg9[%77, %c1_i32_86] : memref<2x3x!tpu.dma_semaphore, #tpu.memory_space<semaphore_mem>> -> memref<1x1x!tpu.dma_semaphore, #tpu.memory_space<semaphore_mem>>
        %98 = tpu.memref_squeeze %97 : memref<1x1x!tpu.dma_semaphore, #tpu.memory_space<semaphore_mem>> -> memref<!tpu.dma_semaphore, #tpu.memory_space<semaphore_mem>>
        tpu.enqueue_dma source(%94 : memref<1x16x128xf32, #tpu.memory_space<any>>) target(%96 : memref<1x16x128xf32, #tpu.memory_space<vmem>>) target_semaphore(%98 : memref<!tpu.dma_semaphore, #tpu.memory_space<semaphore_mem>>)
      } else {
      }
      %c1_i32_82 = arith.constant 1 : i32
      %88 = arith.cmpi slt, %76, %c1_i32_82 : i32
      %89 = arith.extui %88 : i1 to i32
      %c0_i32_83 = arith.constant 0 : i32
      %90 = arith.cmpi ne, %89, %c0_i32_83 : i32
      scf.if %90 {
        %c8_i32_84 = arith.constant 8 : i32
        %91 = arith.addi %78, %c8_i32_84 : i32
        %c15_i32 = arith.constant 15 : i32
        %92 = arith.minsi %91, %c15_i32 : i32
        %c2_i32_85 = arith.constant 2 : i32
        %c0_i32_86 = arith.constant 0 : i32
        %c0_i32_87 = arith.constant 0 : i32
        %93 = tpu.memref_slice %arg2[%arg0, %92, %c0_i32_86, %c0_i32_87] : memref<2x16x16x128xf32, #tpu.memory_space<any>> -> memref<1x1x16x128xf32, #tpu.memory_space<any>>
        %94 = tpu.memref_squeeze %93 : memref<1x1x16x128xf32, #tpu.memory_space<any>> -> memref<1x16x128xf32, #tpu.memory_space<any>>
        %c9_i32 = arith.constant 9 : i32
        %c1_i32_88 = arith.constant 1 : i32
        %c0_i32_89 = arith.constant 0 : i32
        %95 = tpu.memref_slice %arg7[%77, %c9_i32, %c1_i32_88, %c0_i32_89] : memref<2x10x18x128xf32, #tpu.memory_space<vmem>> -> memref<1x1x16x128xf32, #tpu.memory_space<vmem>>
        %96 = tpu.memref_squeeze %95 : memref<1x1x16x128xf32, #tpu.memory_space<vmem>> -> memref<1x16x128xf32, #tpu.memory_space<vmem>>
        %97 = tpu.memref_slice %arg9[%77, %c2_i32_85] : memref<2x3x!tpu.dma_semaphore, #tpu.memory_space<semaphore_mem>> -> memref<1x1x!tpu.dma_semaphore, #tpu.memory_space<semaphore_mem>>
        %98 = tpu.memref_squeeze %97 : memref<1x1x!tpu.dma_semaphore, #tpu.memory_space<semaphore_mem>> -> memref<!tpu.dma_semaphore, #tpu.memory_space<semaphore_mem>>
        tpu.enqueue_dma source(%94 : memref<1x16x128xf32, #tpu.memory_space<any>>) target(%96 : memref<1x16x128xf32, #tpu.memory_space<vmem>>) target_semaphore(%98 : memref<!tpu.dma_semaphore, #tpu.memory_space<semaphore_mem>>)
      } else {
      }
    } else {
    }
    %30 = arith.index_cast %9 : i32 to index
    %c0 = arith.constant 0 : index
    %c0_18 = arith.constant 0 : index
    %c0_19 = arith.constant 0 : index
    %31 = vector.load %arg7[%30, %c0, %c0_18, %c0_19] : memref<2x10x18x128xf32, #tpu.memory_space<vmem>>, vector<1x10x18x128xf32>
    %32 = vector.shape_cast %31 : vector<1x10x18x128xf32> to vector<10x18x128xf32>
    %33 = arith.truncf %32 : vector<10x18x128xf32> to vector<10x18x128xbf16>
    %c0_20 = arith.constant 0 : index
    %c0_21 = arith.constant 0 : index
    %c0_22 = arith.constant 0 : index
    %34 = vector.load %arg8[%c0_20, %c0_21, %c0_22] : memref<10x18x128xbf16, #tpu.memory_space<vmem>>, vector<10x18x128xbf16>
    tpu.vector_store %arg8[%c0_20, %c0_21, %c0_22], %33 {strides = array<i32>} : memref<10x18x128xbf16, #tpu.memory_space<vmem>>, vector<10x18x128xbf16>,
    %cst = arith.constant 0.000000e+00 : bf16
    %35 = vector.broadcast %cst : bf16 to vector<10x1x128xbf16>
    %c0_23 = arith.constant 0 : index
    %c0_24 = arith.constant 0 : index
    %c0_25 = arith.constant 0 : index
    %36 = vector.load %arg8[%c0_23, %c0_24, %c0_25] : memref<10x18x128xbf16, #tpu.memory_space<vmem>>, vector<10x1x128xbf16>
    tpu.vector_store %arg8[%c0_23, %c0_24, %c0_25], %35 {strides = array<i32>} : memref<10x18x128xbf16, #tpu.memory_space<vmem>>, vector<10x1x128xbf16>,
    %c0_26 = arith.constant 0 : index
    %c17 = arith.constant 17 : index
    %c0_27 = arith.constant 0 : index
    %37 = vector.load %arg8[%c0_26, %c17, %c0_27] : memref<10x18x128xbf16, #tpu.memory_space<vmem>>, vector<10x1x128xbf16>
    tpu.vector_store %arg8[%c0_26, %c17, %c0_27], %35 {strides = array<i32>} : memref<10x18x128xbf16, #tpu.memory_space<vmem>>, vector<10x1x128xbf16>,
    %cst_28 = arith.constant 0.000000e+00 : bf16
    %38 = vector.broadcast %cst_28 : bf16 to vector<1x18x128xbf16>
    %c0_i32_29 = arith.constant 0 : i32
    %39 = arith.cmpi eq, %arg1, %c0_i32_29 : i32
    %40 = arith.extui %39 : i1 to i32
    %c0_i32_30 = arith.constant 0 : i32
    %41 = arith.cmpi ne, %40, %c0_i32_30 : i32
    scf.if %41 {
      %c0_71 = arith.constant 0 : index
      %c0_72 = arith.constant 0 : index
      %c0_73 = arith.constant 0 : index
      %76 = vector.load %arg8[%c0_71, %c0_72, %c0_73] : memref<10x18x128xbf16, #tpu.memory_space<vmem>>, vector<1x18x128xbf16>
      tpu.vector_store %arg8[%c0_71, %c0_72, %c0_73], %38 {strides = array<i32>} : memref<10x18x128xbf16, #tpu.memory_space<vmem>>, vector<1x18x128xbf16>,
    } else {
    }
    %c1_i32_31 = arith.constant 1 : i32
    %42 = arith.cmpi eq, %arg1, %c1_i32_31 : i32
    %43 = arith.extui %42 : i1 to i32
    %c0_i32_32 = arith.constant 0 : i32
    %44 = arith.cmpi ne, %43, %c0_i32_32 : i32
    scf.if %44 {
      %c9 = arith.constant 9 : index
      %c0_71 = arith.constant 0 : index
      %c0_72 = arith.constant 0 : index
      %76 = vector.load %arg8[%c9, %c0_71, %c0_72] : memref<10x18x128xbf16, #tpu.memory_space<vmem>>, vector<1x18x128xbf16>
      tpu.vector_store %arg8[%c9, %c0_71, %c0_72], %38 {strides = array<i32>} : memref<10x18x128xbf16, #tpu.memory_space<vmem>>, vector<1x18x128xbf16>,
    } else {
    }
    %c0_33 = arith.constant 0 : index
    %c0_34 = arith.constant 0 : index
    %c0_35 = arith.constant 0 : index
    %45 = vector.load %arg8[%c0_33, %c0_34, %c0_35] : memref<10x18x128xbf16, #tpu.memory_space<vmem>>, vector<8x16x128xbf16>
    %46 = vector.shape_cast %45 : vector<8x16x128xbf16> to vector<128x128xbf16>
    %c0_36 = arith.constant 0 : index
    %c1 = arith.constant 1 : index
    %c0_37 = arith.constant 0 : index
    %47 = vector.load %arg8[%c0_36, %c1, %c0_37] : memref<10x18x128xbf16, #tpu.memory_space<vmem>>, vector<8x16x128xbf16>
    %48 = vector.shape_cast %47 : vector<8x16x128xbf16> to vector<128x128xbf16>
    %c0_38 = arith.constant 0 : index
    %c2 = arith.constant 2 : index
    %c0_39 = arith.constant 0 : index
    %49 = vector.load %arg8[%c0_38, %c2, %c0_39] : memref<10x18x128xbf16, #tpu.memory_space<vmem>>, vector<8x16x128xbf16>
    %50 = vector.shape_cast %49 : vector<8x16x128xbf16> to vector<128x128xbf16>
    %c1_40 = arith.constant 1 : index
    %c0_41 = arith.constant 0 : index
    %c0_42 = arith.constant 0 : index
    %51 = vector.load %arg8[%c1_40, %c0_41, %c0_42] : memref<10x18x128xbf16, #tpu.memory_space<vmem>>, vector<8x16x128xbf16>
    %52 = vector.shape_cast %51 : vector<8x16x128xbf16> to vector<128x128xbf16>
    %c1_43 = arith.constant 1 : index
    %c1_44 = arith.constant 1 : index
    %c0_45 = arith.constant 0 : index
    %53 = vector.load %arg8[%c1_43, %c1_44, %c0_45] : memref<10x18x128xbf16, #tpu.memory_space<vmem>>, vector<8x16x128xbf16>
    %54 = vector.shape_cast %53 : vector<8x16x128xbf16> to vector<128x128xbf16>
    %c1_46 = arith.constant 1 : index
    %c2_47 = arith.constant 2 : index
    %c0_48 = arith.constant 0 : index
    %55 = vector.load %arg8[%c1_46, %c2_47, %c0_48] : memref<10x18x128xbf16, #tpu.memory_space<vmem>>, vector<8x16x128xbf16>
    %56 = vector.shape_cast %55 : vector<8x16x128xbf16> to vector<128x128xbf16>
    %c2_49 = arith.constant 2 : index
    %c0_50 = arith.constant 0 : index
    %c0_51 = arith.constant 0 : index
    %57 = vector.load %arg8[%c2_49, %c0_50, %c0_51] : memref<10x18x128xbf16, #tpu.memory_space<vmem>>, vector<8x16x128xbf16>
    %58 = vector.shape_cast %57 : vector<8x16x128xbf16> to vector<128x128xbf16>
    %c2_52 = arith.constant 2 : index
    %c1_53 = arith.constant 1 : index
    %c0_54 = arith.constant 0 : index
    %59 = vector.load %arg8[%c2_52, %c1_53, %c0_54] : memref<10x18x128xbf16, #tpu.memory_space<vmem>>, vector<8x16x128xbf16>
    %60 = vector.shape_cast %59 : vector<8x16x128xbf16> to vector<128x128xbf16>
    %c2_55 = arith.constant 2 : index
    %c2_56 = arith.constant 2 : index
    %c0_57 = arith.constant 0 : index
    %61 = vector.load %arg8[%c2_55, %c2_56, %c0_57] : memref<10x18x128xbf16, #tpu.memory_space<vmem>>, vector<8x16x128xbf16>
    %62 = vector.shape_cast %61 : vector<8x16x128xbf16> to vector<128x128xbf16>
    %63 = tpu.concatenate %46, %48, %50, %52, %54, %56, %58, %60, %62 in 1 : vector<128x128xbf16>, vector<128x128xbf16>, vector<128x128xbf16>, vector<128x128xbf16>, vector<128x128xbf16>, vector<128x128xbf16>, vector<128x128xbf16>, vector<128x128xbf16>, vector<128x128xbf16> -> vector<128x1152xbf16>
    %c0_58 = arith.constant 0 : index
    %c0_59 = arith.constant 0 : index
    %64 = vector.load %arg3[%c0_58, %c0_59] : memref<1152x128xbf16, #tpu.memory_space<vmem>>, vector<1152x128xbf16>
    %cst_60 = arith.constant dense<0.000000e+00> : vector<128x128xf32>
    %65 = tpu.matmul %63, %64, %cst_60 {dimension_numbers = #tpu.dot_dimension_numbers<[1], [0], [0], [1], [0, 0, 1, 1], [], []>} : vector<128x1152xbf16>, vector<1152x128xbf16>, vector<128x128xf32> -> vector<128x128xf32>
    %66 = vector.shape_cast %65 : vector<128x128xf32> to vector<1x8x16x128xf32>
    %c0_61 = arith.constant 0 : index
    %c0_62 = arith.constant 0 : index
    %c0_63 = arith.constant 0 : index
    %c0_64 = arith.constant 0 : index
    %67 = vector.load %arg5[%c0_61, %c0_62, %c0_63, %c0_64] : memref<1x8x16x128xf32, #tpu.memory_space<vmem>>, vector<1x8x16x128xf32>
    tpu.vector_store %arg5[%c0_61, %c0_62, %c0_63, %c0_64], %66 {strides = array<i32>} : memref<1x8x16x128xf32, #tpu.memory_space<vmem>>, vector<1x8x16x128xf32>,
    %cst_65 = arith.constant dense<0.000000e+00> : vector<128xf32>
    %68 = vector.multi_reduction <add>, %65, %cst_65 [0] : vector<128x128xf32> to vector<128xf32>
    %69 = vector.shape_cast %68 : vector<128xf32> to vector<1x128xf32>
    %70 = arith.mulf %65, %65 : vector<128x128xf32>
    %cst_66 = arith.constant dense<0.000000e+00> : vector<128xf32>
    %71 = vector.multi_reduction <add>, %70, %cst_66 [0] : vector<128x128xf32> to vector<128xf32>
    %72 = vector.shape_cast %71 : vector<128xf32> to vector<1x128xf32>
    %73 = tpu.concatenate %69, %72 in 0 : vector<1x128xf32>, vector<1x128xf32> -> vector<2x128xf32>
    %74 = vector.shape_cast %73 : vector<2x128xf32> to vector<1x1x2x128xf32>
    %c0_67 = arith.constant 0 : index
    %c0_68 = arith.constant 0 : index
    %c0_69 = arith.constant 0 : index
    %c0_70 = arith.constant 0 : index
    %75 = vector.load %arg6[%c0_67, %c0_68, %c0_69, %c0_70] : memref<1x1x2x128xf32, #tpu.memory_space<vmem>>, vector<1x1x2x128xf32>
    tpu.vector_store %arg6[%c0_67, %c0_68, %c0_69, %c0_70], %74 {strides = array<i32>} : memref<1x1x2x128xf32, #tpu.memory_space<vmem>>, vector<1x1x2x128xf32>,
    return
  }
  func.func @transform_1(%arg0: i32, %arg1: i32) -> (i32, i32) {
    %c0_i32 = arith.constant 0 : i32
    %c0_i32_0 = arith.constant 0 : i32
    %c0_i32_1 = arith.constant 0 : i32
    return %c0_i32, %c0_i32_0 : i32, i32
  }
  func.func @transform_2(%arg0: i32, %arg1: i32) -> (i32, i32) {
    %c0_i32 = arith.constant 0 : i32
    %c0_i32_0 = arith.constant 0 : i32
    %c0_i32_1 = arith.constant 0 : i32
    return %c0_i32, %c0_i32_0 : i32, i32
  }
  func.func @transform_3(%arg0: i32, %arg1: i32) -> (i32, i32, i32, i32) {
    %c0_i32 = arith.constant 0 : i32
    %c0_i32_0 = arith.constant 0 : i32
    %c0_i32_1 = arith.constant 0 : i32
    return %arg0, %arg1, %c0_i32, %c0_i32_0 : i32, i32, i32, i32
  }
  func.func @transform_4(%arg0: i32, %arg1: i32) -> (i32, i32, i32, i32) {
    %c0_i32 = arith.constant 0 : i32
    %c0_i32_0 = arith.constant 0 : i32
    %c0_i32_1 = arith.constant 0 : i32
    return %arg0, %arg1, %c0_i32, %c0_i32_0 : i32, i32, i32, i32
  }
}

module attributes {stable_mosaic.version = 11 : i64} {
  func.func @_bn_relu_kernel(%arg0: i32, %arg1: i32, %arg2: memref<1x8x16x128xf32, #tpu.memory_space<vmem>>, %arg3: memref<2x128xf32, #tpu.memory_space<vmem>>, %arg4: memref<1x8x16x128xf32, #tpu.memory_space<vmem>>) attributes {dimension_semantics = [#tpu.dimension_semantics<parallel>, #tpu.dimension_semantics<parallel>], iteration_bounds = array<i64: 2, 2>, scalar_prefetch = 0 : i64, scratch_operands = 0 : i64, tpu.core_type = #tpu.core_type<tc>, window_params = [{transform_indices = @transform_0, window_bounds = array<i64: 1, 8, 16, 128>}, {pipeline_mode = #tpu.pipeline_mode<synchronous>, transform_indices = @transform_1, window_bounds = array<i64: 2, 128>}, {transform_indices = @transform_2, window_bounds = array<i64: 1, 8, 16, 128>}]} {
    %c0 = arith.constant 0 : index
    %c0_0 = arith.constant 0 : index
    %0 = vector.load %arg3[%c0, %c0_0] : memref<2x128xf32, #tpu.memory_space<vmem>>, vector<1x128xf32>
    %1 = vector.shape_cast %0 : vector<1x128xf32> to vector<1x1x1x128xf32>
    %c1 = arith.constant 1 : index
    %c0_1 = arith.constant 0 : index
    %2 = vector.load %arg3[%c1, %c0_1] : memref<2x128xf32, #tpu.memory_space<vmem>>, vector<1x128xf32>
    %3 = vector.shape_cast %2 : vector<1x128xf32> to vector<1x1x1x128xf32>
    %c0_2 = arith.constant 0 : index
    %c0_3 = arith.constant 0 : index
    %c0_4 = arith.constant 0 : index
    %c0_5 = arith.constant 0 : index
    %4 = vector.load %arg2[%c0_2, %c0_3, %c0_4, %c0_5] : memref<1x8x16x128xf32, #tpu.memory_space<vmem>>, vector<1x8x16x128xf32>
    %5 = vector.broadcast %1 : vector<1x1x1x128xf32> to vector<1x8x16x128xf32>
    %6 = arith.mulf %4, %5 : vector<1x8x16x128xf32>
    %7 = vector.broadcast %3 : vector<1x1x1x128xf32> to vector<1x8x16x128xf32>
    %8 = arith.addf %6, %7 : vector<1x8x16x128xf32>
    %cst = arith.constant 0.000000e+00 : f32
    %9 = vector.broadcast %cst : f32 to vector<1x8x16x128xf32>
    %10 = arith.maximumf %8, %9 : vector<1x8x16x128xf32>
    %c0_6 = arith.constant 0 : index
    %c0_7 = arith.constant 0 : index
    %c0_8 = arith.constant 0 : index
    %c0_9 = arith.constant 0 : index
    %11 = vector.load %arg4[%c0_6, %c0_7, %c0_8, %c0_9] : memref<1x8x16x128xf32, #tpu.memory_space<vmem>>, vector<1x8x16x128xf32>
    tpu.vector_store %arg4[%c0_6, %c0_7, %c0_8, %c0_9], %10 {strides = array<i32>} : memref<1x8x16x128xf32, #tpu.memory_space<vmem>>, vector<1x8x16x128xf32>,
    return
  }
  func.func @transform_0(%arg0: i32, %arg1: i32) -> (i32, i32, i32, i32) {
    %c0_i32 = arith.constant 0 : i32
    %c0_i32_0 = arith.constant 0 : i32
    %c0_i32_1 = arith.constant 0 : i32
    return %arg0, %arg1, %c0_i32, %c0_i32_0 : i32, i32, i32, i32
  }
  func.func @transform_1(%arg0: i32, %arg1: i32) -> (i32, i32) {
    %c0_i32 = arith.constant 0 : i32
    %c0_i32_0 = arith.constant 0 : i32
    %c0_i32_1 = arith.constant 0 : i32
    return %c0_i32, %c0_i32_0 : i32, i32
  }
  func.func @transform_2(%arg0: i32, %arg1: i32) -> (i32, i32, i32, i32) {
    %c0_i32 = arith.constant 0 : i32
    %c0_i32_0 = arith.constant 0 : i32
    %c0_i32_1 = arith.constant 0 : i32
    return %arg0, %arg1, %c0_i32, %c0_i32_0 : i32, i32, i32, i32
  }
}

module attributes {stable_mosaic.version = 11 : i64} {
  func.func @_conv_stats_kernel(%arg0: i32, %arg1: i32, %arg2: memref<2x16x16x128xf32, #tpu.memory_space<any>>, %arg3: memref<1152x128xbf16, #tpu.memory_space<vmem>>, %arg4: memref<2x128xf32, #tpu.memory_space<vmem>>, %arg5: memref<1x8x16x128xf32, #tpu.memory_space<vmem>>, %arg6: memref<1x1x2x128xf32, #tpu.memory_space<vmem>>, %arg7: memref<2x10x18x128xf32, #tpu.memory_space<vmem>>, %arg8: memref<10x18x128xbf16, #tpu.memory_space<vmem>>, %arg9: memref<2x3x!tpu.dma_semaphore, #tpu.memory_space<semaphore_mem>>) attributes {dimension_semantics = [#tpu.dimension_semantics<parallel>, #tpu.dimension_semantics<arbitrary>], iteration_bounds = array<i64: 2, 2>, scalar_prefetch = 0 : i64, scratch_operands = 3 : i64, tpu.core_type = #tpu.core_type<tc>, window_params = [{}, {pipeline_mode = #tpu.pipeline_mode<synchronous>, transform_indices = @transform_1, window_bounds = array<i64: 1152, 128>}, {pipeline_mode = #tpu.pipeline_mode<synchronous>, transform_indices = @transform_2, window_bounds = array<i64: 2, 128>}, {transform_indices = @transform_3, window_bounds = array<i64: 1, 8, 16, 128>}, {transform_indices = @transform_4, window_bounds = array<i64: 1, 1, 2, 128>}]} {
    %c2_i32 = arith.constant 2 : i32
    %c0_i32 = arith.constant 0 : i32
    %0 = arith.cmpi eq, %c2_i32, %c0_i32 : i32
    %c1_i32 = arith.constant 1 : i32
    %1 = arith.select %0, %c1_i32, %c2_i32 : i32
    %2 = arith.remsi %arg1, %1 : i32
    %c0_i32_0 = arith.constant 0 : i32
    %3 = arith.cmpi ne, %2, %c0_i32_0 : i32
    %c0_i32_1 = arith.constant 0 : i32
    %4 = arith.cmpi slt, %2, %c0_i32_1 : i32
    %c0_i32_2 = arith.constant 0 : i32
    %5 = arith.cmpi slt, %1, %c0_i32_2 : i32
    %6 = arith.xori %4, %5 : i1
    %7 = arith.andi %6, %3 : i1
    %8 = arith.addi %2, %1 : i32
    %9 = arith.select %7, %8, %2 : i32
    %c0_i32_3 = arith.constant 0 : i32
    %10 = arith.cmpi eq, %arg1, %c0_i32_3 : i32
    %11 = arith.extui %10 : i1 to i32
    %c0_i32_4 = arith.constant 0 : i32
    %12 = arith.cmpi ne, %11, %c0_i32_4 : i32
    scf.if %12 {
      %c8_i32_76 = arith.constant 8 : i32
      %86 = arith.muli %arg1, %c8_i32_76 : i32
      %c0_i32_77 = arith.constant 0 : i32
      %c0_i32_78 = arith.constant 0 : i32
      %c0_i32_79 = arith.constant 0 : i32
      %87 = tpu.memref_slice %arg2[%arg0, %86, %c0_i32_78, %c0_i32_79] : memref<2x16x16x128xf32, #tpu.memory_space<any>> -> memref<1x8x16x128xf32, #tpu.memory_space<any>>
      %88 = tpu.memref_squeeze %87 : memref<1x8x16x128xf32, #tpu.memory_space<any>> -> memref<8x16x128xf32, #tpu.memory_space<any>>
      %c1_i32_80 = arith.constant 1 : i32
      %c1_i32_81 = arith.constant 1 : i32
      %c0_i32_82 = arith.constant 0 : i32
      %89 = tpu.memref_slice %arg7[%9, %c1_i32_80, %c1_i32_81, %c0_i32_82] : memref<2x10x18x128xf32, #tpu.memory_space<vmem>> -> memref<1x8x16x128xf32, #tpu.memory_space<vmem>>
      %90 = tpu.memref_squeeze %89 : memref<1x8x16x128xf32, #tpu.memory_space<vmem>> -> memref<8x16x128xf32, #tpu.memory_space<vmem>>
      %91 = tpu.memref_slice %arg9[%9, %c0_i32_77] : memref<2x3x!tpu.dma_semaphore, #tpu.memory_space<semaphore_mem>> -> memref<1x1x!tpu.dma_semaphore, #tpu.memory_space<semaphore_mem>>
      %92 = tpu.memref_squeeze %91 : memref<1x1x!tpu.dma_semaphore, #tpu.memory_space<semaphore_mem>> -> memref<!tpu.dma_semaphore, #tpu.memory_space<semaphore_mem>>
      tpu.enqueue_dma source(%88 : memref<8x16x128xf32, #tpu.memory_space<any>>) target(%90 : memref<8x16x128xf32, #tpu.memory_space<vmem>>) target_semaphore(%92 : memref<!tpu.dma_semaphore, #tpu.memory_space<semaphore_mem>>)
      %c0_i32_83 = arith.constant 0 : i32
      %93 = arith.cmpi sgt, %arg1, %c0_i32_83 : i32
      %94 = arith.extui %93 : i1 to i32
      %c0_i32_84 = arith.constant 0 : i32
      %95 = arith.cmpi ne, %94, %c0_i32_84 : i32
      scf.if %95 {
        %c1_i32_87 = arith.constant 1 : i32
        %99 = arith.subi %86, %c1_i32_87 : i32
        %c0_i32_88 = arith.constant 0 : i32
        %100 = arith.maxsi %99, %c0_i32_88 : i32
        %c1_i32_89 = arith.constant 1 : i32
        %c0_i32_90 = arith.constant 0 : i32
        %c0_i32_91 = arith.constant 0 : i32
        %101 = tpu.memref_slice %arg2[%arg0, %100, %c0_i32_90, %c0_i32_91] : memref<2x16x16x128xf32, #tpu.memory_space<any>> -> memref<1x1x16x128xf32, #tpu.memory_space<any>>
        %102 = tpu.memref_squeeze %101 : memref<1x1x16x128xf32, #tpu.memory_space<any>> -> memref<1x16x128xf32, #tpu.memory_space<any>>
        %c0_i32_92 = arith.constant 0 : i32
        %c1_i32_93 = arith.constant 1 : i32
        %c0_i32_94 = arith.constant 0 : i32
        %103 = tpu.memref_slice %arg7[%9, %c0_i32_92, %c1_i32_93, %c0_i32_94] : memref<2x10x18x128xf32, #tpu.memory_space<vmem>> -> memref<1x1x16x128xf32, #tpu.memory_space<vmem>>
        %104 = tpu.memref_squeeze %103 : memref<1x1x16x128xf32, #tpu.memory_space<vmem>> -> memref<1x16x128xf32, #tpu.memory_space<vmem>>
        %105 = tpu.memref_slice %arg9[%9, %c1_i32_89] : memref<2x3x!tpu.dma_semaphore, #tpu.memory_space<semaphore_mem>> -> memref<1x1x!tpu.dma_semaphore, #tpu.memory_space<semaphore_mem>>
        %106 = tpu.memref_squeeze %105 : memref<1x1x!tpu.dma_semaphore, #tpu.memory_space<semaphore_mem>> -> memref<!tpu.dma_semaphore, #tpu.memory_space<semaphore_mem>>
        tpu.enqueue_dma source(%102 : memref<1x16x128xf32, #tpu.memory_space<any>>) target(%104 : memref<1x16x128xf32, #tpu.memory_space<vmem>>) target_semaphore(%106 : memref<!tpu.dma_semaphore, #tpu.memory_space<semaphore_mem>>)
      } else {
      }
      %c1_i32_85 = arith.constant 1 : i32
      %96 = arith.cmpi slt, %arg1, %c1_i32_85 : i32
      %97 = arith.extui %96 : i1 to i32
      %c0_i32_86 = arith.constant 0 : i32
      %98 = arith.cmpi ne, %97, %c0_i32_86 : i32
      scf.if %98 {
        %c8_i32_87 = arith.constant 8 : i32
        %99 = arith.addi %86, %c8_i32_87 : i32
        %c15_i32 = arith.constant 15 : i32
        %100 = arith.minsi %99, %c15_i32 : i32
        %c2_i32_88 = arith.constant 2 : i32
        %c0_i32_89 = arith.constant 0 : i32
        %c0_i32_90 = arith.constant 0 : i32
        %101 = tpu.memref_slice %arg2[%arg0, %100, %c0_i32_89, %c0_i32_90] : memref<2x16x16x128xf32, #tpu.memory_space<any>> -> memref<1x1x16x128xf32, #tpu.memory_space<any>>
        %102 = tpu.memref_squeeze %101 : memref<1x1x16x128xf32, #tpu.memory_space<any>> -> memref<1x16x128xf32, #tpu.memory_space<any>>
        %c9_i32 = arith.constant 9 : i32
        %c1_i32_91 = arith.constant 1 : i32
        %c0_i32_92 = arith.constant 0 : i32
        %103 = tpu.memref_slice %arg7[%9, %c9_i32, %c1_i32_91, %c0_i32_92] : memref<2x10x18x128xf32, #tpu.memory_space<vmem>> -> memref<1x1x16x128xf32, #tpu.memory_space<vmem>>
        %104 = tpu.memref_squeeze %103 : memref<1x1x16x128xf32, #tpu.memory_space<vmem>> -> memref<1x16x128xf32, #tpu.memory_space<vmem>>
        %105 = tpu.memref_slice %arg9[%9, %c2_i32_88] : memref<2x3x!tpu.dma_semaphore, #tpu.memory_space<semaphore_mem>> -> memref<1x1x!tpu.dma_semaphore, #tpu.memory_space<semaphore_mem>>
        %106 = tpu.memref_squeeze %105 : memref<1x1x!tpu.dma_semaphore, #tpu.memory_space<semaphore_mem>> -> memref<!tpu.dma_semaphore, #tpu.memory_space<semaphore_mem>>
        tpu.enqueue_dma source(%102 : memref<1x16x128xf32, #tpu.memory_space<any>>) target(%104 : memref<1x16x128xf32, #tpu.memory_space<vmem>>) target_semaphore(%106 : memref<!tpu.dma_semaphore, #tpu.memory_space<semaphore_mem>>)
      } else {
      }
    } else {
    }
    %c8_i32 = arith.constant 8 : i32
    %13 = arith.muli %arg1, %c8_i32 : i32
    %c0_i32_5 = arith.constant 0 : i32
    %c0_i32_6 = arith.constant 0 : i32
    %c0_i32_7 = arith.constant 0 : i32
    %14 = tpu.memref_slice %arg2[%arg0, %13, %c0_i32_6, %c0_i32_7] : memref<2x16x16x128xf32, #tpu.memory_space<any>> -> memref<1x8x16x128xf32, #tpu.memory_space<any>>
    %15 = tpu.memref_squeeze %14 : memref<1x8x16x128xf32, #tpu.memory_space<any>> -> memref<8x16x128xf32, #tpu.memory_space<any>>
    %c1_i32_8 = arith.constant 1 : i32
    %c1_i32_9 = arith.constant 1 : i32
    %c0_i32_10 = arith.constant 0 : i32
    %16 = tpu.memref_slice %arg7[%9, %c1_i32_8, %c1_i32_9, %c0_i32_10] : memref<2x10x18x128xf32, #tpu.memory_space<vmem>> -> memref<1x8x16x128xf32, #tpu.memory_space<vmem>>
    %17 = tpu.memref_squeeze %16 : memref<1x8x16x128xf32, #tpu.memory_space<vmem>> -> memref<8x16x128xf32, #tpu.memory_space<vmem>>
    %18 = tpu.memref_slice %arg9[%9, %c0_i32_5] : memref<2x3x!tpu.dma_semaphore, #tpu.memory_space<semaphore_mem>> -> memref<1x1x!tpu.dma_semaphore, #tpu.memory_space<semaphore_mem>>
    %19 = tpu.memref_squeeze %18 : memref<1x1x!tpu.dma_semaphore, #tpu.memory_space<semaphore_mem>> -> memref<!tpu.dma_semaphore, #tpu.memory_space<semaphore_mem>>
    tpu.wait_dma2 semaphore(%19 : memref<!tpu.dma_semaphore, #tpu.memory_space<semaphore_mem>>) src(%15 : memref<8x16x128xf32, #tpu.memory_space<any>>) dst(%17 : memref<8x16x128xf32, #tpu.memory_space<vmem>>)
    %c0_i32_11 = arith.constant 0 : i32
    %20 = arith.cmpi sgt, %arg1, %c0_i32_11 : i32
    %21 = arith.extui %20 : i1 to i32
    %c0_i32_12 = arith.constant 0 : i32
    %22 = arith.cmpi ne, %21, %c0_i32_12 : i32
    scf.if %22 {
      %c1_i32_76 = arith.constant 1 : i32
      %86 = arith.subi %13, %c1_i32_76 : i32
      %c0_i32_77 = arith.constant 0 : i32
      %87 = arith.maxsi %86, %c0_i32_77 : i32
      %c1_i32_78 = arith.constant 1 : i32
      %c0_i32_79 = arith.constant 0 : i32
      %c0_i32_80 = arith.constant 0 : i32
      %88 = tpu.memref_slice %arg2[%arg0, %87, %c0_i32_79, %c0_i32_80] : memref<2x16x16x128xf32, #tpu.memory_space<any>> -> memref<1x1x16x128xf32, #tpu.memory_space<any>>
      %89 = tpu.memref_squeeze %88 : memref<1x1x16x128xf32, #tpu.memory_space<any>> -> memref<1x16x128xf32, #tpu.memory_space<any>>
      %c0_i32_81 = arith.constant 0 : i32
      %c1_i32_82 = arith.constant 1 : i32
      %c0_i32_83 = arith.constant 0 : i32
      %90 = tpu.memref_slice %arg7[%9, %c0_i32_81, %c1_i32_82, %c0_i32_83] : memref<2x10x18x128xf32, #tpu.memory_space<vmem>> -> memref<1x1x16x128xf32, #tpu.memory_space<vmem>>
      %91 = tpu.memref_squeeze %90 : memref<1x1x16x128xf32, #tpu.memory_space<vmem>> -> memref<1x16x128xf32, #tpu.memory_space<vmem>>
      %92 = tpu.memref_slice %arg9[%9, %c1_i32_78] : memref<2x3x!tpu.dma_semaphore, #tpu.memory_space<semaphore_mem>> -> memref<1x1x!tpu.dma_semaphore, #tpu.memory_space<semaphore_mem>>
      %93 = tpu.memref_squeeze %92 : memref<1x1x!tpu.dma_semaphore, #tpu.memory_space<semaphore_mem>> -> memref<!tpu.dma_semaphore, #tpu.memory_space<semaphore_mem>>
      tpu.wait_dma2 semaphore(%93 : memref<!tpu.dma_semaphore, #tpu.memory_space<semaphore_mem>>) src(%89 : memref<1x16x128xf32, #tpu.memory_space<any>>) dst(%91 : memref<1x16x128xf32, #tpu.memory_space<vmem>>)
    } else {
    }
    %c1_i32_13 = arith.constant 1 : i32
    %23 = arith.cmpi slt, %arg1, %c1_i32_13 : i32
    %24 = arith.extui %23 : i1 to i32
    %c0_i32_14 = arith.constant 0 : i32
    %25 = arith.cmpi ne, %24, %c0_i32_14 : i32
    scf.if %25 {
      %c8_i32_76 = arith.constant 8 : i32
      %86 = arith.addi %13, %c8_i32_76 : i32
      %c15_i32 = arith.constant 15 : i32
      %87 = arith.minsi %86, %c15_i32 : i32
      %c2_i32_77 = arith.constant 2 : i32
      %c0_i32_78 = arith.constant 0 : i32
      %c0_i32_79 = arith.constant 0 : i32
      %88 = tpu.memref_slice %arg2[%arg0, %87, %c0_i32_78, %c0_i32_79] : memref<2x16x16x128xf32, #tpu.memory_space<any>> -> memref<1x1x16x128xf32, #tpu.memory_space<any>>
      %89 = tpu.memref_squeeze %88 : memref<1x1x16x128xf32, #tpu.memory_space<any>> -> memref<1x16x128xf32, #tpu.memory_space<any>>
      %c9_i32 = arith.constant 9 : i32
      %c1_i32_80 = arith.constant 1 : i32
      %c0_i32_81 = arith.constant 0 : i32
      %90 = tpu.memref_slice %arg7[%9, %c9_i32, %c1_i32_80, %c0_i32_81] : memref<2x10x18x128xf32, #tpu.memory_space<vmem>> -> memref<1x1x16x128xf32, #tpu.memory_space<vmem>>
      %91 = tpu.memref_squeeze %90 : memref<1x1x16x128xf32, #tpu.memory_space<vmem>> -> memref<1x16x128xf32, #tpu.memory_space<vmem>>
      %92 = tpu.memref_slice %arg9[%9, %c2_i32_77] : memref<2x3x!tpu.dma_semaphore, #tpu.memory_space<semaphore_mem>> -> memref<1x1x!tpu.dma_semaphore, #tpu.memory_space<semaphore_mem>>
      %93 = tpu.memref_squeeze %92 : memref<1x1x!tpu.dma_semaphore, #tpu.memory_space<semaphore_mem>> -> memref<!tpu.dma_semaphore, #tpu.memory_space<semaphore_mem>>
      tpu.wait_dma2 semaphore(%93 : memref<!tpu.dma_semaphore, #tpu.memory_space<semaphore_mem>>) src(%89 : memref<1x16x128xf32, #tpu.memory_space<any>>) dst(%91 : memref<1x16x128xf32, #tpu.memory_space<vmem>>)
    } else {
    }
    %c1_i32_15 = arith.constant 1 : i32
    %26 = arith.addi %arg1, %c1_i32_15 : i32
    %c2_i32_16 = arith.constant 2 : i32
    %27 = arith.cmpi slt, %26, %c2_i32_16 : i32
    %28 = arith.extui %27 : i1 to i32
    %c0_i32_17 = arith.constant 0 : i32
    %29 = arith.cmpi ne, %28, %c0_i32_17 : i32
    scf.if %29 {
      %c1_i32_76 = arith.constant 1 : i32
      %86 = arith.addi %arg1, %c1_i32_76 : i32
      %c1_i32_77 = arith.constant 1 : i32
      %87 = arith.subi %c1_i32_77, %9 : i32
      %c8_i32_78 = arith.constant 8 : i32
      %88 = arith.muli %86, %c8_i32_78 : i32
      %c0_i32_79 = arith.constant 0 : i32
      %c0_i32_80 = arith.constant 0 : i32
      %c0_i32_81 = arith.constant 0 : i32
      %89 = tpu.memref_slice %arg2[%arg0, %88, %c0_i32_80, %c0_i32_81] : memref<2x16x16x128xf32, #tpu.memory_space<any>> -> memref<1x8x16x128xf32, #tpu.memory_space<any>>
      %90 = tpu.memref_squeeze %89 : memref<1x8x16x128xf32, #tpu.memory_space<any>> -> memref<8x16x128xf32, #tpu.memory_space<any>>
      %c1_i32_82 = arith.constant 1 : i32
      %c1_i32_83 = arith.constant 1 : i32
      %c0_i32_84 = arith.constant 0 : i32
      %91 = tpu.memref_slice %arg7[%87, %c1_i32_82, %c1_i32_83, %c0_i32_84] : memref<2x10x18x128xf32, #tpu.memory_space<vmem>> -> memref<1x8x16x128xf32, #tpu.memory_space<vmem>>
      %92 = tpu.memref_squeeze %91 : memref<1x8x16x128xf32, #tpu.memory_space<vmem>> -> memref<8x16x128xf32, #tpu.memory_space<vmem>>
      %93 = tpu.memref_slice %arg9[%87, %c0_i32_79] : memref<2x3x!tpu.dma_semaphore, #tpu.memory_space<semaphore_mem>> -> memref<1x1x!tpu.dma_semaphore, #tpu.memory_space<semaphore_mem>>
      %94 = tpu.memref_squeeze %93 : memref<1x1x!tpu.dma_semaphore, #tpu.memory_space<semaphore_mem>> -> memref<!tpu.dma_semaphore, #tpu.memory_space<semaphore_mem>>
      tpu.enqueue_dma source(%90 : memref<8x16x128xf32, #tpu.memory_space<any>>) target(%92 : memref<8x16x128xf32, #tpu.memory_space<vmem>>) target_semaphore(%94 : memref<!tpu.dma_semaphore, #tpu.memory_space<semaphore_mem>>)
      %c0_i32_85 = arith.constant 0 : i32
      %95 = arith.cmpi sgt, %86, %c0_i32_85 : i32
      %96 = arith.extui %95 : i1 to i32
      %c0_i32_86 = arith.constant 0 : i32
      %97 = arith.cmpi ne, %96, %c0_i32_86 : i32
      scf.if %97 {
        %c1_i32_89 = arith.constant 1 : i32
        %101 = arith.subi %88, %c1_i32_89 : i32
        %c0_i32_90 = arith.constant 0 : i32
        %102 = arith.maxsi %101, %c0_i32_90 : i32
        %c1_i32_91 = arith.constant 1 : i32
        %c0_i32_92 = arith.constant 0 : i32
        %c0_i32_93 = arith.constant 0 : i32
        %103 = tpu.memref_slice %arg2[%arg0, %102, %c0_i32_92, %c0_i32_93] : memref<2x16x16x128xf32, #tpu.memory_space<any>> -> memref<1x1x16x128xf32, #tpu.memory_space<any>>
        %104 = tpu.memref_squeeze %103 : memref<1x1x16x128xf32, #tpu.memory_space<any>> -> memref<1x16x128xf32, #tpu.memory_space<any>>
        %c0_i32_94 = arith.constant 0 : i32
        %c1_i32_95 = arith.constant 1 : i32
        %c0_i32_96 = arith.constant 0 : i32
        %105 = tpu.memref_slice %arg7[%87, %c0_i32_94, %c1_i32_95, %c0_i32_96] : memref<2x10x18x128xf32, #tpu.memory_space<vmem>> -> memref<1x1x16x128xf32, #tpu.memory_space<vmem>>
        %106 = tpu.memref_squeeze %105 : memref<1x1x16x128xf32, #tpu.memory_space<vmem>> -> memref<1x16x128xf32, #tpu.memory_space<vmem>>
        %107 = tpu.memref_slice %arg9[%87, %c1_i32_91] : memref<2x3x!tpu.dma_semaphore, #tpu.memory_space<semaphore_mem>> -> memref<1x1x!tpu.dma_semaphore, #tpu.memory_space<semaphore_mem>>
        %108 = tpu.memref_squeeze %107 : memref<1x1x!tpu.dma_semaphore, #tpu.memory_space<semaphore_mem>> -> memref<!tpu.dma_semaphore, #tpu.memory_space<semaphore_mem>>
        tpu.enqueue_dma source(%104 : memref<1x16x128xf32, #tpu.memory_space<any>>) target(%106 : memref<1x16x128xf32, #tpu.memory_space<vmem>>) target_semaphore(%108 : memref<!tpu.dma_semaphore, #tpu.memory_space<semaphore_mem>>)
      } else {
      }
      %c1_i32_87 = arith.constant 1 : i32
      %98 = arith.cmpi slt, %86, %c1_i32_87 : i32
      %99 = arith.extui %98 : i1 to i32
      %c0_i32_88 = arith.constant 0 : i32
      %100 = arith.cmpi ne, %99, %c0_i32_88 : i32
      scf.if %100 {
        %c8_i32_89 = arith.constant 8 : i32
        %101 = arith.addi %88, %c8_i32_89 : i32
        %c15_i32 = arith.constant 15 : i32
        %102 = arith.minsi %101, %c15_i32 : i32
        %c2_i32_90 = arith.constant 2 : i32
        %c0_i32_91 = arith.constant 0 : i32
        %c0_i32_92 = arith.constant 0 : i32
        %103 = tpu.memref_slice %arg2[%arg0, %102, %c0_i32_91, %c0_i32_92] : memref<2x16x16x128xf32, #tpu.memory_space<any>> -> memref<1x1x16x128xf32, #tpu.memory_space<any>>
        %104 = tpu.memref_squeeze %103 : memref<1x1x16x128xf32, #tpu.memory_space<any>> -> memref<1x16x128xf32, #tpu.memory_space<any>>
        %c9_i32 = arith.constant 9 : i32
        %c1_i32_93 = arith.constant 1 : i32
        %c0_i32_94 = arith.constant 0 : i32
        %105 = tpu.memref_slice %arg7[%87, %c9_i32, %c1_i32_93, %c0_i32_94] : memref<2x10x18x128xf32, #tpu.memory_space<vmem>> -> memref<1x1x16x128xf32, #tpu.memory_space<vmem>>
        %106 = tpu.memref_squeeze %105 : memref<1x1x16x128xf32, #tpu.memory_space<vmem>> -> memref<1x16x128xf32, #tpu.memory_space<vmem>>
        %107 = tpu.memref_slice %arg9[%87, %c2_i32_90] : memref<2x3x!tpu.dma_semaphore, #tpu.memory_space<semaphore_mem>> -> memref<1x1x!tpu.dma_semaphore, #tpu.memory_space<semaphore_mem>>
        %108 = tpu.memref_squeeze %107 : memref<1x1x!tpu.dma_semaphore, #tpu.memory_space<semaphore_mem>> -> memref<!tpu.dma_semaphore, #tpu.memory_space<semaphore_mem>>
        tpu.enqueue_dma source(%104 : memref<1x16x128xf32, #tpu.memory_space<any>>) target(%106 : memref<1x16x128xf32, #tpu.memory_space<vmem>>) target_semaphore(%108 : memref<!tpu.dma_semaphore, #tpu.memory_space<semaphore_mem>>)
      } else {
      }
    } else {
    }
    %30 = arith.index_cast %9 : i32 to index
    %c0 = arith.constant 0 : index
    %c0_18 = arith.constant 0 : index
    %c0_19 = arith.constant 0 : index
    %31 = vector.load %arg7[%30, %c0, %c0_18, %c0_19] : memref<2x10x18x128xf32, #tpu.memory_space<vmem>>, vector<1x10x18x128xf32>
    %32 = vector.shape_cast %31 : vector<1x10x18x128xf32> to vector<10x18x128xf32>
    %c0_20 = arith.constant 0 : index
    %c0_21 = arith.constant 0 : index
    %33 = vector.load %arg4[%c0_20, %c0_21] : memref<2x128xf32, #tpu.memory_space<vmem>>, vector<1x128xf32>
    %34 = vector.shape_cast %33 : vector<1x128xf32> to vector<1x1x128xf32>
    %c1 = arith.constant 1 : index
    %c0_22 = arith.constant 0 : index
    %35 = vector.load %arg4[%c1, %c0_22] : memref<2x128xf32, #tpu.memory_space<vmem>>, vector<1x128xf32>
    %36 = vector.shape_cast %35 : vector<1x128xf32> to vector<1x1x128xf32>
    %37 = vector.broadcast %34 : vector<1x1x128xf32> to vector<10x18x128xf32>
    %38 = arith.mulf %32, %37 : vector<10x18x128xf32>
    %39 = vector.broadcast %36 : vector<1x1x128xf32> to vector<10x18x128xf32>
    %40 = arith.addf %38, %39 : vector<10x18x128xf32>
    %cst = arith.constant 0.000000e+00 : f32
    %41 = vector.broadcast %cst : f32 to vector<10x18x128xf32>
    %42 = arith.maximumf %40, %41 : vector<10x18x128xf32>
    %43 = arith.truncf %42 : vector<10x18x128xf32> to vector<10x18x128xbf16>
    %c0_23 = arith.constant 0 : index
    %c0_24 = arith.constant 0 : index
    %c0_25 = arith.constant 0 : index
    %44 = vector.load %arg8[%c0_23, %c0_24, %c0_25] : memref<10x18x128xbf16, #tpu.memory_space<vmem>>, vector<10x18x128xbf16>
    tpu.vector_store %arg8[%c0_23, %c0_24, %c0_25], %43 {strides = array<i32>} : memref<10x18x128xbf16, #tpu.memory_space<vmem>>, vector<10x18x128xbf16>,
    %cst_26 = arith.constant 0.000000e+00 : bf16
    %45 = vector.broadcast %cst_26 : bf16 to vector<10x1x128xbf16>
    %c0_27 = arith.constant 0 : index
    %c0_28 = arith.constant 0 : index
    %c0_29 = arith.constant 0 : index
    %46 = vector.load %arg8[%c0_27, %c0_28, %c0_29] : memref<10x18x128xbf16, #tpu.memory_space<vmem>>, vector<10x1x128xbf16>
    tpu.vector_store %arg8[%c0_27, %c0_28, %c0_29], %45 {strides = array<i32>} : memref<10x18x128xbf16, #tpu.memory_space<vmem>>, vector<10x1x128xbf16>,
    %c0_30 = arith.constant 0 : index
    %c17 = arith.constant 17 : index
    %c0_31 = arith.constant 0 : index
    %47 = vector.load %arg8[%c0_30, %c17, %c0_31] : memref<10x18x128xbf16, #tpu.memory_space<vmem>>, vector<10x1x128xbf16>
    tpu.vector_store %arg8[%c0_30, %c17, %c0_31], %45 {strides = array<i32>} : memref<10x18x128xbf16, #tpu.memory_space<vmem>>, vector<10x1x128xbf16>,
    %cst_32 = arith.constant 0.000000e+00 : bf16
    %48 = vector.broadcast %cst_32 : bf16 to vector<1x18x128xbf16>
    %c0_i32_33 = arith.constant 0 : i32
    %49 = arith.cmpi eq, %arg1, %c0_i32_33 : i32
    %50 = arith.extui %49 : i1 to i32
    %c0_i32_34 = arith.constant 0 : i32
    %51 = arith.cmpi ne, %50, %c0_i32_34 : i32
    scf.if %51 {
      %c0_76 = arith.constant 0 : index
      %c0_77 = arith.constant 0 : index
      %c0_78 = arith.constant 0 : index
      %86 = vector.load %arg8[%c0_76, %c0_77, %c0_78] : memref<10x18x128xbf16, #tpu.memory_space<vmem>>, vector<1x18x128xbf16>
      tpu.vector_store %arg8[%c0_76, %c0_77, %c0_78], %48 {strides = array<i32>} : memref<10x18x128xbf16, #tpu.memory_space<vmem>>, vector<1x18x128xbf16>,
    } else {
    }
    %c1_i32_35 = arith.constant 1 : i32
    %52 = arith.cmpi eq, %arg1, %c1_i32_35 : i32
    %53 = arith.extui %52 : i1 to i32
    %c0_i32_36 = arith.constant 0 : i32
    %54 = arith.cmpi ne, %53, %c0_i32_36 : i32
    scf.if %54 {
      %c9 = arith.constant 9 : index
      %c0_76 = arith.constant 0 : index
      %c0_77 = arith.constant 0 : index
      %86 = vector.load %arg8[%c9, %c0_76, %c0_77] : memref<10x18x128xbf16, #tpu.memory_space<vmem>>, vector<1x18x128xbf16>
      tpu.vector_store %arg8[%c9, %c0_76, %c0_77], %48 {strides = array<i32>} : memref<10x18x128xbf16, #tpu.memory_space<vmem>>, vector<1x18x128xbf16>,
    } else {
    }
    %c0_37 = arith.constant 0 : index
    %c0_38 = arith.constant 0 : index
    %c0_39 = arith.constant 0 : index
    %55 = vector.load %arg8[%c0_37, %c0_38, %c0_39] : memref<10x18x128xbf16, #tpu.memory_space<vmem>>, vector<8x16x128xbf16>
    %56 = vector.shape_cast %55 : vector<8x16x128xbf16> to vector<128x128xbf16>
    %c0_40 = arith.constant 0 : index
    %c1_41 = arith.constant 1 : index
    %c0_42 = arith.constant 0 : index
    %57 = vector.load %arg8[%c0_40, %c1_41, %c0_42] : memref<10x18x128xbf16, #tpu.memory_space<vmem>>, vector<8x16x128xbf16>
    %58 = vector.shape_cast %57 : vector<8x16x128xbf16> to vector<128x128xbf16>
    %c0_43 = arith.constant 0 : index
    %c2 = arith.constant 2 : index
    %c0_44 = arith.constant 0 : index
    %59 = vector.load %arg8[%c0_43, %c2, %c0_44] : memref<10x18x128xbf16, #tpu.memory_space<vmem>>, vector<8x16x128xbf16>
    %60 = vector.shape_cast %59 : vector<8x16x128xbf16> to vector<128x128xbf16>
    %c1_45 = arith.constant 1 : index
    %c0_46 = arith.constant 0 : index
    %c0_47 = arith.constant 0 : index
    %61 = vector.load %arg8[%c1_45, %c0_46, %c0_47] : memref<10x18x128xbf16, #tpu.memory_space<vmem>>, vector<8x16x128xbf16>
    %62 = vector.shape_cast %61 : vector<8x16x128xbf16> to vector<128x128xbf16>
    %c1_48 = arith.constant 1 : index
    %c1_49 = arith.constant 1 : index
    %c0_50 = arith.constant 0 : index
    %63 = vector.load %arg8[%c1_48, %c1_49, %c0_50] : memref<10x18x128xbf16, #tpu.memory_space<vmem>>, vector<8x16x128xbf16>
    %64 = vector.shape_cast %63 : vector<8x16x128xbf16> to vector<128x128xbf16>
    %c1_51 = arith.constant 1 : index
    %c2_52 = arith.constant 2 : index
    %c0_53 = arith.constant 0 : index
    %65 = vector.load %arg8[%c1_51, %c2_52, %c0_53] : memref<10x18x128xbf16, #tpu.memory_space<vmem>>, vector<8x16x128xbf16>
    %66 = vector.shape_cast %65 : vector<8x16x128xbf16> to vector<128x128xbf16>
    %c2_54 = arith.constant 2 : index
    %c0_55 = arith.constant 0 : index
    %c0_56 = arith.constant 0 : index
    %67 = vector.load %arg8[%c2_54, %c0_55, %c0_56] : memref<10x18x128xbf16, #tpu.memory_space<vmem>>, vector<8x16x128xbf16>
    %68 = vector.shape_cast %67 : vector<8x16x128xbf16> to vector<128x128xbf16>
    %c2_57 = arith.constant 2 : index
    %c1_58 = arith.constant 1 : index
    %c0_59 = arith.constant 0 : index
    %69 = vector.load %arg8[%c2_57, %c1_58, %c0_59] : memref<10x18x128xbf16, #tpu.memory_space<vmem>>, vector<8x16x128xbf16>
    %70 = vector.shape_cast %69 : vector<8x16x128xbf16> to vector<128x128xbf16>
    %c2_60 = arith.constant 2 : index
    %c2_61 = arith.constant 2 : index
    %c0_62 = arith.constant 0 : index
    %71 = vector.load %arg8[%c2_60, %c2_61, %c0_62] : memref<10x18x128xbf16, #tpu.memory_space<vmem>>, vector<8x16x128xbf16>
    %72 = vector.shape_cast %71 : vector<8x16x128xbf16> to vector<128x128xbf16>
    %73 = tpu.concatenate %56, %58, %60, %62, %64, %66, %68, %70, %72 in 1 : vector<128x128xbf16>, vector<128x128xbf16>, vector<128x128xbf16>, vector<128x128xbf16>, vector<128x128xbf16>, vector<128x128xbf16>, vector<128x128xbf16>, vector<128x128xbf16>, vector<128x128xbf16> -> vector<128x1152xbf16>
    %c0_63 = arith.constant 0 : index
    %c0_64 = arith.constant 0 : index
    %74 = vector.load %arg3[%c0_63, %c0_64] : memref<1152x128xbf16, #tpu.memory_space<vmem>>, vector<1152x128xbf16>
    %cst_65 = arith.constant dense<0.000000e+00> : vector<128x128xf32>
    %75 = tpu.matmul %73, %74, %cst_65 {dimension_numbers = #tpu.dot_dimension_numbers<[1], [0], [0], [1], [0, 0, 1, 1], [], []>} : vector<128x1152xbf16>, vector<1152x128xbf16>, vector<128x128xf32> -> vector<128x128xf32>
    %76 = vector.shape_cast %75 : vector<128x128xf32> to vector<1x8x16x128xf32>
    %c0_66 = arith.constant 0 : index
    %c0_67 = arith.constant 0 : index
    %c0_68 = arith.constant 0 : index
    %c0_69 = arith.constant 0 : index
    %77 = vector.load %arg5[%c0_66, %c0_67, %c0_68, %c0_69] : memref<1x8x16x128xf32, #tpu.memory_space<vmem>>, vector<1x8x16x128xf32>
    tpu.vector_store %arg5[%c0_66, %c0_67, %c0_68, %c0_69], %76 {strides = array<i32>} : memref<1x8x16x128xf32, #tpu.memory_space<vmem>>, vector<1x8x16x128xf32>,
    %cst_70 = arith.constant dense<0.000000e+00> : vector<128xf32>
    %78 = vector.multi_reduction <add>, %75, %cst_70 [0] : vector<128x128xf32> to vector<128xf32>
    %79 = vector.shape_cast %78 : vector<128xf32> to vector<1x128xf32>
    %80 = arith.mulf %75, %75 : vector<128x128xf32>
    %cst_71 = arith.constant dense<0.000000e+00> : vector<128xf32>
    %81 = vector.multi_reduction <add>, %80, %cst_71 [0] : vector<128x128xf32> to vector<128xf32>
    %82 = vector.shape_cast %81 : vector<128xf32> to vector<1x128xf32>
    %83 = tpu.concatenate %79, %82 in 0 : vector<1x128xf32>, vector<1x128xf32> -> vector<2x128xf32>
    %84 = vector.shape_cast %83 : vector<2x128xf32> to vector<1x1x2x128xf32>
    %c0_72 = arith.constant 0 : index
    %c0_73 = arith.constant 0 : index
    %c0_74 = arith.constant 0 : index
    %c0_75 = arith.constant 0 : index
    %85 = vector.load %arg6[%c0_72, %c0_73, %c0_74, %c0_75] : memref<1x1x2x128xf32, #tpu.memory_space<vmem>>, vector<1x1x2x128xf32>
    tpu.vector_store %arg6[%c0_72, %c0_73, %c0_74, %c0_75], %84 {strides = array<i32>} : memref<1x1x2x128xf32, #tpu.memory_space<vmem>>, vector<1x1x2x128xf32>,
    return
  }
  func.func @transform_1(%arg0: i32, %arg1: i32) -> (i32, i32) {
    %c0_i32 = arith.constant 0 : i32
    %c0_i32_0 = arith.constant 0 : i32
    %c0_i32_1 = arith.constant 0 : i32
    return %c0_i32, %c0_i32_0 : i32, i32
  }
  func.func @transform_2(%arg0: i32, %arg1: i32) -> (i32, i32) {
    %c0_i32 = arith.constant 0 : i32
    %c0_i32_0 = arith.constant 0 : i32
    %c0_i32_1 = arith.constant 0 : i32
    return %c0_i32, %c0_i32_0 : i32, i32
  }
  func.func @transform_3(%arg0: i32, %arg1: i32) -> (i32, i32, i32, i32) {
    %c0_i32 = arith.constant 0 : i32
    %c0_i32_0 = arith.constant 0 : i32
    %c0_i32_1 = arith.constant 0 : i32
    return %arg0, %arg1, %c0_i32, %c0_i32_0 : i32, i32, i32, i32
  }
  func.func @transform_4(%arg0: i32, %arg1: i32) -> (i32, i32, i32, i32) {
    %c0_i32 = arith.constant 0 : i32
    %c0_i32_0 = arith.constant 0 : i32
    %c0_i32_1 = arith.constant 0 : i32
    return %arg0, %arg1, %c0_i32, %c0_i32_0 : i32, i32, i32, i32
  }
}

</mosaic_0001>

<bundles_post_ra>
// kernel: up_block_forward.5
= control target key start
LH: loop header
LB: loop body
LE: loop exit
PB: predicated region body
PF: predicated region fallthrough
CT: control target
= control target key end

     0   :  { %s489_s9 = smov 0   ;;  %s491_s10 = smov 0   ;;  %s618_s0 = inlined_call_operand.vmem [shape: f32[2,16,16,128], index: 0, kind: input, shape index: {}]   ;;  %s619_s1 = inlined_call_operand.vmem [shape: f32[2,128], index: 1, kind: input, shape index: {}]   ;;  %s620_s2 = inlined_call_operand.vmem [shape: f32[2,16,16,128], index: 2, kind: output, shape index: {}]  }
   0x1   :  { %s493_s11 = smov 0   ;;  %s495_s12 = smov 0  }
   0x2   :  { %s497_s13 = smov 0  }
   0x3 LB: > { %s21_s14 = sadd.s32 1, %s464_s11  ;;  %s24_s15 = sadd.s32 1, %s468_s12  ;;  %s472_s13 = sphi %s497_s13, %s12_s13   ;;  %s468_s12 = sphi %s495_s12, %s624_s12   ;;  %s464_s11 = sphi %s493_s11, %s623_s11   ;;  %s460_s10 = sphi %s491_s10, %s622_s10   ;;  %s456_s9 = sphi %s489_s9, %s621_s9  }
   0x4   : > { %p22_p0 = scmp.ge.s32.totalorder %s21_s14, 2  ;;  %p381_p1 = scmp.ge.s32.totalorder %s472_s13, 1 }
   0x5   : > { %p134_p2 = scmp.lt.s32.totalorder %s472_s13, 5 }
   0x6   : > { %s626_s14 = smov (%p22_p0, %s21_s14), 0  ;;  %s628_s15 = smov (!%p22_p0, %s24_s15), %s468_s12 }
   0x7   : > { %p135_p3 = pnand %p381_p1, %p134_p2  ;;  %p26_p4 = scmp.ge.s32.totalorder %s628_s15, 2 }
   0x8   : > { %s382_s16 = sshll.u32 (!%p135_p3), %s456_s9, 3  ;;  %p167_p5 = scmp.lt.s32.totalorder (!%p135_p3), %s460_s10, 1  ;;  %v522_v0 = vld [vmem:[%s619_s1] ss:$0 sm:$0xff] (!%p135_p3)  ;;  %v532_v1 = vld [vmem:[%s619_s1 + $0x1] ss:$0 sm:$0xff] (!%p135_p3) }
   0x9   : > { %s630_s15 = smov (%p26_p4, %s628_s15), 0  ;;  %138 = sbr.rel (%p135_p3) target bundleno = 39 (0x27), region = 28 }
   0xa   : > { %p169_p6 = scmp.lt.s32.totalorder (!%p135_p3), %s382_s16, 15 }
  0x10   : > { %s632_s10 = smov (!%p167_p5, %s460_s10), 1  ;;  %s634_s16 = smov (!%p169_p6, %s382_s16), 15 }
  0x11   : > { %s384_s17 = sshll.u32 %s632_s10, 5  ;;  %s383_s18 = sshll.u32 %s634_s16, 1 }
  0x12   : > { %s173_s19 = sadd.s32 %s384_s17, %s383_s18 }
  0x13   : > { %s385_s20 = sshll.u32 %s173_s19, 3 }
  0x14   : > { %s527_s25 = scalar_lea.vmem %s618_s0, %s385_s20  ;;  %s555_s30 = scalar_lea.vmem %s620_s2, %s385_s20 }
  0x15   : > { %v190_v2 = vld [vmem:[%s527_s25] sm:$0xff]  ;;  %v191_v3 = vld [vmem:[%s527_s25 + $0x8] sm:$0xff]  ;;  %v192_v4 = vld [vmem:[%s527_s25 + $0x10] sm:$0xff] }
  0x16   : > { %v210_v5 = vmul.f32 %v522_v0, %v190_v2  ;;  %v211_v6 = vmul.f32 %v522_v0, %v191_v3  ;;  %v212_v7 = vmul.f32 %v522_v0, %v192_v4  ;;  %v193_v8 = vld [vmem:[%s527_s25 + $0x18] sm:$0xff]  ;;  %v194_v9 = vld [vmem:[%s527_s25 + $0x20] sm:$0xff]  ;;  %v195_v10 = vld [vmem:[%s527_s25 + $0x28] sm:$0xff] }
  0x17   : > { %v213_v11 = vmul.f32 %v522_v0, %v193_v8  ;;  %v214_v12 = vmul.f32 %v522_v0, %v194_v9  ;;  %v215_v13 = vmul.f32 %v522_v0, %v195_v10  ;;  %v196_v14 = vld [vmem:[%s527_s25 + $0x30] sm:$0xff]  ;;  %v197_v15 = vld [vmem:[%s527_s25 + $0x38] sm:$0xff]  ;;  %v198_v24 = vld [vmem:[%s527_s25 + $0x40] sm:$0xff] }
  0x18   : > { %v230_v16 = vadd.f32 %v532_v1, %v210_v5  ;;  %v231_v17 = vadd.f32 %v532_v1, %v211_v6  ;;  %v232_v18 = vadd.f32 %v532_v1, %v212_v7  ;;  %v216_v19 = vmul.f32 %v522_v0, %v196_v14  ;;  %v199_v25 = vld [vmem:[%s527_s25 + $0x48] sm:$0xff]  ;;  %v200_v26 = vld [vmem:[%s527_s25 + $0x50] sm:$0xff]  ;;  %v201_v31 = vld [vmem:[%s527_s25 + $0x58] sm:$0xff] }
  0x19   : > { %v233_v20 = vadd.f32 %v532_v1, %v213_v11  ;;  %v234_v21 = vadd.f32 %v532_v1, %v214_v12  ;;  %v235_v22 = vadd.f32 %v532_v1, %v215_v13  ;;  %v217_v23 = vmul.f32 %v522_v0, %v197_v15  ;;  %v202_v32 = vld [vmem:[%s527_s25 + $0x60] sm:$0xff]  ;;  %v203_v33 = vld [vmem:[%s527_s25 + $0x68] sm:$0xff]  ;;  %v204_v38 = vld [vmem:[%s527_s25 + $0x70] sm:$0xff] }
  0x1a   : > { %v246_v27 = vmax.f32 %v230_v16, 0.0  ;;  %v247_v28 = vmax.f32 %v231_v17, 0.0  ;;  %v248_v29 = vmax.f32 %v232_v18, 0.0  ;;  %v236_v30 = vadd.f32 %v532_v1, %v216_v19  ;;  %v205_v43 = vld [vmem:[%s527_s25 + $0x78] sm:$0xff] }
  0x1b   : > { %v249_v34 = vmax.f32 %v233_v20, 0.0  ;;  %v250_v35 = vmax.f32 %v234_v21, 0.0  ;;  %v251_v36 = vmax.f32 %v235_v22, 0.0  ;;  %v237_v37 = vadd.f32 %v532_v1, %v217_v23 }
  0x1c   : > { %262 = vst [vmem:[%s555_s30] sm:$0xff] %v246_v27  ;;  %263 = vst [vmem:[%s555_s30 + $0x8] sm:$0xff] %v247_v28  ;;  %v252_v39 = vmax.f32 %v236_v30, 0.0  ;;  %v218_v40 = vmul.f32 %v522_v0, %v198_v24  ;;  %v219_v41 = vmul.f32 %v522_v0, %v199_v25  ;;  %v220_v42 = vmul.f32 %v522_v0, %v200_v26 }
  0x1d   : > { %264 = vst [vmem:[%s555_s30 + $0x10] sm:$0xff] %v248_v29  ;;  %265 = vst [vmem:[%s555_s30 + $0x18] sm:$0xff] %v249_v34  ;;  %v253_v44 = vmax.f32 %v237_v37, 0.0  ;;  %v221_v45 = vmul.f32 %v522_v0, %v201_v31  ;;  %v222_v46 = vmul.f32 %v522_v0, %v202_v32  ;;  %v223_v47 = vmul.f32 %v522_v0, %v203_v33 }
  0x1e   : > { %266 = vst [vmem:[%s555_s30 + $0x20] sm:$0xff] %v250_v35  ;;  %267 = vst [vmem:[%s555_s30 + $0x28] sm:$0xff] %v251_v36  ;;  %v238_v48 = vadd.f32 %v532_v1, %v218_v40  ;;  %v239_v49 = vadd.f32 %v532_v1, %v219_v41  ;;  %v240_v50 = vadd.f32 %v532_v1, %v220_v42 }
  0x1f   : > { %268 = vst [vmem:[%s555_s30 + $0x30] sm:$0xff] %v252_v39  ;;  %v224_v51 = vmul.f32 %v522_v0, %v204_v38  ;;  %269 = vst [vmem:[%s555_s30 + $0x38] sm:$0xff] %v253_v44  ;;  %v241_v52 = vadd.f32 %v532_v1, %v221_v45  ;;  %v242_v53 = vadd.f32 %v532_v1, %v222_v46 }
  0x20   : > { %v243_v54 = vadd.f32 %v532_v1, %v223_v47  ;;  %v225_v55 = vmul.f32 %v522_v0, %v205_v43  ;;  %v254_v56 = vmax.f32 %v238_v48, 0.0  ;;  %v255_v57 = vmax.f32 %v239_v49, 0.0 }
  0x21   : > { %v256_v58 = vmax.f32 %v240_v50, 0.0  ;;  %v244_v59 = vadd.f32 %v532_v1, %v224_v51  ;;  %v257_v60 = vmax.f32 %v241_v52, 0.0  ;;  %v258_v61 = vmax.f32 %v242_v53, 0.0 }
  0x22   : > { %v259_v62 = vmax.f32 %v243_v54, 0.0  ;;  %v245_v63 = vadd.f32 %v532_v1, %v225_v55  ;;  %270 = vst [vmem:[%s555_s30 + $0x40] sm:$0xff] %v254_v56  ;;  %271 = vst [vmem:[%s555_s30 + $0x48] sm:$0xff] %v255_v57 }
  0x23   : > { %272 = vst [vmem:[%s555_s30 + $0x50] sm:$0xff] %v256_v58  ;;  %v260_v2 = vmax.f32 %v244_v59, 0.0  ;;  %273 = vst [vmem:[%s555_s30 + $0x58] sm:$0xff] %v257_v60 }
  0x24   : > { %274 = vst [vmem:[%s555_s30 + $0x60] sm:$0xff] %v258_v61  ;;  %275 = vst [vmem:[%s555_s30 + $0x68] sm:$0xff] %v259_v62  ;;  %v261_v0 = vmax.f32 %v245_v63, 0.0 }
  0x25   : > { %276 = vst [vmem:[%s555_s30 + $0x70] sm:$0xff] %v260_v2 }
  0x26   : > { %277 = vst [vmem:[%s555_s30 + $0x78] sm:$0xff] %v261_v0 }
  0x27 PF: > { %s12_s13 = sadd.s32 1, %s472_s13   ;;  %s621_s9 = smov %s464_s11 }
  0x28   : > { %p9_p7 = scmp.ge.s32.totalorder %s12_s13, 6   ;;  %s622_s10 = smov %s468_s12 }
  0x29   : > { %s623_s11 = smov %s626_s14  ;;  %s624_s12 = smov %s630_s15 }
  0x2a   :  { %11 = sbr.rel (!%p9_p7) target bundleno = 3 (0x3), region = 58 }

// kernel: up_block_forward.4
= control target key start
LH: loop header
LB: loop body
LE: loop exit
PB: predicated region body
PF: predicated region fallthrough
CT: control target
= control target key end

     0   :  { %s4626_s15 = smov 0   ;;  %s4628_s16 = smov 0   ;;  %s5960_s0 = inlined_call_operand.vmem [shape: f32[2,16,16,128], index: 0, kind: input, shape index: {}]   ;;  %s5961_s1 = inlined_call_operand.vmem [shape: bf16[1152,128], index: 1, kind: input, shape index: {}]   ;;  %s5962_s2 = inlined_call_operand.vmem [shape: f32[2,128], index: 2, kind: input, shape index: {}]   ;;  %s5963_s3 = inlined_call_operand.vmem [shape: f32[2,16,16,128], index: 3, kind: output, shape index: {0}]   ;;  %s5964_s4 = inlined_call_operand.vmem [shape: f32[2,2,2,128], index: 4, kind: output, shape index: {1}]  }
   0x1   :  { %s4630_s17 = smov 0   ;;  %s4632_s18 = smov 0  }
   0x2   :  { %s4634_s19 = smov 0  }
   0x3 LB: > { %s24_s20 = sadd.s32 1, %s4589_s17  ;;  %s27_s21 = sadd.s32 1, %s4593_s18  ;;  %s4597_s19 = sphi %s4634_s19, %s15_s19   ;;  %s4593_s18 = sphi %s4632_s18, %s5982_s18   ;;  %s4589_s17 = sphi %s4630_s17, %s5981_s17   ;;  %s4585_s16 = sphi %s4628_s16, %s5980_s16   ;;  %s4581_s15 = sphi %s4626_s15, %s5979_s15  }
   0x4   : > { %p25_p0 = scmp.ge.s32.totalorder %s24_s20, 2  ;;  %p3698_p1 = scmp.ge.s32.totalorder %s4597_s19, 1 }
   0x5   : > { %p147_p2 = scmp.lt.s32.totalorder %s4597_s19, 5 }
   0x6   : > { %s5984_s20 = smov (%p25_p0, %s24_s20), 0  ;;  %s5986_s21 = smov (!%p25_p0, %s27_s21), %s4593_s18 }
   0x7   : > { %p148_p3 = pnand %p3698_p1, %p147_p2  ;;  %p29_p4 = scmp.ge.s32.totalorder %s5986_s21, 2 }
   0x8   : > { %s4661_s22 = sshll.u32 (!%p148_p3), %s4581_s15, 3  ;;  %p180_p5 = scmp.lt.s32.totalorder (!%p148_p3), %s4585_s16, 1 }
   0x9   : > { %s5988_s21 = smov (%p29_p4, %s5986_s21), 0  ;;  %151 = sbr.rel (%p148_p3) target bundleno = 626 (0x272), region = 28 }
   0xa   : > { %5965 = sst [smem:[#allocation14_spill]] %s5988_s21  ;;  %p182_p6 = scmp.lt.s32.totalorder (!%p148_p3), %s4661_s22, 15 }
   0xb   : > { %p192_p7 = scmp.lt.s32.totalorder (!%p148_p3), %s4581_s15, 1  ;;  %s200_s29 = ssub.s32 (!%p148_p3), 0, %s4581_s15 }
   0xc   : > { %s3705_s5 = smin.u32 (!%p148_p3), %s4581_s15, %s200_s29  ;;  %p199_p8 = scmp.lt.s32.totalorder (!%p148_p3), %s4581_s15, 0 }
   0xd   : > { %s202_s9 = sand.u32 (!%p148_p3), 1, %s3705_s5   ;;  %p3708_p10 = scmp.ne.s32.totalorder (!%p148_p3), %s4581_s15, 0 }
   0xe   : > { %s203_s12 = ssub.s32 (!%p148_p3), 0, %s202_s9 }
  0x10   : > { %s181_s23 = scalar_select %p180_p5, %s4585_s16, 1 }
  0x11   : > { %s183_s24 = scalar_select %p182_p6, %s4661_s22, 15 }
  0x12   : > { %s3701_s25 = sshll.u32 %s181_s23, 5  ;;  %s3703_s27 = sshll.u32 %s181_s23, 1 }
  0x13   : > { %s3700_s26 = sshll.u32 %s183_s24, 1  ;;  %s5990_s12 = smov (!%p199_p8, %s203_s12), %s202_s9 }
  0x14   : > { %s186_s28 = sadd.s32 %s3701_s25, %s3700_s26  ;;  %p3707_p9 = scmp.lt.s32.totalorder %s5990_s12, 0 }
  0x15   : > { %s3702_s30 = sshll.u32 %s186_s28, 3  ;;  %s209_s24 = sadd.s32 2, %s5990_s12 }
  0x16   : > { %s4673_s8 = scalar_lea.vmem %s5963_s3, %s3702_s30  ;;  %s5992_s24 = smov (!%p3707_p9, %s209_s24), %s5990_s12 }
  0x17   : > { %s193_s10 = scalar_select %p192_p7, %s4581_s15, 1 }
  0x18   : > { %214 = sbr.rel (%p3708_p10) target bundleno = 70 (0x46), region = 32  ;;  %s4023_s25 = sshll.u32 (!%p3708_p10), %s4581_s15, 7 }
  0x19   : > { %s195_s11 = sadd.s32 %s3703_s27, %s193_s10  ;;  %s4691_s26 = sshll.u32 (!%p3708_p10), %s4585_s16, 8 }
  0x1a   : > { %s3704_s13 = sshll.u32 %s195_s11, 1  ;;  %s218_s21 = sadd.s32 (!%p3708_p10), %s4023_s25, %s4691_s26 }
  0x1b   : > { %s4682_s23 = scalar_lea.vmem %s5964_s4, %s3704_s13  ;;  %s3529_s27 = smul.u32 (!%p3708_p10), 240, %s5992_s24 }
  0x1c   : > { %s4698_s30 = scalar_lea.vmem (!%p3708_p10), %s5960_s0, %s218_s21  ;;  %s223_s5 = smul.u32 (!%p3708_p10), 3, %s5992_s24 }
  0x1d   : > { %v271_v0 = vld [vmem:[%s4698_s30] sm:$0xff] (!%p3708_p10)  ;;  %v273_v1 = vld [vmem:[%s4698_s30 + $0x8] sm:$0xff] (!%p3708_p10)  ;;  %v275_v2 = vld [vmem:[%s4698_s30 + $0x10] sm:$0xff] (!%p3708_p10)  ;;  %s4704_s6 = scalar_lea.vmem (!%p3708_p10), [#allocation2], %s3529_s27 }
  0x1e   : > { %3712 = vst [vmem:[%s4704_s6 + $0x19] sm:$0xff] (!%p3708_p10), %v271_v0  ;;  %3713 = vst [vmem:[%s4704_s6 + $0x21] sm:$0xff] (!%p3708_p10), %v273_v1  ;;  %v277_v3 = vld [vmem:[%s4698_s30 + $0x18] sm:$0xff] (!%p3708_p10)  ;;  %v279_v4 = vld [vmem:[%s4698_s30 + $0x20] sm:$0xff] (!%p3708_p10)  ;;  %s4737_s7 = scalar_lea.sflag (!%p3708_p10), [#allocation4], %s223_s5 }
  0x1f   : > { %3714 = vst [vmem:[%s4704_s6 + $0x31] sm:$0xff] %v275_v2  ;;  %v281_v5 = vld [vmem:[%s4698_s30 + $0x28] sm:$0xff]  ;;  %3715 = vst [vmem:[%s4704_s6 + $0x39] sm:$0xff] %v277_v3  ;;  %v283_v6 = vld [vmem:[%s4698_s30 + $0x30] sm:$0xff] }
  0x20   : > { %3716 = vst [vmem:[%s4704_s6 + $0x49] sm:$0xff] %v279_v4  ;;  %3717 = vst [vmem:[%s4704_s6 + $0x51] sm:$0xff] %v281_v5  ;;  %v285_v7 = vld [vmem:[%s4698_s30 + $0x38] sm:$0xff]  ;;  %v287_v8 = vld [vmem:[%s4698_s30 + $0x40] sm:$0xff] }
  0x21   : > { %3718 = vst [vmem:[%s4704_s6 + $0x61] sm:$0xff] %v283_v6  ;;  %3719 = vst [vmem:[%s4704_s6 + $0x69] sm:$0xff] %v285_v7  ;;  %v289_v9 = vld [vmem:[%s4698_s30 + $0x48] sm:$0xff]  ;;  %v291_v10 = vld [vmem:[%s4698_s30 + $0x50] sm:$0xff] }
  0x22   : > { %3720 = vst [vmem:[%s4704_s6 + $0x79] sm:$0xff] %v287_v8  ;;  %v293_v11 = vld [vmem:[%s4698_s30 + $0x58] sm:$0xff]  ;;  %3721 = vst [vmem:[%s4704_s6 + $0x81] sm:$0xff] %v289_v9  ;;  %v295_v12 = vld [vmem:[%s4698_s30 + $0x60] sm:$0xff] }
  0x23   : > { %3722 = vst [vmem:[%s4704_s6 + $0x91] sm:$0xff] %v291_v10  ;;  %3723 = vst [vmem:[%s4704_s6 + $0x99] sm:$0xff] %v293_v11  ;;  %v297_v13 = vld [vmem:[%s4698_s30 + $0x68] sm:$0xff]  ;;  %v299_v14 = vld [vmem:[%s4698_s30 + $0x70] sm:$0xff] }
  0x24   : > { %3724 = vst [vmem:[%s4704_s6 + $0xa9] sm:$0xff] %v295_v12  ;;  %3725 = vst [vmem:[%s4704_s6 + $0xb1] sm:$0xff] %v297_v13  ;;  %v301_v15 = vld [vmem:[%s4698_s30 + $0x78] sm:$0xff] }
  0x25   : > { %3726 = vst [vmem:[%s4704_s6 + $0xc1] sm:$0xff] %v299_v14  ;;  %3727 = vst [vmem:[%s4704_s6 + $0xc9] sm:$0xff] %v301_v15 }
  0x26   : > { %310 = vsyncadd %s4737_s7, 2048  ;;  %p3736_p11 = scmp.le.s32.totalorder %s4581_s15, 0 }
  0x27   : > { %s3737_s9 = sadd.s32 (!%p3736_p11), 4294967295, %s4661_s22  ;;  %s3543_s10 = scalar_lea.sflag (!%p3736_p11), %s4737_s7, 1 [#allocation4] }
  0x28   : > { %314 = sbr.rel (%p3736_p11) target bundleno = 54 (0x36), region = 70  ;;  %p316_p12 = scmp.gt.s32.totalorder (!%p3736_p11), %s3737_s9, 0 }
  0x2f   : > { %s5994_s9 = smov (!%p316_p12, %s3737_s9), 0 }
  0x30   : > { %s3738_s11 = sshll.u32 %s5994_s9, 4 }
  0x31   : > { %s319_s12 = sadd.s32 %s3738_s11, %s4691_s26 }
  0x32   : > { %s320_s25 = scalar_lea.vmem %s5960_s0, %s319_s12 }
  0x33   : > { %v357_v16 = vld [vmem:[%s320_s25] sm:$0xff]  ;;  %v359_v17 = vld [vmem:[%s320_s25 + $0x8] sm:$0xff] }
  0x34   : > { %3739 = vst [vmem:[%s4704_s6 + $0x1] sm:$0xff] %v357_v16  ;;  %3740 = vst [vmem:[%s4704_s6 + $0x9] sm:$0xff] %v359_v17 }
  0x35   : > { %368 = vsyncadd %s3543_s10, 256 }
  0x36 PF: > { %p3742_p13 = scmp.ge.s32.totalorder %s4581_s15, 1 }
  0x37   : > { %s373_s21 = sadd.s32 (!%p3742_p13), 8, %s4661_s22  ;;  %s3553_s27 = scalar_lea.sflag (!%p3742_p13), %s4737_s7, 2 [#allocation4] }
  0x38   : > { %372 = sbr.rel (%p3742_p13) target bundleno = 70 (0x46), region = 108  ;;  %p374_p0 = scmp.lt.s32.totalorder (!%p3742_p13), %s373_s21, 15 }
  0x3f   : > { %s5996_s21 = smov (!%p374_p0, %s373_s21), 15 }
  0x40   : > { %s3743_s28 = sshll.u32 %s5996_s21, 4 }
  0x41   : > { %s377_s29 = sadd.s32 %s3743_s28, %s4691_s26 }
  0x42   : > { %s378_s9 = scalar_lea.vmem %s5960_s0, %s377_s29 }
  0x43   : > { %v415_v18 = vld [vmem:[%s378_s9] sm:$0xff]  ;;  %v417_v19 = vld [vmem:[%s378_s9 + $0x8] sm:$0xff] }
  0x44   : > { %3744 = vst [vmem:[%s4704_s6 + $0xd9] sm:$0xff] %v415_v18  ;;  %3745 = vst [vmem:[%s4704_s6 + $0xe1] sm:$0xff] %v417_v19 }
  0x45   : > { %426 = vsyncadd %s3553_s27, 256 }
  0x46 PF: > { %s427_s10 = smul.u32 3, %s5992_s24 }
  0x48   : > { %s428_s11 = scalar_lea.sflag [#allocation4], %s427_s10 }
  0x49   : > { %4569 = dma.done.wait %s428_s11, 2048 }
  0x4a   : > { %4570 = vsyncadd %s428_s11, 4294965248  ;;  %p4409_p1 = scmp.gt.s32.totalorder %s4581_s15, 0  ;;  %s3558_s7 = scalar_lea.sflag %s428_s11, 1 [#allocation4] }
  0x4c   : > { %4572 = dma.done.wait (%p4409_p1), %s3558_s7, 256 }
  0x4d   : > { %4574 = vsyncadd (%p4409_p1), %s3558_s7, 4294967040  ;;  %s3561_s26 = scalar_lea.sflag %s428_s11, 2 [#allocation4] }
  0x4e   : > { %4576 = dma.done.wait (%p192_p7), %s3561_s26, 256 }
  0x4f   : > { %4578 = vsyncadd (%p192_p7), %s3561_s26, 4294967040  ;;  %s4765_s6 = sadd.s32 1, %s4581_s15 }
  0x50   : > { %p3749_p2 = scmp.ge.s32.totalorder %s4765_s6, 2 }
  0x51   : > { %s458_s12 = ssub.s32 (!%p3749_p2), 1, %s5992_s24  ;;  %s4025_s13 = sadd.s32 (!%p3749_p2), 8, %s4661_s22 }
  0x52   : > { %457 = sbr.rel (%p3749_p2) target bundleno = 127 (0x7f), region = 154  ;;  %s4771_s14 = sshll.u32 (!%p3749_p2), %s4585_s16, 8 }
  0x53   : > { %s3752_s25 = sshll.u32 (!%p3749_p2), %s4581_s15, 7  ;;  %s3567_s27 = smul.u32 (!%p3749_p2), 240, %s458_s12 }
  0x54   : > { %s3564_s21 = sadd.s32 (!%p3749_p2), %s3752_s25, %s4771_s14  ;;  %s4780_s5 = smul.u32 (!%p3749_p2), 3, %s458_s12 }
  0x55   : > { %s4778_s30 = scalar_lea.vmem (!%p3749_p2), %s5960_s0, %s3564_s21  ;;  %s4785_s16 = scalar_lea.vmem (!%p3749_p2), [#allocation2], %s3567_s27 }
  0x56   : > { %v3754_v20 = vld [vmem:[%s4778_s30 + $0x80] sm:$0xff] (!%p3749_p2)  ;;  %v3756_v21 = vld [vmem:[%s4778_s30 + $0x88] sm:$0xff] (!%p3749_p2)  ;;  %v3758_v22 = vld [vmem:[%s4778_s30 + $0x90] sm:$0xff] (!%p3749_p2)  ;;  %s4817_s9 = scalar_lea.sflag (!%p3749_p2), [#allocation4], %s4780_s5 }
  0x57   : > { %3755 = vst [vmem:[%s4785_s16 + $0x19] sm:$0xff] (!%p3749_p2), %v3754_v20  ;;  %3757 = vst [vmem:[%s4785_s16 + $0x21] sm:$0xff] (!%p3749_p2), %v3756_v21  ;;  %v3760_v23 = vld [vmem:[%s4778_s30 + $0x98] sm:$0xff] (!%p3749_p2)  ;;  %v3762_v24 = vld [vmem:[%s4778_s30 + $0xa0] sm:$0xff] (!%p3749_p2) }
  0x58   : > { %3759 = vst [vmem:[%s4785_s16 + $0x31] sm:$0xff] (!%p3749_p2), %v3758_v22  ;;  %v3764_v25 = vld [vmem:[%s4778_s30 + $0xa8] sm:$0xff] (!%p3749_p2)  ;;  %3761 = vst [vmem:[%s4785_s16 + $0x39] sm:$0xff] (!%p3749_p2), %v3760_v23  ;;  %v3766_v26 = vld [vmem:[%s4778_s30 + $0xb0] sm:$0xff] (!%p3749_p2) }
  0x59   : > { %3763 = vst [vmem:[%s4785_s16 + $0x49] sm:$0xff] %v3762_v24  ;;  %3765 = vst [vmem:[%s4785_s16 + $0x51] sm:$0xff] %v3764_v25  ;;  %v3768_v27 = vld [vmem:[%s4778_s30 + $0xb8] sm:$0xff]  ;;  %v3770_v28 = vld [vmem:[%s4778_s30 + $0xc0] sm:$0xff] }
  0x5a   : > { %3767 = vst [vmem:[%s4785_s16 + $0x61] sm:$0xff] %v3766_v26  ;;  %3769 = vst [vmem:[%s4785_s16 + $0x69] sm:$0xff] %v3768_v27  ;;  %v3772_v29 = vld [vmem:[%s4778_s30 + $0xc8] sm:$0xff]  ;;  %v3774_v30 = vld [vmem:[%s4778_s30 + $0xd0] sm:$0xff] }
  0x5b   : > { %3771 = vst [vmem:[%s4785_s16 + $0x79] sm:$0xff] %v3770_v28  ;;  %v3776_v31 = vld [vmem:[%s4778_s30 + $0xd8] sm:$0xff]  ;;  %3773 = vst [vmem:[%s4785_s16 + $0x81] sm:$0xff] %v3772_v29  ;;  %v3778_v32 = vld [vmem:[%s4778_s30 + $0xe0] sm:$0xff] }
  0x5c   : > { %3775 = vst [vmem:[%s4785_s16 + $0x91] sm:$0xff] %v3774_v30  ;;  %3777 = vst [vmem:[%s4785_s16 + $0x99] sm:$0xff] %v3776_v31  ;;  %v3780_v33 = vld [vmem:[%s4778_s30 + $0xe8] sm:$0xff]  ;;  %v3782_v34 = vld [vmem:[%s4778_s30 + $0xf0] sm:$0xff] }
  0x5d   : > { %3779 = vst [vmem:[%s4785_s16 + $0xa9] sm:$0xff] %v3778_v32  ;;  %3781 = vst [vmem:[%s4785_s16 + $0xb1] sm:$0xff] %v3780_v33  ;;  %v3784_v35 = vld [vmem:[%s4778_s30 + $0xf8] sm:$0xff] }
  0x5e   : > { %3783 = vst [vmem:[%s4785_s16 + $0xc1] sm:$0xff] %v3782_v34  ;;  %3785 = vst [vmem:[%s4785_s16 + $0xc9] sm:$0xff] %v3784_v35 }
  0x5f   : > { %554 = vsyncadd %s4817_s9, 2048  ;;  %p3802_p3 = scmp.le.s32.totalorder %s4765_s6, 0 }
  0x60   : > { %s3803_s10 = sadd.s32 (!%p3802_p3), 4294967295, %s4025_s13  ;;  %s3581_s11 = scalar_lea.sflag (!%p3802_p3), %s4817_s9, 1 [#allocation4] }
  0x61   : > { %558 = sbr.rel (%p3802_p3) target bundleno = 111 (0x6f), region = 192  ;;  %p560_p4 = scmp.gt.s32.totalorder (!%p3802_p3), %s3803_s10, 0 }
  0x68   : > { %s5998_s10 = smov (!%p560_p4, %s3803_s10), 0 }
  0x69   : > { %s3804_s7 = sshll.u32 %s5998_s10, 4 }
  0x6a   : > { %s563_s26 = sadd.s32 %s3804_s7, %s4771_s14 }
  0x6b   : > { %s564_s21 = scalar_lea.vmem %s5960_s0, %s563_s26 }
  0x6c   : > { %v601_v36 = vld [vmem:[%s564_s21] sm:$0xff]  ;;  %v603_v37 = vld [vmem:[%s564_s21 + $0x8] sm:$0xff] }
  0x6d   : > { %3805 = vst [vmem:[%s4785_s16 + $0x1] sm:$0xff] %v601_v36  ;;  %3806 = vst [vmem:[%s4785_s16 + $0x9] sm:$0xff] %v603_v37 }
  0x6e   : > { %612 = vsyncadd %s3581_s11, 256 }
  0x6f PF: > { %p3808_p5 = scmp.ge.s32.totalorder %s4765_s6, 1 }
  0x70   : > { %s617_s27 = sadd.s32 (!%p3808_p5), 8, %s4025_s13  ;;  %s3591_s28 = scalar_lea.sflag (!%p3808_p5), %s4817_s9, 2 [#allocation4] }
  0x71   : > { %616 = sbr.rel (%p3808_p5) target bundleno = 127 (0x7f), region = 230  ;;  %p618_p6 = scmp.lt.s32.totalorder (!%p3808_p5), %s617_s27, 15 }
  0x78   : > { %s6000_s27 = smov (!%p618_p6, %s617_s27), 15 }
  0x79   : > { %s3809_s29 = sshll.u32 %s6000_s27, 4 }
  0x7a   : > { %s621_s30 = sadd.s32 %s3809_s29, %s4771_s14 }
  0x7b   : > { %s622_s11 = scalar_lea.vmem %s5960_s0, %s621_s30 }
  0x7c   : > { %v659_v38 = vld [vmem:[%s622_s11] sm:$0xff]  ;;  %v661_v39 = vld [vmem:[%s622_s11 + $0x8] sm:$0xff] }
  0x7d   : > { %3810 = vst [vmem:[%s4785_s16 + $0xd9] sm:$0xff] %v659_v38  ;;  %3811 = vst [vmem:[%s4785_s16 + $0xe1] sm:$0xff] %v661_v39 }
  0x7e   : > { %670 = vsyncadd %s3591_s28, 256 }
  0x7f PF: > { %s671_s22 = smul.u32 240, %s5992_s24  ;;  %v4844_v40 = vld [vmem:[%s5962_s2] ss:$0 sm:$0xff]  ;;  %v4849_v41 = vld [vmem:[%s5962_s2 + $0x1] ss:$0 sm:$0xff]  ;;  %vm963_vm0 = vcmask 1040384  }
  0x80   : > { %vm964_vm1 = vsmask.f32 256  ;;  %vm996_vm2 = vsmask.f32 7938 }
  0x81   : > { %s4851_s7 = scalar_lea.vmem [#allocation2], %s671_s22  ;;  %vm4938_vm3 = vmand %vm963_vm0, %vm964_vm1 }
  0x82   : > { %vm4955_vm4 = vmand %vm963_vm0, %vm996_vm2 }
  0x86   : > { %v673_v42 = vld [vmem:[%s4851_s7] sm:$0xff]  ;;  %v674_v43 = vld [vmem:[%s4851_s7 + $0x8] sm:$0xff]  ;;  %v675_v44 = vld [vmem:[%s4851_s7 + $0x10] sm:$0x3] }
  0x87   : > { %v709_v45 = vmul.f32 %v4844_v40, %v673_v42  ;;  %v710_v46 = vmul.f32 %v4844_v40, %v674_v43  ;;  %v711_v47 = vmul.f32 %v4844_v40, %v675_v44  ;;  %v676_v48 = vld [vmem:[%s4851_s7 + $0x18] sm:$0xff]  ;;  %v678_v49 = vld [vmem:[%s4851_s7 + $0x28] sm:$0x3]  ;;  %v679_v50 = vld [vmem:[%s4851_s7 + $0x30] sm:$0xff] }
  0x88   : > { %v712_v51 = vmul.f32 %v4844_v40, %v676_v48  ;;  %v714_v52 = vmul.f32 %v4844_v40, %v678_v49  ;;  %v680_v53 = vld [vmem:[%s4851_s7 + $0x38] sm:$0xff]  ;;  %v715_v54 = vmul.f32 %v4844_v40, %v679_v50  ;;  %v681_v55 = vld [vmem:[%s4851_s7 + $0x40] sm:$0x3]  ;;  %v682_v0 = vld [vmem:[%s4851_s7 + $0x48] sm:$0xff] }
  0x89   : > { %v743_v56 = vadd.f32 %v4849_v41, %v709_v45  ;;  %v744_v57 = vadd.f32 %v4849_v41, %v710_v46  ;;  %v745_v58 = vadd.f32 %v4849_v41, %v711_v47  ;;  %v716_v59 = vmul.f32 %v4844_v40, %v680_v53  ;;  %v684_v5 = vld [vmem:[%s4851_s7 + $0x58] sm:$0x3]  ;;  %v685_v10 = vld [vmem:[%s4851_s7 + $0x60] sm:$0xff]  ;;  %v686_v11 = vld [vmem:[%s4851_s7 + $0x68] sm:$0xff] }
  0x8a   : > { %v746_v60 = vadd.f32 %v4849_v41, %v712_v51  ;;  %v748_v61 = vadd.f32 %v4849_v41, %v714_v52  ;;  %v749_v62 = vadd.f32 %v4849_v41, %v715_v54  ;;  %v717_v63 = vmul.f32 %v4844_v40, %v681_v55  ;;  %v687_v16 = vld [vmem:[%s4851_s7 + $0x70] sm:$0x3]  ;;  %v688_v17 = vld [vmem:[%s4851_s7 + $0x78] sm:$0xff]  ;;  %v690_v22 = vld [vmem:[%s4851_s7 + $0x88] sm:$0x3] }
  0x8b   : > { %v773_v1 = vmax.f32 %v743_v56, 0.0  ;;  %v774_v2 = vmax.f32 %v744_v57, 0.0  ;;  %v775_v3 = vmax.f32 %v745_v58, 0.0  ;;  %v750_v4 = vadd.f32 %v4849_v41, %v716_v59  ;;  %v691_v27 = vld [vmem:[%s4851_s7 + $0x90] sm:$0xff]  ;;  %v692_v36 = vld [vmem:[%s4851_s7 + $0x98] sm:$0xff]  ;;  %v694_v48 = vld [vmem:[%s4851_s7 + $0xa8] sm:$0xff] }
  0x8c   : > { %v776_v6 = vmax.f32 %v746_v60, 0.0  ;;  %v778_v7 = vmax.f32 %v748_v61, 0.0  ;;  %v779_v8 = vmax.f32 %v749_v62, 0.0  ;;  %v751_v9 = vadd.f32 %v4849_v41, %v717_v63  ;;  %v693_v43 = vld [vmem:[%s4851_s7 + $0xa0] sm:$0x3]  ;;  %v698_v59 = vld [vmem:[%s4851_s7 + $0xc8] sm:$0xff] }
  0x8d   : > { %v4059_v12 = vpack.c.bf16 %v774_v2, %v773_v1  ;;  %v4028_v13 = vpack.c.bf16 %v775_v3, %v775_v3  ;;  %v780_v14 = vmax.f32 %v750_v4, 0.0  ;;  %v718_v15 = vmul.f32 %v4844_v40, %v682_v0  ;;  %v696_v53 = vld [vmem:[%s4851_s7 + $0xb8] sm:$0x3]  ;;  %v697_v58 = vld [vmem:[%s4851_s7 + $0xc0] sm:$0xff]  ;;  %v699_v0 = vld [vmem:[%s4851_s7 + $0xd0] sm:$0x3] }
  0x8e   : > { %v4029_v18 = vpack.c.bf16 %v776_v6, %v776_v6  ;;  %v4031_v19 = vpack.c.bf16 %v778_v7, %v778_v7  ;;  %v781_v20 = vmax.f32 %v751_v9, 0.0  ;;  %v720_v21 = vmul.f32 %v4844_v40, %v684_v5  ;;  %v700_v1 = vld [vmem:[%s4851_s7 + $0xd8] sm:$0xff] }
  0x8f   : > { %4060 = vst [vmem:[#allocation3] sm:$0xff] %v4059_v12   ;;  %935 = vst [vmem:[#allocation3 + $0x8] sm:$0x1] %v4028_v13  ;;  %v4064_v23 = vpack.c.bf16 %v780_v14, %v779_v8  ;;  %v752_v24 = vadd.f32 %v4849_v41, %v718_v15  ;;  %v721_v25 = vmul.f32 %v4844_v40, %v685_v10  ;;  %v702_v14 = vld [vmem:[%s4851_s7 + $0xe8] sm:$0x3] }
  0x90   : > { %v722_v26 = vmul.f32 %v4844_v40, %v686_v11  ;;  %936 = vst [vmem:[#allocation3 + $0xc] sm:$0xf] %v4029_v18  ;;  %938 = vst [vmem:[#allocation3 + $0x14] sm:$0x1] %v4031_v19  ;;  %v4034_v28 = vpack.c.bf16 %v781_v20, %v781_v20  ;;  %v754_v29 = vadd.f32 %v4849_v41, %v720_v21  ;;  %v677_v19 = vld [vmem:[%s4851_s7 + $0x20] sm:$0xff] }
  0x91   : > { %v723_v30 = vmul.f32 %v4844_v40, %v687_v16  ;;  %v724_v31 = vmul.f32 %v4844_v40, %v688_v17  ;;  %4081 = vst [vmem:[#allocation3 + $0x18] sm:$0xff] %v4064_v23   ;;  %v782_v32 = vmax.f32 %v752_v24, 0.0  ;;  %v755_v33 = vadd.f32 %v4849_v41, %v721_v25  ;;  %v683_v24 = vld [vmem:[%s4851_s7 + $0x50] sm:$0xff]  ;;  %v689_v25 = vld [vmem:[%s4851_s7 + $0x80] sm:$0xff] }
  0x92   : > { %v756_v34 = vadd.f32 %v4849_v41, %v722_v26  ;;  %v726_v35 = vmul.f32 %v4844_v40, %v690_v22  ;;  %941 = vst [vmem:[#allocation3 + $0x20] sm:$0x1] %v4034_v28  ;;  %v784_v37 = vmax.f32 %v754_v29, 0.0  ;;  %v727_v42 = vmul.f32 %v4844_v40, %v691_v27 }
  0x93   : > { %v757_v38 = vadd.f32 %v4849_v41, %v723_v30  ;;  %v758_v39 = vadd.f32 %v4849_v41, %v724_v31  ;;  %v4035_v44 = vpack.c.bf16 %v782_v32, %v782_v32  ;;  %v785_v45 = vmax.f32 %v755_v33, 0.0  ;;  %v695_v30 = vld [vmem:[%s4851_s7 + $0xb0] sm:$0xff] }
  0x94   : > { %v786_v46 = vmax.f32 %v756_v34, 0.0  ;;  %v760_v47 = vadd.f32 %v4849_v41, %v726_v35  ;;  %v4037_v49 = vpack.c.bf16 %v784_v37, %v784_v37  ;;  %v728_v52 = vmul.f32 %v4844_v40, %v692_v36  ;;  %v701_v35 = vld [vmem:[%s4851_s7 + $0xe0] sm:$0xff] }
  0x95   : > { %v787_v50 = vmax.f32 %v757_v38, 0.0  ;;  %v788_v51 = vmax.f32 %v758_v39, 0.0  ;;  %942 = vst [vmem:[#allocation3 + $0x24] sm:$0xf] %v4035_v44  ;;  %v761_v56 = vadd.f32 %v4849_v41, %v727_v42  ;;  %v729_v57 = vmul.f32 %v4844_v40, %v693_v43 }
  0x96   : > { %v4069_v54 = vpack.c.bf16 %v786_v46, %v785_v45  ;;  %v790_v55 = vmax.f32 %v760_v47, 0.0  ;;  %944 = vst [vmem:[#allocation3 + $0x2c] sm:$0x1] %v4037_v49  ;;  %v762_v62 = vadd.f32 %v4849_v41, %v728_v52  ;;  %v730_v63 = vmul.f32 %v4844_v40, %v694_v48  ;;  %v966_v43 = vld [vmem:[#allocation3] sm:$0x1] }
  0x97   : > { %v4040_v60 = vpack.c.bf16 %v787_v50, %v787_v50  ;;  %v4041_v61 = vpack.c.bf16 %v788_v51, %v788_v51  ;;  %v791_v3 = vmax.f32 %v761_v56, 0.0  ;;  %v763_v4 = vadd.f32 %v4849_v41, %v729_v57  ;;  %v969_v44 = vld [vmem:[#allocation3 + $0xc] sm:$0x1] }
  0x98   : > { %4082 = vst [vmem:[#allocation3 + $0x30] sm:$0xff] %v4069_v54   ;;  %v4043_v2 = vpack.c.bf16 %v790_v55, %v790_v55  ;;  %v732_v5 = vmul.f32 %v4844_v40, %v696_v53  ;;  %v792_v6 = vmax.f32 %v762_v62, 0.0  ;;  %v764_v7 = vadd.f32 %v4849_v41, %v730_v63  ;;  %v972_v53 = vld [vmem:[#allocation3 + $0x18] sm:$0x1]  ;;  %v998_v55 = vld [vmem:[#allocation3 + $0x8] sm:$0x1] }
  0x99   : > { %947 = vst [vmem:[#allocation3 + $0x38] sm:$0x1] %v4040_v60  ;;  %948 = vst [vmem:[#allocation3 + $0x3c] sm:$0xf] %v4041_v61  ;;  %v733_v8 = vmul.f32 %v4844_v40, %v697_v58  ;;  %v734_v9 = vmul.f32 %v4844_v40, %v698_v59  ;;  %v793_v10 = vmax.f32 %v763_v4, 0.0  ;;  %v735_v12 = vmul.f32 %v4844_v40, %v699_v0 }
  0x9a   : > { %950 = vst [vmem:[#allocation3 + $0x44] sm:$0x1] %v4043_v2  ;;  %v766_v11 = vadd.f32 %v4849_v41, %v732_v5  ;;  %v736_v13 = vmul.f32 %v4844_v40, %v700_v1  ;;  %v4074_v15 = vpack.c.bf16 %v792_v6, %v791_v3  ;;  %v794_v16 = vmax.f32 %v764_v7, 0.0  ;;  %v1001_v61 = vld [vmem:[#allocation3 + $0x14] sm:$0x1] }
  0x9b   : > { %v767_v17 = vadd.f32 %v4849_v41, %v733_v8  ;;  %v768_v18 = vadd.f32 %v4849_v41, %v734_v9  ;;  %v4046_v20 = vpack.c.bf16 %v793_v10, %v793_v10  ;;  %v769_v22 = vadd.f32 %v4849_v41, %v735_v12  ;;  %v1004_v62 = vld [vmem:[#allocation3 + $0x20] sm:$0x1] }
  0x9c   : > { %v796_v21 = vmax.f32 %v766_v11, 0.0  ;;  %v770_v23 = vadd.f32 %v4849_v41, %v736_v13  ;;  %4083 = vst [vmem:[#allocation3 + $0x48] sm:$0xff] %v4074_v15   ;;  %v4047_v26 = vpack.c.bf16 %v794_v16, %v794_v16  ;;  %v738_v29 = vmul.f32 %v4844_v40, %v702_v14  ;;  %v975_v54 = vld [vmem:[#allocation3 + $0x24] sm:$0x1] }
  0x9d   : > { %v797_v27 = vmax.f32 %v767_v17, 0.0  ;;  %v798_v28 = vmax.f32 %v768_v18, 0.0  ;;  %953 = vst [vmem:[#allocation3 + $0x50] sm:$0x1] %v4046_v20  ;;  %v799_v32 = vmax.f32 %v769_v22, 0.0  ;;  %v713_v34 = vmul.f32 %v4844_v40, %v677_v19 }
  0x9e   : > { %v4049_v31 = vpack.c.bf16 %v796_v21, %v796_v21  ;;  %v800_v33 = vmax.f32 %v770_v23, 0.0  ;;  %954 = vst [vmem:[#allocation3 + $0x54] sm:$0xf] %v4047_v26  ;;  %v772_v37 = vadd.f32 %v4849_v41, %v738_v29  ;;  %v719_v38 = vmul.f32 %v4844_v40, %v683_v24  ;;  %v1007_v4 = vld [vmem:[#allocation3 + $0x2c] sm:$0x1] }
  0x9f   : > { %v4079_v36 = vpack.c.bf16 %v798_v28, %v797_v27  ;;  %v725_v39 = vmul.f32 %v4844_v40, %v689_v25  ;;  %v4052_v45 = vpack.c.bf16 %v799_v32, %v799_v32  ;;  %v747_v47 = vadd.f32 %v4849_v41, %v713_v34  ;;  %v978_v60 = vld [vmem:[#allocation3 + $0x30] sm:$0x1] }
  0xa0   : > { %956 = vst [vmem:[#allocation3 + $0x5c] sm:$0x1] %v4049_v31  ;;  %v4053_v46 = vpack.c.bf16 %v800_v33, %v800_v33  ;;  %v731_v48 = vmul.f32 %v4844_v40, %v695_v30  ;;  %v802_v49 = vmax.f32 %v772_v37, 0.0  ;;  %v753_v50 = vadd.f32 %v4849_v41, %v719_v38  ;;  %v981_v2 = vld [vmem:[#allocation3 + $0x3c] sm:$0x1] }
  0xa1   : > { %4084 = vst [vmem:[#allocation3 + $0x60] sm:$0xff] %v4079_v36   ;;  %v759_v51 = vadd.f32 %v4849_v41, %v725_v39  ;;  %v737_v52 = vmul.f32 %v4844_v40, %v701_v35  ;;  %959 = vst [vmem:[#allocation3 + $0x68] sm:$0x1] %v4052_v45  ;;  %v777_v56 = vmax.f32 %v747_v47, 0.0  ;;  %v967_v58 = vsel %vm4938_vm3, 0, %v966_v43 }
  0xa2   : > { %960 = vst [vmem:[#allocation3 + $0x6c] sm:$0xf] %v4053_v46  ;;  %v765_v57 = vadd.f32 %v4849_v41, %v731_v48  ;;  %v970_v59 = vsel %vm4938_vm3, 0, %v969_v44  ;;  %v4055_v63 = vpack.c.bf16 %v802_v49, %v802_v49  ;;  %v783_v0 = vmax.f32 %v753_v50, 0.0  ;;  %968 = vst [vmem:[#allocation3] sm:$0x1] %v967_v58 }
  0xa3   : > { %v789_v40 = vmax.f32 %v759_v51, 0.0  ;;  %v771_v1 = vadd.f32 %v4849_v41, %v737_v52  ;;  %971 = vst [vmem:[#allocation3 + $0xc] sm:$0x1] %v970_v59  ;;  %v1010_v5 = vld [vmem:[#allocation3 + $0x38] sm:$0x1]  ;;  %v4030_v6 = vpack.c.bf16 %v777_v56, %v777_v56  ;;  %v973_v8 = vsel %vm4938_vm3, 0, %v972_v53 }
  0xa4   : > { %v795_v7 = vmax.f32 %v765_v57, 0.0  ;;  %v976_v9 = vsel %vm4938_vm3, 0, %v975_v54  ;;  %v984_v41 = vld [vmem:[#allocation3 + $0x48] sm:$0x1]  ;;  %962 = vst [vmem:[#allocation3 + $0x74] sm:$0x1] %v4055_v63  ;;  %v4036_v10 = vpack.c.bf16 %v783_v0, %v783_v0 }
  0xa5   : > { %v4042_v11 = vpack.c.bf16 %v789_v40, %v789_v40  ;;  %v801_v12 = vmax.f32 %v771_v1, 0.0  ;;  %974 = vst [vmem:[#allocation3 + $0x18] sm:$0x1] %v973_v8  ;;  %977 = vst [vmem:[#allocation3 + $0x24] sm:$0x1] %v976_v9  ;;  %v979_v13 = vsel %vm4938_vm3, 0, %v978_v60 }
  0xa6   : > { %v1013_v14 = vld [vmem:[#allocation3 + $0x44] sm:$0x1]  ;;  %v1016_v15 = vld [vmem:[#allocation3 + $0x50] sm:$0x1]  ;;  %937 = vst [vmem:[#allocation3 + $0x10] sm:$0xf] %v4030_v6  ;;  %v4048_v16 = vpack.c.bf16 %v795_v7, %v795_v7 }
  0xa7   : > { %980 = vst [vmem:[#allocation3 + $0x30] sm:$0x1] %v979_v13  ;;  %v982_v17 = vsel %vm4938_vm3, 0, %v981_v2  ;;  %v985_v18 = vsel %vm4938_vm3, 0, %v984_v41  ;;  %v987_v19 = vld [vmem:[#allocation3 + $0x54] sm:$0x1]  ;;  %v4054_v21 = vpack.c.bf16 %v801_v12, %v801_v12 }
  0xa8   : > { %v999_v20 = vsel %vm4955_vm4, 0, %v998_v55  ;;  %943 = vst [vmem:[#allocation3 + $0x28] sm:$0xf] %v4036_v10  ;;  %949 = vst [vmem:[#allocation3 + $0x40] sm:$0xf] %v4042_v11  ;;  %v988_v22 = vsel %vm4938_vm3, 0, %v987_v19 }
  0xa9   : > { %983 = vst [vmem:[#allocation3 + $0x3c] sm:$0x1] %v982_v17  ;;  %986 = vst [vmem:[#allocation3 + $0x48] sm:$0x1] %v985_v18  ;;  %v1002_v23 = vsel %vm4955_vm4, 0, %v1001_v61  ;;  %v1005_v24 = vsel %vm4955_vm4, 0, %v1004_v62 }
  0xaa   : > { %1000 = vst [vmem:[#allocation3 + $0x8] sm:$0x1] %v999_v20  ;;  %v1019_v25 = vld [vmem:[#allocation3 + $0x5c] sm:$0x1]  ;;  %955 = vst [vmem:[#allocation3 + $0x58] sm:$0xf] %v4048_v16 }
  0xab   : > { %989 = vst [vmem:[#allocation3 + $0x54] sm:$0x1] %v988_v22  ;;  %v990_v26 = vld [vmem:[#allocation3 + $0x60] sm:$0x1]  ;;  %1003 = vst [vmem:[#allocation3 + $0x14] sm:$0x1] %v1002_v23 }
  0xac   : > { %1006 = vst [vmem:[#allocation3 + $0x20] sm:$0x1] %v1005_v24  ;;  %v1008_v27 = vsel %vm4955_vm4, 0, %v1007_v4  ;;  %v1011_v28 = vsel %vm4955_vm4, 0, %v1010_v5  ;;  %v1014_v29 = vsel %vm4955_vm4, 0, %v1013_v14  ;;  %v1017_v30 = vsel %vm4955_vm4, 0, %v1016_v15 }
  0xad   : > { %961 = vst [vmem:[#allocation3 + $0x70] sm:$0xf] %v4054_v21  ;;  %v991_v31 = vsel %vm4938_vm3, 0, %v990_v26  ;;  %v993_v32 = vld [vmem:[#allocation3 + $0x6c] sm:$0x1]  ;;  %v1020_v33 = vsel %vm4955_vm4, 0, %v1019_v25 }
  0xae   : > { %1009 = vst [vmem:[#allocation3 + $0x2c] sm:$0x1] %v1008_v27  ;;  %1012 = vst [vmem:[#allocation3 + $0x38] sm:$0x1] %v1011_v28  ;;  %v1022_v34 = vld [vmem:[#allocation3 + $0x68] sm:$0x1] }
  0xaf   : > { %1015 = vst [vmem:[#allocation3 + $0x44] sm:$0x1] %v1014_v29  ;;  %1018 = vst [vmem:[#allocation3 + $0x50] sm:$0x1] %v1017_v30  ;;  %v994_v35 = vsel %vm4938_vm3, 0, %v993_v32  ;;  %v1023_v36 = vsel %vm4955_vm4, 0, %v1022_v34 }
  0xb0   : > { %992 = vst [vmem:[#allocation3 + $0x60] sm:$0x1] %v991_v31  ;;  %1021 = vst [vmem:[#allocation3 + $0x5c] sm:$0x1] %v1020_v33  ;;  %v1025_v37 = vld [vmem:[#allocation3 + $0x74] sm:$0x1] }
  0xb1   : > { %995 = vst [vmem:[#allocation3 + $0x6c] sm:$0x1] %v994_v35  ;;  %1024 = vst [vmem:[#allocation3 + $0x68] sm:$0x1] %v1023_v36  ;;  %v1026_v38 = vsel %vm4955_vm4, 0, %v1025_v37  ;;  %1030 = sbr.rel (%p3708_p10) target bundleno = 184 (0xb8), region = 268 }
  0xb2   : > { %1027 = vst [vmem:[#allocation3 + $0x74] sm:$0x1] %v1026_v38  ;;  %v4599_v39 = vmov (!%p3708_p10), 0  }
  0xb3   : > { %1031 = vst [vmem:[#allocation3] sm:$0xf] (!%p3708_p10), %v4599_v39  ;;  %1032 = vst [vmem:[#allocation3 + $0x4] sm:$0xf] (!%p3708_p10), %v4599_v39 }
  0xb4   : > { %1033 = vst [vmem:[#allocation3 + $0x8] sm:$0x1] (!%p3708_p10), %v4599_v39 }
  0xb8 PF: > { %p3846_p7 = scmp.ne.s32.totalorder %s4581_s15, 1 }
  0xb9   : > { %v4600_v42 = vmov (!%p3846_p7), 0  }
  0xba   : > { %1037 = sbr.rel (%p3846_p7) target bundleno = 193 (0xc1), region = 272  ;;  %1039 = vst [vmem:[#allocation3 + $0x6c] sm:$0xf] (!%p3846_p7), %v4600_v42  ;;  %1040 = vst [vmem:[#allocation3 + $0x70] sm:$0xf] (!%p3846_p7), %v4600_v42 }
  0xbb   : > { %1041 = vst [vmem:[#allocation3 + $0x74] sm:$0x1] (!%p3846_p7), %v4600_v42 }
  0xc1 PF: > { %v4453_v43 = vld [vmem:[%s5961_s1 + $0x40] sm:$0xff]   ;;  %v4457_v47 = vld [vmem:[%s5961_s1 + $0x48] sm:$0xff]   ;;  %v4461_v51 = vld [vmem:[%s5961_s1 + $0x50] sm:$0xff]   ;;  %vm1293_vm5 = vcmask 1042432   ;;  %vm1066_vm6 = vsmask.f32 3328 }
  0xc2   : > { %v4454_v44 = vld [vmem:[%s5961_s1 + $0xc0] sm:$0xff]   ;;  %4085 = vmatprep.subr.bf16.mxu0 %v4453_v43  ;;  %v4458_v48 = vld [vmem:[%s5961_s1 + $0xc8] sm:$0xff]   ;;  %v4462_v52 = vld [vmem:[%s5961_s1 + $0xd0] sm:$0xff]   ;;  %vm1067_vm7 = vsmask.f32 7440  ;;  %vm1294_vm8 = vcmask 1046532  }
  0xc3   : > { %v4455_v45 = vld [vmem:[%s5961_s1] sm:$0xff]   ;;  %4149 = vmatprep.subr.bf16.mxu1 %v4454_v44  ;;  %v4459_v49 = vld [vmem:[%s5961_s1 + $0x8] sm:$0xff]   ;;  %v4463_v53 = vld [vmem:[%s5961_s1 + $0x10] sm:$0xff]  }
  0xc4   : > { %v4456_v46 = vld [vmem:[%s5961_s1 + $0x80] sm:$0xff]   ;;  %4086 = vmatpush3.bf16.msra.mxu0 %v4455_v45  ;;  %v4460_v50 = vld [vmem:[%s5961_s1 + $0x88] sm:$0xff]   ;;  %v4464_v54 = vld [vmem:[%s5961_s1 + $0x90] sm:$0xff]  }
  0xc5   : > { %4150 = vmatpush3.bf16.msra.mxu1 %v4456_v46  ;;  %4087 = vmatprep.subr.bf16.mxu0 %v4457_v47  ;;  %v4465_v55 = vld [vmem:[%s5961_s1 + $0x58] sm:$0xff]   ;;  %v4469_v59 = vld [vmem:[%s5961_s1 + $0x60] sm:$0xff]   ;;  %v4473_v63 = vld [vmem:[%s5961_s1 + $0x68] sm:$0xff]  }
  0xc6   : > { %4151 = vmatprep.subr.bf16.mxu1 %v4458_v48  ;;  %v4466_v56 = vld [vmem:[%s5961_s1 + $0xd8] sm:$0xff]   ;;  %v4470_v60 = vld [vmem:[%s5961_s1 + $0xe0] sm:$0xff]   ;;  %v4474_v0 = vld [vmem:[%s5961_s1 + $0xe8] sm:$0xff]  }
  0xc7   : > { %v4467_v57 = vld [vmem:[%s5961_s1 + $0x18] sm:$0xff]   ;;  %v4471_v61 = vld [vmem:[%s5961_s1 + $0x20] sm:$0xff]   ;;  %v4475_v40 = vld [vmem:[%s5961_s1 + $0x28] sm:$0xff]  }
  0xc8   : > { %4088 = vmatpush3.bf16.msra.mxu0 %v4459_v49  ;;  %v4468_v58 = vld [vmem:[%s5961_s1 + $0x98] sm:$0xff]   ;;  %v4472_v62 = vld [vmem:[%s5961_s1 + $0xa0] sm:$0xff]   ;;  %v4476_v1 = vld [vmem:[%s5961_s1 + $0xa8] sm:$0xff]  }
  0xc9   : > { %4152 = vmatpush3.bf16.msra.mxu1 %v4460_v50  ;;  %4089 = vmatprep.subr.bf16.mxu0 %v4461_v51  ;;  %v4477_v2 = vld [vmem:[%s5961_s1 + $0x70] sm:$0xff]   ;;  %v4481_v6 = vld [vmem:[%s5961_s1 + $0x78] sm:$0xff]   ;;  %v5094_v41 = vld [vmem:[#allocation3] sm:$0xf] }
  0xca   : > { %4153 = vmatprep.subr.bf16.mxu1 %v4462_v52  ;;  %v4478_v3 = vld [vmem:[%s5961_s1 + $0xf0] sm:$0xff]   ;;  %v4482_v7 = vld [vmem:[%s5961_s1 + $0xf8] sm:$0xff]   ;;  %v5096_v10 = vld [vmem:[#allocation3 + $0x4] sm:$0xf]  ;;  %v1070_v12 = vshrl.u32 %v5094_v41, 16  ;;  %v1073_v13 = vshll.u32 %v5094_v41, 16 }
  0xcb   : > { %v4479_v4 = vld [vmem:[%s5961_s1 + $0x30] sm:$0xff]   ;;  %v4483_v8 = vld [vmem:[%s5961_s1 + $0x38] sm:$0xff]   ;;  %v5098_v11 = vld [vmem:[#allocation3 + $0x8] sm:$0x1]  ;;  %v1079_v14 = vshll.u32 %v5096_v10, 16  ;;  %v1083_v15 = vshrl.u32 %v5096_v10, 16  ;;  %v3871_v46 = vcombine.low %v5094_v41, %v5096_v10 }
  0xcc   : > { %4090 = vmatpush3.bf16.msra.mxu0 %v4463_v53  ;;  %v4480_v5 = vld [vmem:[%s5961_s1 + $0xb0] sm:$0xff]   ;;  %v4484_v9 = vld [vmem:[%s5961_s1 + $0xb8] sm:$0xff]   ;;  %v1089_v16 = vshll.u32 %v5098_v11, 16  ;;  %v1353_v17 = vld [vmem:[#allocation3 + $0xc] sm:$0xf]  ;;  %v1072_v18 = vrot.slane %v1070_v12, 4 }
  0xcd   : > { %4154 = vmatpush3.bf16.msra.mxu1 %v4464_v54  ;;  %4091 = vmatprep.subr.bf16.mxu0 %v4465_v55  ;;  %v1075_v19 = vrot.slane %v1073_v13, 5  ;;  %v5105_v20 = vld [vmem:[#allocation3 + $0x10] sm:$0xf]  ;;  %v1378_v21 = vshrl.u32 %v1353_v17, 16  ;;  %v1381_v22 = vshll.u32 %v1353_v17, 16  ;;  %v1081_v23 = vrot.slane %v1079_v14, 5  ;;  %vm5115_vm9 = vmor %vm1066_vm6, %vm1067_vm7 }
  0xce   : > { %4155 = vmatprep.subr.bf16.mxu1 %v4466_v56  ;;  %v1085_v24 = vrot.slane %v1083_v15, 4  ;;  %v1301_v25 = vrot.slane %v5098_v11, 5  ;;  %v1387_v26 = vshll.u32 %v5105_v20, 16  ;;  %v1261_v27 = vld [vmem:[#allocation3] sm:$0xe]  ;;  %v1391_v31 = vshrl.u32 %v5105_v20, 16  ;;  %vm5125_vm10 = vmor %vm1293_vm5, %vm1294_vm8 }
  0xcf   : > { %v1076_v28 = vor.u32 %v1075_v19, %v1072_v18  ;;  %v1380_v29 = vrot.slane %v1378_v21, 4  ;;  %v1383_v30 = vrot.slane %v1381_v22, 5  ;;  %v4487_v32 = vld [vmem:[%s5961_s1 + $0x140] sm:$0xff]   ;;  %v1091_v35 = vrot.slane %v1089_v16, 5  ;;  %v5132_v49 = vld [vmem:[#allocation3 + $0xc] sm:$0xf] }
  0xd0   : > { %4092 = vmatpush3.bf16.msra.mxu0 %v4467_v57  ;;  %v1086_v34 = vor.u32 %v1085_v24, %v1081_v23  ;;  %v5119_v36 = vrot.slane %v1387_v26, 5  ;;  %v3895_v37 = vcombine.low %v1353_v17, %v5105_v20  ;;  %v1393_v42 = vrot.slane %v1391_v31, 4  ;;  %v4488_v53 = vld [vmem:[%s5961_s1 + $0x100] sm:$0xff]   ;;  %v5142_v54 = vld [vmem:[#allocation3 + $0x10] sm:$0xf]  ;;  %v4492_v16 = vld [vmem:[%s5961_s1 + $0x108] sm:$0xff]  }
  0xd1   : > { %4156 = vmatpush3.bf16.msra.mxu1 %v4468_v58  ;;  %4093 = vmatprep.subr.bf16.mxu0 %v4469_v59  ;;  %v1077_v38 = vrot.slane %v1076_v28, 4  ;;  %v1384_v39 = vor.u32 %v1383_v30, %v1380_v29  ;;  %v1603_v43 = vrot.slane %v5105_v20, 5  ;;  %v3847_v47 = vrot.slane %v1261_v27, 9  ;;  %v5144_v55 = vld [vmem:[#allocation3 + $0x14] sm:$0x1]  ;;  %v4496_v11 = vld [vmem:[%s5961_s1 + $0x1c0] sm:$0xff]  }
  0xd2   : > { %4157 = vmatprep.subr.bf16.mxu1 %v4470_v60  ;;  %v1087_v45 = vrot.slane %v1086_v34, 4  ;;  %2979 = vmatprep.mubr.bf16.mxu1 %v3895_v37  ;;  %v1298_v48 = vrot.slane %v5096_v10, 5  ;;  %v1394_v52 = vor.u32 %v1393_v42, %v5119_v36  ;;  %v1094_v56 = vshrl.u32 %v5132_v49, 16  ;;  %v5180_v22 = vld [vmem:[#allocation3 + $0x18] sm:$0xf]  ;;  %v4495_v29 = vld [vmem:[%s5961_s1 + $0x150] sm:$0xff]  }
  0xd3   : > { %v1082_v50 = vsel %vm5115_vm9, %v1077_v38, %v1081_v23  ;;  %v5136_v51 = vrot.slane %v1384_v39, 4  ;;  %v1097_v60 = vshll.u32 %v5132_v49, 16  ;;  %v4498_v23 = vld [vmem:[%s5961_s1 + $0x180] sm:$0xff]   ;;  %v3872_v26 = vcombine.low %v5132_v49, %v5142_v54  ;;  %v5187_v28 = vld [vmem:[#allocation3 + $0x1c] sm:$0xf] }
  0xd4   : > { %4094 = vmatpush3.bf16.msra.mxu0 %v4471_v61  ;;  %v1092_v57 = vsel %vm5115_vm9, %v1087_v45, %v1091_v35  ;;  %v1299_v58 = vsel %vm5125_vm10, %v3847_v47, %v1298_v48  ;;  %v1300_v59 = vrot.slane %v1298_v48, 4  ;;  %v1355_v61 = vld [vmem:[#allocation3 + $0x18] sm:$0xf]  ;;  %v1305_v30 = vrot.slane %v5142_v54, 5  ;;  %v5202_v45 = vld [vmem:[#allocation3 + $0x24] sm:$0xf] }
  0xd5   : > { %4158 = vmatpush3.bf16.msra.mxu1 %v4472_v62  ;;  %4095 = vmatprep.subr.bf16.mxu0 %v4473_v63  ;;  %v5152_v62 = vld [vmem:[#allocation3 + $0x1c] sm:$0xf]  ;;  %v3879_v63 = vcombine.low %v1082_v50, %v1092_v57  ;;  %v1402_v41 = vshrl.u32 %v1355_v61, 16  ;;  %v1405_v10 = vshll.u32 %v1355_v61, 16  ;;  %v1308_v31 = vrot.slane %v5144_v55, 5  ;;  %v4497_v47 = vld [vmem:[%s5961_s1 + $0x110] sm:$0xff]  }
  0xd6   : > { %4159 = vmatprep.subr.bf16.mxu1 %v4474_v0  ;;  %v1390_v0 = vsel %vm5115_vm9, %v5136_v51, %v5119_v36  ;;  %v1415_v15 = vshrl.u32 %v5152_v62, 16  ;;  %v3896_v21 = vcombine.low %v1355_v61, %v5152_v62  ;;  %v1118_v34 = vshrl.u32 %v5180_v22, 16 }
  0xd7   : > { %2882 = vmatprep.mubr.bf16.mxu0 %v3879_v63  ;;  %v5175_v18 = vrot.slane %v1402_v41, 4  ;;  %v5177_v19 = vrot.slane %v1405_v10, 5  ;;  %v1121_v35 = vshll.u32 %v5180_v22, 16  ;;  %v1127_v39 = vshll.u32 %v5187_v28, 16  ;;  %v4503_v10 = vld [vmem:[%s5961_s1 + $0x118] sm:$0xff]  }
  0xd8   : > { %4096 = vmatpush3.bf16.msra.mxu0 %v4475_v40  ;;  %v5158_v40 = vrot.slane %v1394_v52, 4  ;;  %v1131_v42 = vshrl.u32 %v5187_v28, 16  ;;  %v1307_v49 = vrot.slane %v1305_v30, 4  ;;  %v1120_v50 = vrot.slane %v1118_v34, 4 }
  0xd9   : > { %4160 = vmatpush3.bf16.msra.mxu1 %v4476_v1  ;;  %4097 = vmatprep.subr.bf16.mxu0 %v4477_v2  ;;  %v1096_v1 = vrot.slane %v1094_v56, 4  ;;  %v1262_v2 = vld [vmem:[#allocation3 + $0xc] sm:$0xe]  ;;  %v1123_v52 = vrot.slane %v1121_v35, 5  ;;  %v1129_v56 = vrot.slane %v1127_v39, 5 }
  0xda   : > { %4161 = vmatprep.subr.bf16.mxu1 %v4478_v3  ;;  %v1302_v3 = vsel %vm5125_vm10, %v1300_v59, %v1301_v25  ;;  %v3848_v27 = vrot.slane %v1262_v2, 9  ;;  %v1133_v57 = vrot.slane %v1131_v42, 4  ;;  %v4501_v59 = vld [vmem:[%s5961_s1 + $0x158] sm:$0xff]   ;;  %v1309_v61 = vsel %vm5125_vm10, %v1307_v49, %v1308_v31  ;;  %v4504_v2 = vld [vmem:[%s5961_s1 + $0x188] sm:$0xff]  }
  0xdb   : > { %v1124_v63 = vor.u32 %v1123_v52, %v1120_v50  ;;  %v4509_v52 = vld [vmem:[%s5961_s1 + $0x120] sm:$0xff]  }
  0xdc   : > { %4098 = vmatpush3.bf16.msra.mxu0 %v4479_v4  ;;  %v1099_v4 = vrot.slane %v1097_v60, 5  ;;  %v1306_v48 = vsel %vm5125_vm10, %v3848_v27, %v1305_v30  ;;  %v5253_v27 = vld [vmem:[#allocation3 + $0x2c] sm:$0x1] }
  0xdd   : > { %4162 = vmatpush3.bf16.msra.mxu1 %v4480_v5  ;;  %4099 = vmatprep.subr.bf16.mxu0 %v4481_v6  ;;  %v1103_v5 = vshll.u32 %v5142_v54, 16  ;;  %v1107_v6 = vshrl.u32 %v5142_v54, 16  ;;  %v4502_v54 = vld [vmem:[%s5961_s1 + $0x1c8] sm:$0xff]   ;;  %v1161_v42 = vshll.u32 %v5253_v27, 16 }
  0xde   : > { %4163 = vmatprep.subr.bf16.mxu1 %v4482_v7  ;;  %v4491_v7 = vld [vmem:[%s5961_s1 + $0x148] sm:$0xff]   ;;  %v1100_v12 = vor.u32 %v1099_v4, %v1096_v1  ;;  %v1426_v1 = vshrl.u32 %v5202_v45, 16  ;;  %v1134_v4 = vor.u32 %v1133_v57, %v1129_v56 }
  0xdf   : > { %v1105_v13 = vrot.slane %v1103_v5, 5  ;;  %v1109_v14 = vrot.slane %v1107_v6, 4  ;;  %v1429_v6 = vshll.u32 %v5202_v45, 16  ;;  %v1163_v57 = vrot.slane %v1161_v42, 5 }
  0xe0   : > { %4100 = vmatpush3.bf16.msra.mxu0 %v4483_v8  ;;  %v3887_v8 = vcombine.low %v1299_v58, %v1302_v3  ;;  %v1101_v24 = vrot.slane %v1100_v12, 4  ;;  %v3888_v3 = vcombine.low %v1306_v48, %v1309_v61  ;;  %v4510_v61 = vld [vmem:[%s5961_s1 + $0x190] sm:$0xff]  }
  0xe1   : > { %4164 = vmatpush3.bf16.msra.mxu1 %v4484_v9  ;;  %4213 = vmatprep.subr.bf16.mxu0 %v4487_v32  ;;  %v1113_v9 = vshll.u32 %v5144_v55, 16  ;;  %v1110_v25 = vor.u32 %v1109_v14, %v1105_v13  ;;  %v5194_v32 = vld [vmem:[#allocation3 + $0x20] sm:$0x1]  ;;  %v4508_v14 = vld [vmem:[%s5961_s1 + $0x1d0] sm:$0xff]  }
  0xe2   : > { %4277 = vmatprep.subr.bf16.mxu1 %v4496_v11  ;;  %v1106_v37 = vsel %vm5115_vm9, %v1101_v24, %v1105_v13  ;;  %v1137_v58 = vshll.u32 %v5194_v32, 16  ;;  %v1135_v11 = vrot.slane %v1134_v4, 4  ;;  %v4507_v13 = vld [vmem:[%s5961_s1 + $0x160] sm:$0xff]   ;;  %v1322_v4 = vrot.slane %v5253_v27, 5  ;;  %v5303_v27 = vld [vmem:[#allocation3 + $0x3c] sm:$0xf] }
  0xe3   : > { %2883 = vmatmul.mubr.bf16.vlgmr.msra.gmra.mrb[0].mxu0 %v3871_v46  ;;  %v1115_v17 = vrot.slane %v1113_v9, 5  ;;  %v1111_v38 = vrot.slane %v1110_v25, 4  ;;  %v5204_v46 = vld [vmem:[#allocation3 + $0x28] sm:$0xf]  ;;  %v3873_v25 = vcombine.low %v5180_v22, %v5187_v28 }
  0xe4   : > { %2980 = vmatmul.mubr.bf16.vlgmr.msra.gmra.mrb[0].mxu1 %v3887_v8  ;;  %4214 = vmatpush3.bf16.msra.mxu0 %v4488_v53  ;;  %v1263_v53 = vld [vmem:[#allocation3 + $0x18] sm:$0xe]  ;;  %v1139_v5 = vrot.slane %v1137_v58, 5  ;;  %v5227_v8 = vrot.slane %v1426_v1, 4  ;;  %v1439_v9 = vshrl.u32 %v5204_v46, 16  ;;  %v3897_v41 = vcombine.low %v5202_v45, %v5204_v46 }
  0xe5   : > { %4215 = vmatprep.subr.bf16.mxu0 %v4491_v7  ;;  %2987 = vmatprep.mubr.bf16.mxu1 %v3896_v21  ;;  %v1116_v55 = vsel %vm5115_vm9, %v1111_v38, %v1115_v17  ;;  %v1125_v7 = vrot.slane %v1124_v63, 4  ;;  %v3849_v12 = vrot.slane %v1263_v53, 9  ;;  %v1312_v17 = vrot.slane %v5187_v28, 5  ;;  %v5260_v38 = vld [vmem:[#allocation3 + $0x34] sm:$0xf] }
  0xe6   : > { %4278 = vmatpush3.bf16.msra.mxu1 %v4498_v23  ;;  %v3880_v60 = vcombine.low %v1106_v37, %v1116_v55  ;;  %v1315_v21 = vrot.slane %v5194_v32, 5  ;;  %v5245_v23 = vld [vmem:[#allocation3 + $0x24] sm:$0xf]  ;;  %v1140_v24 = vsel %vm5115_vm9, %v1135_v11, %v1139_v5  ;;  %v1359_v37 = vld [vmem:[#allocation3 + $0x30] sm:$0xf]  ;;  %v5269_v53 = vrot.slane %v1429_v6, 5 }
  0xe7   : > { %4279 = vmatprep.subr.bf16.mxu1 %v4502_v54  ;;  %v1145_v30 = vshll.u32 %v5245_v23, 16  ;;  %v1313_v32 = vsel %vm5125_vm10, %v3849_v12, %v1312_v17  ;;  %v1314_v34 = vrot.slane %v1312_v17, 4  ;;  %v1264_v45 = vld [vmem:[#allocation3 + $0x24] sm:$0xe]  ;;  %v1450_v49 = vshrl.u32 %v1359_v37, 16  ;;  %v4513_v11 = vld [vmem:[%s5961_s1 + $0x168] sm:$0xff]  }
  0xe8   : > { %4216 = vmatpush3.bf16.msra.mxu0 %v4492_v16  ;;  %2890 = vmatprep.mubr.bf16.mxu0 %v3880_v60  ;;  %v1130_v16 = vsel %vm5115_vm9, %v1125_v7, %v1129_v56  ;;  %v1453_v50 = vshll.u32 %v1359_v37, 16  ;;  %v3898_v60 = vcombine.low %v1359_v37, %v5260_v38  ;;  %v1265_v37 = vld [vmem:[#allocation3 + $0x30] sm:$0xe] }
  0xe9   : > { %4217 = vmatprep.subr.bf16.mxu0 %v4495_v29  ;;  %v1142_v29 = vshrl.u32 %v5245_v23, 16  ;;  %v3881_v31 = vcombine.low %v1130_v16, %v1140_v24  ;;  %v1147_v28 = vrot.slane %v1145_v30, 5  ;;  %v5271_v58 = vrot.slane %v1450_v49, 4 }
  0xea   : > { %4280 = vmatpush3.bf16.msra.mxu1 %v4504_v2  ;;  %v3850_v2 = vrot.slane %v1264_v45, 9  ;;  %v4516_v45 = vld [vmem:[%s5961_s1 + $0x198] sm:$0xff]   ;;  %v1474_v49 = vshrl.u32 %v5303_v27, 16 }
  0xeb   : > { %2891 = vmatmul.mubr.bf16.gmra.mrb[4].mxu0 %v3872_v26  ;;  %v5251_v26 = vld [vmem:[#allocation3 + $0x28] sm:$0xf]  ;;  %4281 = vmatprep.subr.bf16.mxu1 %v4508_v14  ;;  %v1144_v22 = vrot.slane %v1142_v29, 4  ;;  %v1062_v14 = vld [vmem:[#allocation3 + $0x38] sm:$0x1] }
  0xec   : > { %4218 = vmatpush3.bf16.msra.mxu0 %v4497_v47  ;;  %2988 = vmatmul.mubr.bf16.gmra.mrb[4].mxu1 %v3888_v3  ;;  %v1151_v35 = vshll.u32 %v5251_v26, 16  ;;  %v1155_v39 = vshrl.u32 %v5251_v26, 16  ;;  %v1316_v47 = vsel %vm5125_vm10, %v1314_v34, %v1315_v21  ;;  %v1319_v3 = vrot.slane %v5251_v26, 5  ;;  %v4514_v21 = vld [vmem:[%s5961_s1 + $0x1d8] sm:$0xff]   ;;  %v4515_v29 = vld [vmem:[%s5961_s1 + $0x128] sm:$0xff]  }
  0xed   : > { %2995 = vmatprep.mubr.bf16.mxu1 %v3897_v41  ;;  %4219 = vmatprep.subr.bf16.mxu0 %v4501_v59  ;;  %v3889_v54 = vcombine.low %v1313_v32, %v1316_v47  ;;  %v1148_v55 = vor.u32 %v1147_v28, %v1144_v22  ;;  %v5273_v59 = vrot.slane %v1453_v50, 5  ;;  %v3874_v7 = vcombine.low %v5245_v23, %v5251_v26  ;;  %v5285_v41 = vld [vmem:[#allocation3 + $0x30] sm:$0xf] }
  0xee   : > { %2898 = vmatprep.mubr.bf16.mxu0 %v3881_v31  ;;  %v1153_v48 = vrot.slane %v1151_v35, 5  ;;  %v1157_v56 = vrot.slane %v1155_v39, 4  ;;  %4282 = vmatpush3.bf16.msra.mxu1 %v4510_v61  ;;  %v1320_v12 = vsel %vm5125_vm10, %v3850_v2, %v1319_v3  ;;  %v1166_v16 = vshrl.u32 %v5285_v41, 16  ;;  %v5310_v35 = vld [vmem:[#allocation3 + $0x40] sm:$0xf] }
  0xef   : > { %v1149_v63 = vrot.slane %v1148_v55, 4  ;;  %v1169_v17 = vshll.u32 %v5285_v41, 16  ;;  %v1185_v26 = vshll.u32 %v1062_v14, 16  ;;  %4283 = vmatprep.subr.bf16.mxu1 %v4514_v21  ;;  %v1463_v22 = vshrl.u32 %v5260_v38, 16 }
  0xf0   : > { %4220 = vmatpush3.bf16.msra.mxu0 %v4503_v10  ;;  %v1158_v1 = vor.u32 %v1157_v56, %v1153_v48  ;;  %v5287_v10 = vld [vmem:[#allocation3 + $0x34] sm:$0xf]  ;;  %v1168_v32 = vrot.slane %v1166_v16, 4  ;;  %v1477_v50 = vshll.u32 %v5303_v27, 16  ;;  %v3899_v55 = vcombine.low %v5303_v27, %v5310_v35  ;;  %v1063_v16 = vld [vmem:[#allocation3 + $0x44] sm:$0x1] }
  0xf1   : > { %4221 = vmatprep.subr.bf16.mxu0 %v4507_v13  ;;  %v1154_v5 = vsel %vm5115_vm9, %v1149_v63, %v1153_v48  ;;  %v1321_v13 = vrot.slane %v1319_v3, 4  ;;  %v1175_v24 = vshll.u32 %v5287_v10, 16  ;;  %v1171_v34 = vrot.slane %v1169_v17, 5  ;;  %v1363_v27 = vld [vmem:[#allocation3 + $0x48] sm:$0xf] }
  0xf2   : > { %v1159_v6 = vrot.slane %v1158_v1, 4  ;;  %v1187_v48 = vrot.slane %v1185_v26, 5  ;;  %v3851_v56 = vrot.slane %v1265_v37, 9  ;;  %v5326_v61 = vrot.slane %v1474_v49, 4  ;;  %4284 = vmatpush3.bf16.msra.mxu1 %v4516_v45 }
  0xf3   : > { %2899 = vmatmul.mubr.bf16.gmra.mrb[8].mxu0 %v3873_v25  ;;  %v1179_v25 = vshrl.u32 %v5287_v10, 16  ;;  %v1323_v31 = vsel %vm5125_vm10, %v1321_v13, %v1322_v4  ;;  %v1177_v39 = vrot.slane %v1175_v24, 5  ;;  %v1172_v47 = vor.u32 %v1171_v34, %v1168_v32  ;;  %v1266_v32 = vld [vmem:[#allocation3 + $0x3c] sm:$0xe]  ;;  %v4522_v34 = vld [vmem:[%s5961_s1 + $0x1a0] sm:$0xff]  }
  0xf4   : > { %4222 = vmatpush3.bf16.msra.mxu0 %v4509_v52  ;;  %2996 = vmatmul.mubr.bf16.gmra.mrb[8].mxu1 %v3889_v54  ;;  %v1164_v23 = vsel %vm5115_vm9, %v1159_v6, %v1163_v57  ;;  %v3890_v28 = vcombine.low %v1320_v12, %v1323_v31  ;;  %v4519_v52 = vld [vmem:[%s5961_s1 + $0x170] sm:$0xff]   ;;  %v4520_v57 = vld [vmem:[%s5961_s1 + $0x1e0] sm:$0xff]   ;;  %v1487_v63 = vshrl.u32 %v5310_v35, 16  ;;  %v1326_v1 = vrot.slane %v5287_v10, 5 }
  0xf5   : > { %3003 = vmatprep.mubr.bf16.mxu1 %v3898_v60  ;;  %4223 = vmatprep.subr.bf16.mxu0 %v4513_v11  ;;  %v3882_v30 = vcombine.low %v1154_v5, %v1164_v23  ;;  %v1181_v42 = vrot.slane %v1179_v25, 4  ;;  %v1173_v60 = vrot.slane %v1172_v47, 4  ;;  %v1329_v3 = vrot.slane %v1062_v14, 5  ;;  %v4521_v11 = vld [vmem:[%s5961_s1 + $0x130] sm:$0xff]   ;;  %v5343_v14 = vld [vmem:[#allocation3 + $0x40] sm:$0xf] }
  0xf6   : > { %4285 = vmatprep.subr.bf16.mxu1 %v4520_v57  ;;  %v1327_v5 = vsel %vm5125_vm10, %v3851_v56, %v1326_v1  ;;  %v1328_v6 = vrot.slane %v1326_v1, 4  ;;  %v3875_v13 = vcombine.low %v5285_v41, %v5287_v10  ;;  %v1199_v25 = vshll.u32 %v5343_v14, 16 }
  0xf7   : > { %2906 = vmatprep.mubr.bf16.mxu0 %v3882_v30  ;;  %v1182_v54 = vor.u32 %v1181_v42, %v1177_v39  ;;  %v1178_v4 = vsel %vm5115_vm9, %v1173_v60, %v1177_v39  ;;  %v1203_v26 = vshrl.u32 %v5343_v14, 16  ;;  %v1209_v31 = vshll.u32 %v1063_v16, 16  ;;  %4286 = vmatpush3.bf16.msra.mxu1 %v4522_v34 }
  0xf8   : > { %4224 = vmatpush3.bf16.msra.mxu0 %v4515_v29  ;;  %v1330_v24 = vsel %vm5125_vm10, %v1328_v6, %v1329_v3  ;;  %v5351_v29 = vld [vmem:[#allocation3 + $0x4c] sm:$0xf]  ;;  %v5356_v37 = vrot.slane %v1477_v50, 5  ;;  %v1498_v42 = vshrl.u32 %v1363_v27, 16  ;;  %v3852_v50 = vrot.slane %v1266_v32, 9 }
  0xf9   : > { %4225 = vmatprep.subr.bf16.mxu0 %v4519_v52  ;;  %v1183_v2 = vrot.slane %v1182_v54, 4  ;;  %v3891_v41 = vcombine.low %v1327_v5, %v1330_v24  ;;  %v1205_v39 = vrot.slane %v1203_v26, 4  ;;  %v1211_v47 = vrot.slane %v1209_v31, 5 }
  0xfa   : > { %v3900_v49 = vcombine.low %v1363_v27, %v5351_v29  ;;  %v5359_v54 = vrot.slane %v1498_v42, 4  ;;  %v1333_v57 = vrot.slane %v5343_v14, 5  ;;  %v1336_v60 = vrot.slane %v1063_v16, 5 }
  0xfb   : > { %2907 = vmatmul.mubr.bf16.gmra.mrb[12].mxu0 %v3874_v7  ;;  %v5334_v7 = vld [vmem:[#allocation3 + $0x3c] sm:$0xf]  ;;  %v1188_v12 = vsel %vm5115_vm9, %v1183_v2, %v1187_v48  ;;  %v1501_v48 = vshll.u32 %v1363_v27, 16  ;;  %v4523_v2 = vld [vmem:[%s5961_s1 + $0x1e8] sm:$0xff]  }
  0xfc   : > { %3004 = vmatmul.mubr.bf16.gmra.mrb[12].mxu1 %v3890_v28  ;;  %v1190_v17 = vshrl.u32 %v5334_v7, 16  ;;  %v1193_v21 = vshll.u32 %v5334_v7, 16  ;;  %v3883_v23 = vcombine.low %v1178_v4, %v1188_v12  ;;  %4226 = vmatpush3.bf16.msra.mxu0 %v4521_v11  ;;  %v1201_v28 = vrot.slane %v1199_v25, 5  ;;  %v5372_v11 = vld [vmem:[#allocation3 + $0x48] sm:$0xf] }
  0xfd   : > { %3011 = vmatprep.mubr.bf16.mxu1 %v3899_v55  ;;  %v1511_v55 = vshrl.u32 %v5351_v29, 16  ;;  %v3876_v4 = vcombine.low %v5334_v7, %v5343_v14  ;;  %v1334_v5 = vsel %vm5125_vm10, %v3852_v50, %v1333_v57  ;;  %v1335_v6 = vrot.slane %v1333_v57, 4  ;;  %v5374_v12 = vld [vmem:[#allocation3 + $0x4c] sm:$0xf]  ;;  %4287 = vmatprep.subr.bf16.mxu1 %v4523_v2  ;;  %v4529_v57 = vld [vmem:[%s5961_s1 + $0x138] sm:$0xff]  }
  0xfe   : > { %v1192_v10 = vrot.slane %v1190_v17, 4  ;;  %v1195_v30 = vrot.slane %v1193_v21, 5  ;;  %2914 = vmatprep.mubr.bf16.mxu0 %v3883_v23  ;;  %v1206_v52 = vor.u32 %v1205_v39, %v1201_v28  ;;  %v1064_v17 = vld [vmem:[#allocation3 + $0x50] sm:$0x1]  ;;  %v1214_v21 = vshrl.u32 %v5372_v11, 16  ;;  %v4527_v23 = vld [vmem:[%s5961_s1 + $0x178] sm:$0xff]  }
  0xff   : > { %v1217_v7 = vshll.u32 %v5372_v11, 16  ;;  %v1223_v14 = vshll.u32 %v5374_v12, 16  ;;  %v1337_v25 = vsel %vm5125_vm10, %v1335_v6, %v1336_v60  ;;  %v1227_v26 = vshrl.u32 %v5374_v12, 16  ;;  %4227 = vmatprep.subr.bf16.mxu0 %v4527_v23  ;;  %v4528_v39 = vld [vmem:[%s5961_s1 + $0x1f0] sm:$0xff]   ;;  %v1370_v2 = vld [vmem:[#allocation3 + $0x20] sm:$0x1] }
 0x100   : > { %v1196_v45 = vor.u32 %v1195_v30, %v1192_v10  ;;  %v1207_v1 = vrot.slane %v1206_v52, 4  ;;  %v1233_v27 = vshll.u32 %v1064_v17, 16  ;;  %v5390_v10 = vld [vmem:[#allocation3 + $0x58] sm:$0xf]  ;;  %v3892_v30 = vcombine.low %v1334_v5, %v1337_v25  ;;  %4228 = vmatpush3.bf16.msra.mxu0 %v4529_v57 }
 0x101   : > { %v1216_v31 = vrot.slane %v1214_v21, 4  ;;  %v1219_v32 = vrot.slane %v1217_v7, 5  ;;  %v1225_v34 = vrot.slane %v1223_v14, 5  ;;  %v5395_v42 = vrot.slane %v1501_v48, 5  ;;  %v4532_v21 = vld [vmem:[%s5961_s1 + $0x1b8] sm:$0xff]  }
 0x102   : > { %v1197_v56 = vrot.slane %v1196_v45, 4  ;;  %v1212_v16 = vsel %vm5115_vm9, %v1207_v1, %v1211_v47  ;;  %v1229_v45 = vrot.slane %v1227_v26, 4  ;;  %v1235_v47 = vrot.slane %v1233_v27, 5 }
 0x103   : > { %2915 = vmatmul.mubr.bf16.gmra.mrb[16].mxu0 %v3875_v13  ;;  %v4524_v13 = vld [vmem:[%s5961_s1 + $0x1a8] sm:$0xff]   ;;  %v1220_v52 = vor.u32 %v1219_v32, %v1216_v31  ;;  %v1340_v5 = vrot.slane %v5374_v12, 5  ;;  %v1343_v6 = vrot.slane %v1064_v17, 5  ;;  %v3877_v25 = vcombine.low %v5372_v11, %v5374_v12  ;;  %v1065_v31 = vld [vmem:[#allocation3 + $0x5c] sm:$0x1]  ;;  %v5436_v11 = vld [vmem:[%s5961_s1 + $0x200] sm:$0xff]  }
 0x104   : > { %3012 = vmatmul.mubr.bf16.gmra.mrb[16].mxu1 %v3891_v41  ;;  %v1202_v3 = vsel %vm5115_vm9, %v1197_v56, %v1201_v28  ;;  %v1365_v41 = vld [vmem:[#allocation3 + $0x54] sm:$0xf]  ;;  %v1267_v28 = vld [vmem:[#allocation3 + $0x48] sm:$0xe]  ;;  %v1230_v60 = vor.u32 %v1229_v45, %v1225_v34  ;;  %v1367_v45 = vld [vmem:[#allocation3 + $0x60] sm:$0xf]  ;;  %4357 = vmatprep.subr.bf16.mxu0 %v5436_v11 }
 0x105   : > { %3019 = vmatprep.mubr.bf16.mxu1 %v3900_v49  ;;  %v3884_v24 = vcombine.low %v1202_v3, %v1212_v16  ;;  %4288 = vmatpush3.bf16.msra.mxu1 %v4524_v13  ;;  %v1522_v49 = vshrl.u32 %v1365_v41, 16  ;;  %v1525_v56 = vshll.u32 %v1365_v41, 16  ;;  %v3901_v50 = vcombine.low %v1365_v41, %v5390_v10  ;;  %v4530_v3 = vld [vmem:[%s5961_s1 + $0x1b0] sm:$0xff]   ;;  %v4531_v13 = vld [vmem:[%s5961_s1 + $0x1f8] sm:$0xff]  }
 0x106   : > { %v3853_v48 = vrot.slane %v1267_v28, 9  ;;  %4289 = vmatprep.subr.bf16.mxu1 %v4528_v39  ;;  %v1231_v16 = vrot.slane %v1230_v60, 4  ;;  %v1342_v17 = vrot.slane %v1340_v5, 4  ;;  %v5426_v41 = vld [vmem:[#allocation3 + $0x54] sm:$0xf] }
 0x107   : > { %2922 = vmatprep.mubr.bf16.mxu0 %v3884_v24  ;;  %v5401_v1 = vrot.slane %v1522_v49, 4  ;;  %v5416_v14 = vrot.slane %v1525_v56, 5  ;;  %v1241_v28 = vshll.u32 %v5426_v41, 16  ;;  %v5439_v49 = vld [vmem:[#allocation3 + $0x64] sm:$0xf]  ;;  %v1549_v56 = vshll.u32 %v1367_v45, 16 }
 0x108   : > { %v1341_v23 = vsel %vm5125_vm10, %v3853_v48, %v1340_v5  ;;  %v1236_v24 = vsel %vm5115_vm9, %v1231_v16, %v1235_v47  ;;  %v1344_v27 = vsel %vm5125_vm10, %v1342_v17, %v1343_v6  ;;  %v1257_v47 = vshll.u32 %v1065_v31, 16  ;;  %v1268_v48 = vld [vmem:[#allocation3 + $0x54] sm:$0xe] }
 0x109   : > { %4290 = vmatpush3.bf16.msra.mxu1 %v4530_v3  ;;  %v3893_v32 = vcombine.low %v1341_v23, %v1344_v27  ;;  %v1243_v57 = vrot.slane %v1241_v28, 5  ;;  %v1605_v3 = vrot.slane %v1603_v43, 4  ;;  %v3854_v23 = vrot.slane %v1268_v48, 9 }
 0x10a   : > { %4291 = vmatprep.subr.bf16.mxu1 %v4531_v13  ;;  %v1259_v5 = vrot.slane %v1257_v47, 5  ;;  %v1610_v27 = vrot.slane %v5152_v62, 5  ;;  %v1480_v47 = vor.u32 %v5356_v37, %v5326_v61  ;;  %v5479_v13 = vld [vmem:[#allocation3 + $0x1c] sm:$0xf] }
 0x10b   : > { %2923 = vmatmul.mubr.bf16.gmra.mrb[20].mxu0 %v3876_v4  ;;  %v1221_v4 = vrot.slane %v1220_v52, 4  ;;  %v1546_v52 = vshrl.u32 %v1367_v45, 16 }
 0x10c   : > { %3020 = vmatmul.mubr.bf16.gmra.mrb[20].mxu1 %v3892_v30  ;;  %v5428_v30 = vld [vmem:[#allocation3 + $0x58] sm:$0xf] }
 0x10d   : > { %3027 = vmatprep.mubr.bf16.mxu1 %v3901_v50  ;;  %v1226_v7 = vsel %vm5115_vm9, %v1221_v4, %v1225_v34  ;;  %v1238_v34 = vshrl.u32 %v5426_v41, 16  ;;  %v1247_v39 = vshll.u32 %v5428_v30, 16  ;;  %4292 = vmatpush3.bf16.msra.mxu1 %v4532_v21  ;;  %v1251_v12 = vshrl.u32 %v5428_v30, 16 }
 0x10e   : > { %v3885_v26 = vcombine.low %v1226_v7, %v1236_v24  ;;  %v5443_v6 = vrot.slane %v1546_v52, 4  ;;  %4389 = vmatprep.subr.bf16.mxu1 %v5436_v11  ;;  %v5448_v21 = vrot.slane %v1549_v56, 5  ;;  %v3902_v7 = vcombine.low %v1367_v45, %v5439_v49 }
 0x10f   : > { %v1240_v50 = vrot.slane %v1238_v34, 4  ;;  %v1249_v60 = vrot.slane %v1247_v39, 5  ;;  %v1253_v4 = vrot.slane %v1251_v12, 4  ;;  %v1347_v24 = vrot.slane %v5428_v30, 5 }
 0x110   : > { %2930 = vmatprep.mubr.bf16.mxu0 %v3885_v26  ;;  %v1432_v34 = vor.u32 %v5269_v53, %v5227_v8  ;;  %v1456_v12 = vor.u32 %v5273_v59, %v5271_v58  ;;  %v1504_v52 = vor.u32 %v5395_v42, %v5359_v54  ;;  %v5626_v58 = vld [vmem:[#allocation3 + $0x44] sm:$0x1]  ;;  %v5628_v59 = vld [vmem:[#allocation3 + $0x48] sm:$0xf]  ;;  %v5709_v54 = vld [vmem:[#allocation3 + $0x60] sm:$0xf] }
 0x111   : > { %v1244_v16 = vor.u32 %v1243_v57, %v1240_v50  ;;  %v1254_v17 = vor.u32 %v1253_v4, %v1249_v60  ;;  %v1348_v39 = vsel %vm5125_vm10, %v3854_v23, %v1347_v24  ;;  %v1349_v45 = vrot.slane %v1347_v24, 4  ;;  %v1369_v4 = vld [vmem:[#allocation3 + $0x14] sm:$0x1] }
 0x112   : > { %v3878_v57 = vcombine.low %v5426_v41, %v5428_v30  ;;  %v1397_v24 = vshll.u32 %v1369_v4, 16  ;;  %v1493_v61 = vshll.u32 %v5626_v58, 16 }
 0x113   : > { %2931 = vmatmul.mubr.bf16.gmra.mrb[24].mxu0 %v3877_v25  ;;  %v1350_v25 = vrot.slane %v1065_v31, 5  ;;  %v1245_v26 = vrot.slane %v1244_v16, 4  ;;  %v1255_v28 = vrot.slane %v1254_v17, 4  ;;  %v5475_v16 = vld [vmem:[#allocation3 + $0x18] sm:$0xf] }
 0x114   : > { %3028 = vmatmul.mubr.bf16.gmra.mrb[24].mxu1 %v3893_v32  ;;  %v1408_v32 = vor.u32 %v5177_v19, %v5175_v18  ;;  %v1683_v41 = vshrl.u32 %v5475_v16, 16  ;;  %v1686_v30 = vshll.u32 %v5475_v16, 16 }
 0x115   : > { %3035 = vmatprep.mubr.bf16.mxu1 %v3902_v7  ;;  %v1250_v31 = vsel %vm5115_vm9, %v1245_v26, %v1249_v60  ;;  %v1260_v50 = vsel %vm5115_vm9, %v1255_v28, %v1259_v5  ;;  %v1351_v48 = vsel %vm5125_vm10, %v1349_v45, %v1350_v25  ;;  %v1569_v60 = vld [vmem:[#allocation3 + $0xc] sm:$0xe]  ;;  %v5481_v5 = vld [vmem:[#allocation3 + $0x20] sm:$0x1]  ;;  %v1606_v28 = vrot.slane %v1369_v4, 5 }
 0x116   : > { %v3886_v23 = vcombine.low %v1250_v31, %v1260_v50  ;;  %v3894_v17 = vcombine.low %v1348_v39, %v1351_v48  ;;  %v3855_v26 = vrot.slane %v1569_v60, 9  ;;  %v1692_v25 = vshll.u32 %v5479_v13, 16 }
 0x117   : > { %v1399_v45 = vrot.slane %v1397_v24, 5  ;;  %v1696_v31 = vshrl.u32 %v5479_v13, 16  ;;  %v1702_v50 = vshll.u32 %v5481_v5, 16  ;;  %v1607_v48 = vsel %vm5125_vm10, %v1605_v3, %v1606_v28 }
 0x118   : > { %2938 = vmatprep.mubr.bf16.mxu0 %v3886_v23  ;;  %v1604_v39 = vsel %vm5125_vm10, %v3855_v26, %v1603_v43  ;;  %v1685_v4 = vrot.slane %v1683_v41, 4  ;;  %v1688_v60 = vrot.slane %v1686_v30, 5  ;;  %v1694_v7 = vrot.slane %v1692_v25, 5  ;;  %v1570_v43 = vld [vmem:[#allocation3 + $0x18] sm:$0xe] }
 0x119   : > { %v3911_v23 = vcombine.low %v1604_v39, %v1607_v48  ;;  %v1704_v24 = vrot.slane %v1702_v50, 5  ;;  %v1400_v20 = vsel %vm5115_vm9, %v5158_v40, %v1399_v45  ;;  %v5497_v26 = vld [vmem:[#allocation3 + $0x24] sm:$0xf]  ;;  %v3856_v28 = vrot.slane %v1570_v43, 9  ;;  %v5506_v41 = vld [vmem:[#allocation3 + $0x28] sm:$0xf] }
 0x11a   : > { %v1689_v56 = vor.u32 %v1688_v60, %v1685_v4  ;;  %v3903_v3 = vcombine.low %v1390_v0, %v1400_v20  ;;  %v5508_v30 = vld [vmem:[#allocation3 + $0x2c] sm:$0x1]  ;;  %v1612_v25 = vrot.slane %v1610_v27, 4  ;;  %v1613_v45 = vrot.slane %v1370_v2, 5 }
 0x11b   : > { %2939 = vmatmul.mubr.bf16.gmra.mrb[28].mxu0 %v3878_v57  ;;  %v3919_v57 = vcombine.low %v5475_v16, %v5479_v13  ;;  %v1707_v39 = vshrl.u32 %v5497_v26, 16  ;;  %v1611_v50 = vsel %vm5125_vm10, %v3856_v28, %v1610_v27  ;;  %v1710_v36 = vshll.u32 %v5497_v26, 16  ;;  %v4536_v27 = vld [vmem:[%s5961_s1 + $0x208] sm:$0xff]  }
 0x11c   : > { %3036 = vmatmul.mubr.bf16.gmra.mrb[28].mxu1 %v3894_v17  ;;  %v1698_v17 = vrot.slane %v1696_v31, 4  ;;  %3076 = vmatprep.mubr.bf16.mxu0 %v3911_v23  ;;  %v1690_v31 = vrot.slane %v1689_v56, 4  ;;  %v1716_v51 = vshll.u32 %v5506_v41, 16  ;;  %v1614_v16 = vsel %vm5125_vm10, %v1612_v25, %v1613_v45  ;;  %v5523_v20 = vld [vmem:[#allocation3 + $0x2c] sm:$0x1] }
 0x11d   : > { %v1709_v48 = vrot.slane %v1707_v39, 4  ;;  %v1720_v4 = vshrl.u32 %v5506_v41, 16  ;;  %v3912_v23 = vcombine.low %v1611_v50, %v1614_v16  ;;  %v1918_v25 = vrot.slane %v5508_v30, 5  ;;  %v1571_v45 = vld [vmem:[#allocation3 + $0x24] sm:$0xe] }
 0x11e   : > { %v1699_v40 = vor.u32 %v1698_v17, %v1694_v7  ;;  %v1695_v60 = vsel %vm5115_vm9, %v1690_v31, %v1694_v7  ;;  %v1712_v17 = vrot.slane %v1710_v36, 5  ;;  %v1718_v56 = vrot.slane %v1716_v51, 5  ;;  %v5533_v36 = vld [vmem:[#allocation3 + $0x30] sm:$0xf] }
 0x11f   : > { %v1722_v28 = vrot.slane %v1720_v4, 4  ;;  %v1409_v31 = vrot.slane %v1408_v32, 4  ;;  %v1411_v50 = vshll.u32 %v5152_v62, 16  ;;  %v1421_v16 = vshll.u32 %v1370_v2, 16  ;;  %v4538_v32 = vld [vmem:[%s5961_s1 + $0x210] sm:$0xff]  }
 0x120   : > { %v1700_v0 = vrot.slane %v1699_v40, 4  ;;  %v1726_v40 = vshll.u32 %v5508_v30, 16  ;;  %v1713_v7 = vor.u32 %v1712_v17, %v1709_v48  ;;  %v3920_v18 = vcombine.low %v5497_v26, %v5506_v41 }
 0x121   : > { %v1413_v48 = vrot.slane %v1411_v50, 5  ;;  %v3857_v19 = vrot.slane %v1571_v45, 9  ;;  %v1620_v62 = vrot.slane %v5523_v20, 5  ;;  %v1445_v8 = vshll.u32 %v5523_v20, 16 }
 0x122   : > { %v1705_v43 = vsel %vm5115_vm9, %v1700_v0, %v1704_v24  ;;  %v1723_v24 = vor.u32 %v1722_v28, %v1718_v56  ;;  %v1728_v51 = vrot.slane %v1726_v40, 5  ;;  %v1417_v0 = vrot.slane %v1415_v15, 4  ;;  %v5545_v15 = vld [vmem:[#allocation3 + $0x34] sm:$0xf] }
 0x123   : > { %v3927_v39 = vcombine.low %v1695_v60, %v1705_v43  ;;  %3077 = vmatmul.mubr.bf16.vlgmr.msra.gmra.mrb[32].mxu0 %v3903_v3  ;;  %v1714_v3 = vrot.slane %v1713_v7, 4  ;;  %v1423_v60 = vrot.slane %v1421_v16, 5  ;;  %v1414_v26 = vsel %vm5115_vm9, %v1409_v31, %v1413_v48  ;;  %v5551_v43 = vld [vmem:[#allocation3 + $0x38] sm:$0x1] }
 0x124   : > { %4358 = vmatpush3.bf16.msra.mxu0 %v5436_v11  ;;  %3084 = vmatprep.mubr.bf16.mxu0 %v3912_v23  ;;  %v1724_v4 = vrot.slane %v1723_v24, 4  ;;  %v1617_v23 = vrot.slane %v5204_v46, 5  ;;  %v1418_v17 = vor.u32 %v1417_v0, %v1413_v48  ;;  %v1731_v28 = vshrl.u32 %v5533_v36, 16 }
 0x125   : > { %3173 = vmatprep.mubr.bf16.mxu1 %v3927_v39  ;;  %4359 = vmatprep.subr.bf16.mxu0 %v4536_v27  ;;  %v1719_v2 = vsel %vm5115_vm9, %v1714_v3, %v1718_v56  ;;  %v1734_v56 = vshll.u32 %v5533_v36, 16  ;;  %v1740_v50 = vshll.u32 %v5545_v15, 16  ;;  %v1744_v0 = vshrl.u32 %v5545_v15, 16 }
 0x126   : > { %3174 = vmatmul.mubr.bf16.vlgmr.msra.gmra.mrb[32].mxu1 %v3919_v57  ;;  %v1729_v57 = vsel %vm5115_vm9, %v1724_v4, %v1728_v51  ;;  %v1618_v40 = vsel %vm5125_vm10, %v3857_v19, %v1617_v23  ;;  %v1619_v45 = vrot.slane %v1617_v23, 4  ;;  %v1419_v7 = vrot.slane %v1418_v17, 4  ;;  %v1572_v23 = vld [vmem:[#allocation3 + $0x30] sm:$0xe] }
 0x127   : > { %4397 = vmatpush3.bf16.msra.mxu1 %v5436_v11  ;;  %v3928_v39 = vcombine.low %v1719_v2, %v1729_v57  ;;  %v1733_v31 = vrot.slane %v1731_v28, 4  ;;  %v4540_v11 = vld [vmem:[%s5961_s1 + $0x218] sm:$0xff]   ;;  %v1736_v51 = vrot.slane %v1734_v56, 5  ;;  %v1750_v16 = vshll.u32 %v5551_v43, 16 }
 0x128   : > { %4360 = vmatpush3.bf16.msra.mxu0 %v4536_v27  ;;  %4390 = vmatprep.subr.bf16.mxu1 %v4536_v27  ;;  %v1621_v24 = vsel %vm5125_vm10, %v1619_v45, %v1620_v62  ;;  %v1424_v3 = vsel %vm5115_vm9, %v1419_v7, %v1423_v60  ;;  %v1742_v19 = vrot.slane %v1740_v50, 5  ;;  %v5573_v4 = vrot.slane %v1432_v34, 4  ;;  %v5575_v57 = vld [vmem:[#allocation3 + $0x38] sm:$0x1]  ;;  %v5577_v45 = vld [vmem:[#allocation3 + $0x3c] sm:$0xf] }
 0x129   : > { %4361 = vmatprep.subr.bf16.mxu0 %v4538_v32  ;;  %3181 = vmatprep.mubr.bf16.mxu1 %v3928_v39  ;;  %v3913_v48 = vcombine.low %v1618_v40, %v1621_v24  ;;  %v3904_v2 = vcombine.low %v1414_v26, %v1424_v3  ;;  %v1737_v62 = vor.u32 %v1736_v51, %v1733_v31  ;;  %v1746_v17 = vrot.slane %v1744_v0, 4  ;;  %v4542_v34 = vld [vmem:[%s5961_s1 + $0x220] sm:$0xff]  }
 0x12a   : > { %v1752_v28 = vrot.slane %v1750_v16, 5  ;;  %v1435_v60 = vshll.u32 %v5204_v46, 16  ;;  %v1441_v40 = vrot.slane %v1439_v9, 4  ;;  %v3921_v53 = vcombine.low %v5533_v36, %v5545_v15  ;;  %v5590_v7 = vld [vmem:[#allocation3 + $0x40] sm:$0xf] }
 0x12b   : > { %4398 = vmatpush3.bf16.msra.mxu1 %v4536_v27  ;;  %3085 = vmatmul.mubr.bf16.gmra.mrb[36].mxu0 %v3904_v2  ;;  %v1738_v27 = vrot.slane %v1737_v62, 4  ;;  %v1747_v26 = vor.u32 %v1746_v17, %v1742_v19  ;;  %v3858_v56 = vrot.slane %v1572_v23, 9  ;;  %v1624_v39 = vrot.slane %v5260_v38, 5  ;;  %v5600_v16 = vld [vmem:[#allocation3 + $0x44] sm:$0x1] }
 0x12c   : > { %4362 = vmatpush3.bf16.msra.mxu0 %v4538_v32  ;;  %4391 = vmatprep.subr.bf16.mxu1 %v4538_v32  ;;  %v1437_v46 = vrot.slane %v1435_v60, 5  ;;  %v1447_v9 = vrot.slane %v1445_v8, 5  ;;  %v1627_v20 = vrot.slane %v5575_v57, 5  ;;  %v1755_v36 = vshrl.u32 %v5577_v45, 16 }
 0x12d   : > { %4363 = vmatprep.subr.bf16.mxu0 %v4540_v11  ;;  %3092 = vmatprep.mubr.bf16.mxu0 %v3913_v48  ;;  %v1743_v31 = vsel %vm5115_vm9, %v1738_v27, %v1742_v19  ;;  %v1748_v50 = vrot.slane %v1747_v26, 4  ;;  %v1626_v24 = vrot.slane %v1624_v39, 4  ;;  %v4544_v48 = vld [vmem:[%s5961_s1 + $0x228] sm:$0xff]   ;;  %v1764_v2 = vshll.u32 %v5590_v7, 16 }
 0x12e   : > { %3182 = vmatmul.mubr.bf16.gmra.mrb[36].mxu1 %v3920_v18  ;;  %v1625_v18 = vsel %vm5125_vm10, %v3858_v56, %v1624_v39  ;;  %v1438_v51 = vsel %vm5115_vm9, %v5573_v4, %v1437_v46  ;;  %v1442_v0 = vor.u32 %v1441_v40, %v1437_v46  ;;  %v1757_v3 = vrot.slane %v1755_v36, 4  ;;  %v1573_v56 = vld [vmem:[#allocation3 + $0x3c] sm:$0xe]  ;;  %v5619_v39 = vld [vmem:[%s5961_s1 + $0x230] sm:$0xff]  }
 0x12f   : > { %4399 = vmatpush3.bf16.msra.mxu1 %v4538_v32  ;;  %v1758_v32 = vshll.u32 %v5577_v45, 16  ;;  %v1753_v19 = vsel %vm5115_vm9, %v1748_v50, %v1752_v28  ;;  %v1628_v23 = vsel %vm5125_vm10, %v1626_v24, %v1627_v20  ;;  %v1768_v4 = vshrl.u32 %v5590_v7, 16 }
 0x130   : > { %4364 = vmatpush3.bf16.msra.mxu0 %v4540_v11  ;;  %4392 = vmatprep.subr.bf16.mxu1 %v4540_v11  ;;  %v3929_v62 = vcombine.low %v1743_v31, %v1753_v19  ;;  %v1443_v17 = vrot.slane %v1442_v0, 4  ;;  %v3914_v60 = vcombine.low %v1625_v18, %v1628_v23  ;;  %v1766_v8 = vrot.slane %v1764_v2, 5  ;;  %v5641_v23 = vld [vmem:[#allocation3 + $0x50] sm:$0x1] }
 0x131   : > { %4365 = vmatprep.subr.bf16.mxu0 %v4542_v34  ;;  %v1760_v40 = vrot.slane %v1758_v32, 5  ;;  %v1770_v27 = vrot.slane %v1768_v4, 4  ;;  %v1774_v26 = vshll.u32 %v5600_v16, 16  ;;  %v1457_v28 = vrot.slane %v1456_v12, 4 }
 0x132   : > { %3189 = vmatprep.mubr.bf16.mxu1 %v3929_v62  ;;  %v1459_v20 = vshll.u32 %v5260_v38, 16  ;;  %v1465_v36 = vrot.slane %v1463_v22, 4  ;;  %v1469_v18 = vshll.u32 %v5575_v57, 16  ;;  %v1631_v32 = vrot.slane %v5310_v35, 5 }
 0x133   : > { %4400 = vmatpush3.bf16.msra.mxu1 %v4540_v11  ;;  %v1448_v11 = vsel %vm5115_vm9, %v1443_v17, %v1447_v9  ;;  %v1761_v46 = vor.u32 %v1760_v40, %v1757_v3  ;;  %v1771_v31 = vor.u32 %v1770_v27, %v1766_v8  ;;  %v1776_v50 = vrot.slane %v1774_v26, 5 }
 0x134   : > { %4366 = vmatpush3.bf16.msra.mxu0 %v4542_v34  ;;  %4393 = vmatprep.subr.bf16.mxu1 %v4542_v34  ;;  %v3905_v12 = vcombine.low %v1438_v51, %v1448_v11  ;;  %v1461_v0 = vrot.slane %v1459_v20, 5  ;;  %v3922_v9 = vcombine.low %v5577_v45, %v5590_v7  ;;  %v3859_v3 = vrot.slane %v1573_v56, 9  ;;  %v5635_v51 = vld [vmem:[#allocation3 + $0x4c] sm:$0xf] }
 0x135   : > { %4367 = vmatprep.subr.bf16.mxu0 %v4544_v48  ;;  %v1762_v24 = vrot.slane %v1761_v46, 4  ;;  %v1772_v38 = vrot.slane %v1771_v31, 4  ;;  %v1471_v22 = vrot.slane %v1469_v18, 5  ;;  %v1634_v19 = vrot.slane %v5626_v58, 5  ;;  %v1574_v31 = vld [vmem:[#allocation3 + $0x48] sm:$0xe] }
 0x136   : > { %3190 = vmatmul.mubr.bf16.gmra.mrb[40].mxu1 %v3921_v53  ;;  %3093 = vmatmul.mubr.bf16.gmra.mrb[40].mxu0 %v3905_v12  ;;  %v1462_v53 = vsel %vm5115_vm9, %v1457_v28, %v1461_v0  ;;  %v1466_v45 = vor.u32 %v1465_v36, %v1461_v0  ;;  %v1632_v4 = vsel %vm5125_vm10, %v3859_v3, %v1631_v32  ;;  %v1633_v62 = vrot.slane %v1631_v32, 4  ;;  %v5665_v3 = vld [vmem:[#allocation3 + $0x50] sm:$0x1] }
 0x137   : > { %4401 = vmatpush3.bf16.msra.mxu1 %v4542_v34  ;;  %3100 = vmatprep.mubr.bf16.mxu0 %v3914_v60  ;;  %v1767_v57 = vsel %vm5115_vm9, %v1762_v24, %v1766_v8  ;;  %v1779_v34 = vshrl.u32 %v5628_v59, 16  ;;  %v1777_v2 = vsel %vm5115_vm9, %v1772_v38, %v1776_v50  ;;  %v1782_v17 = vshll.u32 %v5628_v59, 16  ;;  %v4548_v60 = vld [vmem:[%s5961_s1 + $0x238] sm:$0xff]   ;;  %v5667_v38 = vld [vmem:[#allocation3 + $0x54] sm:$0xf] }
 0x138   : > { %4394 = vmatprep.subr.bf16.mxu1 %v4544_v48  ;;  %4368 = vmatpush3.bf16.msra.mxu0 %v4544_v48  ;;  %v3930_v40 = vcombine.low %v1767_v57, %v1777_v2  ;;  %v1467_v8 = vrot.slane %v1466_v45, 4  ;;  %v1788_v26 = vshll.u32 %v5635_v51, 16  ;;  %v1635_v28 = vsel %vm5125_vm10, %v1633_v62, %v1634_v19 }
 0x139   : > { %4369 = vmatprep.subr.bf16.mxu0 %v5619_v39  ;;  %v1781_v27 = vrot.slane %v1779_v34, 4  ;;  %v1784_v56 = vrot.slane %v1782_v17, 5  ;;  %v1792_v11 = vshrl.u32 %v5635_v51, 16  ;;  %v1798_v46 = vshll.u32 %v5641_v23, 16  ;;  %v5687_v17 = vld [vmem:[#allocation3 + $0x5c] sm:$0x1] }
 0x13a   : > { %3197 = vmatprep.mubr.bf16.mxu1 %v3930_v40  ;;  %v1472_v20 = vsel %vm5115_vm9, %v1467_v8, %v1471_v22  ;;  %v3915_v36 = vcombine.low %v1632_v4, %v1635_v28  ;;  %v1790_v12 = vrot.slane %v1788_v26, 5  ;;  %v1483_v22 = vshll.u32 %v5310_v35, 16 }
 0x13b   : > { %4402 = vmatpush3.bf16.msra.mxu1 %v4544_v48  ;;  %v1481_v48 = vrot.slane %v1480_v47, 4  ;;  %v3906_v50 = vcombine.low %v1462_v53, %v1472_v20  ;;  %v1785_v18 = vor.u32 %v1784_v56, %v1781_v27  ;;  %v1794_v24 = vrot.slane %v1792_v11, 4 }
 0x13c   : > { %4395 = vmatprep.subr.bf16.mxu1 %v5619_v39  ;;  %4370 = vmatpush3.bf16.msra.mxu0 %v5619_v39  ;;  %v1800_v0 = vrot.slane %v1798_v46, 5  ;;  %v1489_v32 = vrot.slane %v1487_v63, 4  ;;  %v3923_v37 = vcombine.low %v5628_v59, %v5635_v51  ;;  %v3860_v19 = vrot.slane %v1574_v31, 9  ;;  %v5678_v63 = vld [vmem:[#allocation3 + $0x58] sm:$0xf] }
 0x13d   : > { %4371 = vmatprep.subr.bf16.mxu0 %v4548_v60  ;;  %v1786_v47 = vrot.slane %v1785_v18, 4  ;;  %v1638_v57 = vrot.slane %v5351_v29, 5  ;;  %v1485_v53 = vrot.slane %v1483_v22, 5  ;;  %v1495_v45 = vrot.slane %v1493_v61, 5  ;;  %v1375_v22 = vld [vmem:[#allocation3 + $0x5c] sm:$0x1] }
 0x13e   : > { %3198 = vmatmul.mubr.bf16.gmra.mrb[44].mxu1 %v3922_v9  ;;  %3101 = vmatmul.mubr.bf16.gmra.mrb[44].mxu0 %v3906_v50  ;;  %v1795_v9 = vor.u32 %v1794_v24, %v1790_v12  ;;  %v1641_v35 = vrot.slane %v5665_v3, 5  ;;  %v1803_v58 = vshrl.u32 %v5667_v38, 16  ;;  %v1806_v8 = vshll.u32 %v5667_v38, 16 }
 0x13f   : > { %4403 = vmatpush3.bf16.msra.mxu1 %v5619_v39  ;;  %3108 = vmatprep.mubr.bf16.mxu0 %v3915_v36  ;;  %v1791_v39 = vsel %vm5115_vm9, %v1786_v47, %v1790_v12  ;;  %v1639_v34 = vsel %vm5125_vm10, %v3860_v19, %v1638_v57  ;;  %v1640_v2 = vrot.slane %v1638_v57, 4  ;;  %v1486_v4 = vsel %vm5115_vm9, %v1481_v48, %v1485_v53 }
 0x140   : > { %4396 = vmatprep.subr.bf16.mxu1 %v4548_v60  ;;  %4372 = vmatpush3.bf16.msra.mxu0 %v4548_v60  ;;  %v1796_v59 = vrot.slane %v1795_v9, 4  ;;  %v1490_v62 = vor.u32 %v1489_v32, %v1485_v53  ;;  %v1805_v40 = vrot.slane %v1803_v58, 4  ;;  %v1812_v28 = vshll.u32 %v5678_v63, 16  ;;  %v1575_v32 = vld [vmem:[#allocation3 + $0x54] sm:$0xe] }
 0x141   : > { %v1642_v26 = vsel %vm5125_vm10, %v1640_v2, %v1641_v35  ;;  %v1816_v56 = vshrl.u32 %v5678_v63, 16  ;;  %v1808_v36 = vrot.slane %v1806_v8, 5  ;;  %v1822_v31 = vshll.u32 %v5687_v17, 16 }
 0x142   : > { %v1801_v27 = vsel %vm5115_vm9, %v1796_v59, %v1800_v0  ;;  %v1491_v46 = vrot.slane %v1490_v62, 4  ;;  %v3916_v20 = vcombine.low %v1639_v34, %v1642_v26  ;;  %v1814_v12 = vrot.slane %v1812_v28, 5 }
 0x143   : > { %4404 = vmatpush3.bf16.msra.mxu1 %v4548_v60  ;;  %v3931_v11 = vcombine.low %v1791_v39, %v1801_v27  ;;  %v1818_v48 = vrot.slane %v1816_v56, 4  ;;  %v1946_v60 = vrot.slane %v5687_v17, 5  ;;  %v1809_v18 = vor.u32 %v1808_v36, %v1805_v40  ;;  %v5712_v39 = vld [vmem:[#allocation3 + $0x64] sm:$0xf] }
 0x144   : > { %v1496_v50 = vsel %vm5115_vm9, %v1491_v46, %v1495_v45  ;;  %v1505_v24 = vrot.slane %v1504_v52, 4  ;;  %v1507_v0 = vshll.u32 %v5351_v29, 16  ;;  %v1824_v9 = vrot.slane %v1822_v31, 5  ;;  %v1576_v31 = vld [vmem:[#allocation3 + $0x60] sm:$0xe] }
 0x145   : > { %3205 = vmatprep.mubr.bf16.mxu1 %v3931_v11  ;;  %v3907_v61 = vcombine.low %v1486_v4, %v1496_v50  ;;  %v1819_v47 = vor.u32 %v1818_v48, %v1814_v12  ;;  %v1513_v19 = vrot.slane %v1511_v55, 4  ;;  %v1810_v57 = vrot.slane %v1809_v18, 4 }
 0x146   : > { %3206 = vmatmul.mubr.bf16.gmra.mrb[48].mxu1 %v3923_v37  ;;  %v1509_v53 = vrot.slane %v1507_v0, 5  ;;  %v1517_v45 = vshll.u32 %v5665_v3, 16  ;;  %v3924_v35 = vcombine.low %v5667_v38, %v5678_v63  ;;  %v3861_v52 = vrot.slane %v1575_v32, 9  ;;  %v5718_v38 = vld [vmem:[#allocation3 + $0x68] sm:$0x1] }
 0x147   : > { %3109 = vmatmul.mubr.bf16.gmra.mrb[48].mxu0 %v3907_v61  ;;  %v1820_v42 = vrot.slane %v1819_v47, 4  ;;  %v1645_v58 = vrot.slane %v5390_v10, 5  ;;  %v1648_v37 = vrot.slane %v1375_v22, 5  ;;  %v1815_v29 = vsel %vm5115_vm9, %v1810_v57, %v1814_v12  ;;  %v1376_v61 = vld [vmem:[#allocation3 + $0x68] sm:$0x1] }
 0x148   : > { %3116 = vmatprep.mubr.bf16.mxu0 %v3916_v20  ;;  %v1510_v55 = vsel %vm5115_vm9, %v1505_v24, %v1509_v53  ;;  %v1514_v3 = vor.u32 %v1513_v19, %v1509_v53  ;;  %v1519_v59 = vrot.slane %v1517_v45, 5  ;;  %v1827_v62 = vshrl.u32 %v5709_v54, 16  ;;  %v5739_v45 = vld [vmem:[#allocation3 + $0x6c] sm:$0xf] }
 0x149   : > { %v1825_v34 = vsel %vm5115_vm9, %v1820_v42, %v1824_v9  ;;  %v1646_v2 = vsel %vm5125_vm10, %v3861_v52, %v1645_v58  ;;  %v1647_v4 = vrot.slane %v1645_v58, 4  ;;  %v1830_v27 = vshll.u32 %v5709_v54, 16 }
 0x14a   : > { %v3932_v40 = vcombine.low %v1815_v29, %v1825_v34  ;;  %v1515_v8 = vrot.slane %v1514_v3, 4  ;;  %v1836_v26 = vshll.u32 %v5712_v39, 16  ;;  %v1829_v56 = vrot.slane %v1827_v62, 4 }
 0x14b   : > { %v1649_v28 = vsel %vm5125_vm10, %v1647_v4, %v1648_v37  ;;  %v1840_v11 = vshrl.u32 %v5712_v39, 16  ;;  %v1846_v46 = vshll.u32 %v5718_v38, 16  ;;  %v1832_v12 = vrot.slane %v1830_v27, 5  ;;  %v5753_v4 = vld [vmem:[#allocation3 + $0x74] sm:$0x1] }
 0x14c   : > { %3213 = vmatprep.mubr.bf16.mxu1 %v3932_v40  ;;  %v1520_v20 = vsel %vm5115_vm9, %v1515_v8, %v1519_v59  ;;  %v3917_v36 = vcombine.low %v1646_v2, %v1649_v28  ;;  %v1838_v48 = vrot.slane %v1836_v26, 5  ;;  %v5974_v0 = vor.u32 %v5416_v14, %v5401_v1 }
 0x14d   : > { %v3908_v50 = vcombine.low %v1510_v55, %v1520_v20  ;;  %v1842_v18 = vrot.slane %v1840_v11, 4  ;;  %v1848_v24 = vrot.slane %v1846_v46, 5  ;;  %v1833_v47 = vor.u32 %v1832_v12, %v1829_v56  ;;  %v5744_v55 = vld [vmem:[#allocation3 + $0x70] sm:$0xf] }
 0x14e   : > { %3214 = vmatmul.mubr.bf16.gmra.mrb[52].mxu1 %v3924_v35  ;;  %v1529_v32 = vrot.slane %v5974_v0, 4  ;;  %v1531_v9 = vshll.u32 %v5390_v10, 16  ;;  %v5975_v19 = vshrl.u32 %v5390_v10, 16  ;;  %v1541_v53 = vshll.u32 %v1375_v22, 16 }
 0x14f   : > { %3117 = vmatmul.mubr.bf16.gmra.mrb[52].mxu0 %v3908_v50  ;;  %v1843_v42 = vor.u32 %v1842_v18, %v1838_v48  ;;  %v3925_v35 = vcombine.low %v5709_v54, %v5712_v39  ;;  %v3862_v52 = vrot.slane %v1576_v31, 9  ;;  %v1652_v58 = vrot.slane %v5439_v49, 5  ;;  %v1874_v50 = vld [vmem:[#allocation3 + $0x18] sm:$0xe] }
 0x150   : > { %v1537_v57 = vrot.slane %v5975_v19, 4  ;;  %3124 = vmatprep.mubr.bf16.mxu0 %v3917_v36  ;;  %v1834_v1 = vrot.slane %v1833_v47, 4  ;;  %v1533_v14 = vrot.slane %v1531_v9, 5  ;;  %v1543_v37 = vrot.slane %v1541_v53, 5 }
 0x151   : > { %v1655_v29 = vrot.slane %v1376_v61, 5  ;;  %v1844_v10 = vrot.slane %v1843_v42, 4  ;;  %v1653_v22 = vsel %vm5125_vm10, %v3862_v52, %v1652_v58  ;;  %v1654_v3 = vrot.slane %v1652_v58, 4  ;;  %v1878_v42 = vld [vmem:[#allocation3 + $0x48] sm:$0xe] }
 0x152   : > { %v1851_v59 = vshrl.u32 %v5739_v45, 16  ;;  %v1839_v54 = vsel %vm5115_vm9, %v1834_v1, %v1838_v48  ;;  %v1534_v34 = vsel %vm5115_vm9, %v1529_v32, %v1533_v14  ;;  %v1538_v2 = vor.u32 %v1537_v57, %v1533_v14 }
 0x153   : > { %v1854_v62 = vshll.u32 %v5739_v45, 16  ;;  %v1849_v40 = vsel %vm5115_vm9, %v1844_v10, %v1848_v24  ;;  %v1656_v8 = vsel %vm5125_vm10, %v1654_v3, %v1655_v29  ;;  %v1860_v26 = vshll.u32 %v5744_v55, 16  ;;  %v1875_v29 = vld [vmem:[#allocation3 + $0x24] sm:$0xe] }
 0x154   : > { %v1853_v27 = vrot.slane %v1851_v59, 4  ;;  %v3933_v28 = vcombine.low %v1839_v54, %v1849_v40  ;;  %v1539_v56 = vrot.slane %v1538_v2, 4  ;;  %v3918_v11 = vcombine.low %v1653_v22, %v1656_v8 }
 0x155   : > { %v1856_v46 = vrot.slane %v1854_v62, 5  ;;  %v1862_v20 = vrot.slane %v1860_v26, 5  ;;  %v1864_v36 = vshrl.u32 %v5744_v55, 16  ;;  %v1870_v12 = vshll.u32 %v5753_v4, 16  ;;  %v1879_v62 = vld [vmem:[#allocation3 + $0x54] sm:$0xe] }
 0x156   : > { %v5976_v48 = vor.u32 %v5448_v21, %v5443_v6  ;;  %3221 = vmatprep.mubr.bf16.mxu1 %v3933_v28  ;;  %v1544_v18 = vsel %vm5115_vm9, %v1539_v56, %v1543_v37  ;;  %v1555_v0 = vshll.u32 %v5439_v49, 16  ;;  %v5977_v32 = vshrl.u32 %v5439_v49, 16  ;;  %v1876_v28 = vld [vmem:[#allocation3 + $0x30] sm:$0xe] }
 0x157   : > { %v1857_v24 = vor.u32 %v1856_v46, %v1853_v27  ;;  %v3909_v9 = vcombine.low %v1534_v34, %v1544_v18  ;;  %3222 = vmatmul.mubr.bf16.gmra.mrb[56].mxu1 %v3925_v35  ;;  %v1866_v19 = vrot.slane %v1864_v36, 4  ;;  %v1872_v57 = vrot.slane %v1870_v12, 5 }
 0x158   : > { %v1553_v31 = vrot.slane %v5976_v48, 4  ;;  %v1561_v47 = vrot.slane %v5977_v32, 4  ;;  %v1565_v53 = vshll.u32 %v1376_v61, 16  ;;  %v1557_v6 = vrot.slane %v1555_v0, 5 }
 0x159   : > { %v1858_v52 = vrot.slane %v1857_v24, 4  ;;  %v3926_v21 = vcombine.low %v5739_v45, %v5744_v55  ;;  %v3863_v58 = vrot.slane %v1874_v50, 9  ;;  %3125 = vmatmul.mubr.bf16.gmra.mrb[56].mxu0 %v3909_v9  ;;  %v1867_v1 = vor.u32 %v1866_v19, %v1862_v20 }
 0x15a   : > { %v1567_v14 = vrot.slane %v1565_v53, 5  ;;  %v1908_v37 = vrot.slane %v5479_v13, 5  ;;  %v1911_v49 = vrot.slane %v5481_v5, 5  ;;  %3132 = vmatprep.mubr.bf16.mxu0 %v3918_v11  ;;  %v1558_v61 = vsel %vm5115_vm9, %v1553_v31, %v1557_v6  ;;  %v1880_v11 = vld [vmem:[#allocation3 + $0x60] sm:$0xe] }
 0x15b   : > { %v1863_v35 = vsel %vm5115_vm9, %v1858_v52, %v1862_v20  ;;  %v1562_v10 = vor.u32 %v1561_v47, %v1557_v6  ;;  %v3867_v22 = vrot.slane %v1878_v42, 9  ;;  %v1868_v3 = vrot.slane %v1867_v1, 4  ;;  %v1877_v47 = vld [vmem:[#allocation3 + $0x3c] sm:$0xe]  ;;  %v1881_v53 = vld [vmem:[#allocation3 + $0x6c] sm:$0xe] }
 0x15c   : > { %v1909_v45 = vsel %vm5125_vm10, %v3863_v58, %v1908_v37  ;;  %v1910_v59 = vrot.slane %v1908_v37, 4  ;;  %v1936_v54 = vrot.slane %v5635_v51, 5  ;;  %v1939_v5 = vrot.slane %v5641_v23, 5 }
 0x15d   : > { %v1563_v13 = vrot.slane %v1562_v10, 4  ;;  %v3864_v34 = vrot.slane %v1875_v29, 9  ;;  %v1915_v2 = vrot.slane %v5506_v41, 5  ;;  %v1873_v40 = vsel %vm5115_vm9, %v1868_v3, %v1872_v57 }
 0x15e   : > { %v1912_v8 = vsel %vm5125_vm10, %v1910_v59, %v1911_v49  ;;  %v1937_v27 = vsel %vm5125_vm10, %v3867_v22, %v1936_v54  ;;  %v1938_v26 = vrot.slane %v1936_v54, 4  ;;  %v3934_v56 = vcombine.low %v1863_v35, %v1873_v40 }
 0x15f   : > { %v1568_v51 = vsel %vm5115_vm9, %v1563_v13, %v1567_v14  ;;  %v3935_v23 = vcombine.low %v1909_v45, %v1912_v8  ;;  %v1916_v41 = vsel %vm5125_vm10, %v3864_v34, %v1915_v2  ;;  %v1917_v36 = vrot.slane %v1915_v2, 4 }
 0x160   : > { %v3910_v46 = vcombine.low %v1558_v61, %v1568_v51  ;;  %v1940_v20 = vsel %vm5125_vm10, %v1938_v26, %v1939_v5  ;;  %v3868_v12 = vrot.slane %v1879_v62, 9  ;;  %3229 = vmatprep.mubr.bf16.mxu1 %v3934_v56  ;;  %v1943_v31 = vrot.slane %v5678_v63, 5 }
 0x161   : > { %v3939_v48 = vcombine.low %v1937_v27, %v1940_v20  ;;  %v3865_v50 = vrot.slane %v1876_v28, 9  ;;  %v1922_v18 = vrot.slane %v5545_v15, 5  ;;  %3230 = vmatmul.mubr.bf16.gmra.mrb[60].mxu1 %v3926_v21  ;;  %v1919_v33 = vsel %vm5125_vm10, %v1917_v36, %v1918_v25 }
 0x162   : > { %3133 = vmatmul.mubr.bf16.gmra.mrb[60].mxu0 %v3910_v46  ;;  %v1925_v24 = vrot.slane %v5551_v43, 5  ;;  %v3869_v0 = vrot.slane %v1880_v11, 9  ;;  %v1950_v32 = vrot.slane %v5712_v39, 5  ;;  %v3936_v9 = vcombine.low %v1916_v41, %v1919_v33 }
 0x163   : > { %4373 = vmatprep.mubr.bf16.mxu0 %v3935_v23  ;;  %4381 = vmatprep.mubr.bf16.mxu1 %v3939_v48  ;;  %v1944_v63 = vsel %vm5125_vm10, %v3868_v12, %v1943_v31  ;;  %v1945_v15 = vrot.slane %v1943_v31, 4  ;;  %v1923_v19 = vsel %vm5125_vm10, %v3865_v50, %v1922_v18  ;;  %v1924_v30 = vrot.slane %v1922_v18, 4 }
 0x164   : > { %v1951_v25 = vsel %vm5125_vm10, %v3869_v0, %v1950_v32  ;;  %v1952_v57 = vrot.slane %v1950_v32, 4  ;;  %v1953_v43 = vrot.slane %v5718_v38, 5  ;;  %v3866_v42 = vrot.slane %v1877_v47, 9 }
 0x165   : > { %v1947_v39 = vsel %vm5125_vm10, %v1945_v15, %v1946_v60  ;;  %v1929_v52 = vrot.slane %v5590_v7, 5  ;;  %v1926_v21 = vsel %vm5125_vm10, %v1924_v30, %v1925_v24  ;;  %v1932_v1 = vrot.slane %v5600_v16, 5 }
 0x166   : > { %v3940_v6 = vcombine.low %v1944_v63, %v1947_v39  ;;  %v1954_v58 = vsel %vm5125_vm10, %v1952_v57, %v1953_v43  ;;  %v3937_v14 = vcombine.low %v1923_v19, %v1926_v21  ;;  %v3870_v49 = vrot.slane %v1881_v53, 9 }
 0x167   : > { %v3941_v38 = vcombine.low %v1951_v25, %v1954_v58  ;;  %v1931_v37 = vrot.slane %v1929_v52, 4  ;;  %v1957_v17 = vrot.slane %v5744_v55, 5  ;;  %v1960_v60 = vrot.slane %v5753_v4, 5 }
 0x168   : > { %v1930_v29 = vsel %vm5125_vm10, %v3866_v42, %v1929_v52 }
 0x169   : > { %4382 = vmatmul.mubr.bf16.vlgmr.msra.gmra.mrb[64].mxu1 %v3940_v6  ;;  %v1959_v7 = vrot.slane %v1957_v17, 4  ;;  %v1933_v35 = vsel %vm5125_vm10, %v1931_v37, %v1932_v1  ;;  %v1958_v16 = vsel %vm5125_vm10, %v3870_v49, %v1957_v17 }
 0x16a   : > { %4374 = vmatmul.mubr.bf16.vlgmr.msra.gmra.mrb[64].mxu0 %v3936_v9  ;;  %4385 = vmatprep.mubr.bf16.mxu1 %v3941_v38  ;;  %v3938_v55 = vcombine.low %v1930_v29, %v1933_v35 }
 0x16b   : > { %4377 = vmatprep.mubr.bf16.mxu0 %v3937_v14  ;;  %v1961_v61 = vsel %vm5125_vm10, %v1959_v7, %v1960_v60 }
 0x16c   : > { %v3942_v10 = vcombine.low %v1958_v16, %v1961_v61 }
 0x171   : > { %4386 = vmatmul.mubr.bf16.gmra.mrb[68].mxu1 %v3942_v10 }
 0x172   : > { %4378 = vmatmul.mubr.bf16.gmra.mrb[68].mxu0 %v3938_v55 }
 0x1b6   : > { %v4101_v4 = vpop.f32.mrb[0].mxu0 }
 0x1b7   : > { %v4165_v22 = vpop.f32.mrb[0].mxu1  ;;  %v4102_v3 = vpop.f32.mrb[1].mxu0 }
 0x1b8   : > { %v4103_v45 = vadd.f32 %v4102_v3, %v4101_v4  ;;  %v4166_v59 = vpop.f32.mrb[1].mxu1  ;;  %v4104_v54 = vpop.f32.mrb[2].mxu0 }
 0x1b9   : > { %v4167_v13 = vadd.f32 %v4166_v59, %v4165_v22  ;;  %v4168_v5 = vpop.f32.mrb[2].mxu1  ;;  %v4105_v34 = vpop.f32.mrb[3].mxu0 }
 0x1ba   : > { %v4106_v2 = vadd.f32 %v4105_v34, %v4104_v54  ;;  %v4169_v62 = vpop.f32.mrb[3].mxu1 }
 0x1bb   : > { %v5831_v40 = vadd.f32 %v4167_v13, %v4103_v45  ;;  %v4170_v8 = vadd.f32 %v4169_v62, %v4168_v5 }
 0x1bd   : > { %v5833_v44 = vadd.f32 %v4170_v8, %v4106_v2 }
 0x1be   : > { %v4107_v27 = vpop.f32.mrb[4].mxu0 }
 0x1bf   : > { %v4171_v26 = vpop.f32.mrb[4].mxu1  ;;  %v4108_v28 = vpop.f32.mrb[5].mxu0 }
 0x1c0   : > { %v4172_v56 = vpop.f32.mrb[5].mxu1  ;;  %v4109_v51 = vadd.f32 %v4108_v28, %v4107_v27  ;;  %v4110_v41 = vpop.f32.mrb[6].mxu0 }
 0x1c1   : > { %v4173_v23 = vadd.f32 %v4172_v56, %v4171_v26  ;;  %v4174_v11 = vpop.f32.mrb[6].mxu1  ;;  %v4111_v46 = vpop.f32.mrb[7].mxu0 }
 0x1c2   : > { %v4175_v20 = vpop.f32.mrb[7].mxu1  ;;  %v4112_v12 = vadd.f32 %v4111_v46, %v4110_v41 }
 0x1c3   : > { %v5835_v36 = vadd.f32 %v4173_v23, %v4109_v51  ;;  %v4176_v48 = vadd.f32 %v4175_v20, %v4174_v11 }
 0x1c5   : > { %v5837_v31 = vadd.f32 %v4176_v48, %v4112_v12 }
 0x1c6   : > { %v4113_v50 = vpop.f32.mrb[8].mxu0 }
 0x1c7   : > { %v4177_v18 = vpop.f32.mrb[8].mxu1  ;;  %v4114_v33 = vpop.f32.mrb[9].mxu0 }
 0x1c8   : > { %v4178_v24 = vpop.f32.mrb[9].mxu1  ;;  %v4115_v0 = vadd.f32 %v4114_v33, %v4113_v50  ;;  %v4116_v47 = vpop.f32.mrb[10].mxu0 }
 0x1c9   : > { %v4179_v32 = vadd.f32 %v4178_v24, %v4177_v18  ;;  %v4180_v9 = vpop.f32.mrb[10].mxu1  ;;  %v4117_v63 = vpop.f32.mrb[11].mxu0 }
 0x1ca   : > { %v4181_v15 = vpop.f32.mrb[11].mxu1  ;;  %v4118_v30 = vadd.f32 %v4117_v63, %v4116_v47 }
 0x1cb   : > { %v5839_v19 = vadd.f32 %v4179_v32, %v4115_v0  ;;  %v4182_v25 = vadd.f32 %v4181_v15, %v4180_v9 }
 0x1cd   : > { %v5841_v57 = vadd.f32 %v4182_v25, %v4118_v30 }
 0x1ce   : > { %v4119_v43 = vpop.f32.mrb[12].mxu0 }
 0x1cf   : > { %v4183_v53 = vpop.f32.mrb[12].mxu1  ;;  %v4120_v39 = vpop.f32.mrb[13].mxu0 }
 0x1d0   : > { %v4184_v42 = vpop.f32.mrb[13].mxu1  ;;  %v4121_v52 = vadd.f32 %v4120_v39, %v4119_v43  ;;  %v4122_v21 = vpop.f32.mrb[14].mxu0 }
 0x1d1   : > { %v4185_v6 = vadd.f32 %v4184_v42, %v4183_v53  ;;  %v4186_v58 = vpop.f32.mrb[14].mxu1  ;;  %v4123_v1 = vpop.f32.mrb[15].mxu0 }
 0x1d2   : > { %v4187_v14 = vpop.f32.mrb[15].mxu1  ;;  %v4124_v37 = vadd.f32 %v4123_v1, %v4122_v21 }
 0x1d3   : > { %v5843_v38 = vadd.f32 %v4185_v6, %v4121_v52  ;;  %v4188_v49 = vadd.f32 %v4187_v14, %v4186_v58 }
 0x1d5   : > { %v5845_v17 = vadd.f32 %v4188_v49, %v4124_v37 }
 0x1d6   : > { %v4125_v60 = vpop.f32.mrb[16].mxu0 }
 0x1d7   : > { %v4189_v7 = vpop.f32.mrb[16].mxu1  ;;  %v4126_v29 = vpop.f32.mrb[17].mxu0 }
 0x1d8   : > { %v4190_v35 = vpop.f32.mrb[17].mxu1  ;;  %v4127_v16 = vadd.f32 %v4126_v29, %v4125_v60  ;;  %v4128_v55 = vpop.f32.mrb[18].mxu0 }
 0x1d9   : > { %v4191_v61 = vadd.f32 %v4190_v35, %v4189_v7  ;;  %v4192_v10 = vpop.f32.mrb[18].mxu1  ;;  %v4129_v4 = vpop.f32.mrb[19].mxu0 }
 0x1da   : > { %v4193_v22 = vpop.f32.mrb[19].mxu1  ;;  %v4130_v45 = vadd.f32 %v4129_v4, %v4128_v55 }
 0x1db   : > { %v5847_v3 = vadd.f32 %v4191_v61, %v4127_v16  ;;  %v4194_v59 = vadd.f32 %v4193_v22, %v4192_v10 }
 0x1dd   : > { %v5849_v54 = vadd.f32 %v4194_v59, %v4130_v45 }
 0x1de   : > { %v4131_v13 = vpop.f32.mrb[20].mxu0 }
 0x1df   : > { %v4195_v5 = vpop.f32.mrb[20].mxu1  ;;  %v4132_v34 = vpop.f32.mrb[21].mxu0 }
 0x1e0   : > { %v4196_v2 = vpop.f32.mrb[21].mxu1  ;;  %v4133_v62 = vadd.f32 %v4132_v34, %v4131_v13  ;;  %v4134_v27 = vpop.f32.mrb[22].mxu0 }
 0x1e1   : > { %v4197_v8 = vadd.f32 %v4196_v2, %v4195_v5  ;;  %v4198_v26 = vpop.f32.mrb[22].mxu1  ;;  %v4135_v28 = vpop.f32.mrb[23].mxu0 }
 0x1e2   : > { %v4199_v56 = vpop.f32.mrb[23].mxu1  ;;  %v4136_v23 = vadd.f32 %v4135_v28, %v4134_v27 }
 0x1e3   : > { %v5851_v51 = vadd.f32 %v4197_v8, %v4133_v62  ;;  %v4200_v41 = vadd.f32 %v4199_v56, %v4198_v26 }
 0x1e5   : > { %v5853_v11 = vadd.f32 %v4200_v41, %v4136_v23 }
 0x1e6   : > { %v4137_v46 = vpop.f32.mrb[24].mxu0 }
 0x1e7   : > { %v4201_v20 = vpop.f32.mrb[24].mxu1  ;;  %v4138_v12 = vpop.f32.mrb[25].mxu0 }
 0x1e8   : > { %v4202_v48 = vpop.f32.mrb[25].mxu1  ;;  %v4139_v50 = vadd.f32 %v4138_v12, %v4137_v46  ;;  %v4140_v33 = vpop.f32.mrb[26].mxu0 }
 0x1e9   : > { %v4203_v18 = vadd.f32 %v4202_v48, %v4201_v20  ;;  %v4204_v24 = vpop.f32.mrb[26].mxu1  ;;  %v4141_v0 = vpop.f32.mrb[27].mxu0 }
 0x1ea   : > { %v4205_v32 = vpop.f32.mrb[27].mxu1  ;;  %v4142_v9 = vadd.f32 %v4141_v0, %v4140_v33 }
 0x1eb   : > { %v5855_v47 = vadd.f32 %v4203_v18, %v4139_v50  ;;  %v4206_v63 = vadd.f32 %v4205_v32, %v4204_v24 }
 0x1ed   : > { %v5857_v15 = vadd.f32 %v4206_v63, %v4142_v9 }
 0x1ee   : > { %v4143_v25 = vpop.f32.mrb[28].mxu0 }
 0x1ef   : > { %v4207_v30 = vpop.f32.mrb[28].mxu1  ;;  %v4144_v53 = vpop.f32.mrb[29].mxu0 }
 0x1f0   : > { %v4208_v43 = vpop.f32.mrb[29].mxu1  ;;  %v4145_v52 = vadd.f32 %v4144_v53, %v4143_v25  ;;  %v4146_v6 = vpop.f32.mrb[30].mxu0 }
 0x1f1   : > { %v4209_v39 = vadd.f32 %v4208_v43, %v4207_v30  ;;  %v4210_v42 = vpop.f32.mrb[30].mxu1  ;;  %v4147_v58 = vpop.f32.mrb[31].mxu0 }
 0x1f2   : > { %v4211_v21 = vpop.f32.mrb[31].mxu1  ;;  %v4148_v37 = vadd.f32 %v4147_v58, %v4146_v6 }
 0x1f3   : > { %v4212_v1 = vadd.f32 %v4211_v21, %v4210_v42  ;;  %v5859_v14 = vadd.f32 %v4209_v39, %v4145_v52 }
 0x1f5   : > { %v5861_v49 = vadd.f32 %v4212_v1, %v4148_v37 }
 0x1f6   : > { %v4229_v60 = vpop.f32.mrb[32].mxu0 }
 0x1f7   : > { %v4230_v7 = vpop.f32.mrb[33].mxu0 }
 0x1f8   : > { %v4231_v29 = vadd.f32 %v4230_v7, %v4229_v60  ;;  %v4232_v35 = vpop.f32.mrb[34].mxu0 }
 0x1f9   : > { %v4293_v16 = vpop.f32.mrb[32].mxu1  ;;  %v4233_v61 = vpop.f32.mrb[35].mxu0 }
 0x1fa   : > { %v3079_v55 = vadd.f32 %v4231_v29, %v5831_v40  ;;  %v4234_v10 = vadd.f32 %v4233_v61, %v4232_v35  ;;  %v4294_v4 = vpop.f32.mrb[33].mxu1 }
 0x1fb   : > { %v4295_v22 = vadd.f32 %v4294_v4, %v4293_v16  ;;  %v4296_v45 = vpop.f32.mrb[34].mxu1 }
 0x1fc   : > { %v3082_v59 = vadd.f32 %v4234_v10, %v5833_v44  ;;  %v4297_v13 = vpop.f32.mrb[35].mxu1 }
 0x1fd   : > { %v4298_v5 = vadd.f32 %v4297_v13, %v4296_v45  ;;  %v5865_v34 = vadd.f32 %v4295_v22, %v3079_v55 }
 0x1fe   : > { %v4235_v62 = vpop.f32.mrb[36].mxu0 }
 0x1ff   : > { %v5867_v2 = vadd.f32 %v4298_v5, %v3082_v59  ;;  %v4236_v27 = vpop.f32.mrb[37].mxu0 }
 0x200   : > { %v4237_v28 = vadd.f32 %v4236_v27, %v4235_v62  ;;  %v4238_v56 = vpop.f32.mrb[38].mxu0 }
 0x201   : > { %v4299_v8 = vpop.f32.mrb[36].mxu1  ;;  %v4239_v41 = vpop.f32.mrb[39].mxu0 }
 0x202   : > { %v4300_v26 = vpop.f32.mrb[37].mxu1  ;;  %v3087_v20 = vadd.f32 %v4237_v28, %v5835_v36  ;;  %v4240_v12 = vadd.f32 %v4239_v41, %v4238_v56 }
 0x203   : > { %v4301_v23 = vadd.f32 %v4300_v26, %v4299_v8  ;;  %v4302_v40 = vpop.f32.mrb[38].mxu1 }
 0x204   : > { %v4303_v46 = vpop.f32.mrb[39].mxu1  ;;  %v3090_v48 = vadd.f32 %v4240_v12, %v5837_v31 }
 0x205   : > { %v4304_v44 = vadd.f32 %v4303_v46, %v4302_v40  ;;  %v5871_v50 = vadd.f32 %v4301_v23, %v3087_v20 }
 0x207   : > { %v5873_v33 = vadd.f32 %v4304_v44, %v3090_v48 }
 0x209   : > { %v4305_v18 = vpop.f32.mrb[40].mxu1  ;;  %v4241_v0 = vpop.f32.mrb[40].mxu0 }
 0x20a   : > { %v4306_v24 = vpop.f32.mrb[41].mxu1  ;;  %v4242_v63 = vpop.f32.mrb[41].mxu0 }
 0x20b   : > { %v4307_v32 = vadd.f32 %v4306_v24, %v4305_v18  ;;  %v4308_v9 = vpop.f32.mrb[42].mxu1  ;;  %v4243_v25 = vadd.f32 %v4242_v63, %v4241_v0  ;;  %v4244_v43 = vpop.f32.mrb[42].mxu0 }
 0x20c   : > { %v4309_v30 = vpop.f32.mrb[43].mxu1  ;;  %v4245_v39 = vpop.f32.mrb[43].mxu0 }
 0x20d   : > { %v4310_v53 = vadd.f32 %v4309_v30, %v4308_v9  ;;  %v3095_v36 = vadd.f32 %v4243_v25, %v5839_v19  ;;  %v4246_v42 = vadd.f32 %v4245_v39, %v4244_v43 }
 0x20f   : > { %v3098_v31 = vadd.f32 %v4246_v42, %v5841_v57  ;;  %v5877_v6 = vadd.f32 %v4307_v32, %v3095_v36 }
 0x211   : > { %v4311_v52 = vpop.f32.mrb[44].mxu1  ;;  %v4247_v58 = vpop.f32.mrb[44].mxu0  ;;  %v5879_v60 = vadd.f32 %v4310_v53, %v3098_v31 }
 0x212   : > { %v4312_v21 = vpop.f32.mrb[45].mxu1  ;;  %v4248_v7 = vpop.f32.mrb[45].mxu0 }
 0x213   : > { %v4313_v1 = vadd.f32 %v4312_v21, %v4311_v52  ;;  %v4314_v37 = vpop.f32.mrb[46].mxu1  ;;  %v4249_v35 = vadd.f32 %v4248_v7, %v4247_v58  ;;  %v4250_v16 = vpop.f32.mrb[46].mxu0 }
 0x214   : > { %v4315_v29 = vpop.f32.mrb[47].mxu1  ;;  %v4251_v55 = vpop.f32.mrb[47].mxu0 }
 0x215   : > { %v4316_v61 = vadd.f32 %v4315_v29, %v4314_v37  ;;  %v3103_v19 = vadd.f32 %v4249_v35, %v5843_v38  ;;  %v4252_v10 = vadd.f32 %v4251_v55, %v4250_v16 }
 0x217   : > { %v3106_v57 = vadd.f32 %v4252_v10, %v5845_v17  ;;  %v5883_v4 = vadd.f32 %v4313_v1, %v3103_v19 }
 0x219   : > { %v4317_v22 = vpop.f32.mrb[48].mxu1  ;;  %v5885_v45 = vadd.f32 %v4316_v61, %v3106_v57 }
 0x21a   : > { %v4318_v59 = vpop.f32.mrb[49].mxu1  ;;  %v4253_v13 = vpop.f32.mrb[48].mxu0 }
 0x21b   : > { %v4319_v5 = vadd.f32 %v4318_v59, %v4317_v22  ;;  %v4320_v62 = vpop.f32.mrb[50].mxu1  ;;  %v4254_v8 = vpop.f32.mrb[49].mxu0 }
 0x21c   : > { %v4321_v27 = vpop.f32.mrb[51].mxu1  ;;  %v4255_v26 = vadd.f32 %v4254_v8, %v4253_v13  ;;  %v4256_v28 = vpop.f32.mrb[50].mxu0 }
 0x21d   : > { %v4322_v56 = vadd.f32 %v4321_v27, %v4320_v62  ;;  %v4257_v23 = vpop.f32.mrb[51].mxu0 }
 0x21e   : > { %v3111_v38 = vadd.f32 %v4255_v26, %v5847_v3  ;;  %v4258_v40 = vadd.f32 %v4257_v23, %v4256_v28 }
 0x220   : > { %v3114_v17 = vadd.f32 %v4258_v40, %v5849_v54  ;;  %v3208_v46 = vadd.f32 %v4319_v5, %v3111_v38 }
 0x221   : > { %v4323_v41 = vpop.f32.mrb[52].mxu1 }
 0x222   : > { %v4324_v20 = vpop.f32.mrb[53].mxu1  ;;  %v4259_v12 = vpop.f32.mrb[52].mxu0  ;;  %v5889_v18 = vadd.f32 %v4322_v56, %v3114_v17 }
 0x223   : > { %v4325_v44 = vadd.f32 %v4324_v20, %v4323_v41  ;;  %v4326_v48 = vpop.f32.mrb[54].mxu1  ;;  %v4260_v24 = vpop.f32.mrb[53].mxu0 }
 0x224   : > { %v4327_v0 = vpop.f32.mrb[55].mxu1  ;;  %v4261_v32 = vadd.f32 %v4260_v24, %v4259_v12  ;;  %v4262_v9 = vpop.f32.mrb[54].mxu0 }
 0x225   : > { %v4328_v63 = vadd.f32 %v4327_v0, %v4326_v48  ;;  %v4263_v30 = vpop.f32.mrb[55].mxu0 }
 0x226   : > { %v3119_v25 = vadd.f32 %v4261_v32, %v5851_v51  ;;  %v4264_v3 = vadd.f32 %v4263_v30, %v4262_v9 }
 0x228   : > { %v3122_v43 = vadd.f32 %v4264_v3, %v5853_v11  ;;  %v3216_v54 = vadd.f32 %v4325_v44, %v3119_v25 }
 0x22a   : > { %v4329_v53 = vpop.f32.mrb[56].mxu1  ;;  %v3219_v39 = vadd.f32 %v4328_v63, %v3122_v43 }
 0x22b   : > { %v4330_v36 = vpop.f32.mrb[57].mxu1 }
 0x22c   : > { %v4265_v42 = vpop.f32.mrb[56].mxu0  ;;  %v4331_v31 = vadd.f32 %v4330_v36, %v4329_v53  ;;  %v4332_v52 = vpop.f32.mrb[58].mxu1 }
 0x22d   : > { %v4266_v21 = vpop.f32.mrb[57].mxu0  ;;  %v4333_v58 = vpop.f32.mrb[59].mxu1 }
 0x22e   : > { %v4267_v1 = vadd.f32 %v4266_v21, %v4265_v42  ;;  %v4268_v37 = vpop.f32.mrb[58].mxu0  ;;  %v4334_v7 = vadd.f32 %v4333_v58, %v4332_v52 }
 0x22f   : > { %v4269_v29 = vpop.f32.mrb[59].mxu0 }
 0x230   : > { %v3127_v35 = vadd.f32 %v4267_v1, %v5855_v47  ;;  %v4270_v16 = vadd.f32 %v4269_v29, %v4268_v37 }
 0x232   : > { %v3130_v51 = vadd.f32 %v4270_v16, %v5857_v15  ;;  %v3224_v61 = vadd.f32 %v4331_v31, %v3127_v35 }
 0x234   : > { %v4335_v55 = vpop.f32.mrb[60].mxu1  ;;  %v5895_v19 = vadd.f32 %v4334_v7, %v3130_v51 }
 0x235   : > { %v4271_v11 = vpop.f32.mrb[60].mxu0  ;;  %v4336_v57 = vpop.f32.mrb[61].mxu1 }
 0x236   : > { %v4272_v10 = vpop.f32.mrb[61].mxu0  ;;  %v4337_v13 = vadd.f32 %v4336_v57, %v4335_v55  ;;  %v4338_v5 = vpop.f32.mrb[62].mxu1 }
 0x237   : > { %v4273_v22 = vadd.f32 %v4272_v10, %v4271_v11  ;;  %v4274_v59 = vpop.f32.mrb[62].mxu0  ;;  %v4339_v8 = vpop.f32.mrb[63].mxu1 }
 0x238   : > { %v4275_v62 = vpop.f32.mrb[63].mxu0  ;;  %v4340_v26 = vadd.f32 %v4339_v8, %v4338_v5 }
 0x239   : > { %v3135_v27 = vadd.f32 %v4273_v22, %v5859_v14  ;;  %v4276_v47 = vadd.f32 %v4275_v62, %v4274_v59 }
 0x23b   : > { %v3138_v15 = vadd.f32 %v4276_v47, %v5861_v49  ;;  %v3232_v28 = vadd.f32 %v4337_v13, %v3135_v27 }
 0x23c   : > { %v4383_v23 = vpop.f32.mrb[64].mxu1 }
 0x23d   : > { %v4375_v56 = vpop.f32.mrb[64].mxu0  ;;  %v3235_v38 = vadd.f32 %v4340_v26, %v3138_v15  ;;  %v5900_v17 = vadd.f32 %v4383_v23, %v3216_v54  ;;  %v3304_v20 = vpop.f32.mrb[65].mxu1 }
 0x23e   : > { %v3281_v40 = vadd.f32 %v4375_v56, %v5871_v50  ;;  %v3272_v41 = vpop.f32.mrb[65].mxu0  ;;  %v5903_v12 = vadd.f32 %v3304_v20, %v3208_v46  ;;  %v4384_v44 = vpop.f32.mrb[66].mxu1 }
 0x23f   : > { %v3273_v14 = vadd.f32 %v3272_v41, %v5865_v34  ;;  %v4376_v49 = vpop.f32.mrb[66].mxu0  ;;  %3345 = vst [vmem:[%s4673_s8 + $0x50] sm:$0xff] %v5900_v17  ;;  %v5909_v50 = vadd.f32 %v4384_v44, %v3219_v39  ;;  %v3307_v0 = vpop.f32.mrb[67].mxu1  ;;  %v3382_v47 = vmul.f32 %v5900_v17, %v5900_v17 }
 0x240   : > { %3337 = vst [vmem:[%s4673_s8 + $0x10] sm:$0xff] %v3281_v40  ;;  %v3284_v48 = vadd.f32 %v4376_v49, %v5873_v33  ;;  %v3275_v24 = vpop.f32.mrb[67].mxu0  ;;  %3343 = vst [vmem:[%s4673_s8 + $0x40] sm:$0xff] %v5903_v12  ;;  %v3308_v46 = vadd.f32 %v3307_v0, %v5889_v18  ;;  %v3374_v33 = vmul.f32 %v3281_v40, %v3281_v40 }
 0x241   : > { %3335 = vst [vmem:[%s4673_s8] sm:$0xff] %v3273_v14  ;;  %v3276_v34 = vadd.f32 %v3275_v24, %v5867_v2  ;;  %3346 = vst [vmem:[%s4673_s8 + $0x58] sm:$0xff] %v5909_v50  ;;  %v3372_v32 = vmul.f32 %v3273_v14, %v3273_v14  ;;  %v3380_v5 = vmul.f32 %v5903_v12, %v5903_v12 }
 0x242   : > { %3338 = vst [vmem:[%s4673_s8 + $0x18] sm:$0xff] %v3284_v48  ;;  %3344 = vst [vmem:[%s4673_s8 + $0x48] sm:$0xff] %v3308_v46  ;;  %v3375_v54 = vmul.f32 %v3284_v48, %v3284_v48 }
 0x243   : > { %3336 = vst [vmem:[%s4673_s8 + $0x8] sm:$0xff] %v3276_v34  ;;  %v3351_v9 = vadd.f32 %v3276_v34, %v3273_v14  ;;  %v3373_v63 = vmul.f32 %v3276_v34, %v3276_v34 }
 0x244   : > { %v4387_v43 = vpop.f32.mrb[68].mxu1 }
 0x245   : > { %v3352_v30 = vadd.f32 %v3351_v9, %v3281_v40  ;;  %v3388_v25 = vadd.f32 %v3373_v63, %v3372_v32  ;;  %v4379_v3 = vpop.f32.mrb[68].mxu0  ;;  %v3329_v18 = vadd.f32 %v4387_v43, %v3232_v28  ;;  %v3320_v39 = vpop.f32.mrb[69].mxu1  ;;  %v3383_v28 = vmul.f32 %v5909_v50, %v5909_v50 }
 0x246   : > { %v3297_v2 = vadd.f32 %v4379_v3, %v5883_v4  ;;  %v3288_v53 = vpop.f32.mrb[69].mxu0  ;;  %v3321_v52 = vadd.f32 %v3320_v39, %v3224_v61  ;;  %v4388_v58 = vpop.f32.mrb[70].mxu1 }
 0x247   : > { %v3389_v36 = vadd.f32 %v3388_v25, %v3374_v33  ;;  %v3289_v42 = vadd.f32 %v3288_v53, %v5877_v6  ;;  %v3353_v31 = vadd.f32 %v3352_v30, %v3284_v48  ;;  %v4380_v21 = vpop.f32.mrb[70].mxu0  ;;  %3349 = vst [vmem:[%s4673_s8 + $0x70] sm:$0xff] %v3329_v18  ;;  %v3332_v4 = vadd.f32 %v4388_v58, %v3235_v38  ;;  %v3323_v7 = vpop.f32.mrb[71].mxu1 }
 0x248   : > { %3341 = vst [vmem:[%s4673_s8 + $0x30] sm:$0xff] %v3297_v2  ;;  %v3300_v1 = vadd.f32 %v4380_v21, %v5885_v45  ;;  %v3291_v37 = vpop.f32.mrb[71].mxu0  ;;  %3347 = vst [vmem:[%s4673_s8 + $0x60] sm:$0xff] %v3321_v52  ;;  %v3324_v51 = vadd.f32 %v3323_v7, %v5895_v19  ;;  %v3378_v45 = vmul.f32 %v3297_v2, %v3297_v2 }
 0x249   : > { %3339 = vst [vmem:[%s4673_s8 + $0x20] sm:$0xff] %v3289_v42  ;;  %v3354_v29 = vadd.f32 %v3353_v31, %v3289_v42  ;;  %v3376_v35 = vmul.f32 %v3289_v42, %v3289_v42  ;;  %v3390_v16 = vadd.f32 %v3389_v36, %v3375_v54  ;;  %3350 = vst [vmem:[%s4673_s8 + $0x78] sm:$0xff] %v3332_v4 }
 0x24a   : > { %3342 = vst [vmem:[%s4673_s8 + $0x38] sm:$0xff] %v3300_v1  ;;  %v3292_v6 = vadd.f32 %v3291_v37, %v5879_v60  ;;  %3348 = vst [vmem:[%s4673_s8 + $0x68] sm:$0xff] %v3324_v51  ;;  %v3379_v22 = vmul.f32 %v3300_v1, %v3300_v1  ;;  %v3381_v60 = vmul.f32 %v3308_v46, %v3308_v46 }
 0x24b   : > { %v3391_v61 = vadd.f32 %v3390_v16, %v3376_v35  ;;  %v3384_v38 = vmul.f32 %v3321_v52, %v3321_v52  ;;  %v3385_v14 = vmul.f32 %v3324_v51, %v3324_v51  ;;  %v3386_v49 = vmul.f32 %v3329_v18, %v3329_v18 }
 0x24c   : > { %3340 = vst [vmem:[%s4673_s8 + $0x28] sm:$0xff] %v3292_v6  ;;  %v3355_v11 = vadd.f32 %v3354_v29, %v3292_v6  ;;  %v3377_v55 = vmul.f32 %v3292_v6, %v3292_v6  ;;  %v3387_v24 = vmul.f32 %v3332_v4, %v3332_v4 }
 0x24e   : > { %v3356_v10 = vadd.f32 %v3355_v11, %v3297_v2  ;;  %v3392_v57 = vadd.f32 %v3391_v61, %v3377_v55 }
 0x250   : > { %v3357_v59 = vadd.f32 %v3356_v10, %v3300_v1  ;;  %v3393_v13 = vadd.f32 %v3392_v57, %v3378_v45 }
 0x252   : > { %v3358_v62 = vadd.f32 %v3357_v59, %v5903_v12  ;;  %v3394_v8 = vadd.f32 %v3393_v13, %v3379_v22 }
 0x254   : > { %v3395_v27 = vadd.f32 %v3394_v8, %v3380_v5  ;;  %v3359_v19 = vadd.f32 %v3358_v62, %v3308_v46 }
 0x256   : > { %v3360_v26 = vadd.f32 %v3359_v19, %v5900_v17  ;;  %v3396_v15 = vadd.f32 %v3395_v27, %v3381_v60 }
 0x258   : > { %v3361_v56 = vadd.f32 %v3360_v26, %v5909_v50  ;;  %v3397_v23 = vadd.f32 %v3396_v15, %v3382_v47 }
 0x25a   : > { %v3362_v40 = vadd.f32 %v3361_v56, %v3321_v52  ;;  %v3398_v41 = vadd.f32 %v3397_v23, %v3383_v28 }
 0x25c   : > { %v3363_v20 = vadd.f32 %v3362_v40, %v3324_v51  ;;  %v3399_v12 = vadd.f32 %v3398_v41, %v3384_v38 }
 0x25e   : > { %v3364_v44 = vadd.f32 %v3363_v20, %v3329_v18  ;;  %v3400_v48 = vadd.f32 %v3399_v12, %v3385_v14 }
 0x260   : > { %v3365_v0 = vadd.f32 %v3364_v44, %v3332_v4  ;;  %v3401_v17 = vadd.f32 %v3400_v48, %v3386_v49 }
 0x262   : > { %v3366_v34 = vrot.slane %v3365_v0, 4  ;;  %v3402_v46 = vadd.f32 %v3401_v17, %v3387_v24 }
 0x264   : > { %v3367_v32 = vadd.f32 %v3366_v34, %v3365_v0  ;;  %v3403_v9 = vrot.slane %v3402_v46, 4 }
 0x266   : > { %v3368_v63 = vrot.slane %v3367_v32, 2  ;;  %v3404_v50 = vadd.f32 %v3403_v9, %v3402_v46 }
 0x268   : > { %v3369_v33 = vadd.f32 %v3368_v63, %v3367_v32  ;;  %v3405_v30 = vrot.slane %v3404_v50, 2 }
 0x26a   : > { %v3370_v25 = vrot.slane %v3369_v33, 1  ;;  %v3406_v3 = vadd.f32 %v3405_v30, %v3404_v50 }
 0x26c   : > { %v3407_v43 = vrot.slane %v3406_v3, 1  ;;  %v3371_v54 = vadd.f32 %v3370_v25, %v3369_v33 }
 0x26e   : > { %v3408_v2 = vadd.f32 %v3407_v43, %v3406_v3 }
 0x270   : > { %v3410_v18 = vsel %vm963_vm0, %v3371_v54, %v3408_v2 }
 0x271   : > { %3411 = vst [vmem:[%s4682_s23] sm:$0x3] %v3410_v18 }
 0x272 PF: > { %s15_s19 = sadd.s32 1, %s4597_s19   ;;  %s5978_s8 = sld [smem:[#allocation14_spill]] }
 0x273   : > { %p12_p8 = scmp.ge.s32.totalorder %s15_s19, 6   ;;  %s5979_s15 = smov %s4589_s17 }
 0x274   : > { %s5980_s16 = smov %s4593_s18  ;;  %s5981_s17 = smov %s5984_s20 }
 0x275   :  { %14 = sbr.rel (!%p12_p8) target bundleno = 3 (0x3), region = 389 }
 0x278   : > { %s5982_s18 = smov %s5978_s8 }
 0x27c   :  { %3466 = vsyncmov [#allocation4] }
 0x27f   :  { %s3467_s23 = vpop.sfrf %3466 }
 0x280   :  { %p4017_p9 = scmp.ne.s32.totalorder %s3467_s23, 0 }
 0x282   :  { %3471 = shalt.err (%p4017_p9)  }
 0x283   :  { %3473 = vsyncmov [#allocation4 + $0x1] }
 0x286   :  { %s3474_s25 = vpop.sfrf %3473 }
 0x287   :  { %p4018_p10 = scmp.ne.s32.totalorder %s3474_s25, 0 }
 0x289   :  { %3478 = shalt.err (%p4018_p10)  }
 0x28a   :  { %3480 = vsyncmov [#allocation4 + $0x2] }
 0x28d   :  { %s3481_s21 = vpop.sfrf %3480 }
 0x28e   :  { %p4019_p11 = scmp.ne.s32.totalorder %s3481_s21, 0 }
 0x290   :  { %3485 = shalt.err (%p4019_p11)  }
 0x291   :  { %3487 = vsyncmov [#allocation4 + $0x3] }
 0x294   :  { %s3488_s27 = vpop.sfrf %3487 }
 0x295   :  { %p4020_p12 = scmp.ne.s32.totalorder %s3488_s27, 0 }
 0x297   :  { %3492 = shalt.err (%p4020_p12)  }
 0x298   :  { %3494 = vsyncmov [#allocation4 + $0x4] }
 0x29b   :  { %s3495_s20 = vpop.sfrf %3494 }
 0x29c   :  { %p4021_p13 = scmp.ne.s32.totalorder %s3495_s20, 0 }
 0x29e   :  { %3499 = shalt.err (%p4021_p13)  }
 0x29f   :  { %3501 = vsyncmov [#allocation4 + $0x5] }
 0x2a2   :  { %s3502_s0 = vpop.sfrf %3501 }
 0x2a3   :  { %p4022_p0 = scmp.ne.s32.totalorder %s3502_s0, 0 }
 0x2a5   :  { %3506 = shalt.err (%p4022_p0)  }

// kernel: up_block_forward.3
= control target key start
LH: loop header
LB: loop body
LE: loop exit
PB: predicated region body
PF: predicated region fallthrough
CT: control target
= control target key end

     0   :  { %s4524_s15 = smov 0   ;;  %s4526_s16 = smov 0   ;;  %s5786_s0 = inlined_call_operand.vmem [shape: f32[2,16,16,128], index: 0, kind: input, shape index: {}]   ;;  %s5787_s1 = inlined_call_operand.vmem [shape: bf16[1152,128], index: 1, kind: input, shape index: {}]   ;;  %s5788_s2 = inlined_call_operand.vmem [shape: f32[2,128], index: 2, kind: input, shape index: {}]   ;;  %s5789_s3 = inlined_call_operand.vmem [shape: f32[2,16,16,128], index: 3, kind: output, shape index: {0}]   ;;  %s5790_s4 = inlined_call_operand.vmem [shape: f32[2,2,2,128], index: 4, kind: output, shape index: {1}]  }
   0x1   :  { %s4528_s17 = smov 0   ;;  %s4530_s18 = smov 0  }
   0x2   :  { %s4532_s19 = smov 0  }
   0x3 LB: > { %s24_s2 = sadd.s32 1, %s4487_s17  ;;  %s27_s20 = sadd.s32 1, %s4491_s18  ;;  %s4495_s19 = sphi %s4532_s19, %s15_s19   ;;  %s4491_s18 = sphi %s4530_s18, %s5806_s18   ;;  %s4487_s17 = sphi %s4528_s17, %s5805_s17   ;;  %s4483_s16 = sphi %s4526_s16, %s5804_s16   ;;  %s4479_s15 = sphi %s4524_s15, %s5803_s15  }
   0x4   : > { %p25_p0 = scmp.ge.s32.totalorder %s24_s2, 2  ;;  %p3598_p1 = scmp.ge.s32.totalorder %s4495_s19, 1 }
   0x5   : > { %p147_p2 = scmp.lt.s32.totalorder %s4495_s19, 5 }
   0x6   : > { %s5808_s2 = smov (%p25_p0, %s24_s2), 0  ;;  %s5810_s20 = smov (!%p25_p0, %s27_s20), %s4491_s18 }
   0x7   : > { %p148_p3 = pnand %p3598_p1, %p147_p2  ;;  %p29_p4 = scmp.ge.s32.totalorder %s5810_s20, 2 }
   0x8   : > { %s4559_s21 = sshll.u32 (!%p148_p3), %s4479_s15, 3  ;;  %p180_p5 = scmp.lt.s32.totalorder (!%p148_p3), %s4483_s16, 1 }
   0x9   : > { %s5812_s20 = smov (%p29_p4, %s5810_s20), 0  ;;  %151 = sbr.rel (%p148_p3) target bundleno = 610 (0x262), region = 28 }
   0xa   : > { %p182_p6 = scmp.lt.s32.totalorder (!%p148_p3), %s4559_s21, 15  ;;  %p192_p7 = scmp.lt.s32.totalorder (!%p148_p3), %s4479_s15, 1 }
   0xb   : > { %s200_s28 = ssub.s32 (!%p148_p3), 0, %s4479_s15  ;;  %p199_p8 = scmp.lt.s32.totalorder (!%p148_p3), %s4479_s15, 0 }
   0xc   : > { %s3605_s30 = smin.u32 (!%p148_p3), %s4479_s15, %s200_s28  ;;  %p3608_p10 = scmp.ne.s32.totalorder (!%p148_p3), %s4479_s15, 0 }
   0xd   : > { %s202_s8 = sand.u32 (!%p148_p3), 1, %s3605_s30  }
   0xe   : > { %s203_s11 = ssub.s32 (!%p148_p3), 0, %s202_s8 }
  0x10   : > { %s181_s22 = scalar_select %p180_p5, %s4483_s16, 1 }
  0x11   : > { %s183_s23 = scalar_select %p182_p6, %s4559_s21, 15 }
  0x12   : > { %s3601_s24 = sshll.u32 %s181_s22, 5  ;;  %s3603_s26 = sshll.u32 %s181_s22, 1 }
  0x13   : > { %s3600_s25 = sshll.u32 %s183_s23, 1  ;;  %s5814_s11 = smov (!%p199_p8, %s203_s11), %s202_s8 }
  0x14   : > { %s186_s27 = sadd.s32 %s3601_s24, %s3600_s25  ;;  %p3607_p9 = scmp.lt.s32.totalorder %s5814_s11, 0 }
  0x15   : > { %s3602_s29 = sshll.u32 %s186_s27, 3  ;;  %s209_s23 = sadd.s32 2, %s5814_s11 }
  0x16   : > { %s4571_s7 = scalar_lea.vmem %s5789_s3, %s3602_s29  ;;  %s5816_s23 = smov (!%p3607_p9, %s209_s23), %s5814_s11 }
  0x17   : > { %s193_s9 = scalar_select %p192_p7, %s4479_s15, 1 }
  0x18   : > { %214 = sbr.rel (%p3608_p10) target bundleno = 70 (0x46), region = 32  ;;  %s3921_s24 = sshll.u32 (!%p3608_p10), %s4479_s15, 7 }
  0x19   : > { %s195_s10 = sadd.s32 %s3603_s26, %s193_s9  ;;  %s4589_s25 = sshll.u32 (!%p3608_p10), %s4483_s16, 8 }
  0x1a   : > { %s3604_s12 = sshll.u32 %s195_s10, 1  ;;  %s218_s26 = sadd.s32 (!%p3608_p10), %s3921_s24, %s4589_s25 }
  0x1b   : > { %s4580_s22 = scalar_lea.vmem %s5790_s4, %s3604_s12  ;;  %s3429_s27 = smul.u32 (!%p3608_p10), 240, %s5816_s23 }
  0x1c   : > { %s4596_s30 = scalar_lea.vmem (!%p3608_p10), %s5786_s0, %s218_s26  ;;  %s223_s5 = smul.u32 (!%p3608_p10), 3, %s5816_s23 }
  0x1d   : > { %v271_v0 = vld [vmem:[%s4596_s30] sm:$0xff] (!%p3608_p10)  ;;  %v273_v1 = vld [vmem:[%s4596_s30 + $0x8] sm:$0xff] (!%p3608_p10)  ;;  %v275_v2 = vld [vmem:[%s4596_s30 + $0x10] sm:$0xff] (!%p3608_p10)  ;;  %s4602_s6 = scalar_lea.vmem (!%p3608_p10), [#allocation2], %s3429_s27 }
  0x1e   : > { %3612 = vst [vmem:[%s4602_s6 + $0x19] sm:$0xff] (!%p3608_p10), %v271_v0  ;;  %3613 = vst [vmem:[%s4602_s6 + $0x21] sm:$0xff] (!%p3608_p10), %v273_v1  ;;  %v277_v3 = vld [vmem:[%s4596_s30 + $0x18] sm:$0xff] (!%p3608_p10)  ;;  %v279_v4 = vld [vmem:[%s4596_s30 + $0x20] sm:$0xff] (!%p3608_p10)  ;;  %s4635_s8 = scalar_lea.sflag (!%p3608_p10), [#allocation4], %s223_s5 }
  0x1f   : > { %3614 = vst [vmem:[%s4602_s6 + $0x31] sm:$0xff] %v275_v2  ;;  %v281_v5 = vld [vmem:[%s4596_s30 + $0x28] sm:$0xff]  ;;  %3615 = vst [vmem:[%s4602_s6 + $0x39] sm:$0xff] %v277_v3  ;;  %v283_v6 = vld [vmem:[%s4596_s30 + $0x30] sm:$0xff] }
  0x20   : > { %3616 = vst [vmem:[%s4602_s6 + $0x49] sm:$0xff] %v279_v4  ;;  %3617 = vst [vmem:[%s4602_s6 + $0x51] sm:$0xff] %v281_v5  ;;  %v285_v7 = vld [vmem:[%s4596_s30 + $0x38] sm:$0xff]  ;;  %v287_v8 = vld [vmem:[%s4596_s30 + $0x40] sm:$0xff] }
  0x21   : > { %3618 = vst [vmem:[%s4602_s6 + $0x61] sm:$0xff] %v283_v6  ;;  %3619 = vst [vmem:[%s4602_s6 + $0x69] sm:$0xff] %v285_v7  ;;  %v289_v9 = vld [vmem:[%s4596_s30 + $0x48] sm:$0xff]  ;;  %v291_v10 = vld [vmem:[%s4596_s30 + $0x50] sm:$0xff] }
  0x22   : > { %3620 = vst [vmem:[%s4602_s6 + $0x79] sm:$0xff] %v287_v8  ;;  %v293_v11 = vld [vmem:[%s4596_s30 + $0x58] sm:$0xff]  ;;  %3621 = vst [vmem:[%s4602_s6 + $0x81] sm:$0xff] %v289_v9  ;;  %v295_v12 = vld [vmem:[%s4596_s30 + $0x60] sm:$0xff] }
  0x23   : > { %3622 = vst [vmem:[%s4602_s6 + $0x91] sm:$0xff] %v291_v10  ;;  %3623 = vst [vmem:[%s4602_s6 + $0x99] sm:$0xff] %v293_v11  ;;  %v297_v13 = vld [vmem:[%s4596_s30 + $0x68] sm:$0xff]  ;;  %v299_v14 = vld [vmem:[%s4596_s30 + $0x70] sm:$0xff] }
  0x24   : > { %3624 = vst [vmem:[%s4602_s6 + $0xa9] sm:$0xff] %v295_v12  ;;  %3625 = vst [vmem:[%s4602_s6 + $0xb1] sm:$0xff] %v297_v13  ;;  %v301_v15 = vld [vmem:[%s4596_s30 + $0x78] sm:$0xff] }
  0x25   : > { %3626 = vst [vmem:[%s4602_s6 + $0xc1] sm:$0xff] %v299_v14  ;;  %3627 = vst [vmem:[%s4602_s6 + $0xc9] sm:$0xff] %v301_v15 }
  0x26   : > { %310 = vsyncadd %s4635_s8, 2048  ;;  %p3636_p11 = scmp.le.s32.totalorder %s4479_s15, 0 }
  0x27   : > { %s3637_s9 = sadd.s32 (!%p3636_p11), 4294967295, %s4559_s21  ;;  %s3443_s10 = scalar_lea.sflag (!%p3636_p11), %s4635_s8, 1 [#allocation4] }
  0x28   : > { %314 = sbr.rel (%p3636_p11) target bundleno = 54 (0x36), region = 70  ;;  %p316_p12 = scmp.gt.s32.totalorder (!%p3636_p11), %s3637_s9, 0 }
  0x2f   : > { %s5818_s9 = smov (!%p316_p12, %s3637_s9), 0 }
  0x30   : > { %s3638_s11 = sshll.u32 %s5818_s9, 4 }
  0x31   : > { %s319_s12 = sadd.s32 %s3638_s11, %s4589_s25 }
  0x32   : > { %s320_s24 = scalar_lea.vmem %s5786_s0, %s319_s12 }
  0x33   : > { %v357_v16 = vld [vmem:[%s320_s24] sm:$0xff]  ;;  %v359_v17 = vld [vmem:[%s320_s24 + $0x8] sm:$0xff] }
  0x34   : > { %3639 = vst [vmem:[%s4602_s6 + $0x1] sm:$0xff] %v357_v16  ;;  %3640 = vst [vmem:[%s4602_s6 + $0x9] sm:$0xff] %v359_v17 }
  0x35   : > { %368 = vsyncadd %s3443_s10, 256 }
  0x36 PF: > { %p3642_p13 = scmp.ge.s32.totalorder %s4479_s15, 1 }
  0x37   : > { %s373_s26 = sadd.s32 (!%p3642_p13), 8, %s4559_s21  ;;  %s3453_s27 = scalar_lea.sflag (!%p3642_p13), %s4635_s8, 2 [#allocation4] }
  0x38   : > { %372 = sbr.rel (%p3642_p13) target bundleno = 70 (0x46), region = 108  ;;  %p374_p0 = scmp.lt.s32.totalorder (!%p3642_p13), %s373_s26, 15 }
  0x3f   : > { %s5820_s26 = smov (!%p374_p0, %s373_s26), 15 }
  0x40   : > { %s3643_s28 = sshll.u32 %s5820_s26, 4 }
  0x41   : > { %s377_s29 = sadd.s32 %s3643_s28, %s4589_s25 }
  0x42   : > { %s378_s9 = scalar_lea.vmem %s5786_s0, %s377_s29 }
  0x43   : > { %v415_v18 = vld [vmem:[%s378_s9] sm:$0xff]  ;;  %v417_v19 = vld [vmem:[%s378_s9 + $0x8] sm:$0xff] }
  0x44   : > { %3644 = vst [vmem:[%s4602_s6 + $0xd9] sm:$0xff] %v415_v18  ;;  %3645 = vst [vmem:[%s4602_s6 + $0xe1] sm:$0xff] %v417_v19 }
  0x45   : > { %426 = vsyncadd %s3453_s27, 256 }
  0x46 PF: > { %s427_s10 = smul.u32 3, %s5816_s23 }
  0x48   : > { %s428_s11 = scalar_lea.sflag [#allocation4], %s427_s10 }
  0x49   : > { %4467 = dma.done.wait %s428_s11, 2048 }
  0x4a   : > { %4468 = vsyncadd %s428_s11, 4294965248  ;;  %p4307_p1 = scmp.gt.s32.totalorder %s4479_s15, 0  ;;  %s3458_s8 = scalar_lea.sflag %s428_s11, 1 [#allocation4] }
  0x4c   : > { %4470 = dma.done.wait (%p4307_p1), %s3458_s8, 256 }
  0x4d   : > { %4472 = vsyncadd (%p4307_p1), %s3458_s8, 4294967040  ;;  %s3461_s25 = scalar_lea.sflag %s428_s11, 2 [#allocation4] }
  0x4e   : > { %4474 = dma.done.wait (%p192_p7), %s3461_s25, 256 }
  0x4f   : > { %4476 = vsyncadd (%p192_p7), %s3461_s25, 4294967040  ;;  %s4663_s6 = sadd.s32 1, %s4479_s15 }
  0x50   : > { %p3649_p2 = scmp.ge.s32.totalorder %s4663_s6, 2 }
  0x51   : > { %s458_s12 = ssub.s32 (!%p3649_p2), 1, %s5816_s23  ;;  %s3923_s13 = sadd.s32 (!%p3649_p2), 8, %s4559_s21 }
  0x52   : > { %457 = sbr.rel (%p3649_p2) target bundleno = 127 (0x7f), region = 154  ;;  %s4669_s14 = sshll.u32 (!%p3649_p2), %s4483_s16, 8 }
  0x53   : > { %s3652_s24 = sshll.u32 (!%p3649_p2), %s4479_s15, 7  ;;  %s3467_s27 = smul.u32 (!%p3649_p2), 240, %s458_s12 }
  0x54   : > { %s3464_s26 = sadd.s32 (!%p3649_p2), %s3652_s24, %s4669_s14  ;;  %s4678_s5 = smul.u32 (!%p3649_p2), 3, %s458_s12 }
  0x55   : > { %s4676_s30 = scalar_lea.vmem (!%p3649_p2), %s5786_s0, %s3464_s26  ;;  %s4683_s16 = scalar_lea.vmem (!%p3649_p2), [#allocation2], %s3467_s27 }
  0x56   : > { %v3654_v20 = vld [vmem:[%s4676_s30 + $0x80] sm:$0xff] (!%p3649_p2)  ;;  %v3656_v21 = vld [vmem:[%s4676_s30 + $0x88] sm:$0xff] (!%p3649_p2)  ;;  %v3658_v22 = vld [vmem:[%s4676_s30 + $0x90] sm:$0xff] (!%p3649_p2)  ;;  %s4715_s9 = scalar_lea.sflag (!%p3649_p2), [#allocation4], %s4678_s5 }
  0x57   : > { %3655 = vst [vmem:[%s4683_s16 + $0x19] sm:$0xff] (!%p3649_p2), %v3654_v20  ;;  %3657 = vst [vmem:[%s4683_s16 + $0x21] sm:$0xff] (!%p3649_p2), %v3656_v21  ;;  %v3660_v23 = vld [vmem:[%s4676_s30 + $0x98] sm:$0xff] (!%p3649_p2)  ;;  %v3662_v24 = vld [vmem:[%s4676_s30 + $0xa0] sm:$0xff] (!%p3649_p2) }
  0x58   : > { %3659 = vst [vmem:[%s4683_s16 + $0x31] sm:$0xff] (!%p3649_p2), %v3658_v22  ;;  %v3664_v25 = vld [vmem:[%s4676_s30 + $0xa8] sm:$0xff] (!%p3649_p2)  ;;  %3661 = vst [vmem:[%s4683_s16 + $0x39] sm:$0xff] (!%p3649_p2), %v3660_v23  ;;  %v3666_v26 = vld [vmem:[%s4676_s30 + $0xb0] sm:$0xff] (!%p3649_p2) }
  0x59   : > { %3663 = vst [vmem:[%s4683_s16 + $0x49] sm:$0xff] %v3662_v24  ;;  %3665 = vst [vmem:[%s4683_s16 + $0x51] sm:$0xff] %v3664_v25  ;;  %v3668_v27 = vld [vmem:[%s4676_s30 + $0xb8] sm:$0xff]  ;;  %v3670_v28 = vld [vmem:[%s4676_s30 + $0xc0] sm:$0xff] }
  0x5a   : > { %3667 = vst [vmem:[%s4683_s16 + $0x61] sm:$0xff] %v3666_v26  ;;  %3669 = vst [vmem:[%s4683_s16 + $0x69] sm:$0xff] %v3668_v27  ;;  %v3672_v29 = vld [vmem:[%s4676_s30 + $0xc8] sm:$0xff]  ;;  %v3674_v30 = vld [vmem:[%s4676_s30 + $0xd0] sm:$0xff] }
  0x5b   : > { %3671 = vst [vmem:[%s4683_s16 + $0x79] sm:$0xff] %v3670_v28  ;;  %v3676_v31 = vld [vmem:[%s4676_s30 + $0xd8] sm:$0xff]  ;;  %3673 = vst [vmem:[%s4683_s16 + $0x81] sm:$0xff] %v3672_v29  ;;  %v3678_v32 = vld [vmem:[%s4676_s30 + $0xe0] sm:$0xff] }
  0x5c   : > { %3675 = vst [vmem:[%s4683_s16 + $0x91] sm:$0xff] %v3674_v30  ;;  %3677 = vst [vmem:[%s4683_s16 + $0x99] sm:$0xff] %v3676_v31  ;;  %v3680_v33 = vld [vmem:[%s4676_s30 + $0xe8] sm:$0xff]  ;;  %v3682_v34 = vld [vmem:[%s4676_s30 + $0xf0] sm:$0xff] }
  0x5d   : > { %3679 = vst [vmem:[%s4683_s16 + $0xa9] sm:$0xff] %v3678_v32  ;;  %3681 = vst [vmem:[%s4683_s16 + $0xb1] sm:$0xff] %v3680_v33  ;;  %v3684_v35 = vld [vmem:[%s4676_s30 + $0xf8] sm:$0xff] }
  0x5e   : > { %3683 = vst [vmem:[%s4683_s16 + $0xc1] sm:$0xff] %v3682_v34  ;;  %3685 = vst [vmem:[%s4683_s16 + $0xc9] sm:$0xff] %v3684_v35 }
  0x5f   : > { %554 = vsyncadd %s4715_s9, 2048  ;;  %p3702_p3 = scmp.le.s32.totalorder %s4663_s6, 0 }
  0x60   : > { %s3703_s10 = sadd.s32 (!%p3702_p3), 4294967295, %s3923_s13  ;;  %s3481_s11 = scalar_lea.sflag (!%p3702_p3), %s4715_s9, 1 [#allocation4] }
  0x61   : > { %558 = sbr.rel (%p3702_p3) target bundleno = 111 (0x6f), region = 192  ;;  %p560_p4 = scmp.gt.s32.totalorder (!%p3702_p3), %s3703_s10, 0 }
  0x68   : > { %s5822_s10 = smov (!%p560_p4, %s3703_s10), 0 }
  0x69   : > { %s3704_s8 = sshll.u32 %s5822_s10, 4 }
  0x6a   : > { %s563_s25 = sadd.s32 %s3704_s8, %s4669_s14 }
  0x6b   : > { %s564_s26 = scalar_lea.vmem %s5786_s0, %s563_s25 }
  0x6c   : > { %v601_v36 = vld [vmem:[%s564_s26] sm:$0xff]  ;;  %v603_v37 = vld [vmem:[%s564_s26 + $0x8] sm:$0xff] }
  0x6d   : > { %3705 = vst [vmem:[%s4683_s16 + $0x1] sm:$0xff] %v601_v36  ;;  %3706 = vst [vmem:[%s4683_s16 + $0x9] sm:$0xff] %v603_v37 }
  0x6e   : > { %612 = vsyncadd %s3481_s11, 256 }
  0x6f PF: > { %p3708_p5 = scmp.ge.s32.totalorder %s4663_s6, 1 }
  0x70   : > { %s617_s27 = sadd.s32 (!%p3708_p5), 8, %s3923_s13  ;;  %s3491_s28 = scalar_lea.sflag (!%p3708_p5), %s4715_s9, 2 [#allocation4] }
  0x71   : > { %616 = sbr.rel (%p3708_p5) target bundleno = 127 (0x7f), region = 230  ;;  %p618_p6 = scmp.lt.s32.totalorder (!%p3708_p5), %s617_s27, 15 }
  0x78   : > { %s5824_s27 = smov (!%p618_p6, %s617_s27), 15 }
  0x79   : > { %s3709_s29 = sshll.u32 %s5824_s27, 4 }
  0x7a   : > { %s621_s30 = sadd.s32 %s3709_s29, %s4669_s14 }
  0x7b   : > { %s622_s11 = scalar_lea.vmem %s5786_s0, %s621_s30 }
  0x7c   : > { %v659_v38 = vld [vmem:[%s622_s11] sm:$0xff]  ;;  %v661_v39 = vld [vmem:[%s622_s11 + $0x8] sm:$0xff] }
  0x7d   : > { %3710 = vst [vmem:[%s4683_s16 + $0xd9] sm:$0xff] %v659_v38  ;;  %3711 = vst [vmem:[%s4683_s16 + $0xe1] sm:$0xff] %v661_v39 }
  0x7e   : > { %670 = vsyncadd %s3491_s28, 256 }
  0x7f PF: > { %s671_s21 = smul.u32 240, %s5816_s23  ;;  %vm863_vm0 = vcmask 1040384   ;;  %vm864_vm1 = vsmask.f32 256  ;;  %vm896_vm2 = vsmask.f32 7938 }
  0x80   : > { %vm4745_vm3 = vmand %vm863_vm0, %vm864_vm1 }
  0x81   : > { %s4739_s6 = scalar_lea.vmem [#allocation2], %s671_s21  ;;  %vm4750_vm4 = vmand %vm863_vm0, %vm896_vm2 }
  0x86   : > { %v673_v40 = vld [vmem:[%s4739_s6] sm:$0xff]  ;;  %v674_v41 = vld [vmem:[%s4739_s6 + $0x8] sm:$0xff]  ;;  %v675_v42 = vld [vmem:[%s4739_s6 + $0x10] sm:$0x3] }
  0x87   : > { %v3957_v45 = vpack.c.bf16 %v674_v41, %v673_v40  ;;  %v3926_v46 = vpack.c.bf16 %v675_v42, %v675_v42  ;;  %v676_v47 = vld [vmem:[%s4739_s6 + $0x18] sm:$0xff]  ;;  %v678_v48 = vld [vmem:[%s4739_s6 + $0x28] sm:$0x3]  ;;  %v679_v49 = vld [vmem:[%s4739_s6 + $0x30] sm:$0xff] }
  0x88   : > { %v3927_v50 = vpack.c.bf16 %v676_v47, %v676_v47  ;;  %v3929_v51 = vpack.c.bf16 %v678_v48, %v678_v48  ;;  %v680_v52 = vld [vmem:[%s4739_s6 + $0x38] sm:$0xff]  ;;  %v681_v53 = vld [vmem:[%s4739_s6 + $0x40] sm:$0x3]  ;;  %v682_v54 = vld [vmem:[%s4739_s6 + $0x48] sm:$0xff] }
  0x89   : > { %3958 = vst [vmem:[#allocation3] sm:$0xff] %v3957_v45   ;;  %835 = vst [vmem:[#allocation3 + $0x8] sm:$0x1] %v3926_v46  ;;  %v3962_v55 = vpack.c.bf16 %v680_v52, %v679_v49  ;;  %v3932_v56 = vpack.c.bf16 %v681_v53, %v681_v53  ;;  %v3933_v57 = vpack.c.bf16 %v682_v54, %v682_v54  ;;  %v684_v58 = vld [vmem:[%s4739_s6 + $0x58] sm:$0x3]  ;;  %v685_v59 = vld [vmem:[%s4739_s6 + $0x60] sm:$0xff] }
  0x8a   : > { %v686_v60 = vld [vmem:[%s4739_s6 + $0x68] sm:$0xff]  ;;  %836 = vst [vmem:[#allocation3 + $0xc] sm:$0xf] %v3927_v50  ;;  %838 = vst [vmem:[#allocation3 + $0x14] sm:$0x1] %v3929_v51  ;;  %v3935_v61 = vpack.c.bf16 %v684_v58, %v684_v58  ;;  %v688_v0 = vld [vmem:[%s4739_s6 + $0x78] sm:$0xff] }
  0x8b   : > { %v3967_v62 = vpack.c.bf16 %v686_v60, %v685_v59  ;;  %v687_v63 = vld [vmem:[%s4739_s6 + $0x70] sm:$0x3]  ;;  %v690_v1 = vld [vmem:[%s4739_s6 + $0x88] sm:$0x3]  ;;  %3979 = vst [vmem:[#allocation3 + $0x18] sm:$0xff] %v3962_v55   ;;  %v3939_v3 = vpack.c.bf16 %v688_v0, %v688_v0  ;;  %v692_v6 = vld [vmem:[%s4739_s6 + $0x98] sm:$0xff] }
  0x8c   : > { %841 = vst [vmem:[#allocation3 + $0x20] sm:$0x1] %v3932_v56  ;;  %842 = vst [vmem:[#allocation3 + $0x24] sm:$0xf] %v3933_v57  ;;  %v3938_v2 = vpack.c.bf16 %v687_v63, %v687_v63  ;;  %v3941_v4 = vpack.c.bf16 %v690_v1, %v690_v1  ;;  %v691_v5 = vld [vmem:[%s4739_s6 + $0x90] sm:$0xff]  ;;  %v694_v10 = vld [vmem:[%s4739_s6 + $0xa8] sm:$0xff] }
  0x8d   : > { %v693_v7 = vld [vmem:[%s4739_s6 + $0xa0] sm:$0x3]  ;;  %844 = vst [vmem:[#allocation3 + $0x2c] sm:$0x1] %v3935_v61  ;;  %3980 = vst [vmem:[#allocation3 + $0x30] sm:$0xff] %v3967_v62   ;;  %v3972_v8 = vpack.c.bf16 %v692_v6, %v691_v5  ;;  %v3945_v13 = vpack.c.bf16 %v694_v10, %v694_v10  ;;  %v698_v15 = vld [vmem:[%s4739_s6 + $0xc8] sm:$0xff] }
  0x8e   : > { %v3944_v9 = vpack.c.bf16 %v693_v7, %v693_v7  ;;  %v696_v11 = vld [vmem:[%s4739_s6 + $0xb8] sm:$0x3]  ;;  %v697_v12 = vld [vmem:[%s4739_s6 + $0xc0] sm:$0xff]  ;;  %847 = vst [vmem:[#allocation3 + $0x38] sm:$0x1] %v3938_v2  ;;  %v683_v23 = vld [vmem:[%s4739_s6 + $0x50] sm:$0xff] }
  0x8f   : > { %848 = vst [vmem:[#allocation3 + $0x3c] sm:$0xf] %v3939_v3  ;;  %850 = vst [vmem:[#allocation3 + $0x44] sm:$0x1] %v3941_v4  ;;  %v3947_v14 = vpack.c.bf16 %v696_v11, %v696_v11  ;;  %v699_v16 = vld [vmem:[%s4739_s6 + $0xd0] sm:$0x3]  ;;  %v3977_v18 = vpack.c.bf16 %v698_v15, %v697_v12  ;;  %v3934_v26 = vpack.c.bf16 %v683_v23, %v683_v23 }
  0x90   : > { %v700_v17 = vld [vmem:[%s4739_s6 + $0xd8] sm:$0xff]  ;;  %3981 = vst [vmem:[#allocation3 + $0x48] sm:$0xff] %v3972_v8   ;;  %853 = vst [vmem:[#allocation3 + $0x50] sm:$0x1] %v3944_v9  ;;  %v3950_v19 = vpack.c.bf16 %v699_v16, %v699_v16  ;;  %v702_v21 = vld [vmem:[%s4739_s6 + $0xe8] sm:$0x3] }
  0x91   : > { %v3951_v20 = vpack.c.bf16 %v700_v17, %v700_v17  ;;  %v677_v22 = vld [vmem:[%s4739_s6 + $0x20] sm:$0xff]  ;;  %854 = vst [vmem:[#allocation3 + $0x54] sm:$0xf] %v3945_v13  ;;  %856 = vst [vmem:[#allocation3 + $0x5c] sm:$0x1] %v3947_v14  ;;  %v3953_v24 = vpack.c.bf16 %v702_v21, %v702_v21  ;;  %v695_v28 = vld [vmem:[%s4739_s6 + $0xb0] sm:$0xff] }
  0x92   : > { %v3928_v25 = vpack.c.bf16 %v677_v22, %v677_v22  ;;  %v689_v27 = vld [vmem:[%s4739_s6 + $0x80] sm:$0xff]  ;;  %3982 = vst [vmem:[#allocation3 + $0x60] sm:$0xff] %v3977_v18   ;;  %859 = vst [vmem:[#allocation3 + $0x68] sm:$0x1] %v3950_v19  ;;  %v3946_v31 = vpack.c.bf16 %v695_v28, %v695_v28  ;;  %v898_v34 = vld [vmem:[#allocation3 + $0x8] sm:$0x1] }
  0x93   : > { %v701_v29 = vld [vmem:[%s4739_s6 + $0xe0] sm:$0xff]  ;;  %860 = vst [vmem:[#allocation3 + $0x6c] sm:$0xf] %v3951_v20  ;;  %v3940_v30 = vpack.c.bf16 %v689_v27, %v689_v27  ;;  %862 = vst [vmem:[#allocation3 + $0x74] sm:$0x1] %v3953_v24  ;;  %v899_v37 = vsel %vm4750_vm4, 0, %v898_v34 }
  0x94   : > { %v3952_v32 = vpack.c.bf16 %v701_v29, %v701_v29  ;;  %v866_v33 = vld [vmem:[#allocation3] sm:$0x1]  ;;  %837 = vst [vmem:[#allocation3 + $0x10] sm:$0xf] %v3928_v25  ;;  %843 = vst [vmem:[#allocation3 + $0x28] sm:$0xf] %v3934_v26 }
  0x95   : > { %v867_v35 = vsel %vm4745_vm3, 0, %v866_v33  ;;  %v869_v36 = vld [vmem:[#allocation3 + $0xc] sm:$0x1]  ;;  %v901_v38 = vld [vmem:[#allocation3 + $0x14] sm:$0x1]  ;;  %v4497_v10 = vmov (!%p3608_p10), 0  }
  0x96   : > { %849 = vst [vmem:[#allocation3 + $0x40] sm:$0xf] %v3940_v30  ;;  %855 = vst [vmem:[#allocation3 + $0x58] sm:$0xf] %v3946_v31  ;;  %v870_v39 = vsel %vm4745_vm3, 0, %v869_v36  ;;  %v902_v42 = vsel %vm4750_vm4, 0, %v901_v38 }
  0x97   : > { %861 = vst [vmem:[#allocation3 + $0x70] sm:$0xf] %v3952_v32  ;;  %868 = vst [vmem:[#allocation3] sm:$0x1] %v867_v35  ;;  %v872_v40 = vld [vmem:[#allocation3 + $0x18] sm:$0x1] }
  0x98   : > { %v875_v41 = vld [vmem:[#allocation3 + $0x24] sm:$0x1]  ;;  %900 = vst [vmem:[#allocation3 + $0x8] sm:$0x1] %v899_v37  ;;  %871 = vst [vmem:[#allocation3 + $0xc] sm:$0x1] %v870_v39 }
  0x99   : > { %v873_v45 = vsel %vm4745_vm3, 0, %v872_v40  ;;  %v876_v46 = vsel %vm4745_vm3, 0, %v875_v41  ;;  %v878_v47 = vld [vmem:[#allocation3 + $0x30] sm:$0x1]  ;;  %903 = vst [vmem:[#allocation3 + $0x14] sm:$0x1] %v902_v42 }
  0x9a   : > { %v904_v48 = vld [vmem:[#allocation3 + $0x20] sm:$0x1]  ;;  %874 = vst [vmem:[#allocation3 + $0x18] sm:$0x1] %v873_v45  ;;  %877 = vst [vmem:[#allocation3 + $0x24] sm:$0x1] %v876_v46 }
  0x9b   : > { %v879_v49 = vsel %vm4745_vm3, 0, %v878_v47  ;;  %v881_v50 = vld [vmem:[#allocation3 + $0x3c] sm:$0x1]  ;;  %v905_v51 = vsel %vm4750_vm4, 0, %v904_v48  ;;  %v907_v52 = vld [vmem:[#allocation3 + $0x2c] sm:$0x1] }
  0x9c   : > { %880 = vst [vmem:[#allocation3 + $0x30] sm:$0x1] %v879_v49  ;;  %v882_v53 = vsel %vm4745_vm3, 0, %v881_v50  ;;  %v884_v54 = vld [vmem:[#allocation3 + $0x48] sm:$0x1]  ;;  %v908_v55 = vsel %vm4750_vm4, 0, %v907_v52 }
  0x9d   : > { %906 = vst [vmem:[#allocation3 + $0x20] sm:$0x1] %v905_v51  ;;  %v910_v56 = vld [vmem:[#allocation3 + $0x38] sm:$0x1]  ;;  %883 = vst [vmem:[#allocation3 + $0x3c] sm:$0x1] %v882_v53 }
  0x9e   : > { %v885_v57 = vsel %vm4745_vm3, 0, %v884_v54  ;;  %v887_v58 = vld [vmem:[#allocation3 + $0x54] sm:$0x1]  ;;  %909 = vst [vmem:[#allocation3 + $0x2c] sm:$0x1] %v908_v55  ;;  %v911_v59 = vsel %vm4750_vm4, 0, %v910_v56 }
  0x9f   : > { %v913_v60 = vld [vmem:[#allocation3 + $0x44] sm:$0x1]  ;;  %886 = vst [vmem:[#allocation3 + $0x48] sm:$0x1] %v885_v57  ;;  %v888_v61 = vsel %vm4745_vm3, 0, %v887_v58 }
  0xa0   : > { %v890_v62 = vld [vmem:[#allocation3 + $0x60] sm:$0x1]  ;;  %v893_v63 = vld [vmem:[#allocation3 + $0x6c] sm:$0x1]  ;;  %912 = vst [vmem:[#allocation3 + $0x38] sm:$0x1] %v911_v59 }
  0xa1   : > { %v914_v0 = vsel %vm4750_vm4, 0, %v913_v60  ;;  %889 = vst [vmem:[#allocation3 + $0x54] sm:$0x1] %v888_v61  ;;  %v891_v1 = vsel %vm4745_vm3, 0, %v890_v62  ;;  %v894_v2 = vsel %vm4745_vm3, 0, %v893_v63  ;;  %930 = sbr.rel (%p3608_p10) target bundleno = 168 (0xa8), region = 268 }
  0xa2   : > { %915 = vst [vmem:[#allocation3 + $0x44] sm:$0x1] %v914_v0  ;;  %v916_v3 = vld [vmem:[#allocation3 + $0x50] sm:$0x1]  ;;  %v919_v4 = vld [vmem:[#allocation3 + $0x5c] sm:$0x1] }
  0xa3   : > { %892 = vst [vmem:[#allocation3 + $0x60] sm:$0x1] %v891_v1  ;;  %895 = vst [vmem:[#allocation3 + $0x6c] sm:$0x1] %v894_v2  ;;  %v917_v5 = vsel %vm4750_vm4, 0, %v916_v3  ;;  %v920_v6 = vsel %vm4750_vm4, 0, %v919_v4 }
  0xa4   : > { %v922_v7 = vld [vmem:[#allocation3 + $0x68] sm:$0x1]  ;;  %v925_v8 = vld [vmem:[#allocation3 + $0x74] sm:$0x1]  ;;  %918 = vst [vmem:[#allocation3 + $0x50] sm:$0x1] %v917_v5 }
  0xa5   : > { %921 = vst [vmem:[#allocation3 + $0x5c] sm:$0x1] %v920_v6  ;;  %v923_v9 = vsel %vm4750_vm4, 0, %v922_v7  ;;  %v926_v43 = vsel %vm4750_vm4, 0, %v925_v8  ;;  %931 = vst [vmem:[#allocation3] sm:$0xf] (!%p3608_p10), %v4497_v10 }
  0xa6   : > { %924 = vst [vmem:[#allocation3 + $0x68] sm:$0x1] %v923_v9  ;;  %927 = vst [vmem:[#allocation3 + $0x74] sm:$0x1] %v926_v43 }
  0xa7   : > { %932 = vst [vmem:[#allocation3 + $0x4] sm:$0xf] (!%p3608_p10), %v4497_v10  ;;  %933 = vst [vmem:[#allocation3 + $0x8] sm:$0x1] (!%p3608_p10), %v4497_v10 }
  0xa8 PF: > { %p3744_p7 = scmp.ne.s32.totalorder %s4479_s15, 1 }
  0xa9   : > { %v4498_v11 = vmov (!%p3744_p7), 0  }
  0xaa   : > { %937 = sbr.rel (%p3744_p7) target bundleno = 177 (0xb1), region = 272  ;;  %939 = vst [vmem:[#allocation3 + $0x6c] sm:$0xf] (!%p3744_p7), %v4498_v11  ;;  %940 = vst [vmem:[#allocation3 + $0x70] sm:$0xf] (!%p3744_p7), %v4498_v11 }
  0xab   : > { %941 = vst [vmem:[#allocation3 + $0x74] sm:$0x1] (!%p3744_p7), %v4498_v11 }
  0xb1 PF: > { %v4351_v44 = vld [vmem:[%s5787_s1 + $0x40] sm:$0xff]   ;;  %v4355_v15 = vld [vmem:[%s5787_s1 + $0x48] sm:$0xff]   ;;  %v4359_v19 = vld [vmem:[%s5787_s1 + $0x50] sm:$0xff]   ;;  %vm1193_vm5 = vcmask 1042432   ;;  %vm966_vm6 = vsmask.f32 3328 }
  0xb2   : > { %v4352_v12 = vld [vmem:[%s5787_s1 + $0xc0] sm:$0xff]   ;;  %3983 = vmatprep.subr.bf16.mxu0 %v4351_v44  ;;  %v4356_v16 = vld [vmem:[%s5787_s1 + $0xc8] sm:$0xff]   ;;  %v4360_v20 = vld [vmem:[%s5787_s1 + $0xd0] sm:$0xff]   ;;  %vm967_vm7 = vsmask.f32 7440  ;;  %vm1194_vm8 = vcmask 1046532  }
  0xb3   : > { %v4353_v13 = vld [vmem:[%s5787_s1] sm:$0xff]   ;;  %4047 = vmatprep.subr.bf16.mxu1 %v4352_v12  ;;  %v4357_v17 = vld [vmem:[%s5787_s1 + $0x8] sm:$0xff]   ;;  %v4361_v21 = vld [vmem:[%s5787_s1 + $0x10] sm:$0xff]  }
  0xb4   : > { %v4354_v14 = vld [vmem:[%s5787_s1 + $0x80] sm:$0xff]   ;;  %3984 = vmatpush3.bf16.msra.mxu0 %v4353_v13  ;;  %v4358_v18 = vld [vmem:[%s5787_s1 + $0x88] sm:$0xff]   ;;  %v4362_v22 = vld [vmem:[%s5787_s1 + $0x90] sm:$0xff]  }
  0xb5   : > { %4048 = vmatpush3.bf16.msra.mxu1 %v4354_v14  ;;  %3985 = vmatprep.subr.bf16.mxu0 %v4355_v15  ;;  %v4363_v23 = vld [vmem:[%s5787_s1 + $0x58] sm:$0xff]   ;;  %v4367_v27 = vld [vmem:[%s5787_s1 + $0x60] sm:$0xff]   ;;  %v4371_v31 = vld [vmem:[%s5787_s1 + $0x68] sm:$0xff]  }
  0xb6   : > { %4049 = vmatprep.subr.bf16.mxu1 %v4356_v16  ;;  %v4364_v24 = vld [vmem:[%s5787_s1 + $0xd8] sm:$0xff]   ;;  %v4368_v28 = vld [vmem:[%s5787_s1 + $0xe0] sm:$0xff]   ;;  %v4372_v32 = vld [vmem:[%s5787_s1 + $0xe8] sm:$0xff]  }
  0xb7   : > { %v4365_v25 = vld [vmem:[%s5787_s1 + $0x18] sm:$0xff]   ;;  %v4369_v29 = vld [vmem:[%s5787_s1 + $0x20] sm:$0xff]   ;;  %v4373_v33 = vld [vmem:[%s5787_s1 + $0x28] sm:$0xff]  }
  0xb8   : > { %3986 = vmatpush3.bf16.msra.mxu0 %v4357_v17  ;;  %v4366_v26 = vld [vmem:[%s5787_s1 + $0x98] sm:$0xff]   ;;  %v4370_v30 = vld [vmem:[%s5787_s1 + $0xa0] sm:$0xff]   ;;  %v4374_v34 = vld [vmem:[%s5787_s1 + $0xa8] sm:$0xff]  }
  0xb9   : > { %4050 = vmatpush3.bf16.msra.mxu1 %v4358_v18  ;;  %3987 = vmatprep.subr.bf16.mxu0 %v4359_v19  ;;  %v4375_v35 = vld [vmem:[%s5787_s1 + $0x70] sm:$0xff]   ;;  %v4379_v39 = vld [vmem:[%s5787_s1 + $0x78] sm:$0xff]   ;;  %v4920_v45 = vld [vmem:[#allocation3] sm:$0xf] }
  0xba   : > { %4051 = vmatprep.subr.bf16.mxu1 %v4360_v20  ;;  %v4376_v36 = vld [vmem:[%s5787_s1 + $0xf0] sm:$0xff]   ;;  %v4380_v40 = vld [vmem:[%s5787_s1 + $0xf8] sm:$0xff]   ;;  %v4922_v46 = vld [vmem:[#allocation3 + $0x4] sm:$0xf]  ;;  %v970_v48 = vshrl.u32 %v4920_v45, 16  ;;  %v973_v49 = vshll.u32 %v4920_v45, 16 }
  0xbb   : > { %v4377_v37 = vld [vmem:[%s5787_s1 + $0x30] sm:$0xff]   ;;  %v4381_v41 = vld [vmem:[%s5787_s1 + $0x38] sm:$0xff]   ;;  %v4924_v47 = vld [vmem:[#allocation3 + $0x8] sm:$0x1]  ;;  %v979_v50 = vshll.u32 %v4922_v46, 16  ;;  %v983_v51 = vshrl.u32 %v4922_v46, 16  ;;  %v3769_v14 = vcombine.low %v4920_v45, %v4922_v46 }
  0xbc   : > { %3988 = vmatpush3.bf16.msra.mxu0 %v4361_v21  ;;  %v4378_v38 = vld [vmem:[%s5787_s1 + $0xb0] sm:$0xff]   ;;  %v4382_v42 = vld [vmem:[%s5787_s1 + $0xb8] sm:$0xff]   ;;  %v989_v52 = vshll.u32 %v4924_v47, 16  ;;  %v1253_v53 = vld [vmem:[#allocation3 + $0xc] sm:$0xf]  ;;  %v972_v54 = vrot.slane %v970_v48, 4 }
  0xbd   : > { %4052 = vmatpush3.bf16.msra.mxu1 %v4362_v22  ;;  %3989 = vmatprep.subr.bf16.mxu0 %v4363_v23  ;;  %v975_v55 = vrot.slane %v973_v49, 5  ;;  %v4931_v56 = vld [vmem:[#allocation3 + $0x10] sm:$0xf]  ;;  %v1278_v57 = vshrl.u32 %v1253_v53, 16  ;;  %v1281_v58 = vshll.u32 %v1253_v53, 16  ;;  %v981_v59 = vrot.slane %v979_v50, 5  ;;  %vm4941_vm9 = vmor %vm966_vm6, %vm967_vm7 }
  0xbe   : > { %4053 = vmatprep.subr.bf16.mxu1 %v4364_v24  ;;  %v985_v60 = vrot.slane %v983_v51, 4  ;;  %v1201_v61 = vrot.slane %v4924_v47, 5  ;;  %v1287_v62 = vshll.u32 %v4931_v56, 16  ;;  %v1161_v63 = vld [vmem:[#allocation3] sm:$0xe]  ;;  %v1291_v3 = vshrl.u32 %v4931_v56, 16  ;;  %vm4951_vm10 = vmor %vm1193_vm5, %vm1194_vm8 }
  0xbf   : > { %v976_v0 = vor.u32 %v975_v55, %v972_v54  ;;  %v1280_v1 = vrot.slane %v1278_v57, 4  ;;  %v1283_v2 = vrot.slane %v1281_v58, 5  ;;  %v4385_v4 = vld [vmem:[%s5787_s1 + $0x140] sm:$0xff]   ;;  %v991_v7 = vrot.slane %v989_v52, 5  ;;  %v4958_v17 = vld [vmem:[#allocation3 + $0xc] sm:$0xf] }
  0xc0   : > { %3990 = vmatpush3.bf16.msra.mxu0 %v4365_v25  ;;  %v986_v6 = vor.u32 %v985_v60, %v981_v59  ;;  %v4945_v8 = vrot.slane %v1287_v62, 5  ;;  %v3793_v9 = vcombine.low %v1253_v53, %v4931_v56  ;;  %v1293_v11 = vrot.slane %v1291_v3, 4  ;;  %v4386_v21 = vld [vmem:[%s5787_s1 + $0x100] sm:$0xff]   ;;  %v4968_v22 = vld [vmem:[#allocation3 + $0x10] sm:$0xf]  ;;  %v4390_v52 = vld [vmem:[%s5787_s1 + $0x108] sm:$0xff]  }
  0xc1   : > { %4054 = vmatpush3.bf16.msra.mxu1 %v4366_v26  ;;  %3991 = vmatprep.subr.bf16.mxu0 %v4367_v27  ;;  %v977_v43 = vrot.slane %v976_v0, 4  ;;  %v1284_v10 = vor.u32 %v1283_v2, %v1280_v1  ;;  %v1503_v44 = vrot.slane %v4931_v56, 5  ;;  %v3745_v15 = vrot.slane %v1161_v63, 9  ;;  %v4970_v23 = vld [vmem:[#allocation3 + $0x14] sm:$0x1]  ;;  %v4394_v47 = vld [vmem:[%s5787_s1 + $0x1c0] sm:$0xff]  }
  0xc2   : > { %4055 = vmatprep.subr.bf16.mxu1 %v4368_v28  ;;  %v987_v13 = vrot.slane %v986_v6, 4  ;;  %2879 = vmatprep.mubr.bf16.mxu1 %v3793_v9  ;;  %v1198_v16 = vrot.slane %v4922_v46, 5  ;;  %v1294_v20 = vor.u32 %v1293_v11, %v4945_v8  ;;  %v994_v24 = vshrl.u32 %v4958_v17, 16  ;;  %v5006_v58 = vld [vmem:[#allocation3 + $0x18] sm:$0xf]  ;;  %v4393_v1 = vld [vmem:[%s5787_s1 + $0x150] sm:$0xff]  }
  0xc3   : > { %v982_v18 = vsel %vm4941_vm9, %v977_v43, %v981_v59  ;;  %v4962_v19 = vrot.slane %v1284_v10, 4  ;;  %v997_v28 = vshll.u32 %v4958_v17, 16  ;;  %v4396_v59 = vld [vmem:[%s5787_s1 + $0x180] sm:$0xff]   ;;  %v3770_v62 = vcombine.low %v4958_v17, %v4968_v22  ;;  %v5013_v0 = vld [vmem:[#allocation3 + $0x1c] sm:$0xf] }
  0xc4   : > { %3992 = vmatpush3.bf16.msra.mxu0 %v4369_v29  ;;  %v992_v25 = vsel %vm4941_vm9, %v987_v13, %v991_v7  ;;  %v1199_v26 = vsel %vm4951_vm10, %v3745_v15, %v1198_v16  ;;  %v1200_v27 = vrot.slane %v1198_v16, 4  ;;  %v1255_v29 = vld [vmem:[#allocation3 + $0x18] sm:$0xf]  ;;  %v1205_v2 = vrot.slane %v4968_v22, 5  ;;  %v5028_v13 = vld [vmem:[#allocation3 + $0x24] sm:$0xf] }
  0xc5   : > { %4056 = vmatpush3.bf16.msra.mxu1 %v4370_v30  ;;  %3993 = vmatprep.subr.bf16.mxu0 %v4371_v31  ;;  %v4978_v30 = vld [vmem:[#allocation3 + $0x1c] sm:$0xf]  ;;  %v3777_v31 = vcombine.low %v982_v18, %v992_v25  ;;  %v1302_v45 = vshrl.u32 %v1255_v29, 16  ;;  %v1305_v46 = vshll.u32 %v1255_v29, 16  ;;  %v1208_v3 = vrot.slane %v4970_v23, 5  ;;  %v4395_v15 = vld [vmem:[%s5787_s1 + $0x110] sm:$0xff]  }
  0xc6   : > { %4057 = vmatprep.subr.bf16.mxu1 %v4372_v32  ;;  %v1290_v32 = vsel %vm4941_vm9, %v4962_v19, %v4945_v8  ;;  %v1315_v51 = vshrl.u32 %v4978_v30, 16  ;;  %v3794_v57 = vcombine.low %v1255_v29, %v4978_v30  ;;  %v1018_v6 = vshrl.u32 %v5006_v58, 16 }
  0xc7   : > { %2782 = vmatprep.mubr.bf16.mxu0 %v3777_v31  ;;  %v5001_v54 = vrot.slane %v1302_v45, 4  ;;  %v5003_v55 = vrot.slane %v1305_v46, 5  ;;  %v1021_v7 = vshll.u32 %v5006_v58, 16  ;;  %v1027_v10 = vshll.u32 %v5013_v0, 16  ;;  %v4401_v46 = vld [vmem:[%s5787_s1 + $0x118] sm:$0xff]  }
  0xc8   : > { %3994 = vmatpush3.bf16.msra.mxu0 %v4373_v33  ;;  %v4984_v33 = vrot.slane %v1294_v20, 4  ;;  %v1031_v11 = vshrl.u32 %v5013_v0, 16  ;;  %v1207_v17 = vrot.slane %v1205_v2, 4  ;;  %v1020_v18 = vrot.slane %v1018_v6, 4 }
  0xc9   : > { %4058 = vmatpush3.bf16.msra.mxu1 %v4374_v34  ;;  %3995 = vmatprep.subr.bf16.mxu0 %v4375_v35  ;;  %v996_v34 = vrot.slane %v994_v24, 4  ;;  %v1162_v35 = vld [vmem:[#allocation3 + $0xc] sm:$0xe]  ;;  %v1023_v20 = vrot.slane %v1021_v7, 5  ;;  %v1029_v24 = vrot.slane %v1027_v10, 5 }
  0xca   : > { %4059 = vmatprep.subr.bf16.mxu1 %v4376_v36  ;;  %v1202_v36 = vsel %vm4951_vm10, %v1200_v27, %v1201_v61  ;;  %v3746_v63 = vrot.slane %v1162_v35, 9  ;;  %v1033_v25 = vrot.slane %v1031_v11, 4  ;;  %v4399_v27 = vld [vmem:[%s5787_s1 + $0x158] sm:$0xff]   ;;  %v1209_v29 = vsel %vm4951_vm10, %v1207_v17, %v1208_v3  ;;  %v4402_v35 = vld [vmem:[%s5787_s1 + $0x188] sm:$0xff]  }
  0xcb   : > { %v1024_v31 = vor.u32 %v1023_v20, %v1020_v18  ;;  %v4407_v20 = vld [vmem:[%s5787_s1 + $0x120] sm:$0xff]  }
  0xcc   : > { %3996 = vmatpush3.bf16.msra.mxu0 %v4377_v37  ;;  %v999_v37 = vrot.slane %v997_v28, 5  ;;  %v1206_v16 = vsel %vm4951_vm10, %v3746_v63, %v1205_v2  ;;  %v5079_v63 = vld [vmem:[#allocation3 + $0x2c] sm:$0x1] }
  0xcd   : > { %4060 = vmatpush3.bf16.msra.mxu1 %v4378_v38  ;;  %3997 = vmatprep.subr.bf16.mxu0 %v4379_v39  ;;  %v1003_v38 = vshll.u32 %v4968_v22, 16  ;;  %v1007_v39 = vshrl.u32 %v4968_v22, 16  ;;  %v4400_v22 = vld [vmem:[%s5787_s1 + $0x1c8] sm:$0xff]   ;;  %v1061_v11 = vshll.u32 %v5079_v63, 16 }
  0xce   : > { %4061 = vmatprep.subr.bf16.mxu1 %v4380_v40  ;;  %v4389_v40 = vld [vmem:[%s5787_s1 + $0x148] sm:$0xff]   ;;  %v1000_v48 = vor.u32 %v999_v37, %v996_v34  ;;  %v1326_v34 = vshrl.u32 %v5028_v13, 16  ;;  %v1034_v37 = vor.u32 %v1033_v25, %v1029_v24 }
  0xcf   : > { %v1005_v49 = vrot.slane %v1003_v38, 5  ;;  %v1009_v50 = vrot.slane %v1007_v39, 4  ;;  %v1329_v39 = vshll.u32 %v5028_v13, 16  ;;  %v1063_v25 = vrot.slane %v1061_v11, 5 }
  0xd0   : > { %3998 = vmatpush3.bf16.msra.mxu0 %v4381_v41  ;;  %v3785_v41 = vcombine.low %v1199_v26, %v1202_v36  ;;  %v1001_v60 = vrot.slane %v1000_v48, 4  ;;  %v3786_v36 = vcombine.low %v1206_v16, %v1209_v29  ;;  %v4408_v29 = vld [vmem:[%s5787_s1 + $0x190] sm:$0xff]  }
  0xd1   : > { %4062 = vmatpush3.bf16.msra.mxu1 %v4382_v42  ;;  %4111 = vmatprep.subr.bf16.mxu0 %v4385_v4  ;;  %v1013_v42 = vshll.u32 %v4970_v23, 16  ;;  %v1010_v61 = vor.u32 %v1009_v50, %v1005_v49  ;;  %v5020_v4 = vld [vmem:[#allocation3 + $0x20] sm:$0x1]  ;;  %v4406_v50 = vld [vmem:[%s5787_s1 + $0x1d0] sm:$0xff]  }
  0xd2   : > { %4175 = vmatprep.subr.bf16.mxu1 %v4394_v47  ;;  %v1006_v9 = vsel %vm4941_vm9, %v1001_v60, %v1005_v49  ;;  %v1037_v26 = vshll.u32 %v5020_v4, 16  ;;  %v1035_v47 = vrot.slane %v1034_v37, 4  ;;  %v4405_v49 = vld [vmem:[%s5787_s1 + $0x160] sm:$0xff]   ;;  %v1222_v37 = vrot.slane %v5079_v63, 5  ;;  %v5129_v63 = vld [vmem:[#allocation3 + $0x3c] sm:$0xf] }
  0xd3   : > { %2783 = vmatmul.mubr.bf16.vlgmr.msra.gmra.mrb[0].mxu0 %v3769_v14  ;;  %v1015_v53 = vrot.slane %v1013_v42, 5  ;;  %v1011_v43 = vrot.slane %v1010_v61, 4  ;;  %v5030_v14 = vld [vmem:[#allocation3 + $0x28] sm:$0xf]  ;;  %v3771_v61 = vcombine.low %v5006_v58, %v5013_v0 }
  0xd4   : > { %2880 = vmatmul.mubr.bf16.vlgmr.msra.gmra.mrb[0].mxu1 %v3785_v41  ;;  %4112 = vmatpush3.bf16.msra.mxu0 %v4386_v21  ;;  %v1163_v21 = vld [vmem:[#allocation3 + $0x18] sm:$0xe]  ;;  %v1039_v38 = vrot.slane %v1037_v26, 5  ;;  %v5053_v41 = vrot.slane %v1326_v34, 4  ;;  %v1339_v42 = vshrl.u32 %v5030_v14, 16  ;;  %v3795_v45 = vcombine.low %v5028_v13, %v5030_v14 }
  0xd5   : > { %4113 = vmatprep.subr.bf16.mxu0 %v4389_v40  ;;  %2887 = vmatprep.mubr.bf16.mxu1 %v3794_v57  ;;  %v1016_v23 = vsel %vm4941_vm9, %v1011_v43, %v1015_v53  ;;  %v1025_v40 = vrot.slane %v1024_v31, 4  ;;  %v3747_v48 = vrot.slane %v1163_v21, 9  ;;  %v1212_v53 = vrot.slane %v5013_v0, 5  ;;  %v5086_v43 = vld [vmem:[#allocation3 + $0x34] sm:$0xf] }
  0xd6   : > { %4176 = vmatpush3.bf16.msra.mxu1 %v4396_v59  ;;  %v3778_v28 = vcombine.low %v1006_v9, %v1016_v23  ;;  %v1215_v57 = vrot.slane %v5020_v4, 5  ;;  %v5071_v59 = vld [vmem:[#allocation3 + $0x24] sm:$0xf]  ;;  %v1040_v60 = vsel %vm4941_vm9, %v1035_v47, %v1039_v38  ;;  %v1259_v9 = vld [vmem:[#allocation3 + $0x30] sm:$0xf]  ;;  %v5095_v21 = vrot.slane %v1329_v39, 5 }
  0xd7   : > { %4177 = vmatprep.subr.bf16.mxu1 %v4400_v22  ;;  %v1045_v2 = vshll.u32 %v5071_v59, 16  ;;  %v1213_v4 = vsel %vm4951_vm10, %v3747_v48, %v1212_v53  ;;  %v1214_v6 = vrot.slane %v1212_v53, 4  ;;  %v1164_v13 = vld [vmem:[#allocation3 + $0x24] sm:$0xe]  ;;  %v1350_v17 = vshrl.u32 %v1259_v9, 16  ;;  %v4411_v47 = vld [vmem:[%s5787_s1 + $0x168] sm:$0xff]  }
  0xd8   : > { %4114 = vmatpush3.bf16.msra.mxu0 %v4390_v52  ;;  %2790 = vmatprep.mubr.bf16.mxu0 %v3778_v28  ;;  %v1030_v52 = vsel %vm4941_vm9, %v1025_v40, %v1029_v24  ;;  %v1353_v18 = vshll.u32 %v1259_v9, 16  ;;  %v3796_v28 = vcombine.low %v1259_v9, %v5086_v43  ;;  %v1165_v9 = vld [vmem:[#allocation3 + $0x30] sm:$0xe] }
  0xd9   : > { %4115 = vmatprep.subr.bf16.mxu0 %v4393_v1  ;;  %v1042_v1 = vshrl.u32 %v5071_v59, 16  ;;  %v3779_v3 = vcombine.low %v1030_v52, %v1040_v60  ;;  %v1047_v0 = vrot.slane %v1045_v2, 5  ;;  %v5097_v26 = vrot.slane %v1350_v17, 4 }
  0xda   : > { %4178 = vmatpush3.bf16.msra.mxu1 %v4402_v35  ;;  %v3748_v35 = vrot.slane %v1164_v13, 9  ;;  %v4414_v13 = vld [vmem:[%s5787_s1 + $0x198] sm:$0xff]   ;;  %v1374_v17 = vshrl.u32 %v5129_v63, 16 }
  0xdb   : > { %2791 = vmatmul.mubr.bf16.gmra.mrb[4].mxu0 %v3770_v62  ;;  %v5077_v62 = vld [vmem:[#allocation3 + $0x28] sm:$0xf]  ;;  %4179 = vmatprep.subr.bf16.mxu1 %v4406_v50  ;;  %v1044_v58 = vrot.slane %v1042_v1, 4  ;;  %v962_v50 = vld [vmem:[#allocation3 + $0x38] sm:$0x1] }
  0xdc   : > { %4116 = vmatpush3.bf16.msra.mxu0 %v4395_v15  ;;  %2888 = vmatmul.mubr.bf16.gmra.mrb[4].mxu1 %v3786_v36  ;;  %v1051_v7 = vshll.u32 %v5077_v62, 16  ;;  %v1055_v10 = vshrl.u32 %v5077_v62, 16  ;;  %v1216_v15 = vsel %vm4951_vm10, %v1214_v6, %v1215_v57  ;;  %v1219_v36 = vrot.slane %v5077_v62, 5  ;;  %v4412_v57 = vld [vmem:[%s5787_s1 + $0x1d8] sm:$0xff]   ;;  %v4413_v1 = vld [vmem:[%s5787_s1 + $0x128] sm:$0xff]  }
  0xdd   : > { %2895 = vmatprep.mubr.bf16.mxu1 %v3795_v45  ;;  %4117 = vmatprep.subr.bf16.mxu0 %v4399_v27  ;;  %v3787_v22 = vcombine.low %v1213_v4, %v1216_v15  ;;  %v1048_v23 = vor.u32 %v1047_v0, %v1044_v58  ;;  %v5099_v27 = vrot.slane %v1353_v18, 5  ;;  %v3772_v40 = vcombine.low %v5071_v59, %v5077_v62  ;;  %v5111_v45 = vld [vmem:[#allocation3 + $0x30] sm:$0xf] }
  0xde   : > { %2798 = vmatprep.mubr.bf16.mxu0 %v3779_v3  ;;  %v1053_v16 = vrot.slane %v1051_v7, 5  ;;  %v1057_v24 = vrot.slane %v1055_v10, 4  ;;  %4180 = vmatpush3.bf16.msra.mxu1 %v4408_v29  ;;  %v1220_v48 = vsel %vm4951_vm10, %v3748_v35, %v1219_v36  ;;  %v1066_v52 = vshrl.u32 %v5111_v45, 16  ;;  %v5136_v7 = vld [vmem:[#allocation3 + $0x40] sm:$0xf] }
  0xdf   : > { %v1049_v31 = vrot.slane %v1048_v23, 4  ;;  %v1069_v53 = vshll.u32 %v5111_v45, 16  ;;  %v1085_v62 = vshll.u32 %v962_v50, 16  ;;  %4181 = vmatprep.subr.bf16.mxu1 %v4412_v57  ;;  %v1363_v58 = vshrl.u32 %v5086_v43, 16 }
  0xe0   : > { %4118 = vmatpush3.bf16.msra.mxu0 %v4401_v46  ;;  %v1058_v34 = vor.u32 %v1057_v24, %v1053_v16  ;;  %v5113_v46 = vld [vmem:[#allocation3 + $0x34] sm:$0xf]  ;;  %v1068_v4 = vrot.slane %v1066_v52, 4  ;;  %v1377_v18 = vshll.u32 %v5129_v63, 16  ;;  %v3797_v23 = vcombine.low %v5129_v63, %v5136_v7  ;;  %v963_v52 = vld [vmem:[#allocation3 + $0x44] sm:$0x1] }
  0xe1   : > { %4119 = vmatprep.subr.bf16.mxu0 %v4405_v49  ;;  %v1054_v38 = vsel %vm4941_vm9, %v1049_v31, %v1053_v16  ;;  %v1221_v49 = vrot.slane %v1219_v36, 4  ;;  %v1075_v60 = vshll.u32 %v5113_v46, 16  ;;  %v1071_v6 = vrot.slane %v1069_v53, 5  ;;  %v1263_v63 = vld [vmem:[#allocation3 + $0x48] sm:$0xf] }
  0xe2   : > { %v1059_v39 = vrot.slane %v1058_v34, 4  ;;  %v1087_v16 = vrot.slane %v1085_v62, 5  ;;  %v3749_v24 = vrot.slane %v1165_v9, 9  ;;  %v5152_v29 = vrot.slane %v1374_v17, 4  ;;  %4182 = vmatpush3.bf16.msra.mxu1 %v4414_v13 }
  0xe3   : > { %2799 = vmatmul.mubr.bf16.gmra.mrb[8].mxu0 %v3771_v61  ;;  %v1079_v61 = vshrl.u32 %v5113_v46, 16  ;;  %v1223_v3 = vsel %vm4951_vm10, %v1221_v49, %v1222_v37  ;;  %v1077_v10 = vrot.slane %v1075_v60, 5  ;;  %v1072_v15 = vor.u32 %v1071_v6, %v1068_v4  ;;  %v1166_v4 = vld [vmem:[#allocation3 + $0x3c] sm:$0xe]  ;;  %v4420_v6 = vld [vmem:[%s5787_s1 + $0x1a0] sm:$0xff]  }
  0xe4   : > { %4120 = vmatpush3.bf16.msra.mxu0 %v4407_v20  ;;  %2896 = vmatmul.mubr.bf16.gmra.mrb[8].mxu1 %v3787_v22  ;;  %v1064_v59 = vsel %vm4941_vm9, %v1059_v39, %v1063_v25  ;;  %v3788_v0 = vcombine.low %v1220_v48, %v1223_v3  ;;  %v4417_v20 = vld [vmem:[%s5787_s1 + $0x170] sm:$0xff]   ;;  %v4418_v25 = vld [vmem:[%s5787_s1 + $0x1e0] sm:$0xff]   ;;  %v1387_v31 = vshrl.u32 %v5136_v7, 16  ;;  %v1226_v34 = vrot.slane %v5113_v46, 5 }
  0xe5   : > { %2903 = vmatprep.mubr.bf16.mxu1 %v3796_v28  ;;  %4121 = vmatprep.subr.bf16.mxu0 %v4411_v47  ;;  %v3780_v2 = vcombine.low %v1054_v38, %v1064_v59  ;;  %v1081_v11 = vrot.slane %v1079_v61, 4  ;;  %v1073_v28 = vrot.slane %v1072_v15, 4  ;;  %v1229_v36 = vrot.slane %v962_v50, 5  ;;  %v4419_v47 = vld [vmem:[%s5787_s1 + $0x130] sm:$0xff]   ;;  %v5169_v50 = vld [vmem:[#allocation3 + $0x40] sm:$0xf] }
  0xe6   : > { %4183 = vmatprep.subr.bf16.mxu1 %v4418_v25  ;;  %v1227_v38 = vsel %vm4951_vm10, %v3749_v24, %v1226_v34  ;;  %v1228_v39 = vrot.slane %v1226_v34, 4  ;;  %v3773_v49 = vcombine.low %v5111_v45, %v5113_v46  ;;  %v1099_v61 = vshll.u32 %v5169_v50, 16 }
  0xe7   : > { %2806 = vmatprep.mubr.bf16.mxu0 %v3780_v2  ;;  %v1082_v22 = vor.u32 %v1081_v11, %v1077_v10  ;;  %v1078_v37 = vsel %vm4941_vm9, %v1073_v28, %v1077_v10  ;;  %v1103_v62 = vshrl.u32 %v5169_v50, 16  ;;  %v1109_v3 = vshll.u32 %v963_v52, 16  ;;  %4184 = vmatpush3.bf16.msra.mxu1 %v4420_v6 }
  0xe8   : > { %4122 = vmatpush3.bf16.msra.mxu0 %v4413_v1  ;;  %v1230_v60 = vsel %vm4951_vm10, %v1228_v39, %v1229_v36  ;;  %v5177_v1 = vld [vmem:[#allocation3 + $0x4c] sm:$0xf]  ;;  %v5182_v9 = vrot.slane %v1377_v18, 5  ;;  %v1398_v11 = vshrl.u32 %v1263_v63, 16  ;;  %v3750_v18 = vrot.slane %v1166_v4, 9 }
  0xe9   : > { %4123 = vmatprep.subr.bf16.mxu0 %v4417_v20  ;;  %v1083_v35 = vrot.slane %v1082_v22, 4  ;;  %v3789_v45 = vcombine.low %v1227_v38, %v1230_v60  ;;  %v1105_v10 = vrot.slane %v1103_v62, 4  ;;  %v1111_v15 = vrot.slane %v1109_v3, 5 }
  0xea   : > { %v3798_v17 = vcombine.low %v1263_v63, %v5177_v1  ;;  %v5185_v22 = vrot.slane %v1398_v11, 4  ;;  %v1233_v25 = vrot.slane %v5169_v50, 5  ;;  %v1236_v28 = vrot.slane %v963_v52, 5 }
  0xeb   : > { %2807 = vmatmul.mubr.bf16.gmra.mrb[12].mxu0 %v3772_v40  ;;  %v5160_v40 = vld [vmem:[#allocation3 + $0x3c] sm:$0xf]  ;;  %v1088_v48 = vsel %vm4941_vm9, %v1083_v35, %v1087_v16  ;;  %v1401_v16 = vshll.u32 %v1263_v63, 16  ;;  %v4421_v35 = vld [vmem:[%s5787_s1 + $0x1e8] sm:$0xff]  }
  0xec   : > { %2904 = vmatmul.mubr.bf16.gmra.mrb[12].mxu1 %v3788_v0  ;;  %v1090_v53 = vshrl.u32 %v5160_v40, 16  ;;  %v1093_v57 = vshll.u32 %v5160_v40, 16  ;;  %v3781_v59 = vcombine.low %v1078_v37, %v1088_v48  ;;  %4124 = vmatpush3.bf16.msra.mxu0 %v4419_v47  ;;  %v1101_v0 = vrot.slane %v1099_v61, 5  ;;  %v5198_v47 = vld [vmem:[#allocation3 + $0x48] sm:$0xf] }
  0xed   : > { %2911 = vmatprep.mubr.bf16.mxu1 %v3797_v23  ;;  %v1411_v23 = vshrl.u32 %v5177_v1, 16  ;;  %v3774_v37 = vcombine.low %v5160_v40, %v5169_v50  ;;  %v1234_v38 = vsel %vm4951_vm10, %v3750_v18, %v1233_v25  ;;  %v1235_v39 = vrot.slane %v1233_v25, 4  ;;  %v5200_v48 = vld [vmem:[#allocation3 + $0x4c] sm:$0xf]  ;;  %4185 = vmatprep.subr.bf16.mxu1 %v4421_v35  ;;  %v4427_v25 = vld [vmem:[%s5787_s1 + $0x138] sm:$0xff]  }
  0xee   : > { %v1092_v46 = vrot.slane %v1090_v53, 4  ;;  %v1095_v2 = vrot.slane %v1093_v57, 5  ;;  %2814 = vmatprep.mubr.bf16.mxu0 %v3781_v59  ;;  %v1106_v20 = vor.u32 %v1105_v10, %v1101_v0  ;;  %v964_v53 = vld [vmem:[#allocation3 + $0x50] sm:$0x1]  ;;  %v1114_v57 = vshrl.u32 %v5198_v47, 16  ;;  %v4425_v59 = vld [vmem:[%s5787_s1 + $0x178] sm:$0xff]  }
  0xef   : > { %v1117_v40 = vshll.u32 %v5198_v47, 16  ;;  %v1123_v50 = vshll.u32 %v5200_v48, 16  ;;  %v1237_v61 = vsel %vm4951_vm10, %v1235_v39, %v1236_v28  ;;  %v1127_v62 = vshrl.u32 %v5200_v48, 16  ;;  %4125 = vmatprep.subr.bf16.mxu0 %v4425_v59  ;;  %v4426_v10 = vld [vmem:[%s5787_s1 + $0x1f0] sm:$0xff]   ;;  %v1270_v35 = vld [vmem:[#allocation3 + $0x20] sm:$0x1] }
  0xf0   : > { %v1096_v13 = vor.u32 %v1095_v2, %v1092_v46  ;;  %v1107_v34 = vrot.slane %v1106_v20, 4  ;;  %v1133_v63 = vshll.u32 %v964_v53, 16  ;;  %v5216_v46 = vld [vmem:[#allocation3 + $0x58] sm:$0xf]  ;;  %v3790_v2 = vcombine.low %v1234_v38, %v1237_v61  ;;  %4126 = vmatpush3.bf16.msra.mxu0 %v4427_v25 }
  0xf1   : > { %v1116_v3 = vrot.slane %v1114_v57, 4  ;;  %v1119_v4 = vrot.slane %v1117_v40, 5  ;;  %v1125_v6 = vrot.slane %v1123_v50, 5  ;;  %v5221_v11 = vrot.slane %v1401_v16, 5  ;;  %v4430_v57 = vld [vmem:[%s5787_s1 + $0x1b8] sm:$0xff]  }
  0xf2   : > { %v1097_v24 = vrot.slane %v1096_v13, 4  ;;  %v1112_v52 = vsel %vm4941_vm9, %v1107_v34, %v1111_v15  ;;  %v1129_v13 = vrot.slane %v1127_v62, 4  ;;  %v1135_v15 = vrot.slane %v1133_v63, 5 }
  0xf3   : > { %2815 = vmatmul.mubr.bf16.gmra.mrb[16].mxu0 %v3773_v49  ;;  %v4422_v49 = vld [vmem:[%s5787_s1 + $0x1a8] sm:$0xff]   ;;  %v1120_v20 = vor.u32 %v1119_v4, %v1116_v3  ;;  %v1240_v38 = vrot.slane %v5200_v48, 5  ;;  %v1243_v39 = vrot.slane %v964_v53, 5  ;;  %v3775_v61 = vcombine.low %v5198_v47, %v5200_v48  ;;  %v965_v3 = vld [vmem:[#allocation3 + $0x5c] sm:$0x1]  ;;  %v5262_v47 = vld [vmem:[%s5787_s1 + $0x200] sm:$0xff]  }
  0xf4   : > { %2912 = vmatmul.mubr.bf16.gmra.mrb[16].mxu1 %v3789_v45  ;;  %v1102_v36 = vsel %vm4941_vm9, %v1097_v24, %v1101_v0  ;;  %v1265_v45 = vld [vmem:[#allocation3 + $0x54] sm:$0xf]  ;;  %v1167_v0 = vld [vmem:[#allocation3 + $0x48] sm:$0xe]  ;;  %v1130_v28 = vor.u32 %v1129_v13, %v1125_v6  ;;  %v1267_v13 = vld [vmem:[#allocation3 + $0x60] sm:$0xf]  ;;  %4255 = vmatprep.subr.bf16.mxu0 %v5262_v47 }
  0xf5   : > { %2919 = vmatprep.mubr.bf16.mxu1 %v3798_v17  ;;  %v3782_v60 = vcombine.low %v1102_v36, %v1112_v52  ;;  %4186 = vmatpush3.bf16.msra.mxu1 %v4422_v49  ;;  %v1422_v17 = vshrl.u32 %v1265_v45, 16  ;;  %v1425_v24 = vshll.u32 %v1265_v45, 16  ;;  %v3799_v18 = vcombine.low %v1265_v45, %v5216_v46  ;;  %v4428_v36 = vld [vmem:[%s5787_s1 + $0x1b0] sm:$0xff]   ;;  %v4429_v49 = vld [vmem:[%s5787_s1 + $0x1f8] sm:$0xff]  }
  0xf6   : > { %v3751_v16 = vrot.slane %v1167_v0, 9  ;;  %4187 = vmatprep.subr.bf16.mxu1 %v4426_v10  ;;  %v1131_v52 = vrot.slane %v1130_v28, 4  ;;  %v1242_v53 = vrot.slane %v1240_v38, 4  ;;  %v5252_v45 = vld [vmem:[#allocation3 + $0x54] sm:$0xf] }
  0xf7   : > { %2822 = vmatprep.mubr.bf16.mxu0 %v3782_v60  ;;  %v5227_v34 = vrot.slane %v1422_v17, 4  ;;  %v5242_v50 = vrot.slane %v1425_v24, 5  ;;  %v1141_v0 = vshll.u32 %v5252_v45, 16  ;;  %v5265_v17 = vld [vmem:[#allocation3 + $0x64] sm:$0xf]  ;;  %v1449_v24 = vshll.u32 %v1267_v13, 16 }
  0xf8   : > { %v1241_v59 = vsel %vm4951_vm10, %v3751_v16, %v1240_v38  ;;  %v1136_v60 = vsel %vm4941_vm9, %v1131_v52, %v1135_v15  ;;  %v1244_v63 = vsel %vm4951_vm10, %v1242_v53, %v1243_v39  ;;  %v1157_v15 = vshll.u32 %v965_v3, 16  ;;  %v1168_v16 = vld [vmem:[#allocation3 + $0x54] sm:$0xe] }
  0xf9   : > { %4188 = vmatpush3.bf16.msra.mxu1 %v4428_v36  ;;  %v3791_v4 = vcombine.low %v1241_v59, %v1244_v63  ;;  %v1143_v25 = vrot.slane %v1141_v0, 5  ;;  %v1505_v36 = vrot.slane %v1503_v44, 4  ;;  %v3752_v59 = vrot.slane %v1168_v16, 9 }
  0xfa   : > { %4189 = vmatprep.subr.bf16.mxu1 %v4429_v49  ;;  %v1159_v38 = vrot.slane %v1157_v15, 5  ;;  %v1510_v63 = vrot.slane %v4978_v30, 5  ;;  %v1380_v15 = vor.u32 %v5182_v9, %v5152_v29  ;;  %v5305_v49 = vld [vmem:[#allocation3 + $0x1c] sm:$0xf] }
  0xfb   : > { %2823 = vmatmul.mubr.bf16.gmra.mrb[20].mxu0 %v3774_v37  ;;  %v1121_v37 = vrot.slane %v1120_v20, 4  ;;  %v1446_v20 = vshrl.u32 %v1267_v13, 16 }
  0xfc   : > { %2920 = vmatmul.mubr.bf16.gmra.mrb[20].mxu1 %v3790_v2  ;;  %v5254_v2 = vld [vmem:[#allocation3 + $0x58] sm:$0xf] }
  0xfd   : > { %2927 = vmatprep.mubr.bf16.mxu1 %v3799_v18  ;;  %v1126_v40 = vsel %vm4941_vm9, %v1121_v37, %v1125_v6  ;;  %v1138_v6 = vshrl.u32 %v5252_v45, 16  ;;  %v1147_v10 = vshll.u32 %v5254_v2, 16  ;;  %4190 = vmatpush3.bf16.msra.mxu1 %v4430_v57  ;;  %v1151_v48 = vshrl.u32 %v5254_v2, 16 }
  0xfe   : > { %v3783_v62 = vcombine.low %v1126_v40, %v1136_v60  ;;  %v5269_v39 = vrot.slane %v1446_v20, 4  ;;  %4287 = vmatprep.subr.bf16.mxu1 %v5262_v47  ;;  %v5274_v57 = vrot.slane %v1449_v24, 5  ;;  %v3800_v40 = vcombine.low %v1267_v13, %v5265_v17 }
  0xff   : > { %v1140_v18 = vrot.slane %v1138_v6, 4  ;;  %v1149_v28 = vrot.slane %v1147_v10, 5  ;;  %v1153_v37 = vrot.slane %v1151_v48, 4  ;;  %v1247_v60 = vrot.slane %v5254_v2, 5 }
 0x100   : > { %2830 = vmatprep.mubr.bf16.mxu0 %v3783_v62  ;;  %v1332_v6 = vor.u32 %v5095_v21, %v5053_v41  ;;  %v1356_v48 = vor.u32 %v5099_v27, %v5097_v26  ;;  %v1404_v20 = vor.u32 %v5221_v11, %v5185_v22  ;;  %v5452_v26 = vld [vmem:[#allocation3 + $0x44] sm:$0x1]  ;;  %v5454_v27 = vld [vmem:[#allocation3 + $0x48] sm:$0xf]  ;;  %v5535_v22 = vld [vmem:[#allocation3 + $0x60] sm:$0xf] }
 0x101   : > { %v1144_v52 = vor.u32 %v1143_v25, %v1140_v18  ;;  %v1154_v53 = vor.u32 %v1153_v37, %v1149_v28  ;;  %v1248_v10 = vsel %vm4951_vm10, %v3752_v59, %v1247_v60  ;;  %v1249_v13 = vrot.slane %v1247_v60, 4  ;;  %v1269_v37 = vld [vmem:[#allocation3 + $0x14] sm:$0x1] }
 0x102   : > { %v3776_v25 = vcombine.low %v5252_v45, %v5254_v2  ;;  %v1297_v60 = vshll.u32 %v1269_v37, 16  ;;  %v1393_v29 = vshll.u32 %v5452_v26, 16 }
 0x103   : > { %2831 = vmatmul.mubr.bf16.gmra.mrb[24].mxu0 %v3775_v61  ;;  %v1250_v61 = vrot.slane %v965_v3, 5  ;;  %v1145_v62 = vrot.slane %v1144_v52, 4  ;;  %v1155_v0 = vrot.slane %v1154_v53, 4  ;;  %v5301_v52 = vld [vmem:[#allocation3 + $0x18] sm:$0xf] }
 0x104   : > { %2928 = vmatmul.mubr.bf16.gmra.mrb[24].mxu1 %v3791_v4  ;;  %v1308_v4 = vor.u32 %v5003_v55, %v5001_v54  ;;  %v1583_v45 = vshrl.u32 %v5301_v52, 16  ;;  %v1586_v2 = vshll.u32 %v5301_v52, 16 }
 0x105   : > { %2935 = vmatprep.mubr.bf16.mxu1 %v3800_v40  ;;  %v1150_v3 = vsel %vm4941_vm9, %v1145_v62, %v1149_v28  ;;  %v1160_v18 = vsel %vm4941_vm9, %v1155_v0, %v1159_v38  ;;  %v1251_v16 = vsel %vm4951_vm10, %v1249_v13, %v1250_v61  ;;  %v1469_v28 = vld [vmem:[#allocation3 + $0xc] sm:$0xe]  ;;  %v5307_v38 = vld [vmem:[#allocation3 + $0x20] sm:$0x1]  ;;  %v1506_v0 = vrot.slane %v1269_v37, 5 }
 0x106   : > { %v3784_v59 = vcombine.low %v1150_v3, %v1160_v18  ;;  %v3792_v53 = vcombine.low %v1248_v10, %v1251_v16  ;;  %v3753_v62 = vrot.slane %v1469_v28, 9  ;;  %v1592_v61 = vshll.u32 %v5305_v49, 16 }
 0x107   : > { %v1299_v13 = vrot.slane %v1297_v60, 5  ;;  %v1596_v3 = vshrl.u32 %v5305_v49, 16  ;;  %v1602_v18 = vshll.u32 %v5307_v38, 16  ;;  %v1507_v16 = vsel %vm4951_vm10, %v1505_v36, %v1506_v0 }
 0x108   : > { %2838 = vmatprep.mubr.bf16.mxu0 %v3784_v59  ;;  %v1504_v10 = vsel %vm4951_vm10, %v3753_v62, %v1503_v44  ;;  %v1585_v37 = vrot.slane %v1583_v45, 4  ;;  %v1588_v28 = vrot.slane %v1586_v2, 5  ;;  %v1594_v40 = vrot.slane %v1592_v61, 5  ;;  %v1470_v44 = vld [vmem:[#allocation3 + $0x18] sm:$0xe] }
 0x109   : > { %v3809_v59 = vcombine.low %v1504_v10, %v1507_v16  ;;  %v1604_v60 = vrot.slane %v1602_v18, 5  ;;  %v1300_v56 = vsel %vm4941_vm9, %v4984_v33, %v1299_v13  ;;  %v5323_v62 = vld [vmem:[#allocation3 + $0x24] sm:$0xf]  ;;  %v3754_v0 = vrot.slane %v1470_v44, 9  ;;  %v5332_v45 = vld [vmem:[#allocation3 + $0x28] sm:$0xf] }
 0x10a   : > { %v1589_v24 = vor.u32 %v1588_v28, %v1585_v37  ;;  %v3801_v36 = vcombine.low %v1290_v32, %v1300_v56  ;;  %v5334_v2 = vld [vmem:[#allocation3 + $0x2c] sm:$0x1]  ;;  %v1512_v61 = vrot.slane %v1510_v63, 4  ;;  %v1513_v13 = vrot.slane %v1270_v35, 5 }
 0x10b   : > { %2839 = vmatmul.mubr.bf16.gmra.mrb[28].mxu0 %v3776_v25  ;;  %v3817_v25 = vcombine.low %v5301_v52, %v5305_v49  ;;  %v1607_v10 = vshrl.u32 %v5323_v62, 16  ;;  %v1511_v18 = vsel %vm4951_vm10, %v3754_v0, %v1510_v63  ;;  %v1610_v8 = vshll.u32 %v5323_v62, 16  ;;  %v4434_v63 = vld [vmem:[%s5787_s1 + $0x208] sm:$0xff]  }
 0x10c   : > { %2936 = vmatmul.mubr.bf16.gmra.mrb[28].mxu1 %v3792_v53  ;;  %v1598_v53 = vrot.slane %v1596_v3, 4  ;;  %2976 = vmatprep.mubr.bf16.mxu0 %v3809_v59  ;;  %v1590_v3 = vrot.slane %v1589_v24, 4  ;;  %v1616_v19 = vshll.u32 %v5332_v45, 16  ;;  %v1514_v52 = vsel %vm4951_vm10, %v1512_v61, %v1513_v13  ;;  %v5349_v56 = vld [vmem:[#allocation3 + $0x2c] sm:$0x1] }
 0x10d   : > { %v1609_v16 = vrot.slane %v1607_v10, 4  ;;  %v1620_v37 = vshrl.u32 %v5332_v45, 16  ;;  %v3810_v59 = vcombine.low %v1511_v18, %v1514_v52  ;;  %v1818_v61 = vrot.slane %v5334_v2, 5  ;;  %v1471_v13 = vld [vmem:[#allocation3 + $0x24] sm:$0xe] }
 0x10e   : > { %v1599_v33 = vor.u32 %v1598_v53, %v1594_v40  ;;  %v1595_v28 = vsel %vm4941_vm9, %v1590_v3, %v1594_v40  ;;  %v1612_v53 = vrot.slane %v1610_v8, 5  ;;  %v1618_v24 = vrot.slane %v1616_v19, 5  ;;  %v5359_v8 = vld [vmem:[#allocation3 + $0x30] sm:$0xf] }
 0x10f   : > { %v1622_v0 = vrot.slane %v1620_v37, 4  ;;  %v1309_v3 = vrot.slane %v1308_v4, 4  ;;  %v1311_v18 = vshll.u32 %v4978_v30, 16  ;;  %v1321_v52 = vshll.u32 %v1270_v35, 16  ;;  %v4436_v4 = vld [vmem:[%s5787_s1 + $0x210] sm:$0xff]  }
 0x110   : > { %v1600_v32 = vrot.slane %v1599_v33, 4  ;;  %v1626_v33 = vshll.u32 %v5334_v2, 16  ;;  %v1613_v40 = vor.u32 %v1612_v53, %v1609_v16  ;;  %v3818_v54 = vcombine.low %v5323_v62, %v5332_v45 }
 0x111   : > { %v1313_v16 = vrot.slane %v1311_v18, 5  ;;  %v3755_v55 = vrot.slane %v1471_v13, 9  ;;  %v1520_v30 = vrot.slane %v5349_v56, 5  ;;  %v1345_v41 = vshll.u32 %v5349_v56, 16 }
 0x112   : > { %v1605_v44 = vsel %vm4941_vm9, %v1600_v32, %v1604_v60  ;;  %v1623_v60 = vor.u32 %v1622_v0, %v1618_v24  ;;  %v1628_v19 = vrot.slane %v1626_v33, 5  ;;  %v1317_v32 = vrot.slane %v1315_v51, 4  ;;  %v5371_v51 = vld [vmem:[#allocation3 + $0x34] sm:$0xf] }
 0x113   : > { %v3825_v10 = vcombine.low %v1595_v28, %v1605_v44  ;;  %2977 = vmatmul.mubr.bf16.vlgmr.msra.gmra.mrb[32].mxu0 %v3801_v36  ;;  %v1614_v36 = vrot.slane %v1613_v40, 4  ;;  %v1323_v28 = vrot.slane %v1321_v52, 5  ;;  %v1314_v62 = vsel %vm4941_vm9, %v1309_v3, %v1313_v16  ;;  %v5377_v44 = vld [vmem:[#allocation3 + $0x38] sm:$0x1] }
 0x114   : > { %4256 = vmatpush3.bf16.msra.mxu0 %v5262_v47  ;;  %2984 = vmatprep.mubr.bf16.mxu0 %v3810_v59  ;;  %v1624_v37 = vrot.slane %v1623_v60, 4  ;;  %v1517_v59 = vrot.slane %v5030_v14, 5  ;;  %v1318_v53 = vor.u32 %v1317_v32, %v1313_v16  ;;  %v1631_v0 = vshrl.u32 %v5359_v8, 16 }
 0x115   : > { %3073 = vmatprep.mubr.bf16.mxu1 %v3825_v10  ;;  %4257 = vmatprep.subr.bf16.mxu0 %v4434_v63  ;;  %v1619_v35 = vsel %vm4941_vm9, %v1614_v36, %v1618_v24  ;;  %v1634_v24 = vshll.u32 %v5359_v8, 16  ;;  %v1640_v18 = vshll.u32 %v5371_v51, 16  ;;  %v1644_v32 = vshrl.u32 %v5371_v51, 16 }
 0x116   : > { %3074 = vmatmul.mubr.bf16.vlgmr.msra.gmra.mrb[32].mxu1 %v3817_v25  ;;  %v1629_v25 = vsel %vm4941_vm9, %v1624_v37, %v1628_v19  ;;  %v1518_v33 = vsel %vm4951_vm10, %v3755_v55, %v1517_v59  ;;  %v1519_v13 = vrot.slane %v1517_v59, 4  ;;  %v1319_v40 = vrot.slane %v1318_v53, 4  ;;  %v1472_v59 = vld [vmem:[#allocation3 + $0x30] sm:$0xe] }
 0x117   : > { %4295 = vmatpush3.bf16.msra.mxu1 %v5262_v47  ;;  %v3826_v10 = vcombine.low %v1619_v35, %v1629_v25  ;;  %v1633_v3 = vrot.slane %v1631_v0, 4  ;;  %v4438_v47 = vld [vmem:[%s5787_s1 + $0x218] sm:$0xff]   ;;  %v1636_v19 = vrot.slane %v1634_v24, 5  ;;  %v1650_v52 = vshll.u32 %v5377_v44, 16 }
 0x118   : > { %4258 = vmatpush3.bf16.msra.mxu0 %v4434_v63  ;;  %4288 = vmatprep.subr.bf16.mxu1 %v4434_v63  ;;  %v1521_v60 = vsel %vm4951_vm10, %v1519_v13, %v1520_v30  ;;  %v1324_v36 = vsel %vm4941_vm9, %v1319_v40, %v1323_v28  ;;  %v1642_v55 = vrot.slane %v1640_v18, 5  ;;  %v5399_v37 = vrot.slane %v1332_v6, 4  ;;  %v5401_v25 = vld [vmem:[#allocation3 + $0x38] sm:$0x1]  ;;  %v5403_v13 = vld [vmem:[#allocation3 + $0x3c] sm:$0xf] }
 0x119   : > { %4259 = vmatprep.subr.bf16.mxu0 %v4436_v4  ;;  %3081 = vmatprep.mubr.bf16.mxu1 %v3826_v10  ;;  %v3811_v16 = vcombine.low %v1518_v33, %v1521_v60  ;;  %v3802_v35 = vcombine.low %v1314_v62, %v1324_v36  ;;  %v1637_v30 = vor.u32 %v1636_v19, %v1633_v3  ;;  %v1646_v53 = vrot.slane %v1644_v32, 4  ;;  %v4440_v6 = vld [vmem:[%s5787_s1 + $0x220] sm:$0xff]  }
 0x11a   : > { %v1652_v0 = vrot.slane %v1650_v52, 5  ;;  %v1335_v28 = vshll.u32 %v5030_v14, 16  ;;  %v1341_v33 = vrot.slane %v1339_v42, 4  ;;  %v3819_v21 = vcombine.low %v5359_v8, %v5371_v51  ;;  %v5416_v40 = vld [vmem:[#allocation3 + $0x40] sm:$0xf] }
 0x11b   : > { %4296 = vmatpush3.bf16.msra.mxu1 %v4434_v63  ;;  %2985 = vmatmul.mubr.bf16.gmra.mrb[36].mxu0 %v3802_v35  ;;  %v1638_v63 = vrot.slane %v1637_v30, 4  ;;  %v1647_v62 = vor.u32 %v1646_v53, %v1642_v55  ;;  %v3756_v24 = vrot.slane %v1472_v59, 9  ;;  %v1524_v10 = vrot.slane %v5086_v43, 5  ;;  %v5426_v52 = vld [vmem:[#allocation3 + $0x44] sm:$0x1] }
 0x11c   : > { %4260 = vmatpush3.bf16.msra.mxu0 %v4436_v4  ;;  %4289 = vmatprep.subr.bf16.mxu1 %v4436_v4  ;;  %v1337_v14 = vrot.slane %v1335_v28, 5  ;;  %v1347_v42 = vrot.slane %v1345_v41, 5  ;;  %v1527_v56 = vrot.slane %v5401_v25, 5  ;;  %v1655_v8 = vshrl.u32 %v5403_v13, 16 }
 0x11d   : > { %4261 = vmatprep.subr.bf16.mxu0 %v4438_v47  ;;  %2992 = vmatprep.mubr.bf16.mxu0 %v3811_v16  ;;  %v1643_v3 = vsel %vm4941_vm9, %v1638_v63, %v1642_v55  ;;  %v1648_v18 = vrot.slane %v1647_v62, 4  ;;  %v1526_v60 = vrot.slane %v1524_v10, 4  ;;  %v4442_v16 = vld [vmem:[%s5787_s1 + $0x228] sm:$0xff]   ;;  %v1664_v35 = vshll.u32 %v5416_v40, 16 }
 0x11e   : > { %3082 = vmatmul.mubr.bf16.gmra.mrb[36].mxu1 %v3818_v54  ;;  %v1525_v54 = vsel %vm4951_vm10, %v3756_v24, %v1524_v10  ;;  %v1338_v19 = vsel %vm4941_vm9, %v5399_v37, %v1337_v14  ;;  %v1342_v32 = vor.u32 %v1341_v33, %v1337_v14  ;;  %v1657_v36 = vrot.slane %v1655_v8, 4  ;;  %v1473_v24 = vld [vmem:[#allocation3 + $0x3c] sm:$0xe]  ;;  %v5445_v10 = vld [vmem:[%s5787_s1 + $0x230] sm:$0xff]  }
 0x11f   : > { %4297 = vmatpush3.bf16.msra.mxu1 %v4436_v4  ;;  %v1658_v4 = vshll.u32 %v5403_v13, 16  ;;  %v1653_v55 = vsel %vm4941_vm9, %v1648_v18, %v1652_v0  ;;  %v1528_v59 = vsel %vm4951_vm10, %v1526_v60, %v1527_v56  ;;  %v1668_v37 = vshrl.u32 %v5416_v40, 16 }
 0x120   : > { %4262 = vmatpush3.bf16.msra.mxu0 %v4438_v47  ;;  %4290 = vmatprep.subr.bf16.mxu1 %v4438_v47  ;;  %v3827_v30 = vcombine.low %v1643_v3, %v1653_v55  ;;  %v1343_v53 = vrot.slane %v1342_v32, 4  ;;  %v3812_v28 = vcombine.low %v1525_v54, %v1528_v59  ;;  %v1666_v41 = vrot.slane %v1664_v35, 5  ;;  %v5467_v59 = vld [vmem:[#allocation3 + $0x50] sm:$0x1] }
 0x121   : > { %4263 = vmatprep.subr.bf16.mxu0 %v4440_v6  ;;  %v1660_v33 = vrot.slane %v1658_v4, 5  ;;  %v1670_v63 = vrot.slane %v1668_v37, 4  ;;  %v1674_v62 = vshll.u32 %v5426_v52, 16  ;;  %v1357_v0 = vrot.slane %v1356_v48, 4 }
 0x122   : > { %3089 = vmatprep.mubr.bf16.mxu1 %v3827_v30  ;;  %v1359_v56 = vshll.u32 %v5086_v43, 16  ;;  %v1365_v8 = vrot.slane %v1363_v58, 4  ;;  %v1369_v54 = vshll.u32 %v5401_v25, 16  ;;  %v1531_v4 = vrot.slane %v5136_v7, 5 }
 0x123   : > { %4298 = vmatpush3.bf16.msra.mxu1 %v4438_v47  ;;  %v1348_v47 = vsel %vm4941_vm9, %v1343_v53, %v1347_v42  ;;  %v1661_v14 = vor.u32 %v1660_v33, %v1657_v36  ;;  %v1671_v3 = vor.u32 %v1670_v63, %v1666_v41  ;;  %v1676_v18 = vrot.slane %v1674_v62, 5 }
 0x124   : > { %4264 = vmatpush3.bf16.msra.mxu0 %v4440_v6  ;;  %4291 = vmatprep.subr.bf16.mxu1 %v4440_v6  ;;  %v3803_v48 = vcombine.low %v1338_v19, %v1348_v47  ;;  %v1361_v32 = vrot.slane %v1359_v56, 5  ;;  %v3820_v42 = vcombine.low %v5403_v13, %v5416_v40  ;;  %v3757_v36 = vrot.slane %v1473_v24, 9  ;;  %v5461_v19 = vld [vmem:[#allocation3 + $0x4c] sm:$0xf] }
 0x125   : > { %4265 = vmatprep.subr.bf16.mxu0 %v4442_v16  ;;  %v1662_v60 = vrot.slane %v1661_v14, 4  ;;  %v1672_v43 = vrot.slane %v1671_v3, 4  ;;  %v1371_v58 = vrot.slane %v1369_v54, 5  ;;  %v1534_v55 = vrot.slane %v5452_v26, 5  ;;  %v1474_v3 = vld [vmem:[#allocation3 + $0x48] sm:$0xe] }
 0x126   : > { %3090 = vmatmul.mubr.bf16.gmra.mrb[40].mxu1 %v3819_v21  ;;  %2993 = vmatmul.mubr.bf16.gmra.mrb[40].mxu0 %v3803_v48  ;;  %v1362_v21 = vsel %vm4941_vm9, %v1357_v0, %v1361_v32  ;;  %v1366_v13 = vor.u32 %v1365_v8, %v1361_v32  ;;  %v1532_v37 = vsel %vm4951_vm10, %v3757_v36, %v1531_v4  ;;  %v1533_v30 = vrot.slane %v1531_v4, 4  ;;  %v5491_v36 = vld [vmem:[#allocation3 + $0x50] sm:$0x1] }
 0x127   : > { %4299 = vmatpush3.bf16.msra.mxu1 %v4440_v6  ;;  %3000 = vmatprep.mubr.bf16.mxu0 %v3812_v28  ;;  %v1667_v25 = vsel %vm4941_vm9, %v1662_v60, %v1666_v41  ;;  %v1679_v6 = vshrl.u32 %v5454_v27, 16  ;;  %v1677_v35 = vsel %vm4941_vm9, %v1672_v43, %v1676_v18  ;;  %v1682_v53 = vshll.u32 %v5454_v27, 16  ;;  %v4446_v28 = vld [vmem:[%s5787_s1 + $0x238] sm:$0xff]   ;;  %v5493_v43 = vld [vmem:[#allocation3 + $0x54] sm:$0xf] }
 0x128   : > { %4292 = vmatprep.subr.bf16.mxu1 %v4442_v16  ;;  %4266 = vmatpush3.bf16.msra.mxu0 %v4442_v16  ;;  %v3828_v33 = vcombine.low %v1667_v25, %v1677_v35  ;;  %v1367_v41 = vrot.slane %v1366_v13, 4  ;;  %v1688_v62 = vshll.u32 %v5461_v19, 16  ;;  %v1535_v0 = vsel %vm4951_vm10, %v1533_v30, %v1534_v55 }
 0x129   : > { %4267 = vmatprep.subr.bf16.mxu0 %v5445_v10  ;;  %v1681_v63 = vrot.slane %v1679_v6, 4  ;;  %v1684_v24 = vrot.slane %v1682_v53, 5  ;;  %v1692_v47 = vshrl.u32 %v5461_v19, 16  ;;  %v1698_v14 = vshll.u32 %v5467_v59, 16  ;;  %v5513_v53 = vld [vmem:[#allocation3 + $0x5c] sm:$0x1] }
 0x12a   : > { %3097 = vmatprep.mubr.bf16.mxu1 %v3828_v33  ;;  %v1372_v56 = vsel %vm4941_vm9, %v1367_v41, %v1371_v58  ;;  %v3813_v8 = vcombine.low %v1532_v37, %v1535_v0  ;;  %v1690_v48 = vrot.slane %v1688_v62, 5  ;;  %v1383_v58 = vshll.u32 %v5136_v7, 16 }
 0x12b   : > { %4300 = vmatpush3.bf16.msra.mxu1 %v4442_v16  ;;  %v1381_v16 = vrot.slane %v1380_v15, 4  ;;  %v3804_v18 = vcombine.low %v1362_v21, %v1372_v56  ;;  %v1685_v54 = vor.u32 %v1684_v24, %v1681_v63  ;;  %v1694_v60 = vrot.slane %v1692_v47, 4 }
 0x12c   : > { %4293 = vmatprep.subr.bf16.mxu1 %v5445_v10  ;;  %4268 = vmatpush3.bf16.msra.mxu0 %v5445_v10  ;;  %v1700_v32 = vrot.slane %v1698_v14, 5  ;;  %v1389_v4 = vrot.slane %v1387_v31, 4  ;;  %v3821_v9 = vcombine.low %v5454_v27, %v5461_v19  ;;  %v3758_v55 = vrot.slane %v1474_v3, 9  ;;  %v5504_v31 = vld [vmem:[#allocation3 + $0x58] sm:$0xf] }
 0x12d   : > { %4269 = vmatprep.subr.bf16.mxu0 %v4446_v28  ;;  %v1686_v15 = vrot.slane %v1685_v54, 4  ;;  %v1538_v25 = vrot.slane %v5177_v1, 5  ;;  %v1385_v21 = vrot.slane %v1383_v58, 5  ;;  %v1395_v13 = vrot.slane %v1393_v29, 5  ;;  %v1275_v58 = vld [vmem:[#allocation3 + $0x5c] sm:$0x1] }
 0x12e   : > { %3098 = vmatmul.mubr.bf16.gmra.mrb[44].mxu1 %v3820_v42  ;;  %3001 = vmatmul.mubr.bf16.gmra.mrb[44].mxu0 %v3804_v18  ;;  %v1695_v42 = vor.u32 %v1694_v60, %v1690_v48  ;;  %v1541_v7 = vrot.slane %v5491_v36, 5  ;;  %v1703_v26 = vshrl.u32 %v5493_v43, 16  ;;  %v1706_v41 = vshll.u32 %v5493_v43, 16 }
 0x12f   : > { %4301 = vmatpush3.bf16.msra.mxu1 %v5445_v10  ;;  %3008 = vmatprep.mubr.bf16.mxu0 %v3813_v8  ;;  %v1691_v10 = vsel %vm4941_vm9, %v1686_v15, %v1690_v48  ;;  %v1539_v6 = vsel %vm4951_vm10, %v3758_v55, %v1538_v25  ;;  %v1540_v35 = vrot.slane %v1538_v25, 4  ;;  %v1386_v37 = vsel %vm4941_vm9, %v1381_v16, %v1385_v21 }
 0x130   : > { %4294 = vmatprep.subr.bf16.mxu1 %v4446_v28  ;;  %4270 = vmatpush3.bf16.msra.mxu0 %v4446_v28  ;;  %v1696_v27 = vrot.slane %v1695_v42, 4  ;;  %v1390_v30 = vor.u32 %v1389_v4, %v1385_v21  ;;  %v1705_v33 = vrot.slane %v1703_v26, 4  ;;  %v1712_v0 = vshll.u32 %v5504_v31, 16  ;;  %v1475_v4 = vld [vmem:[#allocation3 + $0x54] sm:$0xe] }
 0x131   : > { %v1542_v62 = vsel %vm4951_vm10, %v1540_v35, %v1541_v7  ;;  %v1716_v24 = vshrl.u32 %v5504_v31, 16  ;;  %v1708_v8 = vrot.slane %v1706_v41, 5  ;;  %v1722_v3 = vshll.u32 %v5513_v53, 16 }
 0x132   : > { %v1701_v63 = vsel %vm4941_vm9, %v1696_v27, %v1700_v32  ;;  %v1391_v14 = vrot.slane %v1390_v30, 4  ;;  %v3814_v56 = vcombine.low %v1539_v6, %v1542_v62  ;;  %v1714_v48 = vrot.slane %v1712_v0, 5 }
 0x133   : > { %4302 = vmatpush3.bf16.msra.mxu1 %v4446_v28  ;;  %v3829_v47 = vcombine.low %v1691_v10, %v1701_v63  ;;  %v1718_v16 = vrot.slane %v1716_v24, 4  ;;  %v1846_v28 = vrot.slane %v5513_v53, 5  ;;  %v1709_v54 = vor.u32 %v1708_v8, %v1705_v33  ;;  %v5538_v10 = vld [vmem:[#allocation3 + $0x64] sm:$0xf] }
 0x134   : > { %v1396_v18 = vsel %vm4941_vm9, %v1391_v14, %v1395_v13  ;;  %v1405_v60 = vrot.slane %v1404_v20, 4  ;;  %v1407_v32 = vshll.u32 %v5177_v1, 16  ;;  %v1724_v42 = vrot.slane %v1722_v3, 5  ;;  %v1476_v3 = vld [vmem:[#allocation3 + $0x60] sm:$0xe] }
 0x135   : > { %3105 = vmatprep.mubr.bf16.mxu1 %v3829_v47  ;;  %v3805_v29 = vcombine.low %v1386_v37, %v1396_v18  ;;  %v1719_v15 = vor.u32 %v1718_v16, %v1714_v48  ;;  %v1413_v55 = vrot.slane %v1411_v23, 4  ;;  %v1710_v25 = vrot.slane %v1709_v54, 4 }
 0x136   : > { %3106 = vmatmul.mubr.bf16.gmra.mrb[48].mxu1 %v3821_v9  ;;  %v1409_v21 = vrot.slane %v1407_v32, 5  ;;  %v1417_v13 = vshll.u32 %v5491_v36, 16  ;;  %v3822_v7 = vcombine.low %v5493_v43, %v5504_v31  ;;  %v3759_v20 = vrot.slane %v1475_v4, 9  ;;  %v5544_v43 = vld [vmem:[#allocation3 + $0x68] sm:$0x1] }
 0x137   : > { %3009 = vmatmul.mubr.bf16.gmra.mrb[48].mxu0 %v3805_v29  ;;  %v1720_v11 = vrot.slane %v1719_v15, 4  ;;  %v1545_v26 = vrot.slane %v5216_v46, 5  ;;  %v1548_v9 = vrot.slane %v1275_v58, 5  ;;  %v1715_v1 = vsel %vm4941_vm9, %v1710_v25, %v1714_v48  ;;  %v1276_v29 = vld [vmem:[#allocation3 + $0x68] sm:$0x1] }
 0x138   : > { %3016 = vmatprep.mubr.bf16.mxu0 %v3814_v56  ;;  %v1410_v23 = vsel %vm4941_vm9, %v1405_v60, %v1409_v21  ;;  %v1414_v36 = vor.u32 %v1413_v55, %v1409_v21  ;;  %v1419_v27 = vrot.slane %v1417_v13, 5  ;;  %v1727_v30 = vshrl.u32 %v5535_v22, 16  ;;  %v5565_v13 = vld [vmem:[#allocation3 + $0x6c] sm:$0xf] }
 0x139   : > { %v1725_v6 = vsel %vm4941_vm9, %v1720_v11, %v1724_v42  ;;  %v1546_v35 = vsel %vm4951_vm10, %v3759_v20, %v1545_v26  ;;  %v1547_v37 = vrot.slane %v1545_v26, 4  ;;  %v1730_v63 = vshll.u32 %v5535_v22, 16 }
 0x13a   : > { %v3830_v33 = vcombine.low %v1715_v1, %v1725_v6  ;;  %v1415_v41 = vrot.slane %v1414_v36, 4  ;;  %v1736_v62 = vshll.u32 %v5538_v10, 16  ;;  %v1729_v24 = vrot.slane %v1727_v30, 4 }
 0x13b   : > { %v1549_v0 = vsel %vm4951_vm10, %v1547_v37, %v1548_v9  ;;  %v1740_v47 = vshrl.u32 %v5538_v10, 16  ;;  %v1746_v14 = vshll.u32 %v5544_v43, 16  ;;  %v1732_v48 = vrot.slane %v1730_v63, 5  ;;  %v5579_v37 = vld [vmem:[#allocation3 + $0x74] sm:$0x1] }
 0x13c   : > { %3113 = vmatprep.mubr.bf16.mxu1 %v3830_v33  ;;  %v1420_v56 = vsel %vm4941_vm9, %v1415_v41, %v1419_v27  ;;  %v3815_v8 = vcombine.low %v1546_v35, %v1549_v0  ;;  %v1738_v16 = vrot.slane %v1736_v62, 5  ;;  %v5799_v32 = vor.u32 %v5242_v50, %v5227_v34 }
 0x13d   : > { %v3806_v18 = vcombine.low %v1410_v23, %v1420_v56  ;;  %v1742_v54 = vrot.slane %v1740_v47, 4  ;;  %v1748_v60 = vrot.slane %v1746_v14, 5  ;;  %v1733_v15 = vor.u32 %v1732_v48, %v1729_v24  ;;  %v5570_v23 = vld [vmem:[#allocation3 + $0x70] sm:$0xf] }
 0x13e   : > { %3114 = vmatmul.mubr.bf16.gmra.mrb[52].mxu1 %v3822_v7  ;;  %v1429_v4 = vrot.slane %v5799_v32, 4  ;;  %v1431_v42 = vshll.u32 %v5216_v46, 16  ;;  %v5800_v55 = vshrl.u32 %v5216_v46, 16  ;;  %v1441_v21 = vshll.u32 %v1275_v58, 16 }
 0x13f   : > { %3017 = vmatmul.mubr.bf16.gmra.mrb[52].mxu0 %v3806_v18  ;;  %v1743_v11 = vor.u32 %v1742_v54, %v1738_v16  ;;  %v3823_v7 = vcombine.low %v5535_v22, %v5538_v10  ;;  %v3760_v20 = vrot.slane %v1476_v3, 9  ;;  %v1552_v26 = vrot.slane %v5265_v17, 5  ;;  %v1774_v18 = vld [vmem:[#allocation3 + $0x18] sm:$0xe] }
 0x140   : > { %v1437_v25 = vrot.slane %v5800_v55, 4  ;;  %3024 = vmatprep.mubr.bf16.mxu0 %v3815_v8  ;;  %v1734_v34 = vrot.slane %v1733_v15, 4  ;;  %v1433_v50 = vrot.slane %v1431_v42, 5  ;;  %v1443_v9 = vrot.slane %v1441_v21, 5 }
 0x141   : > { %v1555_v1 = vrot.slane %v1276_v29, 5  ;;  %v1744_v46 = vrot.slane %v1743_v11, 4  ;;  %v1553_v58 = vsel %vm4951_vm10, %v3760_v20, %v1552_v26  ;;  %v1554_v36 = vrot.slane %v1552_v26, 4  ;;  %v1778_v11 = vld [vmem:[#allocation3 + $0x48] sm:$0xe] }
 0x142   : > { %v1751_v27 = vshrl.u32 %v5565_v13, 16  ;;  %v1739_v22 = vsel %vm4941_vm9, %v1734_v34, %v1738_v16  ;;  %v1434_v6 = vsel %vm4941_vm9, %v1429_v4, %v1433_v50  ;;  %v1438_v35 = vor.u32 %v1437_v25, %v1433_v50 }
 0x143   : > { %v1754_v30 = vshll.u32 %v5565_v13, 16  ;;  %v1749_v33 = vsel %vm4941_vm9, %v1744_v46, %v1748_v60  ;;  %v1556_v41 = vsel %vm4951_vm10, %v1554_v36, %v1555_v1  ;;  %v1760_v62 = vshll.u32 %v5570_v23, 16  ;;  %v1775_v1 = vld [vmem:[#allocation3 + $0x24] sm:$0xe] }
 0x144   : > { %v1753_v63 = vrot.slane %v1751_v27, 4  ;;  %v3831_v0 = vcombine.low %v1739_v22, %v1749_v33  ;;  %v1439_v24 = vrot.slane %v1438_v35, 4  ;;  %v3816_v47 = vcombine.low %v1553_v58, %v1556_v41 }
 0x145   : > { %v1756_v14 = vrot.slane %v1754_v30, 5  ;;  %v1762_v56 = vrot.slane %v1760_v62, 5  ;;  %v1764_v8 = vshrl.u32 %v5570_v23, 16  ;;  %v1770_v48 = vshll.u32 %v5579_v37, 16  ;;  %v1779_v30 = vld [vmem:[#allocation3 + $0x54] sm:$0xe] }
 0x146   : > { %v5801_v16 = vor.u32 %v5274_v57, %v5269_v39  ;;  %3121 = vmatprep.mubr.bf16.mxu1 %v3831_v0  ;;  %v1444_v54 = vsel %vm4941_vm9, %v1439_v24, %v1443_v9  ;;  %v1455_v32 = vshll.u32 %v5265_v17, 16  ;;  %v5802_v4 = vshrl.u32 %v5265_v17, 16  ;;  %v1776_v0 = vld [vmem:[#allocation3 + $0x30] sm:$0xe] }
 0x147   : > { %v1757_v60 = vor.u32 %v1756_v14, %v1753_v63  ;;  %v3807_v42 = vcombine.low %v1434_v6, %v1444_v54  ;;  %3122 = vmatmul.mubr.bf16.gmra.mrb[56].mxu1 %v3823_v7  ;;  %v1766_v55 = vrot.slane %v1764_v8, 4  ;;  %v1772_v25 = vrot.slane %v1770_v48, 5 }
 0x148   : > { %v1453_v3 = vrot.slane %v5801_v16, 4  ;;  %v1461_v15 = vrot.slane %v5802_v4, 4  ;;  %v1465_v21 = vshll.u32 %v1276_v29, 16  ;;  %v1457_v39 = vrot.slane %v1455_v32, 5 }
 0x149   : > { %v1758_v20 = vrot.slane %v1757_v60, 4  ;;  %v3824_v57 = vcombine.low %v5565_v13, %v5570_v23  ;;  %v3761_v26 = vrot.slane %v1774_v18, 9  ;;  %3025 = vmatmul.mubr.bf16.gmra.mrb[56].mxu0 %v3807_v42  ;;  %v1767_v34 = vor.u32 %v1766_v55, %v1762_v56 }
 0x14a   : > { %v1467_v50 = vrot.slane %v1465_v21, 5  ;;  %v1808_v9 = vrot.slane %v5305_v49, 5  ;;  %v1811_v17 = vrot.slane %v5307_v38, 5  ;;  %3032 = vmatprep.mubr.bf16.mxu0 %v3816_v47  ;;  %v1458_v29 = vsel %vm4941_vm9, %v1453_v3, %v1457_v39  ;;  %v1780_v47 = vld [vmem:[#allocation3 + $0x60] sm:$0xe] }
 0x14b   : > { %v1763_v7 = vsel %vm4941_vm9, %v1758_v20, %v1762_v56  ;;  %v1462_v46 = vor.u32 %v1461_v15, %v1457_v39  ;;  %v3765_v58 = vrot.slane %v1778_v11, 9  ;;  %v1768_v36 = vrot.slane %v1767_v34, 4  ;;  %v1777_v15 = vld [vmem:[#allocation3 + $0x3c] sm:$0xe]  ;;  %v1781_v21 = vld [vmem:[#allocation3 + $0x6c] sm:$0xe] }
 0x14c   : > { %v1809_v13 = vsel %vm4951_vm10, %v3761_v26, %v1808_v9  ;;  %v1810_v27 = vrot.slane %v1808_v9, 4  ;;  %v1836_v22 = vrot.slane %v5461_v19, 5  ;;  %v1839_v38 = vrot.slane %v5467_v59, 5 }
 0x14d   : > { %v1463_v49 = vrot.slane %v1462_v46, 4  ;;  %v3762_v6 = vrot.slane %v1775_v1, 9  ;;  %v1815_v35 = vrot.slane %v5332_v45, 5  ;;  %v1773_v33 = vsel %vm4941_vm9, %v1768_v36, %v1772_v25 }
 0x14e   : > { %v1812_v41 = vsel %vm4951_vm10, %v1810_v27, %v1811_v17  ;;  %v1837_v63 = vsel %vm4951_vm10, %v3765_v58, %v1836_v22  ;;  %v1838_v62 = vrot.slane %v1836_v22, 4  ;;  %v3832_v24 = vcombine.low %v1763_v7, %v1773_v33 }
 0x14f   : > { %v1468_v19 = vsel %vm4941_vm9, %v1463_v49, %v1467_v50  ;;  %v3833_v59 = vcombine.low %v1809_v13, %v1812_v41  ;;  %v1816_v45 = vsel %vm4951_vm10, %v3762_v6, %v1815_v35  ;;  %v1817_v8 = vrot.slane %v1815_v35, 4 }
 0x150   : > { %v3808_v14 = vcombine.low %v1458_v29, %v1468_v19  ;;  %v1840_v56 = vsel %vm4951_vm10, %v1838_v62, %v1839_v38  ;;  %v3766_v48 = vrot.slane %v1779_v30, 9  ;;  %3129 = vmatprep.mubr.bf16.mxu1 %v3832_v24  ;;  %v1843_v3 = vrot.slane %v5504_v31, 5 }
 0x151   : > { %v3837_v16 = vcombine.low %v1837_v63, %v1840_v56  ;;  %v3763_v18 = vrot.slane %v1776_v0, 9  ;;  %v1822_v54 = vrot.slane %v5371_v51, 5  ;;  %3130 = vmatmul.mubr.bf16.gmra.mrb[60].mxu1 %v3824_v57  ;;  %v1819_v5 = vsel %vm4951_vm10, %v1817_v8, %v1818_v61 }
 0x152   : > { %3033 = vmatmul.mubr.bf16.gmra.mrb[60].mxu0 %v3808_v14  ;;  %v1825_v60 = vrot.slane %v5377_v44, 5  ;;  %v3767_v32 = vrot.slane %v1780_v47, 9  ;;  %v1850_v4 = vrot.slane %v5538_v10, 5  ;;  %v3834_v42 = vcombine.low %v1816_v45, %v1819_v5 }
 0x153   : > { %4271 = vmatprep.mubr.bf16.mxu0 %v3833_v59  ;;  %4279 = vmatprep.mubr.bf16.mxu1 %v3837_v16  ;;  %v1844_v31 = vsel %vm4951_vm10, %v3766_v48, %v1843_v3  ;;  %v1845_v51 = vrot.slane %v1843_v3, 4  ;;  %v1823_v55 = vsel %vm4951_vm10, %v3763_v18, %v1822_v54  ;;  %v1824_v2 = vrot.slane %v1822_v54, 4 }
 0x154   : > { %v1851_v61 = vsel %vm4951_vm10, %v3767_v32, %v1850_v4  ;;  %v1852_v25 = vrot.slane %v1850_v4, 4  ;;  %v1853_v44 = vrot.slane %v5544_v43, 5  ;;  %v3764_v11 = vrot.slane %v1777_v15, 9 }
 0x155   : > { %v1847_v10 = vsel %vm4951_vm10, %v1845_v51, %v1846_v28  ;;  %v1829_v20 = vrot.slane %v5416_v40, 5  ;;  %v1826_v57 = vsel %vm4951_vm10, %v1824_v2, %v1825_v60  ;;  %v1832_v34 = vrot.slane %v5426_v52, 5 }
 0x156   : > { %v3838_v39 = vcombine.low %v1844_v31, %v1847_v10  ;;  %v1854_v26 = vsel %vm4951_vm10, %v1852_v25, %v1853_v44  ;;  %v3835_v50 = vcombine.low %v1823_v55, %v1826_v57  ;;  %v3768_v17 = vrot.slane %v1781_v21, 9 }
 0x157   : > { %v3839_v43 = vcombine.low %v1851_v61, %v1854_v26  ;;  %v1831_v9 = vrot.slane %v1829_v20, 4  ;;  %v1857_v53 = vrot.slane %v5570_v23, 5  ;;  %v1860_v28 = vrot.slane %v5579_v37, 5 }
 0x158   : > { %v1830_v1 = vsel %vm4951_vm10, %v3764_v11, %v1829_v20 }
 0x159   : > { %4280 = vmatmul.mubr.bf16.vlgmr.msra.gmra.mrb[64].mxu1 %v3838_v39  ;;  %v1859_v40 = vrot.slane %v1857_v53, 4  ;;  %v1833_v7 = vsel %vm4951_vm10, %v1831_v9, %v1832_v34  ;;  %v1858_v52 = vsel %vm4951_vm10, %v3768_v17, %v1857_v53 }
 0x15a   : > { %4272 = vmatmul.mubr.bf16.vlgmr.msra.gmra.mrb[64].mxu0 %v3834_v42  ;;  %4283 = vmatprep.mubr.bf16.mxu1 %v3839_v43  ;;  %v3836_v23 = vcombine.low %v1830_v1, %v1833_v7 }
 0x15b   : > { %4275 = vmatprep.mubr.bf16.mxu0 %v3835_v50  ;;  %v1861_v29 = vsel %vm4951_vm10, %v1859_v40, %v1860_v28 }
 0x15c   : > { %v3840_v46 = vcombine.low %v1858_v52, %v1861_v29 }
 0x161   : > { %4284 = vmatmul.mubr.bf16.gmra.mrb[68].mxu1 %v3840_v46 }
 0x162   : > { %4276 = vmatmul.mubr.bf16.gmra.mrb[68].mxu0 %v3836_v23 }
 0x1a6   : > { %v3999_v37 = vpop.f32.mrb[0].mxu0 }
 0x1a7   : > { %v4063_v58 = vpop.f32.mrb[0].mxu1  ;;  %v4000_v36 = vpop.f32.mrb[1].mxu0 }
 0x1a8   : > { %v4001_v13 = vadd.f32 %v4000_v36, %v3999_v37  ;;  %v4064_v27 = vpop.f32.mrb[1].mxu1  ;;  %v4002_v22 = vpop.f32.mrb[2].mxu0 }
 0x1a9   : > { %v4065_v49 = vadd.f32 %v4064_v27, %v4063_v58  ;;  %v4066_v38 = vpop.f32.mrb[2].mxu1  ;;  %v4003_v6 = vpop.f32.mrb[3].mxu0 }
 0x1aa   : > { %v4004_v35 = vadd.f32 %v4003_v6, %v4002_v22  ;;  %v4067_v30 = vpop.f32.mrb[3].mxu1 }
 0x1ab   : > { %v5657_v33 = vadd.f32 %v4065_v49, %v4001_v13  ;;  %v4068_v41 = vadd.f32 %v4067_v30, %v4066_v38 }
 0x1ad   : > { %v5659_v12 = vadd.f32 %v4068_v41, %v4004_v35 }
 0x1ae   : > { %v4005_v63 = vpop.f32.mrb[4].mxu0 }
 0x1af   : > { %v4069_v62 = vpop.f32.mrb[4].mxu1  ;;  %v4006_v0 = vpop.f32.mrb[5].mxu0 }
 0x1b0   : > { %v4070_v24 = vpop.f32.mrb[5].mxu1  ;;  %v4007_v19 = vadd.f32 %v4006_v0, %v4005_v63  ;;  %v4008_v45 = vpop.f32.mrb[6].mxu0 }
 0x1b1   : > { %v4071_v59 = vadd.f32 %v4070_v24, %v4069_v62  ;;  %v4072_v47 = vpop.f32.mrb[6].mxu1  ;;  %v4009_v14 = vpop.f32.mrb[7].mxu0 }
 0x1b2   : > { %v4073_v56 = vpop.f32.mrb[7].mxu1  ;;  %v4010_v48 = vadd.f32 %v4009_v14, %v4008_v45 }
 0x1b3   : > { %v5661_v8 = vadd.f32 %v4071_v59, %v4007_v19  ;;  %v4074_v16 = vadd.f32 %v4073_v56, %v4072_v47 }
 0x1b5   : > { %v5663_v3 = vadd.f32 %v4074_v16, %v4010_v48 }
 0x1b6   : > { %v4011_v18 = vpop.f32.mrb[8].mxu0 }
 0x1b7   : > { %v4075_v54 = vpop.f32.mrb[8].mxu1  ;;  %v4012_v5 = vpop.f32.mrb[9].mxu0 }
 0x1b8   : > { %v4076_v60 = vpop.f32.mrb[9].mxu1  ;;  %v4013_v32 = vadd.f32 %v4012_v5, %v4011_v18  ;;  %v4014_v15 = vpop.f32.mrb[10].mxu0 }
 0x1b9   : > { %v4077_v4 = vadd.f32 %v4076_v60, %v4075_v54  ;;  %v4078_v42 = vpop.f32.mrb[10].mxu1  ;;  %v4015_v31 = vpop.f32.mrb[11].mxu0 }
 0x1ba   : > { %v4079_v51 = vpop.f32.mrb[11].mxu1  ;;  %v4016_v2 = vadd.f32 %v4015_v31, %v4014_v15 }
 0x1bb   : > { %v5665_v55 = vadd.f32 %v4077_v4, %v4013_v32  ;;  %v4080_v61 = vadd.f32 %v4079_v51, %v4078_v42 }
 0x1bd   : > { %v5667_v25 = vadd.f32 %v4080_v61, %v4016_v2 }
 0x1be   : > { %v4017_v44 = vpop.f32.mrb[12].mxu0 }
 0x1bf   : > { %v4081_v21 = vpop.f32.mrb[12].mxu1  ;;  %v4018_v10 = vpop.f32.mrb[13].mxu0 }
 0x1c0   : > { %v4082_v11 = vpop.f32.mrb[13].mxu1  ;;  %v4019_v20 = vadd.f32 %v4018_v10, %v4017_v44  ;;  %v4020_v57 = vpop.f32.mrb[14].mxu0 }
 0x1c1   : > { %v4083_v39 = vadd.f32 %v4082_v11, %v4081_v21  ;;  %v4084_v26 = vpop.f32.mrb[14].mxu1  ;;  %v4021_v34 = vpop.f32.mrb[15].mxu0 }
 0x1c2   : > { %v4085_v50 = vpop.f32.mrb[15].mxu1  ;;  %v4022_v9 = vadd.f32 %v4021_v34, %v4020_v57 }
 0x1c3   : > { %v5669_v43 = vadd.f32 %v4083_v39, %v4019_v20  ;;  %v4086_v17 = vadd.f32 %v4085_v50, %v4084_v26 }
 0x1c5   : > { %v5671_v53 = vadd.f32 %v4086_v17, %v4022_v9 }
 0x1c6   : > { %v4023_v28 = vpop.f32.mrb[16].mxu0 }
 0x1c7   : > { %v4087_v40 = vpop.f32.mrb[16].mxu1  ;;  %v4024_v1 = vpop.f32.mrb[17].mxu0 }
 0x1c8   : > { %v4088_v7 = vpop.f32.mrb[17].mxu1  ;;  %v4025_v52 = vadd.f32 %v4024_v1, %v4023_v28  ;;  %v4026_v23 = vpop.f32.mrb[18].mxu0 }
 0x1c9   : > { %v4089_v29 = vadd.f32 %v4088_v7, %v4087_v40  ;;  %v4090_v46 = vpop.f32.mrb[18].mxu1  ;;  %v4027_v37 = vpop.f32.mrb[19].mxu0 }
 0x1ca   : > { %v4091_v58 = vpop.f32.mrb[19].mxu1  ;;  %v4028_v13 = vadd.f32 %v4027_v37, %v4026_v23 }
 0x1cb   : > { %v5673_v36 = vadd.f32 %v4089_v29, %v4025_v52  ;;  %v4092_v27 = vadd.f32 %v4091_v58, %v4090_v46 }
 0x1cd   : > { %v5675_v22 = vadd.f32 %v4092_v27, %v4028_v13 }
 0x1ce   : > { %v4029_v49 = vpop.f32.mrb[20].mxu0 }
 0x1cf   : > { %v4093_v38 = vpop.f32.mrb[20].mxu1  ;;  %v4030_v6 = vpop.f32.mrb[21].mxu0 }
 0x1d0   : > { %v4094_v35 = vpop.f32.mrb[21].mxu1  ;;  %v4031_v30 = vadd.f32 %v4030_v6, %v4029_v49  ;;  %v4032_v63 = vpop.f32.mrb[22].mxu0 }
 0x1d1   : > { %v4095_v41 = vadd.f32 %v4094_v35, %v4093_v38  ;;  %v4096_v62 = vpop.f32.mrb[22].mxu1  ;;  %v4033_v0 = vpop.f32.mrb[23].mxu0 }
 0x1d2   : > { %v4097_v24 = vpop.f32.mrb[23].mxu1  ;;  %v4034_v59 = vadd.f32 %v4033_v0, %v4032_v63 }
 0x1d3   : > { %v5677_v19 = vadd.f32 %v4095_v41, %v4031_v30  ;;  %v4098_v45 = vadd.f32 %v4097_v24, %v4096_v62 }
 0x1d5   : > { %v5679_v47 = vadd.f32 %v4098_v45, %v4034_v59 }
 0x1d6   : > { %v4035_v14 = vpop.f32.mrb[24].mxu0 }
 0x1d7   : > { %v4099_v56 = vpop.f32.mrb[24].mxu1  ;;  %v4036_v48 = vpop.f32.mrb[25].mxu0 }
 0x1d8   : > { %v4100_v16 = vpop.f32.mrb[25].mxu1  ;;  %v4037_v18 = vadd.f32 %v4036_v48, %v4035_v14  ;;  %v4038_v5 = vpop.f32.mrb[26].mxu0 }
 0x1d9   : > { %v4101_v54 = vadd.f32 %v4100_v16, %v4099_v56  ;;  %v4102_v60 = vpop.f32.mrb[26].mxu1  ;;  %v4039_v32 = vpop.f32.mrb[27].mxu0 }
 0x1da   : > { %v4103_v4 = vpop.f32.mrb[27].mxu1  ;;  %v4040_v42 = vadd.f32 %v4039_v32, %v4038_v5 }
 0x1db   : > { %v5681_v15 = vadd.f32 %v4101_v54, %v4037_v18  ;;  %v4104_v31 = vadd.f32 %v4103_v4, %v4102_v60 }
 0x1dd   : > { %v5683_v51 = vadd.f32 %v4104_v31, %v4040_v42 }
 0x1de   : > { %v4041_v61 = vpop.f32.mrb[28].mxu0 }
 0x1df   : > { %v4105_v2 = vpop.f32.mrb[28].mxu1  ;;  %v4042_v21 = vpop.f32.mrb[29].mxu0 }
 0x1e0   : > { %v4106_v44 = vpop.f32.mrb[29].mxu1  ;;  %v4043_v20 = vadd.f32 %v4042_v21, %v4041_v61  ;;  %v4044_v39 = vpop.f32.mrb[30].mxu0 }
 0x1e1   : > { %v4107_v10 = vadd.f32 %v4106_v44, %v4105_v2  ;;  %v4108_v11 = vpop.f32.mrb[30].mxu1  ;;  %v4045_v26 = vpop.f32.mrb[31].mxu0 }
 0x1e2   : > { %v4109_v57 = vpop.f32.mrb[31].mxu1  ;;  %v4046_v9 = vadd.f32 %v4045_v26, %v4044_v39 }
 0x1e3   : > { %v4110_v34 = vadd.f32 %v4109_v57, %v4108_v11  ;;  %v5685_v50 = vadd.f32 %v4107_v10, %v4043_v20 }
 0x1e5   : > { %v5687_v17 = vadd.f32 %v4110_v34, %v4046_v9 }
 0x1e6   : > { %v4127_v28 = vpop.f32.mrb[32].mxu0 }
 0x1e7   : > { %v4128_v40 = vpop.f32.mrb[33].mxu0 }
 0x1e8   : > { %v4129_v1 = vadd.f32 %v4128_v40, %v4127_v28  ;;  %v4130_v7 = vpop.f32.mrb[34].mxu0 }
 0x1e9   : > { %v4191_v52 = vpop.f32.mrb[32].mxu1  ;;  %v4131_v29 = vpop.f32.mrb[35].mxu0 }
 0x1ea   : > { %v2979_v23 = vadd.f32 %v4129_v1, %v5657_v33  ;;  %v4132_v46 = vadd.f32 %v4131_v29, %v4130_v7  ;;  %v4192_v37 = vpop.f32.mrb[33].mxu1 }
 0x1eb   : > { %v4193_v58 = vadd.f32 %v4192_v37, %v4191_v52  ;;  %v4194_v13 = vpop.f32.mrb[34].mxu1 }
 0x1ec   : > { %v2982_v27 = vadd.f32 %v4132_v46, %v5659_v12  ;;  %v4195_v49 = vpop.f32.mrb[35].mxu1 }
 0x1ed   : > { %v4196_v38 = vadd.f32 %v4195_v49, %v4194_v13  ;;  %v5691_v6 = vadd.f32 %v4193_v58, %v2979_v23 }
 0x1ee   : > { %v4133_v30 = vpop.f32.mrb[36].mxu0 }
 0x1ef   : > { %v5693_v35 = vadd.f32 %v4196_v38, %v2982_v27  ;;  %v4134_v63 = vpop.f32.mrb[37].mxu0 }
 0x1f0   : > { %v4135_v0 = vadd.f32 %v4134_v63, %v4133_v30  ;;  %v4136_v24 = vpop.f32.mrb[38].mxu0 }
 0x1f1   : > { %v4197_v41 = vpop.f32.mrb[36].mxu1  ;;  %v4137_v45 = vpop.f32.mrb[39].mxu0 }
 0x1f2   : > { %v4198_v62 = vpop.f32.mrb[37].mxu1  ;;  %v2987_v56 = vadd.f32 %v4135_v0, %v5661_v8  ;;  %v4138_v48 = vadd.f32 %v4137_v45, %v4136_v24 }
 0x1f3   : > { %v4199_v59 = vadd.f32 %v4198_v62, %v4197_v41  ;;  %v4200_v33 = vpop.f32.mrb[38].mxu1 }
 0x1f4   : > { %v4201_v14 = vpop.f32.mrb[39].mxu1  ;;  %v2990_v16 = vadd.f32 %v4138_v48, %v5663_v3 }
 0x1f5   : > { %v4202_v12 = vadd.f32 %v4201_v14, %v4200_v33  ;;  %v5697_v18 = vadd.f32 %v4199_v59, %v2987_v56 }
 0x1f7   : > { %v5699_v5 = vadd.f32 %v4202_v12, %v2990_v16 }
 0x1f9   : > { %v4203_v54 = vpop.f32.mrb[40].mxu1  ;;  %v4139_v32 = vpop.f32.mrb[40].mxu0 }
 0x1fa   : > { %v4204_v60 = vpop.f32.mrb[41].mxu1  ;;  %v4140_v31 = vpop.f32.mrb[41].mxu0 }
 0x1fb   : > { %v4205_v4 = vadd.f32 %v4204_v60, %v4203_v54  ;;  %v4206_v42 = vpop.f32.mrb[42].mxu1  ;;  %v4141_v61 = vadd.f32 %v4140_v31, %v4139_v32  ;;  %v4142_v44 = vpop.f32.mrb[42].mxu0 }
 0x1fc   : > { %v4207_v2 = vpop.f32.mrb[43].mxu1  ;;  %v4143_v10 = vpop.f32.mrb[43].mxu0 }
 0x1fd   : > { %v4208_v21 = vadd.f32 %v4207_v2, %v4206_v42  ;;  %v2995_v8 = vadd.f32 %v4141_v61, %v5665_v55  ;;  %v4144_v11 = vadd.f32 %v4143_v10, %v4142_v44 }
 0x1ff   : > { %v2998_v3 = vadd.f32 %v4144_v11, %v5667_v25  ;;  %v5703_v39 = vadd.f32 %v4205_v4, %v2995_v8 }
 0x201   : > { %v4209_v20 = vpop.f32.mrb[44].mxu1  ;;  %v4145_v26 = vpop.f32.mrb[44].mxu0  ;;  %v5705_v28 = vadd.f32 %v4208_v21, %v2998_v3 }
 0x202   : > { %v4210_v57 = vpop.f32.mrb[45].mxu1  ;;  %v4146_v40 = vpop.f32.mrb[45].mxu0 }
 0x203   : > { %v4211_v34 = vadd.f32 %v4210_v57, %v4209_v20  ;;  %v4212_v9 = vpop.f32.mrb[46].mxu1  ;;  %v4147_v7 = vadd.f32 %v4146_v40, %v4145_v26  ;;  %v4148_v52 = vpop.f32.mrb[46].mxu0 }
 0x204   : > { %v4213_v1 = vpop.f32.mrb[47].mxu1  ;;  %v4149_v23 = vpop.f32.mrb[47].mxu0 }
 0x205   : > { %v4214_v29 = vadd.f32 %v4213_v1, %v4212_v9  ;;  %v3003_v55 = vadd.f32 %v4147_v7, %v5669_v43  ;;  %v4150_v46 = vadd.f32 %v4149_v23, %v4148_v52 }
 0x207   : > { %v3006_v25 = vadd.f32 %v4150_v46, %v5671_v53  ;;  %v5709_v37 = vadd.f32 %v4211_v34, %v3003_v55 }
 0x209   : > { %v4215_v58 = vpop.f32.mrb[48].mxu1  ;;  %v5711_v13 = vadd.f32 %v4214_v29, %v3006_v25 }
 0x20a   : > { %v4216_v27 = vpop.f32.mrb[49].mxu1  ;;  %v4151_v49 = vpop.f32.mrb[48].mxu0 }
 0x20b   : > { %v4217_v38 = vadd.f32 %v4216_v27, %v4215_v58  ;;  %v4218_v30 = vpop.f32.mrb[50].mxu1  ;;  %v4152_v41 = vpop.f32.mrb[49].mxu0 }
 0x20c   : > { %v4219_v63 = vpop.f32.mrb[51].mxu1  ;;  %v4153_v62 = vadd.f32 %v4152_v41, %v4151_v49  ;;  %v4154_v0 = vpop.f32.mrb[50].mxu0 }
 0x20d   : > { %v4220_v24 = vadd.f32 %v4219_v63, %v4218_v30  ;;  %v4155_v59 = vpop.f32.mrb[51].mxu0 }
 0x20e   : > { %v3011_v43 = vadd.f32 %v4153_v62, %v5673_v36  ;;  %v4156_v33 = vadd.f32 %v4155_v59, %v4154_v0 }
 0x210   : > { %v3014_v53 = vadd.f32 %v4156_v33, %v5675_v22  ;;  %v3108_v14 = vadd.f32 %v4217_v38, %v3011_v43 }
 0x211   : > { %v4221_v45 = vpop.f32.mrb[52].mxu1 }
 0x212   : > { %v4222_v56 = vpop.f32.mrb[53].mxu1  ;;  %v4157_v48 = vpop.f32.mrb[52].mxu0  ;;  %v5715_v54 = vadd.f32 %v4220_v24, %v3014_v53 }
 0x213   : > { %v4223_v12 = vadd.f32 %v4222_v56, %v4221_v45  ;;  %v4224_v16 = vpop.f32.mrb[54].mxu1  ;;  %v4158_v60 = vpop.f32.mrb[53].mxu0 }
 0x214   : > { %v4225_v32 = vpop.f32.mrb[55].mxu1  ;;  %v4159_v4 = vadd.f32 %v4158_v60, %v4157_v48  ;;  %v4160_v42 = vpop.f32.mrb[54].mxu0 }
 0x215   : > { %v4226_v31 = vadd.f32 %v4225_v32, %v4224_v16  ;;  %v4161_v2 = vpop.f32.mrb[55].mxu0 }
 0x216   : > { %v3019_v61 = vadd.f32 %v4159_v4, %v5677_v19  ;;  %v4162_v36 = vadd.f32 %v4161_v2, %v4160_v42 }
 0x218   : > { %v3022_v44 = vadd.f32 %v4162_v36, %v5679_v47  ;;  %v3116_v22 = vadd.f32 %v4223_v12, %v3019_v61 }
 0x21a   : > { %v4227_v21 = vpop.f32.mrb[56].mxu1  ;;  %v3119_v10 = vadd.f32 %v4226_v31, %v3022_v44 }
 0x21b   : > { %v4228_v8 = vpop.f32.mrb[57].mxu1 }
 0x21c   : > { %v4163_v11 = vpop.f32.mrb[56].mxu0  ;;  %v4229_v3 = vadd.f32 %v4228_v8, %v4227_v21  ;;  %v4230_v20 = vpop.f32.mrb[58].mxu1 }
 0x21d   : > { %v4164_v57 = vpop.f32.mrb[57].mxu0  ;;  %v4231_v26 = vpop.f32.mrb[59].mxu1 }
 0x21e   : > { %v4165_v34 = vadd.f32 %v4164_v57, %v4163_v11  ;;  %v4166_v9 = vpop.f32.mrb[58].mxu0  ;;  %v4232_v40 = vadd.f32 %v4231_v26, %v4230_v20 }
 0x21f   : > { %v4167_v1 = vpop.f32.mrb[59].mxu0 }
 0x220   : > { %v3027_v7 = vadd.f32 %v4165_v34, %v5681_v15  ;;  %v4168_v52 = vadd.f32 %v4167_v1, %v4166_v9 }
 0x222   : > { %v3030_v19 = vadd.f32 %v4168_v52, %v5683_v51  ;;  %v3124_v29 = vadd.f32 %v4229_v3, %v3027_v7 }
 0x224   : > { %v4233_v23 = vpop.f32.mrb[60].mxu1  ;;  %v5721_v55 = vadd.f32 %v4232_v40, %v3030_v19 }
 0x225   : > { %v4169_v47 = vpop.f32.mrb[60].mxu0  ;;  %v4234_v25 = vpop.f32.mrb[61].mxu1 }
 0x226   : > { %v4170_v46 = vpop.f32.mrb[61].mxu0  ;;  %v4235_v49 = vadd.f32 %v4234_v25, %v4233_v23  ;;  %v4236_v38 = vpop.f32.mrb[62].mxu1 }
 0x227   : > { %v4171_v58 = vadd.f32 %v4170_v46, %v4169_v47  ;;  %v4172_v27 = vpop.f32.mrb[62].mxu0  ;;  %v4237_v41 = vpop.f32.mrb[63].mxu1 }
 0x228   : > { %v4173_v30 = vpop.f32.mrb[63].mxu0  ;;  %v4238_v62 = vadd.f32 %v4237_v41, %v4236_v38 }
 0x229   : > { %v3035_v63 = vadd.f32 %v4171_v58, %v5685_v50  ;;  %v4174_v15 = vadd.f32 %v4173_v30, %v4172_v27 }
 0x22b   : > { %v3038_v51 = vadd.f32 %v4174_v15, %v5687_v17  ;;  %v3132_v0 = vadd.f32 %v4235_v49, %v3035_v63 }
 0x22c   : > { %v4281_v59 = vpop.f32.mrb[64].mxu1 }
 0x22d   : > { %v4273_v24 = vpop.f32.mrb[64].mxu0  ;;  %v3135_v43 = vadd.f32 %v4238_v62, %v3038_v51  ;;  %v5726_v53 = vadd.f32 %v4281_v59, %v3116_v22  ;;  %v3204_v56 = vpop.f32.mrb[65].mxu1 }
 0x22e   : > { %v3181_v33 = vadd.f32 %v4273_v24, %v5697_v18  ;;  %v3172_v45 = vpop.f32.mrb[65].mxu0  ;;  %v5729_v48 = vadd.f32 %v3204_v56, %v3108_v14  ;;  %v4282_v12 = vpop.f32.mrb[66].mxu1 }
 0x22f   : > { %v3173_v50 = vadd.f32 %v3172_v45, %v5691_v6  ;;  %v4274_v17 = vpop.f32.mrb[66].mxu0  ;;  %3245 = vst [vmem:[%s4571_s7 + $0x50] sm:$0xff] %v5726_v53  ;;  %v5735_v18 = vadd.f32 %v4282_v12, %v3119_v10  ;;  %v3207_v32 = vpop.f32.mrb[67].mxu1  ;;  %v3282_v15 = vmul.f32 %v5726_v53, %v5726_v53 }
 0x230   : > { %3237 = vst [vmem:[%s4571_s7 + $0x10] sm:$0xff] %v3181_v33  ;;  %v3184_v16 = vadd.f32 %v4274_v17, %v5699_v5  ;;  %v3175_v60 = vpop.f32.mrb[67].mxu0  ;;  %3243 = vst [vmem:[%s4571_s7 + $0x40] sm:$0xff] %v5729_v48  ;;  %v3208_v14 = vadd.f32 %v3207_v32, %v5715_v54  ;;  %v3274_v5 = vmul.f32 %v3181_v33, %v3181_v33 }
 0x231   : > { %3235 = vst [vmem:[%s4571_s7] sm:$0xff] %v3173_v50  ;;  %v3176_v6 = vadd.f32 %v3175_v60, %v5693_v35  ;;  %3246 = vst [vmem:[%s4571_s7 + $0x58] sm:$0xff] %v5735_v18  ;;  %v3272_v4 = vmul.f32 %v3173_v50, %v3173_v50  ;;  %v3280_v38 = vmul.f32 %v5729_v48, %v5729_v48 }
 0x232   : > { %3238 = vst [vmem:[%s4571_s7 + $0x18] sm:$0xff] %v3184_v16  ;;  %3244 = vst [vmem:[%s4571_s7 + $0x48] sm:$0xff] %v3208_v14  ;;  %v3275_v22 = vmul.f32 %v3184_v16, %v3184_v16 }
 0x233   : > { %3236 = vst [vmem:[%s4571_s7 + $0x8] sm:$0xff] %v3176_v6  ;;  %v3251_v42 = vadd.f32 %v3176_v6, %v3173_v50  ;;  %v3273_v31 = vmul.f32 %v3176_v6, %v3176_v6 }
 0x234   : > { %v4285_v44 = vpop.f32.mrb[68].mxu1 }
 0x235   : > { %v3252_v2 = vadd.f32 %v3251_v42, %v3181_v33  ;;  %v3288_v61 = vadd.f32 %v3273_v31, %v3272_v4  ;;  %v4277_v36 = vpop.f32.mrb[68].mxu0  ;;  %v3229_v54 = vadd.f32 %v4285_v44, %v3132_v0  ;;  %v3220_v10 = vpop.f32.mrb[69].mxu1  ;;  %v3283_v0 = vmul.f32 %v5735_v18, %v5735_v18 }
 0x236   : > { %v3197_v35 = vadd.f32 %v4277_v36, %v5709_v37  ;;  %v3188_v21 = vpop.f32.mrb[69].mxu0  ;;  %v3221_v20 = vadd.f32 %v3220_v10, %v3124_v29  ;;  %v4286_v26 = vpop.f32.mrb[70].mxu1 }
 0x237   : > { %v3289_v8 = vadd.f32 %v3288_v61, %v3274_v5  ;;  %v3189_v11 = vadd.f32 %v3188_v21, %v5703_v39  ;;  %v3253_v3 = vadd.f32 %v3252_v2, %v3184_v16  ;;  %v4278_v57 = vpop.f32.mrb[70].mxu0  ;;  %3249 = vst [vmem:[%s4571_s7 + $0x70] sm:$0xff] %v3229_v54  ;;  %v3232_v37 = vadd.f32 %v4286_v26, %v3135_v43  ;;  %v3223_v40 = vpop.f32.mrb[71].mxu1 }
 0x238   : > { %3241 = vst [vmem:[%s4571_s7 + $0x30] sm:$0xff] %v3197_v35  ;;  %v3200_v34 = vadd.f32 %v4278_v57, %v5711_v13  ;;  %v3191_v9 = vpop.f32.mrb[71].mxu0  ;;  %3247 = vst [vmem:[%s4571_s7 + $0x60] sm:$0xff] %v3221_v20  ;;  %v3224_v19 = vadd.f32 %v3223_v40, %v5721_v55  ;;  %v3278_v13 = vmul.f32 %v3197_v35, %v3197_v35 }
 0x239   : > { %3239 = vst [vmem:[%s4571_s7 + $0x20] sm:$0xff] %v3189_v11  ;;  %v3254_v1 = vadd.f32 %v3253_v3, %v3189_v11  ;;  %v3276_v7 = vmul.f32 %v3189_v11, %v3189_v11  ;;  %v3290_v52 = vadd.f32 %v3289_v8, %v3275_v22  ;;  %3250 = vst [vmem:[%s4571_s7 + $0x78] sm:$0xff] %v3232_v37 }
 0x23a   : > { %3242 = vst [vmem:[%s4571_s7 + $0x38] sm:$0xff] %v3200_v34  ;;  %v3192_v39 = vadd.f32 %v3191_v9, %v5705_v28  ;;  %3248 = vst [vmem:[%s4571_s7 + $0x68] sm:$0xff] %v3224_v19  ;;  %v3279_v58 = vmul.f32 %v3200_v34, %v3200_v34  ;;  %v3281_v28 = vmul.f32 %v3208_v14, %v3208_v14 }
 0x23b   : > { %v3291_v29 = vadd.f32 %v3290_v52, %v3276_v7  ;;  %v3284_v43 = vmul.f32 %v3221_v20, %v3221_v20  ;;  %v3285_v50 = vmul.f32 %v3224_v19, %v3224_v19  ;;  %v3286_v17 = vmul.f32 %v3229_v54, %v3229_v54 }
 0x23c   : > { %3240 = vst [vmem:[%s4571_s7 + $0x28] sm:$0xff] %v3192_v39  ;;  %v3255_v47 = vadd.f32 %v3254_v1, %v3192_v39  ;;  %v3277_v23 = vmul.f32 %v3192_v39, %v3192_v39  ;;  %v3287_v60 = vmul.f32 %v3232_v37, %v3232_v37 }
 0x23e   : > { %v3256_v46 = vadd.f32 %v3255_v47, %v3197_v35  ;;  %v3292_v25 = vadd.f32 %v3291_v29, %v3277_v23 }
 0x240   : > { %v3257_v27 = vadd.f32 %v3256_v46, %v3200_v34  ;;  %v3293_v49 = vadd.f32 %v3292_v25, %v3278_v13 }
 0x242   : > { %v3258_v30 = vadd.f32 %v3257_v27, %v5729_v48  ;;  %v3294_v41 = vadd.f32 %v3293_v49, %v3279_v58 }
 0x244   : > { %v3295_v63 = vadd.f32 %v3294_v41, %v3280_v38  ;;  %v3259_v55 = vadd.f32 %v3258_v30, %v3208_v14 }
 0x246   : > { %v3260_v62 = vadd.f32 %v3259_v55, %v5726_v53  ;;  %v3296_v51 = vadd.f32 %v3295_v63, %v3281_v28 }
 0x248   : > { %v3261_v24 = vadd.f32 %v3260_v62, %v5735_v18  ;;  %v3297_v59 = vadd.f32 %v3296_v51, %v3282_v15 }
 0x24a   : > { %v3262_v33 = vadd.f32 %v3261_v24, %v3221_v20  ;;  %v3298_v45 = vadd.f32 %v3297_v59, %v3283_v0 }
 0x24c   : > { %v3263_v56 = vadd.f32 %v3262_v33, %v3224_v19  ;;  %v3299_v48 = vadd.f32 %v3298_v45, %v3284_v43 }
 0x24e   : > { %v3264_v12 = vadd.f32 %v3263_v56, %v3229_v54  ;;  %v3300_v16 = vadd.f32 %v3299_v48, %v3285_v50 }
 0x250   : > { %v3265_v32 = vadd.f32 %v3264_v12, %v3232_v37  ;;  %v3301_v53 = vadd.f32 %v3300_v16, %v3286_v17 }
 0x252   : > { %v3266_v6 = vrot.slane %v3265_v32, 4  ;;  %v3302_v14 = vadd.f32 %v3301_v53, %v3287_v60 }
 0x254   : > { %v3267_v4 = vadd.f32 %v3266_v6, %v3265_v32  ;;  %v3303_v42 = vrot.slane %v3302_v14, 4 }
 0x256   : > { %v3268_v31 = vrot.slane %v3267_v4, 2  ;;  %v3304_v18 = vadd.f32 %v3303_v42, %v3302_v14 }
 0x258   : > { %v3269_v5 = vadd.f32 %v3268_v31, %v3267_v4  ;;  %v3305_v2 = vrot.slane %v3304_v18, 2 }
 0x25a   : > { %v3270_v61 = vrot.slane %v3269_v5, 1  ;;  %v3306_v36 = vadd.f32 %v3305_v2, %v3304_v18 }
 0x25c   : > { %v3307_v44 = vrot.slane %v3306_v36, 1  ;;  %v3271_v22 = vadd.f32 %v3270_v61, %v3269_v5 }
 0x25e   : > { %v3308_v35 = vadd.f32 %v3307_v44, %v3306_v36 }
 0x260   : > { %v3310_v54 = vsel %vm863_vm0, %v3271_v22, %v3308_v35 }
 0x261   : > { %3311 = vst [vmem:[%s4580_s22] sm:$0x3] %v3310_v54 }
 0x262 PF: > { %s15_s19 = sadd.s32 1, %s4495_s19   ;;  %s5803_s15 = smov %s4487_s17 }
 0x263   : > { %p12_p8 = scmp.ge.s32.totalorder %s15_s19, 6   ;;  %s5804_s16 = smov %s4491_s18 }
 0x264   : > { %s5805_s17 = smov %s5808_s2  ;;  %s5806_s18 = smov %s5812_s20 }
 0x265   :  { %14 = sbr.rel (!%p12_p8) target bundleno = 3 (0x3), region = 389 }
 0x26c   :  { %3366 = vsyncmov [#allocation4] }
 0x26f   :  { %s3367_s7 = vpop.sfrf %3366 }
 0x270   :  { %p3915_p9 = scmp.ne.s32.totalorder %s3367_s7, 0 }
 0x272   :  { %3371 = shalt.err (%p3915_p9)  }
 0x273   :  { %3373 = vsyncmov [#allocation4 + $0x1] }
 0x276   :  { %s3374_s22 = vpop.sfrf %3373 }
 0x277   :  { %p3916_p10 = scmp.ne.s32.totalorder %s3374_s22, 0 }
 0x279   :  { %3378 = shalt.err (%p3916_p10)  }
 0x27a   :  { %3380 = vsyncmov [#allocation4 + $0x2] }
 0x27d   :  { %s3381_s9 = vpop.sfrf %3380 }
 0x27e   :  { %p3917_p11 = scmp.ne.s32.totalorder %s3381_s9, 0 }
 0x280   :  { %3385 = shalt.err (%p3917_p11)  }
 0x281   :  { %3387 = vsyncmov [#allocation4 + $0x3] }
 0x284   :  { %s3388_s8 = vpop.sfrf %3387 }
 0x285   :  { %p3918_p12 = scmp.ne.s32.totalorder %s3388_s8, 0 }
 0x287   :  { %3392 = shalt.err (%p3918_p12)  }
 0x288   :  { %3394 = vsyncmov [#allocation4 + $0x4] }
 0x28b   :  { %s3395_s2 = vpop.sfrf %3394 }
 0x28c   :  { %p3919_p13 = scmp.ne.s32.totalorder %s3395_s2, 0 }
 0x28e   :  { %3399 = shalt.err (%p3919_p13)  }
 0x28f   :  { %3401 = vsyncmov [#allocation4 + $0x5] }
 0x292   :  { %s3402_s0 = vpop.sfrf %3401 }
 0x293   :  { %p3920_p0 = scmp.ne.s32.totalorder %s3402_s0, 0 }
 0x295   :  { %3406 = shalt.err (%p3920_p0)  }

</bundles_post_ra>
